<compile_context>
chip_gen: v7x
topology: tpu7x:2x2x1
jax: 0.10.0
libtpu: 0.0.40
codegen_flags: <defaults>
</compile_context>

<pallas_src>
import jax
import jax.numpy as jnp
from jax import lax
from jax.experimental import pallas as pl
from jax.experimental.pallas import tpu as pltpu

EPS = 1e-5          # nn.InstanceNorm2d default eps
NEG_SLOPE = 0.01    # nn.LeakyReLU default negative_slope


def _make_kernel(H, W, TILE_B):
    Hout = H - 1
    HW = Hout * W     # packed (Hout, W) plane length on the lane axis

    def lrelu_inorm(planes):
        # planes: list of Co accumulators, each (TILE_B, HW).
        # Stack channels on sublanes -> one LeakyReLU + one set of per-row
        # (= per instance, per channel) lane reductions for the whole stage.
        a = jnp.concatenate(planes, axis=0)                     # (Co*TILE_B, HW)
        a = jnp.where(a >= 0, a, NEG_SLOPE * a)                 # LeakyReLU
        inv_n = 1.0 / float(HW)
        mean = jnp.sum(a, axis=-1, keepdims=True) * inv_n
        d = a - mean                                            # two-pass variance
        var = jnp.sum(d * d, axis=-1, keepdims=True) * inv_n
        return d * lax.rsqrt(var + EPS)

    def kernel(x_ref, w1_ref, b1_ref, w2_ref, b2_ref, w3_ref, b3_ref, out_ref):
        # w position (0..W-1) of every lane in a packed (Hout*W) row.
        wpos = lax.broadcasted_iota(jnp.int32, (TILE_B, HW), 1) % W
        masks = {}
        for s in (-2, -1, 1, 2):
            # valid iff 0 <= wpos + s < W  (conv zero padding along time)
            masks[s] = (wpos >= -s) if s < 0 else (wpos < W - s)

        def shift_w(plane, s):
            # plane[:, j] -> plane[:, j+s] within each length-W row, zeros at edges.
            if s == 0:
                return plane
            rolled = pltpu.roll(plane, shift=(-s) % HW, axis=1)
            return jnp.where(masks[s], rolled, 0.0)

        x2 = x_ref[...]                                         # (TILE_B, H*W)

        # ---- conv1: Conv2d(1, 2, kernel=(2,5), pad=(0,2)) ----------------
        taps1 = []
        for kh in range(2):
            base = x2[:, kh * W: kh * W + HW]                   # rows h+kh, packed
            taps1.append([shift_w(base, kw - 2) for kw in range(5)])
        acc1 = []
        for co in range(2):
            acc = jnp.zeros((TILE_B, HW), jnp.float32)
            for kh in range(2):
                for kw in range(5):
                    acc = acc + taps1[kh][kw] * w1_ref[(co * 2 + kh) * 5 + kw]
            acc1.append(acc + b1_ref[co])
        y1 = lrelu_inorm(acc1)                                  # (2*TILE_B, HW)

        # ---- conv2: Conv2d(2, 4, kernel=(1,5), pad=(0,2)) ----------------
        acc2 = [jnp.zeros((TILE_B, HW), jnp.float32) for _ in range(4)]
        for ci in range(2):
            plane = y1[ci * TILE_B:(ci + 1) * TILE_B, :]
            taps = [shift_w(plane, kw - 2) for kw in range(5)]  # hoisted over co
            for co in range(4):
                for kw in range(5):
                    acc2[co] = acc2[co] + taps[kw] * w2_ref[(co * 2 + ci) * 5 + kw]
        y2 = lrelu_inorm([acc2[co] + b2_ref[co] for co in range(4)])

        # ---- conv3: Conv2d(4, 8, kernel=(1,5), pad=(0,2)) ----------------
        acc3 = [jnp.zeros((TILE_B, HW), jnp.float32) for _ in range(8)]
        for ci in range(4):
            plane = y2[ci * TILE_B:(ci + 1) * TILE_B, :]
            taps = [shift_w(plane, kw - 2) for kw in range(5)]  # hoisted over co
            for co in range(8):
                for kw in range(5):
                    acc3[co] = acc3[co] + taps[kw] * w3_ref[(co * 4 + ci) * 5 + kw]
        y3 = lrelu_inorm([acc3[co] + b3_ref[co] for co in range(8)])  # (8*TILE_B, HW)

        # ---- lane-dense stores: 8 unmasked (TILE_B, Hout*W) slabs --------
        for co in range(8):
            out_ref[co] = y3[co * TILE_B:(co + 1) * TILE_B, :]

    return kernel


def f0_encoder_pallas(x, params, tile_b=8):
    w1, b1, w2, b2, w3, b3 = params
    B, H, W = x.shape
    Hout = H - 1
    HW = Hout * W
    TILE_B = int(tile_b)

    n_blocks = pl.cdiv(B, TILE_B)
    Bp = n_blocks * TILE_B
    if Bp != B:
        # pad batch with zeros; padded rows normalize to 0 (no NaNs) and are sliced off
        x = jnp.pad(x, ((0, Bp - B), (0, 0), (0, 0)))

    # pack (H, W) onto the lane axis so the kernel sees dense (TILE_B, H*W) slabs
    x2 = x.reshape(Bp, H * W).astype(jnp.float32)

    smem = pl.BlockSpec(memory_space=pltpu.MemorySpace.SMEM)
    kernel = _make_kernel(H, W, TILE_B)

    out = pl.pallas_call(
        kernel,
        out_shape=jax.ShapeDtypeStruct((8, Bp, HW), jnp.float32),
        grid=(n_blocks,),
        in_specs=[
            pl.BlockSpec((TILE_B, H * W), lambda b: (b, 0)),    # x (batch block)
            smem, smem,                                         # w1, b1
            smem, smem,                                         # w2, b2
            smem, smem,                                         # w3, b3
        ],
        out_specs=pl.BlockSpec((8, TILE_B, HW), lambda b: (0, b, 0)),
        compiler_params=pltpu.CompilerParams(
            dimension_semantics=("parallel",)),
    )(x2,
      w1.reshape(-1).astype(jnp.float32), b1.astype(jnp.float32),
      w2.reshape(-1).astype(jnp.float32), b2.astype(jnp.float32),
      w3.reshape(-1).astype(jnp.float32), b3.astype(jnp.float32))

    # (8, Bp, Hout*W) -> NCHW (B, 8, Hout, W); pure layout work, free in XLA.
    out = out.reshape(8, Bp, Hout, W).transpose(1, 0, 2, 3)
    return out[:B]


def f0_encoder_ref(x, params):
    """Pure-JAX reference matching the PyTorch module."""
    w1, b1, w2, b2, w3, b3 = params

    def conv(a, w, b):
        out = lax.conv_general_dilated(
            a, w, window_strides=(1, 1), padding=((0, 0), (2, 2)),
            dimension_numbers=('NCHW', 'OIHW', 'NCHW'))
        return out + b[None, :, None, None]

    def inorm(a):
        m = jnp.mean(a, axis=(2, 3), keepdims=True)
        v = jnp.mean((a - m) ** 2, axis=(2, 3), keepdims=True)
        return (a - m) / jnp.sqrt(v + EPS)

    def lrelu(a):
        return jnp.where(a >= 0, a, NEG_SLOPE * a)

    h = x[:, None]                      # unsqueeze(1) -> (B, 1, H, W)
    h = inorm(lrelu(conv(h, w1, b1)))
    h = inorm(lrelu(conv(h, w2, b2)))
    h = inorm(lrelu(conv(h, w3, b3)))
    return h


if __name__ == "__main__":
    key = jax.random.PRNGKey(0)
    kx, k1, k2, k3, kb1, kb2, kb3 = jax.random.split(key, 7)

    # B=16 -> 2 grid steps of TILE_B=8 (both v7x TCs busy); W=128 keeps lanes dense.
    B, H, W = 16, 4, 128
    x = jax.random.normal(kx, (B, H, W), jnp.float32)

    # deterministic synthetic parameters (shapes from F0Encoder.__init__)
    w1 = 0.3 * jax.random.normal(k1, (2, 1, 2, 5), jnp.float32)
    b1 = 0.1 * jax.random.normal(kb1, (2,), jnp.float32)
    w2 = 0.3 * jax.random.normal(k2, (4, 2, 1, 5), jnp.float32)
    b2 = 0.1 * jax.random.normal(kb2, (4,), jnp.float32)
    w3 = 0.3 * jax.random.normal(k3, (8, 4, 1, 5), jnp.float32)
    b3 = 0.1 * jax.random.normal(kb3, (8,), jnp.float32)
    params = (w1, b1, w2, b2, w3, b3)

    out = jax.block_until_ready(f0_encoder_pallas(x, params))
    ref = f0_encoder_ref(x, params)

    assert out.shape == (B, 8, H - 1, W), out.shape
    if not jnp.allclose(out, ref, atol=1e-4, rtol=1e-4):
        raise AssertionError(
            f"mismatch vs reference, max abs err = {jnp.max(jnp.abs(out - ref))}")
    print("KERNEL_OK")
</pallas_src>

<mosaic_0001>
module attributes {stable_mosaic.version = 11 : i64} {
  func.func @kernel(%arg0: i32, %arg1: memref<8x512xf32, #tpu.memory_space<vmem>>, %arg2: memref<20xf32, #tpu.memory_space<smem>>, %arg3: memref<2xf32, #tpu.memory_space<smem>>, %arg4: memref<40xf32, #tpu.memory_space<smem>>, %arg5: memref<4xf32, #tpu.memory_space<smem>>, %arg6: memref<160xf32, #tpu.memory_space<smem>>, %arg7: memref<8xf32, #tpu.memory_space<smem>>, %arg8: memref<8x8x384xf32, #tpu.memory_space<vmem>>) attributes {dimension_semantics = [#tpu.dimension_semantics<parallel>], iteration_bounds = array<i64: 2>, scalar_prefetch = 0 : i64, scratch_operands = 0 : i64, tpu.core_type = #tpu.core_type<tc>, window_params = [{transform_indices = @transform_0, window_bounds = array<i64: 8, 512>}, {transform_indices = @transform_1, window_bounds = array<i64: 20>}, {transform_indices = @transform_2, window_bounds = array<i64: 2>}, {transform_indices = @transform_3, window_bounds = array<i64: 40>}, {transform_indices = @transform_4, window_bounds = array<i64: 4>}, {transform_indices = @transform_5, window_bounds = array<i64: 160>}, {transform_indices = @transform_6, window_bounds = array<i64: 8>}, {transform_indices = @transform_7, window_bounds = array<i64: 8, 8, 384>}]} {
    %0 = tpu.iota {dimensions = array<i32: 1>} : vector<8x384xi32>
    %c128_i32 = arith.constant 128 : i32
    %c0_i32 = arith.constant 0 : i32
    %1 = arith.cmpi eq, %c128_i32, %c0_i32 : i32
    %c1_i32 = arith.constant 1 : i32
    %2 = arith.select %1, %c1_i32, %c128_i32 : i32
    %3 = vector.broadcast %2 : i32 to vector<8x384xi32>
    %4 = arith.remsi %0, %3 : vector<8x384xi32>
    %c0_i32_0 = arith.constant 0 : i32
    %5 = vector.broadcast %c0_i32_0 : i32 to vector<8x384xi32>
    %6 = arith.cmpi ne, %4, %5 : vector<8x384xi32>
    %c0_i32_1 = arith.constant 0 : i32
    %7 = vector.broadcast %c0_i32_1 : i32 to vector<8x384xi32>
    %8 = arith.cmpi slt, %4, %7 : vector<8x384xi32>
    %c0_i32_2 = arith.constant 0 : i32
    %9 = arith.cmpi slt, %2, %c0_i32_2 : i32
    %10 = vector.broadcast %9 : i1 to vector<8x384xi1>
    %11 = vector.broadcast %10 : vector<8x384xi1> to vector<8x384xi1>
    %12 = arith.xori %8, %11 : vector<8x384xi1>
    %13 = arith.andi %12, %6 : vector<8x384xi1>
    %14 = vector.broadcast %2 : i32 to vector<8x384xi32>
    %15 = arith.addi %4, %14 : vector<8x384xi32>
    %16 = arith.select %13, %15, %4 : vector<8x384xi1>, vector<8x384xi32>
    %c2_i32 = arith.constant 2 : i32
    %17 = vector.broadcast %c2_i32 : i32 to vector<8x384xi32>
    %18 = arith.cmpi sge, %16, %17 : vector<8x384xi32>
    %c1_i32_3 = arith.constant 1 : i32
    %19 = vector.broadcast %c1_i32_3 : i32 to vector<8x384xi32>
    %20 = arith.cmpi sge, %16, %19 : vector<8x384xi32>
    %c127_i32 = arith.constant 127 : i32
    %21 = vector.broadcast %c127_i32 : i32 to vector<8x384xi32>
    %22 = arith.cmpi slt, %16, %21 : vector<8x384xi32>
    %c126_i32 = arith.constant 126 : i32
    %23 = vector.broadcast %c126_i32 : i32 to vector<8x384xi32>
    %24 = arith.cmpi slt, %16, %23 : vector<8x384xi32>
    %c0 = arith.constant 0 : index
    %c0_4 = arith.constant 0 : index
    %25 = vector.load %arg1[%c0, %c0_4] : memref<8x512xf32, #tpu.memory_space<vmem>>, vector<8x512xf32>
    %26 = vector.extract_strided_slice %25 {offsets = [0, 0], sizes = [8, 384], strides = [1, 1]} : vector<8x512xf32> to vector<8x384xf32>
    %c2_i32_5 = arith.constant 2 : i32
    %27 = tpu.dynamic_rotate %26 by %c2_i32_5 dim 1 : vector<8x384xf32>, i32 -> vector<8x384xf32>
    %cst = arith.constant 0.000000e+00 : f32
    %28 = vector.broadcast %cst : f32 to vector<8x384xf32>
    %29 = arith.select %18, %27, %28 : vector<8x384xi1>, vector<8x384xf32>
    %c1_i32_6 = arith.constant 1 : i32
    %30 = tpu.dynamic_rotate %26 by %c1_i32_6 dim 1 : vector<8x384xf32>, i32 -> vector<8x384xf32>
    %cst_7 = arith.constant 0.000000e+00 : f32
    %31 = vector.broadcast %cst_7 : f32 to vector<8x384xf32>
    %32 = arith.select %20, %30, %31 : vector<8x384xi1>, vector<8x384xf32>
    %c383_i32 = arith.constant 383 : i32
    %33 = tpu.dynamic_rotate %26 by %c383_i32 dim 1 : vector<8x384xf32>, i32 -> vector<8x384xf32>
    %cst_8 = arith.constant 0.000000e+00 : f32
    %34 = vector.broadcast %cst_8 : f32 to vector<8x384xf32>
    %35 = arith.select %22, %33, %34 : vector<8x384xi1>, vector<8x384xf32>
    %c382_i32 = arith.constant 382 : i32
    %36 = tpu.dynamic_rotate %26 by %c382_i32 dim 1 : vector<8x384xf32>, i32 -> vector<8x384xf32>
    %cst_9 = arith.constant 0.000000e+00 : f32
    %37 = vector.broadcast %cst_9 : f32 to vector<8x384xf32>
    %38 = arith.select %24, %36, %37 : vector<8x384xi1>, vector<8x384xf32>
    %39 = vector.extract_strided_slice %25 {offsets = [0, 128], sizes = [8, 384], strides = [1, 1]} : vector<8x512xf32> to vector<8x384xf32>
    %c2_i32_10 = arith.constant 2 : i32
    %40 = tpu.dynamic_rotate %39 by %c2_i32_10 dim 1 : vector<8x384xf32>, i32 -> vector<8x384xf32>
    %cst_11 = arith.constant 0.000000e+00 : f32
    %41 = vector.broadcast %cst_11 : f32 to vector<8x384xf32>
    %42 = arith.select %18, %40, %41 : vector<8x384xi1>, vector<8x384xf32>
    %c1_i32_12 = arith.constant 1 : i32
    %43 = tpu.dynamic_rotate %39 by %c1_i32_12 dim 1 : vector<8x384xf32>, i32 -> vector<8x384xf32>
    %cst_13 = arith.constant 0.000000e+00 : f32
    %44 = vector.broadcast %cst_13 : f32 to vector<8x384xf32>
    %45 = arith.select %20, %43, %44 : vector<8x384xi1>, vector<8x384xf32>
    %c383_i32_14 = arith.constant 383 : i32
    %46 = tpu.dynamic_rotate %39 by %c383_i32_14 dim 1 : vector<8x384xf32>, i32 -> vector<8x384xf32>
    %cst_15 = arith.constant 0.000000e+00 : f32
    %47 = vector.broadcast %cst_15 : f32 to vector<8x384xf32>
    %48 = arith.select %22, %46, %47 : vector<8x384xi1>, vector<8x384xf32>
    %c382_i32_16 = arith.constant 382 : i32
    %49 = tpu.dynamic_rotate %39 by %c382_i32_16 dim 1 : vector<8x384xf32>, i32 -> vector<8x384xf32>
    %cst_17 = arith.constant 0.000000e+00 : f32
    %50 = vector.broadcast %cst_17 : f32 to vector<8x384xf32>
    %51 = arith.select %24, %49, %50 : vector<8x384xi1>, vector<8x384xf32>
    %cst_18 = arith.constant 0.000000e+00 : f32
    %52 = vector.broadcast %cst_18 : f32 to vector<8x384xf32>
    %c0_19 = arith.constant 0 : index
    %53 = memref.load %arg2[%c0_19] : memref<20xf32, #tpu.memory_space<smem>>
    %54 = vector.broadcast %53 : f32 to vector<8x384xf32>
    %55 = arith.mulf %29, %54 : vector<8x384xf32>
    %56 = arith.addf %52, %55 : vector<8x384xf32>
    %c1 = arith.constant 1 : index
    %57 = memref.load %arg2[%c1] : memref<20xf32, #tpu.memory_space<smem>>
    %58 = vector.broadcast %57 : f32 to vector<8x384xf32>
    %59 = arith.mulf %32, %58 : vector<8x384xf32>
    %60 = arith.addf %56, %59 : vector<8x384xf32>
    %c2 = arith.constant 2 : index
    %61 = memref.load %arg2[%c2] : memref<20xf32, #tpu.memory_space<smem>>
    %62 = vector.broadcast %61 : f32 to vector<8x384xf32>
    %63 = arith.mulf %26, %62 : vector<8x384xf32>
    %64 = arith.addf %60, %63 : vector<8x384xf32>
    %c3 = arith.constant 3 : index
    %65 = memref.load %arg2[%c3] : memref<20xf32, #tpu.memory_space<smem>>
    %66 = vector.broadcast %65 : f32 to vector<8x384xf32>
    %67 = arith.mulf %35, %66 : vector<8x384xf32>
    %68 = arith.addf %64, %67 : vector<8x384xf32>
    %c4 = arith.constant 4 : index
    %69 = memref.load %arg2[%c4] : memref<20xf32, #tpu.memory_space<smem>>
    %70 = vector.broadcast %69 : f32 to vector<8x384xf32>
    %71 = arith.mulf %38, %70 : vector<8x384xf32>
    %72 = arith.addf %68, %71 : vector<8x384xf32>
    %c5 = arith.constant 5 : index
    %73 = memref.load %arg2[%c5] : memref<20xf32, #tpu.memory_space<smem>>
    %74 = vector.broadcast %73 : f32 to vector<8x384xf32>
    %75 = arith.mulf %42, %74 : vector<8x384xf32>
    %76 = arith.addf %72, %75 : vector<8x384xf32>
    %c6 = arith.constant 6 : index
    %77 = memref.load %arg2[%c6] : memref<20xf32, #tpu.memory_space<smem>>
    %78 = vector.broadcast %77 : f32 to vector<8x384xf32>
    %79 = arith.mulf %45, %78 : vector<8x384xf32>
    %80 = arith.addf %76, %79 : vector<8x384xf32>
    %c7 = arith.constant 7 : index
    %81 = memref.load %arg2[%c7] : memref<20xf32, #tpu.memory_space<smem>>
    %82 = vector.broadcast %81 : f32 to vector<8x384xf32>
    %83 = arith.mulf %39, %82 : vector<8x384xf32>
    %84 = arith.addf %80, %83 : vector<8x384xf32>
    %c8 = arith.constant 8 : index
    %85 = memref.load %arg2[%c8] : memref<20xf32, #tpu.memory_space<smem>>
    %86 = vector.broadcast %85 : f32 to vector<8x384xf32>
    %87 = arith.mulf %48, %86 : vector<8x384xf32>
    %88 = arith.addf %84, %87 : vector<8x384xf32>
    %c9 = arith.constant 9 : index
    %89 = memref.load %arg2[%c9] : memref<20xf32, #tpu.memory_space<smem>>
    %90 = vector.broadcast %89 : f32 to vector<8x384xf32>
    %91 = arith.mulf %51, %90 : vector<8x384xf32>
    %92 = arith.addf %88, %91 : vector<8x384xf32>
    %c0_20 = arith.constant 0 : index
    %93 = memref.load %arg3[%c0_20] : memref<2xf32, #tpu.memory_space<smem>>
    %94 = vector.broadcast %93 : f32 to vector<8x384xf32>
    %95 = arith.addf %92, %94 : vector<8x384xf32>
    %cst_21 = arith.constant 0.000000e+00 : f32
    %96 = vector.broadcast %cst_21 : f32 to vector<8x384xf32>
    %c10 = arith.constant 10 : index
    %97 = memref.load %arg2[%c10] : memref<20xf32, #tpu.memory_space<smem>>
    %98 = vector.broadcast %97 : f32 to vector<8x384xf32>
    %99 = arith.mulf %29, %98 : vector<8x384xf32>
    %100 = arith.addf %96, %99 : vector<8x384xf32>
    %c11 = arith.constant 11 : index
    %101 = memref.load %arg2[%c11] : memref<20xf32, #tpu.memory_space<smem>>
    %102 = vector.broadcast %101 : f32 to vector<8x384xf32>
    %103 = arith.mulf %32, %102 : vector<8x384xf32>
    %104 = arith.addf %100, %103 : vector<8x384xf32>
    %c12 = arith.constant 12 : index
    %105 = memref.load %arg2[%c12] : memref<20xf32, #tpu.memory_space<smem>>
    %106 = vector.broadcast %105 : f32 to vector<8x384xf32>
    %107 = arith.mulf %26, %106 : vector<8x384xf32>
    %108 = arith.addf %104, %107 : vector<8x384xf32>
    %c13 = arith.constant 13 : index
    %109 = memref.load %arg2[%c13] : memref<20xf32, #tpu.memory_space<smem>>
    %110 = vector.broadcast %109 : f32 to vector<8x384xf32>
    %111 = arith.mulf %35, %110 : vector<8x384xf32>
    %112 = arith.addf %108, %111 : vector<8x384xf32>
    %c14 = arith.constant 14 : index
    %113 = memref.load %arg2[%c14] : memref<20xf32, #tpu.memory_space<smem>>
    %114 = vector.broadcast %113 : f32 to vector<8x384xf32>
    %115 = arith.mulf %38, %114 : vector<8x384xf32>
    %116 = arith.addf %112, %115 : vector<8x384xf32>
    %c15 = arith.constant 15 : index
    %117 = memref.load %arg2[%c15] : memref<20xf32, #tpu.memory_space<smem>>
    %118 = vector.broadcast %117 : f32 to vector<8x384xf32>
    %119 = arith.mulf %42, %118 : vector<8x384xf32>
    %120 = arith.addf %116, %119 : vector<8x384xf32>
    %c16 = arith.constant 16 : index
    %121 = memref.load %arg2[%c16] : memref<20xf32, #tpu.memory_space<smem>>
    %122 = vector.broadcast %121 : f32 to vector<8x384xf32>
    %123 = arith.mulf %45, %122 : vector<8x384xf32>
    %124 = arith.addf %120, %123 : vector<8x384xf32>
    %c17 = arith.constant 17 : index
    %125 = memref.load %arg2[%c17] : memref<20xf32, #tpu.memory_space<smem>>
    %126 = vector.broadcast %125 : f32 to vector<8x384xf32>
    %127 = arith.mulf %39, %126 : vector<8x384xf32>
    %128 = arith.addf %124, %127 : vector<8x384xf32>
    %c18 = arith.constant 18 : index
    %129 = memref.load %arg2[%c18] : memref<20xf32, #tpu.memory_space<smem>>
    %130 = vector.broadcast %129 : f32 to vector<8x384xf32>
    %131 = arith.mulf %48, %130 : vector<8x384xf32>
    %132 = arith.addf %128, %131 : vector<8x384xf32>
    %c19 = arith.constant 19 : index
    %133 = memref.load %arg2[%c19] : memref<20xf32, #tpu.memory_space<smem>>
    %134 = vector.broadcast %133 : f32 to vector<8x384xf32>
    %135 = arith.mulf %51, %134 : vector<8x384xf32>
    %136 = arith.addf %132, %135 : vector<8x384xf32>
    %c1_22 = arith.constant 1 : index
    %137 = memref.load %arg3[%c1_22] : memref<2xf32, #tpu.memory_space<smem>>
    %138 = vector.broadcast %137 : f32 to vector<8x384xf32>
    %139 = arith.addf %136, %138 : vector<8x384xf32>
    %140 = tpu.concatenate %95, %139 in 0 : vector<8x384xf32>, vector<8x384xf32> -> vector<16x384xf32>
    %cst_23 = arith.constant 0.000000e+00 : f32
    %141 = vector.broadcast %cst_23 : f32 to vector<16x384xf32>
    %142 = arith.cmpf oge, %140, %141 : vector<16x384xf32>
    %cst_24 = arith.constant 0.00999999977 : f32
    %143 = vector.broadcast %cst_24 : f32 to vector<16x384xf32>
    %144 = arith.mulf %143, %140 : vector<16x384xf32>
    %145 = arith.select %142, %140, %144 : vector<16x384xi1>, vector<16x384xf32>
    %cst_25 = arith.constant dense<0.000000e+00> : vector<16xf32>
    %146 = vector.multi_reduction <add>, %145, %cst_25 [1] : vector<16x384xf32> to vector<16xf32>
    %147 = vector.shape_cast %146 : vector<16xf32> to vector<16x1xf32>
    %cst_26 = arith.constant 0.00260416674 : f32
    %148 = vector.broadcast %cst_26 : f32 to vector<16x1xf32>
    %149 = arith.mulf %147, %148 : vector<16x1xf32>
    %150 = vector.broadcast %149 : vector<16x1xf32> to vector<16x384xf32>
    %151 = arith.subf %145, %150 : vector<16x384xf32>
    %152 = arith.mulf %151, %151 : vector<16x384xf32>
    %cst_27 = arith.constant dense<0.000000e+00> : vector<16xf32>
    %153 = vector.multi_reduction <add>, %152, %cst_27 [1] : vector<16x384xf32> to vector<16xf32>
    %154 = vector.shape_cast %153 : vector<16xf32> to vector<16x1xf32>
    %cst_28 = arith.constant 0.00260416674 : f32
    %155 = vector.broadcast %cst_28 : f32 to vector<16x1xf32>
    %156 = arith.mulf %154, %155 : vector<16x1xf32>
    %cst_29 = arith.constant 9.99999974E-6 : f32
    %157 = vector.broadcast %cst_29 : f32 to vector<16x1xf32>
    %158 = arith.addf %156, %157 : vector<16x1xf32>
    %159 = math.rsqrt %158 : vector<16x1xf32>
    %160 = vector.broadcast %159 : vector<16x1xf32> to vector<16x384xf32>
    %161 = arith.mulf %151, %160 : vector<16x384xf32>
    %cst_30 = arith.constant 0.000000e+00 : f32
    %162 = vector.broadcast %cst_30 : f32 to vector<8x384xf32>
    %cst_31 = arith.constant 0.000000e+00 : f32
    %163 = vector.broadcast %cst_31 : f32 to vector<8x384xf32>
    %cst_32 = arith.constant 0.000000e+00 : f32
    %164 = vector.broadcast %cst_32 : f32 to vector<8x384xf32>
    %cst_33 = arith.constant 0.000000e+00 : f32
    %165 = vector.broadcast %cst_33 : f32 to vector<8x384xf32>
    %166 = vector.extract_strided_slice %161 {offsets = [0, 0], sizes = [8, 384], strides = [1, 1]} : vector<16x384xf32> to vector<8x384xf32>
    %c2_i32_34 = arith.constant 2 : i32
    %167 = tpu.dynamic_rotate %166 by %c2_i32_34 dim 1 : vector<8x384xf32>, i32 -> vector<8x384xf32>
    %cst_35 = arith.constant 0.000000e+00 : f32
    %168 = vector.broadcast %cst_35 : f32 to vector<8x384xf32>
    %169 = arith.select %18, %167, %168 : vector<8x384xi1>, vector<8x384xf32>
    %c1_i32_36 = arith.constant 1 : i32
    %170 = tpu.dynamic_rotate %166 by %c1_i32_36 dim 1 : vector<8x384xf32>, i32 -> vector<8x384xf32>
    %cst_37 = arith.constant 0.000000e+00 : f32
    %171 = vector.broadcast %cst_37 : f32 to vector<8x384xf32>
    %172 = arith.select %20, %170, %171 : vector<8x384xi1>, vector<8x384xf32>
    %c383_i32_38 = arith.constant 383 : i32
    %173 = tpu.dynamic_rotate %166 by %c383_i32_38 dim 1 : vector<8x384xf32>, i32 -> vector<8x384xf32>
    %cst_39 = arith.constant 0.000000e+00 : f32
    %174 = vector.broadcast %cst_39 : f32 to vector<8x384xf32>
    %175 = arith.select %22, %173, %174 : vector<8x384xi1>, vector<8x384xf32>
    %c382_i32_40 = arith.constant 382 : i32
    %176 = tpu.dynamic_rotate %166 by %c382_i32_40 dim 1 : vector<8x384xf32>, i32 -> vector<8x384xf32>
    %cst_41 = arith.constant 0.000000e+00 : f32
    %177 = vector.broadcast %cst_41 : f32 to vector<8x384xf32>
    %178 = arith.select %24, %176, %177 : vector<8x384xi1>, vector<8x384xf32>
    %c0_42 = arith.constant 0 : index
    %179 = memref.load %arg4[%c0_42] : memref<40xf32, #tpu.memory_space<smem>>
    %180 = vector.broadcast %179 : f32 to vector<8x384xf32>
    %181 = arith.mulf %169, %180 : vector<8x384xf32>
    %182 = arith.addf %162, %181 : vector<8x384xf32>
    %c1_43 = arith.constant 1 : index
    %183 = memref.load %arg4[%c1_43] : memref<40xf32, #tpu.memory_space<smem>>
    %184 = vector.broadcast %183 : f32 to vector<8x384xf32>
    %185 = arith.mulf %172, %184 : vector<8x384xf32>
    %186 = arith.addf %182, %185 : vector<8x384xf32>
    %c2_44 = arith.constant 2 : index
    %187 = memref.load %arg4[%c2_44] : memref<40xf32, #tpu.memory_space<smem>>
    %188 = vector.broadcast %187 : f32 to vector<8x384xf32>
    %189 = arith.mulf %166, %188 : vector<8x384xf32>
    %190 = arith.addf %186, %189 : vector<8x384xf32>
    %c3_45 = arith.constant 3 : index
    %191 = memref.load %arg4[%c3_45] : memref<40xf32, #tpu.memory_space<smem>>
    %192 = vector.broadcast %191 : f32 to vector<8x384xf32>
    %193 = arith.mulf %175, %192 : vector<8x384xf32>
    %194 = arith.addf %190, %193 : vector<8x384xf32>
    %c4_46 = arith.constant 4 : index
    %195 = memref.load %arg4[%c4_46] : memref<40xf32, #tpu.memory_space<smem>>
    %196 = vector.broadcast %195 : f32 to vector<8x384xf32>
    %197 = arith.mulf %178, %196 : vector<8x384xf32>
    %198 = arith.addf %194, %197 : vector<8x384xf32>
    %c10_47 = arith.constant 10 : index
    %199 = memref.load %arg4[%c10_47] : memref<40xf32, #tpu.memory_space<smem>>
    %200 = vector.broadcast %199 : f32 to vector<8x384xf32>
    %201 = arith.mulf %169, %200 : vector<8x384xf32>
    %202 = arith.addf %163, %201 : vector<8x384xf32>
    %c11_48 = arith.constant 11 : index
    %203 = memref.load %arg4[%c11_48] : memref<40xf32, #tpu.memory_space<smem>>
    %204 = vector.broadcast %203 : f32 to vector<8x384xf32>
    %205 = arith.mulf %172, %204 : vector<8x384xf32>
    %206 = arith.addf %202, %205 : vector<8x384xf32>
    %c12_49 = arith.constant 12 : index
    %207 = memref.load %arg4[%c12_49] : memref<40xf32, #tpu.memory_space<smem>>
    %208 = vector.broadcast %207 : f32 to vector<8x384xf32>
    %209 = arith.mulf %166, %208 : vector<8x384xf32>
    %210 = arith.addf %206, %209 : vector<8x384xf32>
    %c13_50 = arith.constant 13 : index
    %211 = memref.load %arg4[%c13_50] : memref<40xf32, #tpu.memory_space<smem>>
    %212 = vector.broadcast %211 : f32 to vector<8x384xf32>
    %213 = arith.mulf %175, %212 : vector<8x384xf32>
    %214 = arith.addf %210, %213 : vector<8x384xf32>
    %c14_51 = arith.constant 14 : index
    %215 = memref.load %arg4[%c14_51] : memref<40xf32, #tpu.memory_space<smem>>
    %216 = vector.broadcast %215 : f32 to vector<8x384xf32>
    %217 = arith.mulf %178, %216 : vector<8x384xf32>
    %218 = arith.addf %214, %217 : vector<8x384xf32>
    %c20 = arith.constant 20 : index
    %219 = memref.load %arg4[%c20] : memref<40xf32, #tpu.memory_space<smem>>
    %220 = vector.broadcast %219 : f32 to vector<8x384xf32>
    %221 = arith.mulf %169, %220 : vector<8x384xf32>
    %222 = arith.addf %164, %221 : vector<8x384xf32>
    %c21 = arith.constant 21 : index
    %223 = memref.load %arg4[%c21] : memref<40xf32, #tpu.memory_space<smem>>
    %224 = vector.broadcast %223 : f32 to vector<8x384xf32>
    %225 = arith.mulf %172, %224 : vector<8x384xf32>
    %226 = arith.addf %222, %225 : vector<8x384xf32>
    %c22 = arith.constant 22 : index
    %227 = memref.load %arg4[%c22] : memref<40xf32, #tpu.memory_space<smem>>
    %228 = vector.broadcast %227 : f32 to vector<8x384xf32>
    %229 = arith.mulf %166, %228 : vector<8x384xf32>
    %230 = arith.addf %226, %229 : vector<8x384xf32>
    %c23 = arith.constant 23 : index
    %231 = memref.load %arg4[%c23] : memref<40xf32, #tpu.memory_space<smem>>
    %232 = vector.broadcast %231 : f32 to vector<8x384xf32>
    %233 = arith.mulf %175, %232 : vector<8x384xf32>
    %234 = arith.addf %230, %233 : vector<8x384xf32>
    %c24 = arith.constant 24 : index
    %235 = memref.load %arg4[%c24] : memref<40xf32, #tpu.memory_space<smem>>
    %236 = vector.broadcast %235 : f32 to vector<8x384xf32>
    %237 = arith.mulf %178, %236 : vector<8x384xf32>
    %238 = arith.addf %234, %237 : vector<8x384xf32>
    %c30 = arith.constant 30 : index
    %239 = memref.load %arg4[%c30] : memref<40xf32, #tpu.memory_space<smem>>
    %240 = vector.broadcast %239 : f32 to vector<8x384xf32>
    %241 = arith.mulf %169, %240 : vector<8x384xf32>
    %242 = arith.addf %165, %241 : vector<8x384xf32>
    %c31 = arith.constant 31 : index
    %243 = memref.load %arg4[%c31] : memref<40xf32, #tpu.memory_space<smem>>
    %244 = vector.broadcast %243 : f32 to vector<8x384xf32>
    %245 = arith.mulf %172, %244 : vector<8x384xf32>
    %246 = arith.addf %242, %245 : vector<8x384xf32>
    %c32 = arith.constant 32 : index
    %247 = memref.load %arg4[%c32] : memref<40xf32, #tpu.memory_space<smem>>
    %248 = vector.broadcast %247 : f32 to vector<8x384xf32>
    %249 = arith.mulf %166, %248 : vector<8x384xf32>
    %250 = arith.addf %246, %249 : vector<8x384xf32>
    %c33 = arith.constant 33 : index
    %251 = memref.load %arg4[%c33] : memref<40xf32, #tpu.memory_space<smem>>
    %252 = vector.broadcast %251 : f32 to vector<8x384xf32>
    %253 = arith.mulf %175, %252 : vector<8x384xf32>
    %254 = arith.addf %250, %253 : vector<8x384xf32>
    %c34 = arith.constant 34 : index
    %255 = memref.load %arg4[%c34] : memref<40xf32, #tpu.memory_space<smem>>
    %256 = vector.broadcast %255 : f32 to vector<8x384xf32>
    %257 = arith.mulf %178, %256 : vector<8x384xf32>
    %258 = arith.addf %254, %257 : vector<8x384xf32>
    %259 = vector.extract_strided_slice %161 {offsets = [8, 0], sizes = [8, 384], strides = [1, 1]} : vector<16x384xf32> to vector<8x384xf32>
    %c2_i32_52 = arith.constant 2 : i32
    %260 = tpu.dynamic_rotate %259 by %c2_i32_52 dim 1 : vector<8x384xf32>, i32 -> vector<8x384xf32>
    %cst_53 = arith.constant 0.000000e+00 : f32
    %261 = vector.broadcast %cst_53 : f32 to vector<8x384xf32>
    %262 = arith.select %18, %260, %261 : vector<8x384xi1>, vector<8x384xf32>
    %c1_i32_54 = arith.constant 1 : i32
    %263 = tpu.dynamic_rotate %259 by %c1_i32_54 dim 1 : vector<8x384xf32>, i32 -> vector<8x384xf32>
    %cst_55 = arith.constant 0.000000e+00 : f32
    %264 = vector.broadcast %cst_55 : f32 to vector<8x384xf32>
    %265 = arith.select %20, %263, %264 : vector<8x384xi1>, vector<8x384xf32>
    %c383_i32_56 = arith.constant 383 : i32
    %266 = tpu.dynamic_rotate %259 by %c383_i32_56 dim 1 : vector<8x384xf32>, i32 -> vector<8x384xf32>
    %cst_57 = arith.constant 0.000000e+00 : f32
    %267 = vector.broadcast %cst_57 : f32 to vector<8x384xf32>
    %268 = arith.select %22, %266, %267 : vector<8x384xi1>, vector<8x384xf32>
    %c382_i32_58 = arith.constant 382 : i32
    %269 = tpu.dynamic_rotate %259 by %c382_i32_58 dim 1 : vector<8x384xf32>, i32 -> vector<8x384xf32>
    %cst_59 = arith.constant 0.000000e+00 : f32
    %270 = vector.broadcast %cst_59 : f32 to vector<8x384xf32>
    %271 = arith.select %24, %269, %270 : vector<8x384xi1>, vector<8x384xf32>
    %c5_60 = arith.constant 5 : index
    %272 = memref.load %arg4[%c5_60] : memref<40xf32, #tpu.memory_space<smem>>
    %273 = vector.broadcast %272 : f32 to vector<8x384xf32>
    %274 = arith.mulf %262, %273 : vector<8x384xf32>
    %275 = arith.addf %198, %274 : vector<8x384xf32>
    %c6_61 = arith.constant 6 : index
    %276 = memref.load %arg4[%c6_61] : memref<40xf32, #tpu.memory_space<smem>>
    %277 = vector.broadcast %276 : f32 to vector<8x384xf32>
    %278 = arith.mulf %265, %277 : vector<8x384xf32>
    %279 = arith.addf %275, %278 : vector<8x384xf32>
    %c7_62 = arith.constant 7 : index
    %280 = memref.load %arg4[%c7_62] : memref<40xf32, #tpu.memory_space<smem>>
    %281 = vector.broadcast %280 : f32 to vector<8x384xf32>
    %282 = arith.mulf %259, %281 : vector<8x384xf32>
    %283 = arith.addf %279, %282 : vector<8x384xf32>
    %c8_63 = arith.constant 8 : index
    %284 = memref.load %arg4[%c8_63] : memref<40xf32, #tpu.memory_space<smem>>
    %285 = vector.broadcast %284 : f32 to vector<8x384xf32>
    %286 = arith.mulf %268, %285 : vector<8x384xf32>
    %287 = arith.addf %283, %286 : vector<8x384xf32>
    %c9_64 = arith.constant 9 : index
    %288 = memref.load %arg4[%c9_64] : memref<40xf32, #tpu.memory_space<smem>>
    %289 = vector.broadcast %288 : f32 to vector<8x384xf32>
    %290 = arith.mulf %271, %289 : vector<8x384xf32>
    %291 = arith.addf %287, %290 : vector<8x384xf32>
    %c15_65 = arith.constant 15 : index
    %292 = memref.load %arg4[%c15_65] : memref<40xf32, #tpu.memory_space<smem>>
    %293 = vector.broadcast %292 : f32 to vector<8x384xf32>
    %294 = arith.mulf %262, %293 : vector<8x384xf32>
    %295 = arith.addf %218, %294 : vector<8x384xf32>
    %c16_66 = arith.constant 16 : index
    %296 = memref.load %arg4[%c16_66] : memref<40xf32, #tpu.memory_space<smem>>
    %297 = vector.broadcast %296 : f32 to vector<8x384xf32>
    %298 = arith.mulf %265, %297 : vector<8x384xf32>
    %299 = arith.addf %295, %298 : vector<8x384xf32>
    %c17_67 = arith.constant 17 : index
    %300 = memref.load %arg4[%c17_67] : memref<40xf32, #tpu.memory_space<smem>>
    %301 = vector.broadcast %300 : f32 to vector<8x384xf32>
    %302 = arith.mulf %259, %301 : vector<8x384xf32>
    %303 = arith.addf %299, %302 : vector<8x384xf32>
    %c18_68 = arith.constant 18 : index
    %304 = memref.load %arg4[%c18_68] : memref<40xf32, #tpu.memory_space<smem>>
    %305 = vector.broadcast %304 : f32 to vector<8x384xf32>
    %306 = arith.mulf %268, %305 : vector<8x384xf32>
    %307 = arith.addf %303, %306 : vector<8x384xf32>
    %c19_69 = arith.constant 19 : index
    %308 = memref.load %arg4[%c19_69] : memref<40xf32, #tpu.memory_space<smem>>
    %309 = vector.broadcast %308 : f32 to vector<8x384xf32>
    %310 = arith.mulf %271, %309 : vector<8x384xf32>
    %311 = arith.addf %307, %310 : vector<8x384xf32>
    %c25 = arith.constant 25 : index
    %312 = memref.load %arg4[%c25] : memref<40xf32, #tpu.memory_space<smem>>
    %313 = vector.broadcast %312 : f32 to vector<8x384xf32>
    %314 = arith.mulf %262, %313 : vector<8x384xf32>
    %315 = arith.addf %238, %314 : vector<8x384xf32>
    %c26 = arith.constant 26 : index
    %316 = memref.load %arg4[%c26] : memref<40xf32, #tpu.memory_space<smem>>
    %317 = vector.broadcast %316 : f32 to vector<8x384xf32>
    %318 = arith.mulf %265, %317 : vector<8x384xf32>
    %319 = arith.addf %315, %318 : vector<8x384xf32>
    %c27 = arith.constant 27 : index
    %320 = memref.load %arg4[%c27] : memref<40xf32, #tpu.memory_space<smem>>
    %321 = vector.broadcast %320 : f32 to vector<8x384xf32>
    %322 = arith.mulf %259, %321 : vector<8x384xf32>
    %323 = arith.addf %319, %322 : vector<8x384xf32>
    %c28 = arith.constant 28 : index
    %324 = memref.load %arg4[%c28] : memref<40xf32, #tpu.memory_space<smem>>
    %325 = vector.broadcast %324 : f32 to vector<8x384xf32>
    %326 = arith.mulf %268, %325 : vector<8x384xf32>
    %327 = arith.addf %323, %326 : vector<8x384xf32>
    %c29 = arith.constant 29 : index
    %328 = memref.load %arg4[%c29] : memref<40xf32, #tpu.memory_space<smem>>
    %329 = vector.broadcast %328 : f32 to vector<8x384xf32>
    %330 = arith.mulf %271, %329 : vector<8x384xf32>
    %331 = arith.addf %327, %330 : vector<8x384xf32>
    %c35 = arith.constant 35 : index
    %332 = memref.load %arg4[%c35] : memref<40xf32, #tpu.memory_space<smem>>
    %333 = vector.broadcast %332 : f32 to vector<8x384xf32>
    %334 = arith.mulf %262, %333 : vector<8x384xf32>
    %335 = arith.addf %258, %334 : vector<8x384xf32>
    %c36 = arith.constant 36 : index
    %336 = memref.load %arg4[%c36] : memref<40xf32, #tpu.memory_space<smem>>
    %337 = vector.broadcast %336 : f32 to vector<8x384xf32>
    %338 = arith.mulf %265, %337 : vector<8x384xf32>
    %339 = arith.addf %335, %338 : vector<8x384xf32>
    %c37 = arith.constant 37 : index
    %340 = memref.load %arg4[%c37] : memref<40xf32, #tpu.memory_space<smem>>
    %341 = vector.broadcast %340 : f32 to vector<8x384xf32>
    %342 = arith.mulf %259, %341 : vector<8x384xf32>
    %343 = arith.addf %339, %342 : vector<8x384xf32>
    %c38 = arith.constant 38 : index
    %344 = memref.load %arg4[%c38] : memref<40xf32, #tpu.memory_space<smem>>
    %345 = vector.broadcast %344 : f32 to vector<8x384xf32>
    %346 = arith.mulf %268, %345 : vector<8x384xf32>
    %347 = arith.addf %343, %346 : vector<8x384xf32>
    %c39 = arith.constant 39 : index
    %348 = memref.load %arg4[%c39] : memref<40xf32, #tpu.memory_space<smem>>
    %349 = vector.broadcast %348 : f32 to vector<8x384xf32>
    %350 = arith.mulf %271, %349 : vector<8x384xf32>
    %351 = arith.addf %347, %350 : vector<8x384xf32>
    %c0_70 = arith.constant 0 : index
    %352 = memref.load %arg5[%c0_70] : memref<4xf32, #tpu.memory_space<smem>>
    %353 = vector.broadcast %352 : f32 to vector<8x384xf32>
    %354 = arith.addf %291, %353 : vector<8x384xf32>
    %c1_71 = arith.constant 1 : index
    %355 = memref.load %arg5[%c1_71] : memref<4xf32, #tpu.memory_space<smem>>
    %356 = vector.broadcast %355 : f32 to vector<8x384xf32>
    %357 = arith.addf %311, %356 : vector<8x384xf32>
    %c2_72 = arith.constant 2 : index
    %358 = memref.load %arg5[%c2_72] : memref<4xf32, #tpu.memory_space<smem>>
    %359 = vector.broadcast %358 : f32 to vector<8x384xf32>
    %360 = arith.addf %331, %359 : vector<8x384xf32>
    %c3_73 = arith.constant 3 : index
    %361 = memref.load %arg5[%c3_73] : memref<4xf32, #tpu.memory_space<smem>>
    %362 = vector.broadcast %361 : f32 to vector<8x384xf32>
    %363 = arith.addf %351, %362 : vector<8x384xf32>
    %364 = tpu.concatenate %354, %357, %360, %363 in 0 : vector<8x384xf32>, vector<8x384xf32>, vector<8x384xf32>, vector<8x384xf32> -> vector<32x384xf32>
    %cst_74 = arith.constant 0.000000e+00 : f32
    %365 = vector.broadcast %cst_74 : f32 to vector<32x384xf32>
    %366 = arith.cmpf oge, %364, %365 : vector<32x384xf32>
    %cst_75 = arith.constant 0.00999999977 : f32
    %367 = vector.broadcast %cst_75 : f32 to vector<32x384xf32>
    %368 = arith.mulf %367, %364 : vector<32x384xf32>
    %369 = arith.select %366, %364, %368 : vector<32x384xi1>, vector<32x384xf32>
    %cst_76 = arith.constant dense<0.000000e+00> : vector<32xf32>
    %370 = vector.multi_reduction <add>, %369, %cst_76 [1] : vector<32x384xf32> to vector<32xf32>
    %371 = vector.shape_cast %370 : vector<32xf32> to vector<32x1xf32>
    %cst_77 = arith.constant 0.00260416674 : f32
    %372 = vector.broadcast %cst_77 : f32 to vector<32x1xf32>
    %373 = arith.mulf %371, %372 : vector<32x1xf32>
    %374 = vector.broadcast %373 : vector<32x1xf32> to vector<32x384xf32>
    %375 = arith.subf %369, %374 : vector<32x384xf32>
    %376 = arith.mulf %375, %375 : vector<32x384xf32>
    %cst_78 = arith.constant dense<0.000000e+00> : vector<32xf32>
    %377 = vector.multi_reduction <add>, %376, %cst_78 [1] : vector<32x384xf32> to vector<32xf32>
    %378 = vector.shape_cast %377 : vector<32xf32> to vector<32x1xf32>
    %cst_79 = arith.constant 0.00260416674 : f32
    %379 = vector.broadcast %cst_79 : f32 to vector<32x1xf32>
    %380 = arith.mulf %378, %379 : vector<32x1xf32>
    %cst_80 = arith.constant 9.99999974E-6 : f32
    %381 = vector.broadcast %cst_80 : f32 to vector<32x1xf32>
    %382 = arith.addf %380, %381 : vector<32x1xf32>
    %383 = math.rsqrt %382 : vector<32x1xf32>
    %384 = vector.broadcast %383 : vector<32x1xf32> to vector<32x384xf32>
    %385 = arith.mulf %375, %384 : vector<32x384xf32>
    %cst_81 = arith.constant 0.000000e+00 : f32
    %386 = vector.broadcast %cst_81 : f32 to vector<8x384xf32>
    %cst_82 = arith.constant 0.000000e+00 : f32
    %387 = vector.broadcast %cst_82 : f32 to vector<8x384xf32>
    %cst_83 = arith.constant 0.000000e+00 : f32
    %388 = vector.broadcast %cst_83 : f32 to vector<8x384xf32>
    %cst_84 = arith.constant 0.000000e+00 : f32
    %389 = vector.broadcast %cst_84 : f32 to vector<8x384xf32>
    %cst_85 = arith.constant 0.000000e+00 : f32
    %390 = vector.broadcast %cst_85 : f32 to vector<8x384xf32>
    %cst_86 = arith.constant 0.000000e+00 : f32
    %391 = vector.broadcast %cst_86 : f32 to vector<8x384xf32>
    %cst_87 = arith.constant 0.000000e+00 : f32
    %392 = vector.broadcast %cst_87 : f32 to vector<8x384xf32>
    %cst_88 = arith.constant 0.000000e+00 : f32
    %393 = vector.broadcast %cst_88 : f32 to vector<8x384xf32>
    %394 = vector.extract_strided_slice %385 {offsets = [0, 0], sizes = [8, 384], strides = [1, 1]} : vector<32x384xf32> to vector<8x384xf32>
    %c2_i32_89 = arith.constant 2 : i32
    %395 = tpu.dynamic_rotate %394 by %c2_i32_89 dim 1 : vector<8x384xf32>, i32 -> vector<8x384xf32>
    %cst_90 = arith.constant 0.000000e+00 : f32
    %396 = vector.broadcast %cst_90 : f32 to vector<8x384xf32>
    %397 = arith.select %18, %395, %396 : vector<8x384xi1>, vector<8x384xf32>
    %c1_i32_91 = arith.constant 1 : i32
    %398 = tpu.dynamic_rotate %394 by %c1_i32_91 dim 1 : vector<8x384xf32>, i32 -> vector<8x384xf32>
    %cst_92 = arith.constant 0.000000e+00 : f32
    %399 = vector.broadcast %cst_92 : f32 to vector<8x384xf32>
    %400 = arith.select %20, %398, %399 : vector<8x384xi1>, vector<8x384xf32>
    %c383_i32_93 = arith.constant 383 : i32
    %401 = tpu.dynamic_rotate %394 by %c383_i32_93 dim 1 : vector<8x384xf32>, i32 -> vector<8x384xf32>
    %cst_94 = arith.constant 0.000000e+00 : f32
    %402 = vector.broadcast %cst_94 : f32 to vector<8x384xf32>
    %403 = arith.select %22, %401, %402 : vector<8x384xi1>, vector<8x384xf32>
    %c382_i32_95 = arith.constant 382 : i32
    %404 = tpu.dynamic_rotate %394 by %c382_i32_95 dim 1 : vector<8x384xf32>, i32 -> vector<8x384xf32>
    %cst_96 = arith.constant 0.000000e+00 : f32
    %405 = vector.broadcast %cst_96 : f32 to vector<8x384xf32>
    %406 = arith.select %24, %404, %405 : vector<8x384xi1>, vector<8x384xf32>
    %c0_97 = arith.constant 0 : index
    %407 = memref.load %arg6[%c0_97] : memref<160xf32, #tpu.memory_space<smem>>
    %408 = vector.broadcast %407 : f32 to vector<8x384xf32>
    %409 = arith.mulf %397, %408 : vector<8x384xf32>
    %410 = arith.addf %386, %409 : vector<8x384xf32>
    %c1_98 = arith.constant 1 : index
    %411 = memref.load %arg6[%c1_98] : memref<160xf32, #tpu.memory_space<smem>>
    %412 = vector.broadcast %411 : f32 to vector<8x384xf32>
    %413 = arith.mulf %400, %412 : vector<8x384xf32>
    %414 = arith.addf %410, %413 : vector<8x384xf32>
    %c2_99 = arith.constant 2 : index
    %415 = memref.load %arg6[%c2_99] : memref<160xf32, #tpu.memory_space<smem>>
    %416 = vector.broadcast %415 : f32 to vector<8x384xf32>
    %417 = arith.mulf %394, %416 : vector<8x384xf32>
    %418 = arith.addf %414, %417 : vector<8x384xf32>
    %c3_100 = arith.constant 3 : index
    %419 = memref.load %arg6[%c3_100] : memref<160xf32, #tpu.memory_space<smem>>
    %420 = vector.broadcast %419 : f32 to vector<8x384xf32>
    %421 = arith.mulf %403, %420 : vector<8x384xf32>
    %422 = arith.addf %418, %421 : vector<8x384xf32>
    %c4_101 = arith.constant 4 : index
    %423 = memref.load %arg6[%c4_101] : memref<160xf32, #tpu.memory_space<smem>>
    %424 = vector.broadcast %423 : f32 to vector<8x384xf32>
    %425 = arith.mulf %406, %424 : vector<8x384xf32>
    %426 = arith.addf %422, %425 : vector<8x384xf32>
    %c20_102 = arith.constant 20 : index
    %427 = memref.load %arg6[%c20_102] : memref<160xf32, #tpu.memory_space<smem>>
    %428 = vector.broadcast %427 : f32 to vector<8x384xf32>
    %429 = arith.mulf %397, %428 : vector<8x384xf32>
    %430 = arith.addf %387, %429 : vector<8x384xf32>
    %c21_103 = arith.constant 21 : index
    %431 = memref.load %arg6[%c21_103] : memref<160xf32, #tpu.memory_space<smem>>
    %432 = vector.broadcast %431 : f32 to vector<8x384xf32>
    %433 = arith.mulf %400, %432 : vector<8x384xf32>
    %434 = arith.addf %430, %433 : vector<8x384xf32>
    %c22_104 = arith.constant 22 : index
    %435 = memref.load %arg6[%c22_104] : memref<160xf32, #tpu.memory_space<smem>>
    %436 = vector.broadcast %435 : f32 to vector<8x384xf32>
    %437 = arith.mulf %394, %436 : vector<8x384xf32>
    %438 = arith.addf %434, %437 : vector<8x384xf32>
    %c23_105 = arith.constant 23 : index
    %439 = memref.load %arg6[%c23_105] : memref<160xf32, #tpu.memory_space<smem>>
    %440 = vector.broadcast %439 : f32 to vector<8x384xf32>
    %441 = arith.mulf %403, %440 : vector<8x384xf32>
    %442 = arith.addf %438, %441 : vector<8x384xf32>
    %c24_106 = arith.constant 24 : index
    %443 = memref.load %arg6[%c24_106] : memref<160xf32, #tpu.memory_space<smem>>
    %444 = vector.broadcast %443 : f32 to vector<8x384xf32>
    %445 = arith.mulf %406, %444 : vector<8x384xf32>
    %446 = arith.addf %442, %445 : vector<8x384xf32>
    %c40 = arith.constant 40 : index
    %447 = memref.load %arg6[%c40] : memref<160xf32, #tpu.memory_space<smem>>
    %448 = vector.broadcast %447 : f32 to vector<8x384xf32>
    %449 = arith.mulf %397, %448 : vector<8x384xf32>
    %450 = arith.addf %388, %449 : vector<8x384xf32>
    %c41 = arith.constant 41 : index
    %451 = memref.load %arg6[%c41] : memref<160xf32, #tpu.memory_space<smem>>
    %452 = vector.broadcast %451 : f32 to vector<8x384xf32>
    %453 = arith.mulf %400, %452 : vector<8x384xf32>
    %454 = arith.addf %450, %453 : vector<8x384xf32>
    %c42 = arith.constant 42 : index
    %455 = memref.load %arg6[%c42] : memref<160xf32, #tpu.memory_space<smem>>
    %456 = vector.broadcast %455 : f32 to vector<8x384xf32>
    %457 = arith.mulf %394, %456 : vector<8x384xf32>
    %458 = arith.addf %454, %457 : vector<8x384xf32>
    %c43 = arith.constant 43 : index
    %459 = memref.load %arg6[%c43] : memref<160xf32, #tpu.memory_space<smem>>
    %460 = vector.broadcast %459 : f32 to vector<8x384xf32>
    %461 = arith.mulf %403, %460 : vector<8x384xf32>
    %462 = arith.addf %458, %461 : vector<8x384xf32>
    %c44 = arith.constant 44 : index
    %463 = memref.load %arg6[%c44] : memref<160xf32, #tpu.memory_space<smem>>
    %464 = vector.broadcast %463 : f32 to vector<8x384xf32>
    %465 = arith.mulf %406, %464 : vector<8x384xf32>
    %466 = arith.addf %462, %465 : vector<8x384xf32>
    %c60 = arith.constant 60 : index
    %467 = memref.load %arg6[%c60] : memref<160xf32, #tpu.memory_space<smem>>
    %468 = vector.broadcast %467 : f32 to vector<8x384xf32>
    %469 = arith.mulf %397, %468 : vector<8x384xf32>
    %470 = arith.addf %389, %469 : vector<8x384xf32>
    %c61 = arith.constant 61 : index
    %471 = memref.load %arg6[%c61] : memref<160xf32, #tpu.memory_space<smem>>
    %472 = vector.broadcast %471 : f32 to vector<8x384xf32>
    %473 = arith.mulf %400, %472 : vector<8x384xf32>
    %474 = arith.addf %470, %473 : vector<8x384xf32>
    %c62 = arith.constant 62 : index
    %475 = memref.load %arg6[%c62] : memref<160xf32, #tpu.memory_space<smem>>
    %476 = vector.broadcast %475 : f32 to vector<8x384xf32>
    %477 = arith.mulf %394, %476 : vector<8x384xf32>
    %478 = arith.addf %474, %477 : vector<8x384xf32>
    %c63 = arith.constant 63 : index
    %479 = memref.load %arg6[%c63] : memref<160xf32, #tpu.memory_space<smem>>
    %480 = vector.broadcast %479 : f32 to vector<8x384xf32>
    %481 = arith.mulf %403, %480 : vector<8x384xf32>
    %482 = arith.addf %478, %481 : vector<8x384xf32>
    %c64 = arith.constant 64 : index
    %483 = memref.load %arg6[%c64] : memref<160xf32, #tpu.memory_space<smem>>
    %484 = vector.broadcast %483 : f32 to vector<8x384xf32>
    %485 = arith.mulf %406, %484 : vector<8x384xf32>
    %486 = arith.addf %482, %485 : vector<8x384xf32>
    %c80 = arith.constant 80 : index
    %487 = memref.load %arg6[%c80] : memref<160xf32, #tpu.memory_space<smem>>
    %488 = vector.broadcast %487 : f32 to vector<8x384xf32>
    %489 = arith.mulf %397, %488 : vector<8x384xf32>
    %490 = arith.addf %390, %489 : vector<8x384xf32>
    %c81 = arith.constant 81 : index
    %491 = memref.load %arg6[%c81] : memref<160xf32, #tpu.memory_space<smem>>
    %492 = vector.broadcast %491 : f32 to vector<8x384xf32>
    %493 = arith.mulf %400, %492 : vector<8x384xf32>
    %494 = arith.addf %490, %493 : vector<8x384xf32>
    %c82 = arith.constant 82 : index
    %495 = memref.load %arg6[%c82] : memref<160xf32, #tpu.memory_space<smem>>
    %496 = vector.broadcast %495 : f32 to vector<8x384xf32>
    %497 = arith.mulf %394, %496 : vector<8x384xf32>
    %498 = arith.addf %494, %497 : vector<8x384xf32>
    %c83 = arith.constant 83 : index
    %499 = memref.load %arg6[%c83] : memref<160xf32, #tpu.memory_space<smem>>
    %500 = vector.broadcast %499 : f32 to vector<8x384xf32>
    %501 = arith.mulf %403, %500 : vector<8x384xf32>
    %502 = arith.addf %498, %501 : vector<8x384xf32>
    %c84 = arith.constant 84 : index
    %503 = memref.load %arg6[%c84] : memref<160xf32, #tpu.memory_space<smem>>
    %504 = vector.broadcast %503 : f32 to vector<8x384xf32>
    %505 = arith.mulf %406, %504 : vector<8x384xf32>
    %506 = arith.addf %502, %505 : vector<8x384xf32>
    %c100 = arith.constant 100 : index
    %507 = memref.load %arg6[%c100] : memref<160xf32, #tpu.memory_space<smem>>
    %508 = vector.broadcast %507 : f32 to vector<8x384xf32>
    %509 = arith.mulf %397, %508 : vector<8x384xf32>
    %510 = arith.addf %391, %509 : vector<8x384xf32>
    %c101 = arith.constant 101 : index
    %511 = memref.load %arg6[%c101] : memref<160xf32, #tpu.memory_space<smem>>
    %512 = vector.broadcast %511 : f32 to vector<8x384xf32>
    %513 = arith.mulf %400, %512 : vector<8x384xf32>
    %514 = arith.addf %510, %513 : vector<8x384xf32>
    %c102 = arith.constant 102 : index
    %515 = memref.load %arg6[%c102] : memref<160xf32, #tpu.memory_space<smem>>
    %516 = vector.broadcast %515 : f32 to vector<8x384xf32>
    %517 = arith.mulf %394, %516 : vector<8x384xf32>
    %518 = arith.addf %514, %517 : vector<8x384xf32>
    %c103 = arith.constant 103 : index
    %519 = memref.load %arg6[%c103] : memref<160xf32, #tpu.memory_space<smem>>
    %520 = vector.broadcast %519 : f32 to vector<8x384xf32>
    %521 = arith.mulf %403, %520 : vector<8x384xf32>
    %522 = arith.addf %518, %521 : vector<8x384xf32>
    %c104 = arith.constant 104 : index
    %523 = memref.load %arg6[%c104] : memref<160xf32, #tpu.memory_space<smem>>
    %524 = vector.broadcast %523 : f32 to vector<8x384xf32>
    %525 = arith.mulf %406, %524 : vector<8x384xf32>
    %526 = arith.addf %522, %525 : vector<8x384xf32>
    %c120 = arith.constant 120 : index
    %527 = memref.load %arg6[%c120] : memref<160xf32, #tpu.memory_space<smem>>
    %528 = vector.broadcast %527 : f32 to vector<8x384xf32>
    %529 = arith.mulf %397, %528 : vector<8x384xf32>
    %530 = arith.addf %392, %529 : vector<8x384xf32>
    %c121 = arith.constant 121 : index
    %531 = memref.load %arg6[%c121] : memref<160xf32, #tpu.memory_space<smem>>
    %532 = vector.broadcast %531 : f32 to vector<8x384xf32>
    %533 = arith.mulf %400, %532 : vector<8x384xf32>
    %534 = arith.addf %530, %533 : vector<8x384xf32>
    %c122 = arith.constant 122 : index
    %535 = memref.load %arg6[%c122] : memref<160xf32, #tpu.memory_space<smem>>
    %536 = vector.broadcast %535 : f32 to vector<8x384xf32>
    %537 = arith.mulf %394, %536 : vector<8x384xf32>
    %538 = arith.addf %534, %537 : vector<8x384xf32>
    %c123 = arith.constant 123 : index
    %539 = memref.load %arg6[%c123] : memref<160xf32, #tpu.memory_space<smem>>
    %540 = vector.broadcast %539 : f32 to vector<8x384xf32>
    %541 = arith.mulf %403, %540 : vector<8x384xf32>
    %542 = arith.addf %538, %541 : vector<8x384xf32>
    %c124 = arith.constant 124 : index
    %543 = memref.load %arg6[%c124] : memref<160xf32, #tpu.memory_space<smem>>
    %544 = vector.broadcast %543 : f32 to vector<8x384xf32>
    %545 = arith.mulf %406, %544 : vector<8x384xf32>
    %546 = arith.addf %542, %545 : vector<8x384xf32>
    %c140 = arith.constant 140 : index
    %547 = memref.load %arg6[%c140] : memref<160xf32, #tpu.memory_space<smem>>
    %548 = vector.broadcast %547 : f32 to vector<8x384xf32>
    %549 = arith.mulf %397, %548 : vector<8x384xf32>
    %550 = arith.addf %393, %549 : vector<8x384xf32>
    %c141 = arith.constant 141 : index
    %551 = memref.load %arg6[%c141] : memref<160xf32, #tpu.memory_space<smem>>
    %552 = vector.broadcast %551 : f32 to vector<8x384xf32>
    %553 = arith.mulf %400, %552 : vector<8x384xf32>
    %554 = arith.addf %550, %553 : vector<8x384xf32>
    %c142 = arith.constant 142 : index
    %555 = memref.load %arg6[%c142] : memref<160xf32, #tpu.memory_space<smem>>
    %556 = vector.broadcast %555 : f32 to vector<8x384xf32>
    %557 = arith.mulf %394, %556 : vector<8x384xf32>
    %558 = arith.addf %554, %557 : vector<8x384xf32>
    %c143 = arith.constant 143 : index
    %559 = memref.load %arg6[%c143] : memref<160xf32, #tpu.memory_space<smem>>
    %560 = vector.broadcast %559 : f32 to vector<8x384xf32>
    %561 = arith.mulf %403, %560 : vector<8x384xf32>
    %562 = arith.addf %558, %561 : vector<8x384xf32>
    %c144 = arith.constant 144 : index
    %563 = memref.load %arg6[%c144] : memref<160xf32, #tpu.memory_space<smem>>
    %564 = vector.broadcast %563 : f32 to vector<8x384xf32>
    %565 = arith.mulf %406, %564 : vector<8x384xf32>
    %566 = arith.addf %562, %565 : vector<8x384xf32>
    %567 = vector.extract_strided_slice %385 {offsets = [8, 0], sizes = [8, 384], strides = [1, 1]} : vector<32x384xf32> to vector<8x384xf32>
    %c2_i32_107 = arith.constant 2 : i32
    %568 = tpu.dynamic_rotate %567 by %c2_i32_107 dim 1 : vector<8x384xf32>, i32 -> vector<8x384xf32>
    %cst_108 = arith.constant 0.000000e+00 : f32
    %569 = vector.broadcast %cst_108 : f32 to vector<8x384xf32>
    %570 = arith.select %18, %568, %569 : vector<8x384xi1>, vector<8x384xf32>
    %c1_i32_109 = arith.constant 1 : i32
    %571 = tpu.dynamic_rotate %567 by %c1_i32_109 dim 1 : vector<8x384xf32>, i32 -> vector<8x384xf32>
    %cst_110 = arith.constant 0.000000e+00 : f32
    %572 = vector.broadcast %cst_110 : f32 to vector<8x384xf32>
    %573 = arith.select %20, %571, %572 : vector<8x384xi1>, vector<8x384xf32>
    %c383_i32_111 = arith.constant 383 : i32
    %574 = tpu.dynamic_rotate %567 by %c383_i32_111 dim 1 : vector<8x384xf32>, i32 -> vector<8x384xf32>
    %cst_112 = arith.constant 0.000000e+00 : f32
    %575 = vector.broadcast %cst_112 : f32 to vector<8x384xf32>
    %576 = arith.select %22, %574, %575 : vector<8x384xi1>, vector<8x384xf32>
    %c382_i32_113 = arith.constant 382 : i32
    %577 = tpu.dynamic_rotate %567 by %c382_i32_113 dim 1 : vector<8x384xf32>, i32 -> vector<8x384xf32>
    %cst_114 = arith.constant 0.000000e+00 : f32
    %578 = vector.broadcast %cst_114 : f32 to vector<8x384xf32>
    %579 = arith.select %24, %577, %578 : vector<8x384xi1>, vector<8x384xf32>
    %c5_115 = arith.constant 5 : index
    %580 = memref.load %arg6[%c5_115] : memref<160xf32, #tpu.memory_space<smem>>
    %581 = vector.broadcast %580 : f32 to vector<8x384xf32>
    %582 = arith.mulf %570, %581 : vector<8x384xf32>
    %583 = arith.addf %426, %582 : vector<8x384xf32>
    %c6_116 = arith.constant 6 : index
    %584 = memref.load %arg6[%c6_116] : memref<160xf32, #tpu.memory_space<smem>>
    %585 = vector.broadcast %584 : f32 to vector<8x384xf32>
    %586 = arith.mulf %573, %585 : vector<8x384xf32>
    %587 = arith.addf %583, %586 : vector<8x384xf32>
    %c7_117 = arith.constant 7 : index
    %588 = memref.load %arg6[%c7_117] : memref<160xf32, #tpu.memory_space<smem>>
    %589 = vector.broadcast %588 : f32 to vector<8x384xf32>
    %590 = arith.mulf %567, %589 : vector<8x384xf32>
    %591 = arith.addf %587, %590 : vector<8x384xf32>
    %c8_118 = arith.constant 8 : index
    %592 = memref.load %arg6[%c8_118] : memref<160xf32, #tpu.memory_space<smem>>
    %593 = vector.broadcast %592 : f32 to vector<8x384xf32>
    %594 = arith.mulf %576, %593 : vector<8x384xf32>
    %595 = arith.addf %591, %594 : vector<8x384xf32>
    %c9_119 = arith.constant 9 : index
    %596 = memref.load %arg6[%c9_119] : memref<160xf32, #tpu.memory_space<smem>>
    %597 = vector.broadcast %596 : f32 to vector<8x384xf32>
    %598 = arith.mulf %579, %597 : vector<8x384xf32>
    %599 = arith.addf %595, %598 : vector<8x384xf32>
    %c25_120 = arith.constant 25 : index
    %600 = memref.load %arg6[%c25_120] : memref<160xf32, #tpu.memory_space<smem>>
    %601 = vector.broadcast %600 : f32 to vector<8x384xf32>
    %602 = arith.mulf %570, %601 : vector<8x384xf32>
    %603 = arith.addf %446, %602 : vector<8x384xf32>
    %c26_121 = arith.constant 26 : index
    %604 = memref.load %arg6[%c26_121] : memref<160xf32, #tpu.memory_space<smem>>
    %605 = vector.broadcast %604 : f32 to vector<8x384xf32>
    %606 = arith.mulf %573, %605 : vector<8x384xf32>
    %607 = arith.addf %603, %606 : vector<8x384xf32>
    %c27_122 = arith.constant 27 : index
    %608 = memref.load %arg6[%c27_122] : memref<160xf32, #tpu.memory_space<smem>>
    %609 = vector.broadcast %608 : f32 to vector<8x384xf32>
    %610 = arith.mulf %567, %609 : vector<8x384xf32>
    %611 = arith.addf %607, %610 : vector<8x384xf32>
    %c28_123 = arith.constant 28 : index
    %612 = memref.load %arg6[%c28_123] : memref<160xf32, #tpu.memory_space<smem>>
    %613 = vector.broadcast %612 : f32 to vector<8x384xf32>
    %614 = arith.mulf %576, %613 : vector<8x384xf32>
    %615 = arith.addf %611, %614 : vector<8x384xf32>
    %c29_124 = arith.constant 29 : index
    %616 = memref.load %arg6[%c29_124] : memref<160xf32, #tpu.memory_space<smem>>
    %617 = vector.broadcast %616 : f32 to vector<8x384xf32>
    %618 = arith.mulf %579, %617 : vector<8x384xf32>
    %619 = arith.addf %615, %618 : vector<8x384xf32>
    %c45 = arith.constant 45 : index
    %620 = memref.load %arg6[%c45] : memref<160xf32, #tpu.memory_space<smem>>
    %621 = vector.broadcast %620 : f32 to vector<8x384xf32>
    %622 = arith.mulf %570, %621 : vector<8x384xf32>
    %623 = arith.addf %466, %622 : vector<8x384xf32>
    %c46 = arith.constant 46 : index
    %624 = memref.load %arg6[%c46] : memref<160xf32, #tpu.memory_space<smem>>
    %625 = vector.broadcast %624 : f32 to vector<8x384xf32>
    %626 = arith.mulf %573, %625 : vector<8x384xf32>
    %627 = arith.addf %623, %626 : vector<8x384xf32>
    %c47 = arith.constant 47 : index
    %628 = memref.load %arg6[%c47] : memref<160xf32, #tpu.memory_space<smem>>
    %629 = vector.broadcast %628 : f32 to vector<8x384xf32>
    %630 = arith.mulf %567, %629 : vector<8x384xf32>
    %631 = arith.addf %627, %630 : vector<8x384xf32>
    %c48 = arith.constant 48 : index
    %632 = memref.load %arg6[%c48] : memref<160xf32, #tpu.memory_space<smem>>
    %633 = vector.broadcast %632 : f32 to vector<8x384xf32>
    %634 = arith.mulf %576, %633 : vector<8x384xf32>
    %635 = arith.addf %631, %634 : vector<8x384xf32>
    %c49 = arith.constant 49 : index
    %636 = memref.load %arg6[%c49] : memref<160xf32, #tpu.memory_space<smem>>
    %637 = vector.broadcast %636 : f32 to vector<8x384xf32>
    %638 = arith.mulf %579, %637 : vector<8x384xf32>
    %639 = arith.addf %635, %638 : vector<8x384xf32>
    %c65 = arith.constant 65 : index
    %640 = memref.load %arg6[%c65] : memref<160xf32, #tpu.memory_space<smem>>
    %641 = vector.broadcast %640 : f32 to vector<8x384xf32>
    %642 = arith.mulf %570, %641 : vector<8x384xf32>
    %643 = arith.addf %486, %642 : vector<8x384xf32>
    %c66 = arith.constant 66 : index
    %644 = memref.load %arg6[%c66] : memref<160xf32, #tpu.memory_space<smem>>
    %645 = vector.broadcast %644 : f32 to vector<8x384xf32>
    %646 = arith.mulf %573, %645 : vector<8x384xf32>
    %647 = arith.addf %643, %646 : vector<8x384xf32>
    %c67 = arith.constant 67 : index
    %648 = memref.load %arg6[%c67] : memref<160xf32, #tpu.memory_space<smem>>
    %649 = vector.broadcast %648 : f32 to vector<8x384xf32>
    %650 = arith.mulf %567, %649 : vector<8x384xf32>
    %651 = arith.addf %647, %650 : vector<8x384xf32>
    %c68 = arith.constant 68 : index
    %652 = memref.load %arg6[%c68] : memref<160xf32, #tpu.memory_space<smem>>
    %653 = vector.broadcast %652 : f32 to vector<8x384xf32>
    %654 = arith.mulf %576, %653 : vector<8x384xf32>
    %655 = arith.addf %651, %654 : vector<8x384xf32>
    %c69 = arith.constant 69 : index
    %656 = memref.load %arg6[%c69] : memref<160xf32, #tpu.memory_space<smem>>
    %657 = vector.broadcast %656 : f32 to vector<8x384xf32>
    %658 = arith.mulf %579, %657 : vector<8x384xf32>
    %659 = arith.addf %655, %658 : vector<8x384xf32>
    %c85 = arith.constant 85 : index
    %660 = memref.load %arg6[%c85] : memref<160xf32, #tpu.memory_space<smem>>
    %661 = vector.broadcast %660 : f32 to vector<8x384xf32>
    %662 = arith.mulf %570, %661 : vector<8x384xf32>
    %663 = arith.addf %506, %662 : vector<8x384xf32>
    %c86 = arith.constant 86 : index
    %664 = memref.load %arg6[%c86] : memref<160xf32, #tpu.memory_space<smem>>
    %665 = vector.broadcast %664 : f32 to vector<8x384xf32>
    %666 = arith.mulf %573, %665 : vector<8x384xf32>
    %667 = arith.addf %663, %666 : vector<8x384xf32>
    %c87 = arith.constant 87 : index
    %668 = memref.load %arg6[%c87] : memref<160xf32, #tpu.memory_space<smem>>
    %669 = vector.broadcast %668 : f32 to vector<8x384xf32>
    %670 = arith.mulf %567, %669 : vector<8x384xf32>
    %671 = arith.addf %667, %670 : vector<8x384xf32>
    %c88 = arith.constant 88 : index
    %672 = memref.load %arg6[%c88] : memref<160xf32, #tpu.memory_space<smem>>
    %673 = vector.broadcast %672 : f32 to vector<8x384xf32>
    %674 = arith.mulf %576, %673 : vector<8x384xf32>
    %675 = arith.addf %671, %674 : vector<8x384xf32>
    %c89 = arith.constant 89 : index
    %676 = memref.load %arg6[%c89] : memref<160xf32, #tpu.memory_space<smem>>
    %677 = vector.broadcast %676 : f32 to vector<8x384xf32>
    %678 = arith.mulf %579, %677 : vector<8x384xf32>
    %679 = arith.addf %675, %678 : vector<8x384xf32>
    %c105 = arith.constant 105 : index
    %680 = memref.load %arg6[%c105] : memref<160xf32, #tpu.memory_space<smem>>
    %681 = vector.broadcast %680 : f32 to vector<8x384xf32>
    %682 = arith.mulf %570, %681 : vector<8x384xf32>
    %683 = arith.addf %526, %682 : vector<8x384xf32>
    %c106 = arith.constant 106 : index
    %684 = memref.load %arg6[%c106] : memref<160xf32, #tpu.memory_space<smem>>
    %685 = vector.broadcast %684 : f32 to vector<8x384xf32>
    %686 = arith.mulf %573, %685 : vector<8x384xf32>
    %687 = arith.addf %683, %686 : vector<8x384xf32>
    %c107 = arith.constant 107 : index
    %688 = memref.load %arg6[%c107] : memref<160xf32, #tpu.memory_space<smem>>
    %689 = vector.broadcast %688 : f32 to vector<8x384xf32>
    %690 = arith.mulf %567, %689 : vector<8x384xf32>
    %691 = arith.addf %687, %690 : vector<8x384xf32>
    %c108 = arith.constant 108 : index
    %692 = memref.load %arg6[%c108] : memref<160xf32, #tpu.memory_space<smem>>
    %693 = vector.broadcast %692 : f32 to vector<8x384xf32>
    %694 = arith.mulf %576, %693 : vector<8x384xf32>
    %695 = arith.addf %691, %694 : vector<8x384xf32>
    %c109 = arith.constant 109 : index
    %696 = memref.load %arg6[%c109] : memref<160xf32, #tpu.memory_space<smem>>
    %697 = vector.broadcast %696 : f32 to vector<8x384xf32>
    %698 = arith.mulf %579, %697 : vector<8x384xf32>
    %699 = arith.addf %695, %698 : vector<8x384xf32>
    %c125 = arith.constant 125 : index
    %700 = memref.load %arg6[%c125] : memref<160xf32, #tpu.memory_space<smem>>
    %701 = vector.broadcast %700 : f32 to vector<8x384xf32>
    %702 = arith.mulf %570, %701 : vector<8x384xf32>
    %703 = arith.addf %546, %702 : vector<8x384xf32>
    %c126 = arith.constant 126 : index
    %704 = memref.load %arg6[%c126] : memref<160xf32, #tpu.memory_space<smem>>
    %705 = vector.broadcast %704 : f32 to vector<8x384xf32>
    %706 = arith.mulf %573, %705 : vector<8x384xf32>
    %707 = arith.addf %703, %706 : vector<8x384xf32>
    %c127 = arith.constant 127 : index
    %708 = memref.load %arg6[%c127] : memref<160xf32, #tpu.memory_space<smem>>
    %709 = vector.broadcast %708 : f32 to vector<8x384xf32>
    %710 = arith.mulf %567, %709 : vector<8x384xf32>
    %711 = arith.addf %707, %710 : vector<8x384xf32>
    %c128 = arith.constant 128 : index
    %712 = memref.load %arg6[%c128] : memref<160xf32, #tpu.memory_space<smem>>
    %713 = vector.broadcast %712 : f32 to vector<8x384xf32>
    %714 = arith.mulf %576, %713 : vector<8x384xf32>
    %715 = arith.addf %711, %714 : vector<8x384xf32>
    %c129 = arith.constant 129 : index
    %716 = memref.load %arg6[%c129] : memref<160xf32, #tpu.memory_space<smem>>
    %717 = vector.broadcast %716 : f32 to vector<8x384xf32>
    %718 = arith.mulf %579, %717 : vector<8x384xf32>
    %719 = arith.addf %715, %718 : vector<8x384xf32>
    %c145 = arith.constant 145 : index
    %720 = memref.load %arg6[%c145] : memref<160xf32, #tpu.memory_space<smem>>
    %721 = vector.broadcast %720 : f32 to vector<8x384xf32>
    %722 = arith.mulf %570, %721 : vector<8x384xf32>
    %723 = arith.addf %566, %722 : vector<8x384xf32>
    %c146 = arith.constant 146 : index
    %724 = memref.load %arg6[%c146] : memref<160xf32, #tpu.memory_space<smem>>
    %725 = vector.broadcast %724 : f32 to vector<8x384xf32>
    %726 = arith.mulf %573, %725 : vector<8x384xf32>
    %727 = arith.addf %723, %726 : vector<8x384xf32>
    %c147 = arith.constant 147 : index
    %728 = memref.load %arg6[%c147] : memref<160xf32, #tpu.memory_space<smem>>
    %729 = vector.broadcast %728 : f32 to vector<8x384xf32>
    %730 = arith.mulf %567, %729 : vector<8x384xf32>
    %731 = arith.addf %727, %730 : vector<8x384xf32>
    %c148 = arith.constant 148 : index
    %732 = memref.load %arg6[%c148] : memref<160xf32, #tpu.memory_space<smem>>
    %733 = vector.broadcast %732 : f32 to vector<8x384xf32>
    %734 = arith.mulf %576, %733 : vector<8x384xf32>
    %735 = arith.addf %731, %734 : vector<8x384xf32>
    %c149 = arith.constant 149 : index
    %736 = memref.load %arg6[%c149] : memref<160xf32, #tpu.memory_space<smem>>
    %737 = vector.broadcast %736 : f32 to vector<8x384xf32>
    %738 = arith.mulf %579, %737 : vector<8x384xf32>
    %739 = arith.addf %735, %738 : vector<8x384xf32>
    %740 = vector.extract_strided_slice %385 {offsets = [16, 0], sizes = [8, 384], strides = [1, 1]} : vector<32x384xf32> to vector<8x384xf32>
    %c2_i32_125 = arith.constant 2 : i32
    %741 = tpu.dynamic_rotate %740 by %c2_i32_125 dim 1 : vector<8x384xf32>, i32 -> vector<8x384xf32>
    %cst_126 = arith.constant 0.000000e+00 : f32
    %742 = vector.broadcast %cst_126 : f32 to vector<8x384xf32>
    %743 = arith.select %18, %741, %742 : vector<8x384xi1>, vector<8x384xf32>
    %c1_i32_127 = arith.constant 1 : i32
    %744 = tpu.dynamic_rotate %740 by %c1_i32_127 dim 1 : vector<8x384xf32>, i32 -> vector<8x384xf32>
    %cst_128 = arith.constant 0.000000e+00 : f32
    %745 = vector.broadcast %cst_128 : f32 to vector<8x384xf32>
    %746 = arith.select %20, %744, %745 : vector<8x384xi1>, vector<8x384xf32>
    %c383_i32_129 = arith.constant 383 : i32
    %747 = tpu.dynamic_rotate %740 by %c383_i32_129 dim 1 : vector<8x384xf32>, i32 -> vector<8x384xf32>
    %cst_130 = arith.constant 0.000000e+00 : f32
    %748 = vector.broadcast %cst_130 : f32 to vector<8x384xf32>
    %749 = arith.select %22, %747, %748 : vector<8x384xi1>, vector<8x384xf32>
    %c382_i32_131 = arith.constant 382 : i32
    %750 = tpu.dynamic_rotate %740 by %c382_i32_131 dim 1 : vector<8x384xf32>, i32 -> vector<8x384xf32>
    %cst_132 = arith.constant 0.000000e+00 : f32
    %751 = vector.broadcast %cst_132 : f32 to vector<8x384xf32>
    %752 = arith.select %24, %750, %751 : vector<8x384xi1>, vector<8x384xf32>
    %c10_133 = arith.constant 10 : index
    %753 = memref.load %arg6[%c10_133] : memref<160xf32, #tpu.memory_space<smem>>
    %754 = vector.broadcast %753 : f32 to vector<8x384xf32>
    %755 = arith.mulf %743, %754 : vector<8x384xf32>
    %756 = arith.addf %599, %755 : vector<8x384xf32>
    %c11_134 = arith.constant 11 : index
    %757 = memref.load %arg6[%c11_134] : memref<160xf32, #tpu.memory_space<smem>>
    %758 = vector.broadcast %757 : f32 to vector<8x384xf32>
    %759 = arith.mulf %746, %758 : vector<8x384xf32>
    %760 = arith.addf %756, %759 : vector<8x384xf32>
    %c12_135 = arith.constant 12 : index
    %761 = memref.load %arg6[%c12_135] : memref<160xf32, #tpu.memory_space<smem>>
    %762 = vector.broadcast %761 : f32 to vector<8x384xf32>
    %763 = arith.mulf %740, %762 : vector<8x384xf32>
    %764 = arith.addf %760, %763 : vector<8x384xf32>
    %c13_136 = arith.constant 13 : index
    %765 = memref.load %arg6[%c13_136] : memref<160xf32, #tpu.memory_space<smem>>
    %766 = vector.broadcast %765 : f32 to vector<8x384xf32>
    %767 = arith.mulf %749, %766 : vector<8x384xf32>
    %768 = arith.addf %764, %767 : vector<8x384xf32>
    %c14_137 = arith.constant 14 : index
    %769 = memref.load %arg6[%c14_137] : memref<160xf32, #tpu.memory_space<smem>>
    %770 = vector.broadcast %769 : f32 to vector<8x384xf32>
    %771 = arith.mulf %752, %770 : vector<8x384xf32>
    %772 = arith.addf %768, %771 : vector<8x384xf32>
    %c30_138 = arith.constant 30 : index
    %773 = memref.load %arg6[%c30_138] : memref<160xf32, #tpu.memory_space<smem>>
    %774 = vector.broadcast %773 : f32 to vector<8x384xf32>
    %775 = arith.mulf %743, %774 : vector<8x384xf32>
    %776 = arith.addf %619, %775 : vector<8x384xf32>
    %c31_139 = arith.constant 31 : index
    %777 = memref.load %arg6[%c31_139] : memref<160xf32, #tpu.memory_space<smem>>
    %778 = vector.broadcast %777 : f32 to vector<8x384xf32>
    %779 = arith.mulf %746, %778 : vector<8x384xf32>
    %780 = arith.addf %776, %779 : vector<8x384xf32>
    %c32_140 = arith.constant 32 : index
    %781 = memref.load %arg6[%c32_140] : memref<160xf32, #tpu.memory_space<smem>>
    %782 = vector.broadcast %781 : f32 to vector<8x384xf32>
    %783 = arith.mulf %740, %782 : vector<8x384xf32>
    %784 = arith.addf %780, %783 : vector<8x384xf32>
    %c33_141 = arith.constant 33 : index
    %785 = memref.load %arg6[%c33_141] : memref<160xf32, #tpu.memory_space<smem>>
    %786 = vector.broadcast %785 : f32 to vector<8x384xf32>
    %787 = arith.mulf %749, %786 : vector<8x384xf32>
    %788 = arith.addf %784, %787 : vector<8x384xf32>
    %c34_142 = arith.constant 34 : index
    %789 = memref.load %arg6[%c34_142] : memref<160xf32, #tpu.memory_space<smem>>
    %790 = vector.broadcast %789 : f32 to vector<8x384xf32>
    %791 = arith.mulf %752, %790 : vector<8x384xf32>
    %792 = arith.addf %788, %791 : vector<8x384xf32>
    %c50 = arith.constant 50 : index
    %793 = memref.load %arg6[%c50] : memref<160xf32, #tpu.memory_space<smem>>
    %794 = vector.broadcast %793 : f32 to vector<8x384xf32>
    %795 = arith.mulf %743, %794 : vector<8x384xf32>
    %796 = arith.addf %639, %795 : vector<8x384xf32>
    %c51 = arith.constant 51 : index
    %797 = memref.load %arg6[%c51] : memref<160xf32, #tpu.memory_space<smem>>
    %798 = vector.broadcast %797 : f32 to vector<8x384xf32>
    %799 = arith.mulf %746, %798 : vector<8x384xf32>
    %800 = arith.addf %796, %799 : vector<8x384xf32>
    %c52 = arith.constant 52 : index
    %801 = memref.load %arg6[%c52] : memref<160xf32, #tpu.memory_space<smem>>
    %802 = vector.broadcast %801 : f32 to vector<8x384xf32>
    %803 = arith.mulf %740, %802 : vector<8x384xf32>
    %804 = arith.addf %800, %803 : vector<8x384xf32>
    %c53 = arith.constant 53 : index
    %805 = memref.load %arg6[%c53] : memref<160xf32, #tpu.memory_space<smem>>
    %806 = vector.broadcast %805 : f32 to vector<8x384xf32>
    %807 = arith.mulf %749, %806 : vector<8x384xf32>
    %808 = arith.addf %804, %807 : vector<8x384xf32>
    %c54 = arith.constant 54 : index
    %809 = memref.load %arg6[%c54] : memref<160xf32, #tpu.memory_space<smem>>
    %810 = vector.broadcast %809 : f32 to vector<8x384xf32>
    %811 = arith.mulf %752, %810 : vector<8x384xf32>
    %812 = arith.addf %808, %811 : vector<8x384xf32>
    %c70 = arith.constant 70 : index
    %813 = memref.load %arg6[%c70] : memref<160xf32, #tpu.memory_space<smem>>
    %814 = vector.broadcast %813 : f32 to vector<8x384xf32>
    %815 = arith.mulf %743, %814 : vector<8x384xf32>
    %816 = arith.addf %659, %815 : vector<8x384xf32>
    %c71 = arith.constant 71 : index
    %817 = memref.load %arg6[%c71] : memref<160xf32, #tpu.memory_space<smem>>
    %818 = vector.broadcast %817 : f32 to vector<8x384xf32>
    %819 = arith.mulf %746, %818 : vector<8x384xf32>
    %820 = arith.addf %816, %819 : vector<8x384xf32>
    %c72 = arith.constant 72 : index
    %821 = memref.load %arg6[%c72] : memref<160xf32, #tpu.memory_space<smem>>
    %822 = vector.broadcast %821 : f32 to vector<8x384xf32>
    %823 = arith.mulf %740, %822 : vector<8x384xf32>
    %824 = arith.addf %820, %823 : vector<8x384xf32>
    %c73 = arith.constant 73 : index
    %825 = memref.load %arg6[%c73] : memref<160xf32, #tpu.memory_space<smem>>
    %826 = vector.broadcast %825 : f32 to vector<8x384xf32>
    %827 = arith.mulf %749, %826 : vector<8x384xf32>
    %828 = arith.addf %824, %827 : vector<8x384xf32>
    %c74 = arith.constant 74 : index
    %829 = memref.load %arg6[%c74] : memref<160xf32, #tpu.memory_space<smem>>
    %830 = vector.broadcast %829 : f32 to vector<8x384xf32>
    %831 = arith.mulf %752, %830 : vector<8x384xf32>
    %832 = arith.addf %828, %831 : vector<8x384xf32>
    %c90 = arith.constant 90 : index
    %833 = memref.load %arg6[%c90] : memref<160xf32, #tpu.memory_space<smem>>
    %834 = vector.broadcast %833 : f32 to vector<8x384xf32>
    %835 = arith.mulf %743, %834 : vector<8x384xf32>
    %836 = arith.addf %679, %835 : vector<8x384xf32>
    %c91 = arith.constant 91 : index
    %837 = memref.load %arg6[%c91] : memref<160xf32, #tpu.memory_space<smem>>
    %838 = vector.broadcast %837 : f32 to vector<8x384xf32>
    %839 = arith.mulf %746, %838 : vector<8x384xf32>
    %840 = arith.addf %836, %839 : vector<8x384xf32>
    %c92 = arith.constant 92 : index
    %841 = memref.load %arg6[%c92] : memref<160xf32, #tpu.memory_space<smem>>
    %842 = vector.broadcast %841 : f32 to vector<8x384xf32>
    %843 = arith.mulf %740, %842 : vector<8x384xf32>
    %844 = arith.addf %840, %843 : vector<8x384xf32>
    %c93 = arith.constant 93 : index
    %845 = memref.load %arg6[%c93] : memref<160xf32, #tpu.memory_space<smem>>
    %846 = vector.broadcast %845 : f32 to vector<8x384xf32>
    %847 = arith.mulf %749, %846 : vector<8x384xf32>
    %848 = arith.addf %844, %847 : vector<8x384xf32>
    %c94 = arith.constant 94 : index
    %849 = memref.load %arg6[%c94] : memref<160xf32, #tpu.memory_space<smem>>
    %850 = vector.broadcast %849 : f32 to vector<8x384xf32>
    %851 = arith.mulf %752, %850 : vector<8x384xf32>
    %852 = arith.addf %848, %851 : vector<8x384xf32>
    %c110 = arith.constant 110 : index
    %853 = memref.load %arg6[%c110] : memref<160xf32, #tpu.memory_space<smem>>
    %854 = vector.broadcast %853 : f32 to vector<8x384xf32>
    %855 = arith.mulf %743, %854 : vector<8x384xf32>
    %856 = arith.addf %699, %855 : vector<8x384xf32>
    %c111 = arith.constant 111 : index
    %857 = memref.load %arg6[%c111] : memref<160xf32, #tpu.memory_space<smem>>
    %858 = vector.broadcast %857 : f32 to vector<8x384xf32>
    %859 = arith.mulf %746, %858 : vector<8x384xf32>
    %860 = arith.addf %856, %859 : vector<8x384xf32>
    %c112 = arith.constant 112 : index
    %861 = memref.load %arg6[%c112] : memref<160xf32, #tpu.memory_space<smem>>
    %862 = vector.broadcast %861 : f32 to vector<8x384xf32>
    %863 = arith.mulf %740, %862 : vector<8x384xf32>
    %864 = arith.addf %860, %863 : vector<8x384xf32>
    %c113 = arith.constant 113 : index
    %865 = memref.load %arg6[%c113] : memref<160xf32, #tpu.memory_space<smem>>
    %866 = vector.broadcast %865 : f32 to vector<8x384xf32>
    %867 = arith.mulf %749, %866 : vector<8x384xf32>
    %868 = arith.addf %864, %867 : vector<8x384xf32>
    %c114 = arith.constant 114 : index
    %869 = memref.load %arg6[%c114] : memref<160xf32, #tpu.memory_space<smem>>
    %870 = vector.broadcast %869 : f32 to vector<8x384xf32>
    %871 = arith.mulf %752, %870 : vector<8x384xf32>
    %872 = arith.addf %868, %871 : vector<8x384xf32>
    %c130 = arith.constant 130 : index
    %873 = memref.load %arg6[%c130] : memref<160xf32, #tpu.memory_space<smem>>
    %874 = vector.broadcast %873 : f32 to vector<8x384xf32>
    %875 = arith.mulf %743, %874 : vector<8x384xf32>
    %876 = arith.addf %719, %875 : vector<8x384xf32>
    %c131 = arith.constant 131 : index
    %877 = memref.load %arg6[%c131] : memref<160xf32, #tpu.memory_space<smem>>
    %878 = vector.broadcast %877 : f32 to vector<8x384xf32>
    %879 = arith.mulf %746, %878 : vector<8x384xf32>
    %880 = arith.addf %876, %879 : vector<8x384xf32>
    %c132 = arith.constant 132 : index
    %881 = memref.load %arg6[%c132] : memref<160xf32, #tpu.memory_space<smem>>
    %882 = vector.broadcast %881 : f32 to vector<8x384xf32>
    %883 = arith.mulf %740, %882 : vector<8x384xf32>
    %884 = arith.addf %880, %883 : vector<8x384xf32>
    %c133 = arith.constant 133 : index
    %885 = memref.load %arg6[%c133] : memref<160xf32, #tpu.memory_space<smem>>
    %886 = vector.broadcast %885 : f32 to vector<8x384xf32>
    %887 = arith.mulf %749, %886 : vector<8x384xf32>
    %888 = arith.addf %884, %887 : vector<8x384xf32>
    %c134 = arith.constant 134 : index
    %889 = memref.load %arg6[%c134] : memref<160xf32, #tpu.memory_space<smem>>
    %890 = vector.broadcast %889 : f32 to vector<8x384xf32>
    %891 = arith.mulf %752, %890 : vector<8x384xf32>
    %892 = arith.addf %888, %891 : vector<8x384xf32>
    %c150 = arith.constant 150 : index
    %893 = memref.load %arg6[%c150] : memref<160xf32, #tpu.memory_space<smem>>
    %894 = vector.broadcast %893 : f32 to vector<8x384xf32>
    %895 = arith.mulf %743, %894 : vector<8x384xf32>
    %896 = arith.addf %739, %895 : vector<8x384xf32>
    %c151 = arith.constant 151 : index
    %897 = memref.load %arg6[%c151] : memref<160xf32, #tpu.memory_space<smem>>
    %898 = vector.broadcast %897 : f32 to vector<8x384xf32>
    %899 = arith.mulf %746, %898 : vector<8x384xf32>
    %900 = arith.addf %896, %899 : vector<8x384xf32>
    %c152 = arith.constant 152 : index
    %901 = memref.load %arg6[%c152] : memref<160xf32, #tpu.memory_space<smem>>
    %902 = vector.broadcast %901 : f32 to vector<8x384xf32>
    %903 = arith.mulf %740, %902 : vector<8x384xf32>
    %904 = arith.addf %900, %903 : vector<8x384xf32>
    %c153 = arith.constant 153 : index
    %905 = memref.load %arg6[%c153] : memref<160xf32, #tpu.memory_space<smem>>
    %906 = vector.broadcast %905 : f32 to vector<8x384xf32>
    %907 = arith.mulf %749, %906 : vector<8x384xf32>
    %908 = arith.addf %904, %907 : vector<8x384xf32>
    %c154 = arith.constant 154 : index
    %909 = memref.load %arg6[%c154] : memref<160xf32, #tpu.memory_space<smem>>
    %910 = vector.broadcast %909 : f32 to vector<8x384xf32>
    %911 = arith.mulf %752, %910 : vector<8x384xf32>
    %912 = arith.addf %908, %911 : vector<8x384xf32>
    %913 = vector.extract_strided_slice %385 {offsets = [24, 0], sizes = [8, 384], strides = [1, 1]} : vector<32x384xf32> to vector<8x384xf32>
    %c2_i32_143 = arith.constant 2 : i32
    %914 = tpu.dynamic_rotate %913 by %c2_i32_143 dim 1 : vector<8x384xf32>, i32 -> vector<8x384xf32>
    %cst_144 = arith.constant 0.000000e+00 : f32
    %915 = vector.broadcast %cst_144 : f32 to vector<8x384xf32>
    %916 = arith.select %18, %914, %915 : vector<8x384xi1>, vector<8x384xf32>
    %c1_i32_145 = arith.constant 1 : i32
    %917 = tpu.dynamic_rotate %913 by %c1_i32_145 dim 1 : vector<8x384xf32>, i32 -> vector<8x384xf32>
    %cst_146 = arith.constant 0.000000e+00 : f32
    %918 = vector.broadcast %cst_146 : f32 to vector<8x384xf32>
    %919 = arith.select %20, %917, %918 : vector<8x384xi1>, vector<8x384xf32>
    %c383_i32_147 = arith.constant 383 : i32
    %920 = tpu.dynamic_rotate %913 by %c383_i32_147 dim 1 : vector<8x384xf32>, i32 -> vector<8x384xf32>
    %cst_148 = arith.constant 0.000000e+00 : f32
    %921 = vector.broadcast %cst_148 : f32 to vector<8x384xf32>
    %922 = arith.select %22, %920, %921 : vector<8x384xi1>, vector<8x384xf32>
    %c382_i32_149 = arith.constant 382 : i32
    %923 = tpu.dynamic_rotate %913 by %c382_i32_149 dim 1 : vector<8x384xf32>, i32 -> vector<8x384xf32>
    %cst_150 = arith.constant 0.000000e+00 : f32
    %924 = vector.broadcast %cst_150 : f32 to vector<8x384xf32>
    %925 = arith.select %24, %923, %924 : vector<8x384xi1>, vector<8x384xf32>
    %c15_151 = arith.constant 15 : index
    %926 = memref.load %arg6[%c15_151] : memref<160xf32, #tpu.memory_space<smem>>
    %927 = vector.broadcast %926 : f32 to vector<8x384xf32>
    %928 = arith.mulf %916, %927 : vector<8x384xf32>
    %929 = arith.addf %772, %928 : vector<8x384xf32>
    %c16_152 = arith.constant 16 : index
    %930 = memref.load %arg6[%c16_152] : memref<160xf32, #tpu.memory_space<smem>>
    %931 = vector.broadcast %930 : f32 to vector<8x384xf32>
    %932 = arith.mulf %919, %931 : vector<8x384xf32>
    %933 = arith.addf %929, %932 : vector<8x384xf32>
    %c17_153 = arith.constant 17 : index
    %934 = memref.load %arg6[%c17_153] : memref<160xf32, #tpu.memory_space<smem>>
    %935 = vector.broadcast %934 : f32 to vector<8x384xf32>
    %936 = arith.mulf %913, %935 : vector<8x384xf32>
    %937 = arith.addf %933, %936 : vector<8x384xf32>
    %c18_154 = arith.constant 18 : index
    %938 = memref.load %arg6[%c18_154] : memref<160xf32, #tpu.memory_space<smem>>
    %939 = vector.broadcast %938 : f32 to vector<8x384xf32>
    %940 = arith.mulf %922, %939 : vector<8x384xf32>
    %941 = arith.addf %937, %940 : vector<8x384xf32>
    %c19_155 = arith.constant 19 : index
    %942 = memref.load %arg6[%c19_155] : memref<160xf32, #tpu.memory_space<smem>>
    %943 = vector.broadcast %942 : f32 to vector<8x384xf32>
    %944 = arith.mulf %925, %943 : vector<8x384xf32>
    %945 = arith.addf %941, %944 : vector<8x384xf32>
    %c35_156 = arith.constant 35 : index
    %946 = memref.load %arg6[%c35_156] : memref<160xf32, #tpu.memory_space<smem>>
    %947 = vector.broadcast %946 : f32 to vector<8x384xf32>
    %948 = arith.mulf %916, %947 : vector<8x384xf32>
    %949 = arith.addf %792, %948 : vector<8x384xf32>
    %c36_157 = arith.constant 36 : index
    %950 = memref.load %arg6[%c36_157] : memref<160xf32, #tpu.memory_space<smem>>
    %951 = vector.broadcast %950 : f32 to vector<8x384xf32>
    %952 = arith.mulf %919, %951 : vector<8x384xf32>
    %953 = arith.addf %949, %952 : vector<8x384xf32>
    %c37_158 = arith.constant 37 : index
    %954 = memref.load %arg6[%c37_158] : memref<160xf32, #tpu.memory_space<smem>>
    %955 = vector.broadcast %954 : f32 to vector<8x384xf32>
    %956 = arith.mulf %913, %955 : vector<8x384xf32>
    %957 = arith.addf %953, %956 : vector<8x384xf32>
    %c38_159 = arith.constant 38 : index
    %958 = memref.load %arg6[%c38_159] : memref<160xf32, #tpu.memory_space<smem>>
    %959 = vector.broadcast %958 : f32 to vector<8x384xf32>
    %960 = arith.mulf %922, %959 : vector<8x384xf32>
    %961 = arith.addf %957, %960 : vector<8x384xf32>
    %c39_160 = arith.constant 39 : index
    %962 = memref.load %arg6[%c39_160] : memref<160xf32, #tpu.memory_space<smem>>
    %963 = vector.broadcast %962 : f32 to vector<8x384xf32>
    %964 = arith.mulf %925, %963 : vector<8x384xf32>
    %965 = arith.addf %961, %964 : vector<8x384xf32>
    %c55 = arith.constant 55 : index
    %966 = memref.load %arg6[%c55] : memref<160xf32, #tpu.memory_space<smem>>
    %967 = vector.broadcast %966 : f32 to vector<8x384xf32>
    %968 = arith.mulf %916, %967 : vector<8x384xf32>
    %969 = arith.addf %812, %968 : vector<8x384xf32>
    %c56 = arith.constant 56 : index
    %970 = memref.load %arg6[%c56] : memref<160xf32, #tpu.memory_space<smem>>
    %971 = vector.broadcast %970 : f32 to vector<8x384xf32>
    %972 = arith.mulf %919, %971 : vector<8x384xf32>
    %973 = arith.addf %969, %972 : vector<8x384xf32>
    %c57 = arith.constant 57 : index
    %974 = memref.load %arg6[%c57] : memref<160xf32, #tpu.memory_space<smem>>
    %975 = vector.broadcast %974 : f32 to vector<8x384xf32>
    %976 = arith.mulf %913, %975 : vector<8x384xf32>
    %977 = arith.addf %973, %976 : vector<8x384xf32>
    %c58 = arith.constant 58 : index
    %978 = memref.load %arg6[%c58] : memref<160xf32, #tpu.memory_space<smem>>
    %979 = vector.broadcast %978 : f32 to vector<8x384xf32>
    %980 = arith.mulf %922, %979 : vector<8x384xf32>
    %981 = arith.addf %977, %980 : vector<8x384xf32>
    %c59 = arith.constant 59 : index
    %982 = memref.load %arg6[%c59] : memref<160xf32, #tpu.memory_space<smem>>
    %983 = vector.broadcast %982 : f32 to vector<8x384xf32>
    %984 = arith.mulf %925, %983 : vector<8x384xf32>
    %985 = arith.addf %981, %984 : vector<8x384xf32>
    %c75 = arith.constant 75 : index
    %986 = memref.load %arg6[%c75] : memref<160xf32, #tpu.memory_space<smem>>
    %987 = vector.broadcast %986 : f32 to vector<8x384xf32>
    %988 = arith.mulf %916, %987 : vector<8x384xf32>
    %989 = arith.addf %832, %988 : vector<8x384xf32>
    %c76 = arith.constant 76 : index
    %990 = memref.load %arg6[%c76] : memref<160xf32, #tpu.memory_space<smem>>
    %991 = vector.broadcast %990 : f32 to vector<8x384xf32>
    %992 = arith.mulf %919, %991 : vector<8x384xf32>
    %993 = arith.addf %989, %992 : vector<8x384xf32>
    %c77 = arith.constant 77 : index
    %994 = memref.load %arg6[%c77] : memref<160xf32, #tpu.memory_space<smem>>
    %995 = vector.broadcast %994 : f32 to vector<8x384xf32>
    %996 = arith.mulf %913, %995 : vector<8x384xf32>
    %997 = arith.addf %993, %996 : vector<8x384xf32>
    %c78 = arith.constant 78 : index
    %998 = memref.load %arg6[%c78] : memref<160xf32, #tpu.memory_space<smem>>
    %999 = vector.broadcast %998 : f32 to vector<8x384xf32>
    %1000 = arith.mulf %922, %999 : vector<8x384xf32>
    %1001 = arith.addf %997, %1000 : vector<8x384xf32>
    %c79 = arith.constant 79 : index
    %1002 = memref.load %arg6[%c79] : memref<160xf32, #tpu.memory_space<smem>>
    %1003 = vector.broadcast %1002 : f32 to vector<8x384xf32>
    %1004 = arith.mulf %925, %1003 : vector<8x384xf32>
    %1005 = arith.addf %1001, %1004 : vector<8x384xf32>
    %c95 = arith.constant 95 : index
    %1006 = memref.load %arg6[%c95] : memref<160xf32, #tpu.memory_space<smem>>
    %1007 = vector.broadcast %1006 : f32 to vector<8x384xf32>
    %1008 = arith.mulf %916, %1007 : vector<8x384xf32>
    %1009 = arith.addf %852, %1008 : vector<8x384xf32>
    %c96 = arith.constant 96 : index
    %1010 = memref.load %arg6[%c96] : memref<160xf32, #tpu.memory_space<smem>>
    %1011 = vector.broadcast %1010 : f32 to vector<8x384xf32>
    %1012 = arith.mulf %919, %1011 : vector<8x384xf32>
    %1013 = arith.addf %1009, %1012 : vector<8x384xf32>
    %c97 = arith.constant 97 : index
    %1014 = memref.load %arg6[%c97] : memref<160xf32, #tpu.memory_space<smem>>
    %1015 = vector.broadcast %1014 : f32 to vector<8x384xf32>
    %1016 = arith.mulf %913, %1015 : vector<8x384xf32>
    %1017 = arith.addf %1013, %1016 : vector<8x384xf32>
    %c98 = arith.constant 98 : index
    %1018 = memref.load %arg6[%c98] : memref<160xf32, #tpu.memory_space<smem>>
    %1019 = vector.broadcast %1018 : f32 to vector<8x384xf32>
    %1020 = arith.mulf %922, %1019 : vector<8x384xf32>
    %1021 = arith.addf %1017, %1020 : vector<8x384xf32>
    %c99 = arith.constant 99 : index
    %1022 = memref.load %arg6[%c99] : memref<160xf32, #tpu.memory_space<smem>>
    %1023 = vector.broadcast %1022 : f32 to vector<8x384xf32>
    %1024 = arith.mulf %925, %1023 : vector<8x384xf32>
    %1025 = arith.addf %1021, %1024 : vector<8x384xf32>
    %c115 = arith.constant 115 : index
    %1026 = memref.load %arg6[%c115] : memref<160xf32, #tpu.memory_space<smem>>
    %1027 = vector.broadcast %1026 : f32 to vector<8x384xf32>
    %1028 = arith.mulf %916, %1027 : vector<8x384xf32>
    %1029 = arith.addf %872, %1028 : vector<8x384xf32>
    %c116 = arith.constant 116 : index
    %1030 = memref.load %arg6[%c116] : memref<160xf32, #tpu.memory_space<smem>>
    %1031 = vector.broadcast %1030 : f32 to vector<8x384xf32>
    %1032 = arith.mulf %919, %1031 : vector<8x384xf32>
    %1033 = arith.addf %1029, %1032 : vector<8x384xf32>
    %c117 = arith.constant 117 : index
    %1034 = memref.load %arg6[%c117] : memref<160xf32, #tpu.memory_space<smem>>
    %1035 = vector.broadcast %1034 : f32 to vector<8x384xf32>
    %1036 = arith.mulf %913, %1035 : vector<8x384xf32>
    %1037 = arith.addf %1033, %1036 : vector<8x384xf32>
    %c118 = arith.constant 118 : index
    %1038 = memref.load %arg6[%c118] : memref<160xf32, #tpu.memory_space<smem>>
    %1039 = vector.broadcast %1038 : f32 to vector<8x384xf32>
    %1040 = arith.mulf %922, %1039 : vector<8x384xf32>
    %1041 = arith.addf %1037, %1040 : vector<8x384xf32>
    %c119 = arith.constant 119 : index
    %1042 = memref.load %arg6[%c119] : memref<160xf32, #tpu.memory_space<smem>>
    %1043 = vector.broadcast %1042 : f32 to vector<8x384xf32>
    %1044 = arith.mulf %925, %1043 : vector<8x384xf32>
    %1045 = arith.addf %1041, %1044 : vector<8x384xf32>
    %c135 = arith.constant 135 : index
    %1046 = memref.load %arg6[%c135] : memref<160xf32, #tpu.memory_space<smem>>
    %1047 = vector.broadcast %1046 : f32 to vector<8x384xf32>
    %1048 = arith.mulf %916, %1047 : vector<8x384xf32>
    %1049 = arith.addf %892, %1048 : vector<8x384xf32>
    %c136 = arith.constant 136 : index
    %1050 = memref.load %arg6[%c136] : memref<160xf32, #tpu.memory_space<smem>>
    %1051 = vector.broadcast %1050 : f32 to vector<8x384xf32>
    %1052 = arith.mulf %919, %1051 : vector<8x384xf32>
    %1053 = arith.addf %1049, %1052 : vector<8x384xf32>
    %c137 = arith.constant 137 : index
    %1054 = memref.load %arg6[%c137] : memref<160xf32, #tpu.memory_space<smem>>
    %1055 = vector.broadcast %1054 : f32 to vector<8x384xf32>
    %1056 = arith.mulf %913, %1055 : vector<8x384xf32>
    %1057 = arith.addf %1053, %1056 : vector<8x384xf32>
    %c138 = arith.constant 138 : index
    %1058 = memref.load %arg6[%c138] : memref<160xf32, #tpu.memory_space<smem>>
    %1059 = vector.broadcast %1058 : f32 to vector<8x384xf32>
    %1060 = arith.mulf %922, %1059 : vector<8x384xf32>
    %1061 = arith.addf %1057, %1060 : vector<8x384xf32>
    %c139 = arith.constant 139 : index
    %1062 = memref.load %arg6[%c139] : memref<160xf32, #tpu.memory_space<smem>>
    %1063 = vector.broadcast %1062 : f32 to vector<8x384xf32>
    %1064 = arith.mulf %925, %1063 : vector<8x384xf32>
    %1065 = arith.addf %1061, %1064 : vector<8x384xf32>
    %c155 = arith.constant 155 : index
    %1066 = memref.load %arg6[%c155] : memref<160xf32, #tpu.memory_space<smem>>
    %1067 = vector.broadcast %1066 : f32 to vector<8x384xf32>
    %1068 = arith.mulf %916, %1067 : vector<8x384xf32>
    %1069 = arith.addf %912, %1068 : vector<8x384xf32>
    %c156 = arith.constant 156 : index
    %1070 = memref.load %arg6[%c156] : memref<160xf32, #tpu.memory_space<smem>>
    %1071 = vector.broadcast %1070 : f32 to vector<8x384xf32>
    %1072 = arith.mulf %919, %1071 : vector<8x384xf32>
    %1073 = arith.addf %1069, %1072 : vector<8x384xf32>
    %c157 = arith.constant 157 : index
    %1074 = memref.load %arg6[%c157] : memref<160xf32, #tpu.memory_space<smem>>
    %1075 = vector.broadcast %1074 : f32 to vector<8x384xf32>
    %1076 = arith.mulf %913, %1075 : vector<8x384xf32>
    %1077 = arith.addf %1073, %1076 : vector<8x384xf32>
    %c158 = arith.constant 158 : index
    %1078 = memref.load %arg6[%c158] : memref<160xf32, #tpu.memory_space<smem>>
    %1079 = vector.broadcast %1078 : f32 to vector<8x384xf32>
    %1080 = arith.mulf %922, %1079 : vector<8x384xf32>
    %1081 = arith.addf %1077, %1080 : vector<8x384xf32>
    %c159 = arith.constant 159 : index
    %1082 = memref.load %arg6[%c159] : memref<160xf32, #tpu.memory_space<smem>>
    %1083 = vector.broadcast %1082 : f32 to vector<8x384xf32>
    %1084 = arith.mulf %925, %1083 : vector<8x384xf32>
    %1085 = arith.addf %1081, %1084 : vector<8x384xf32>
    %c0_161 = arith.constant 0 : index
    %1086 = memref.load %arg7[%c0_161] : memref<8xf32, #tpu.memory_space<smem>>
    %1087 = vector.broadcast %1086 : f32 to vector<8x384xf32>
    %1088 = arith.addf %945, %1087 : vector<8x384xf32>
    %c1_162 = arith.constant 1 : index
    %1089 = memref.load %arg7[%c1_162] : memref<8xf32, #tpu.memory_space<smem>>
    %1090 = vector.broadcast %1089 : f32 to vector<8x384xf32>
    %1091 = arith.addf %965, %1090 : vector<8x384xf32>
    %c2_163 = arith.constant 2 : index
    %1092 = memref.load %arg7[%c2_163] : memref<8xf32, #tpu.memory_space<smem>>
    %1093 = vector.broadcast %1092 : f32 to vector<8x384xf32>
    %1094 = arith.addf %985, %1093 : vector<8x384xf32>
    %c3_164 = arith.constant 3 : index
    %1095 = memref.load %arg7[%c3_164] : memref<8xf32, #tpu.memory_space<smem>>
    %1096 = vector.broadcast %1095 : f32 to vector<8x384xf32>
    %1097 = arith.addf %1005, %1096 : vector<8x384xf32>
    %c4_165 = arith.constant 4 : index
    %1098 = memref.load %arg7[%c4_165] : memref<8xf32, #tpu.memory_space<smem>>
    %1099 = vector.broadcast %1098 : f32 to vector<8x384xf32>
    %1100 = arith.addf %1025, %1099 : vector<8x384xf32>
    %c5_166 = arith.constant 5 : index
    %1101 = memref.load %arg7[%c5_166] : memref<8xf32, #tpu.memory_space<smem>>
    %1102 = vector.broadcast %1101 : f32 to vector<8x384xf32>
    %1103 = arith.addf %1045, %1102 : vector<8x384xf32>
    %c6_167 = arith.constant 6 : index
    %1104 = memref.load %arg7[%c6_167] : memref<8xf32, #tpu.memory_space<smem>>
    %1105 = vector.broadcast %1104 : f32 to vector<8x384xf32>
    %1106 = arith.addf %1065, %1105 : vector<8x384xf32>
    %c7_168 = arith.constant 7 : index
    %1107 = memref.load %arg7[%c7_168] : memref<8xf32, #tpu.memory_space<smem>>
    %1108 = vector.broadcast %1107 : f32 to vector<8x384xf32>
    %1109 = arith.addf %1085, %1108 : vector<8x384xf32>
    %1110 = tpu.concatenate %1088, %1091, %1094, %1097, %1100, %1103, %1106, %1109 in 0 : vector<8x384xf32>, vector<8x384xf32>, vector<8x384xf32>, vector<8x384xf32>, vector<8x384xf32>, vector<8x384xf32>, vector<8x384xf32>, vector<8x384xf32> -> vector<64x384xf32>
    %cst_169 = arith.constant 0.000000e+00 : f32
    %1111 = vector.broadcast %cst_169 : f32 to vector<64x384xf32>
    %1112 = arith.cmpf oge, %1110, %1111 : vector<64x384xf32>
    %cst_170 = arith.constant 0.00999999977 : f32
    %1113 = vector.broadcast %cst_170 : f32 to vector<64x384xf32>
    %1114 = arith.mulf %1113, %1110 : vector<64x384xf32>
    %1115 = arith.select %1112, %1110, %1114 : vector<64x384xi1>, vector<64x384xf32>
    %cst_171 = arith.constant dense<0.000000e+00> : vector<64xf32>
    %1116 = vector.multi_reduction <add>, %1115, %cst_171 [1] : vector<64x384xf32> to vector<64xf32>
    %1117 = vector.shape_cast %1116 : vector<64xf32> to vector<64x1xf32>
    %cst_172 = arith.constant 0.00260416674 : f32
    %1118 = vector.broadcast %cst_172 : f32 to vector<64x1xf32>
    %1119 = arith.mulf %1117, %1118 : vector<64x1xf32>
    %1120 = vector.broadcast %1119 : vector<64x1xf32> to vector<64x384xf32>
    %1121 = arith.subf %1115, %1120 : vector<64x384xf32>
    %1122 = arith.mulf %1121, %1121 : vector<64x384xf32>
    %cst_173 = arith.constant dense<0.000000e+00> : vector<64xf32>
    %1123 = vector.multi_reduction <add>, %1122, %cst_173 [1] : vector<64x384xf32> to vector<64xf32>
    %1124 = vector.shape_cast %1123 : vector<64xf32> to vector<64x1xf32>
    %cst_174 = arith.constant 0.00260416674 : f32
    %1125 = vector.broadcast %cst_174 : f32 to vector<64x1xf32>
    %1126 = arith.mulf %1124, %1125 : vector<64x1xf32>
    %cst_175 = arith.constant 9.99999974E-6 : f32
    %1127 = vector.broadcast %cst_175 : f32 to vector<64x1xf32>
    %1128 = arith.addf %1126, %1127 : vector<64x1xf32>
    %1129 = math.rsqrt %1128 : vector<64x1xf32>
    %1130 = vector.broadcast %1129 : vector<64x1xf32> to vector<64x384xf32>
    %1131 = arith.mulf %1121, %1130 : vector<64x384xf32>
    %1132 = vector.extract_strided_slice %1131 {offsets = [0, 0], sizes = [8, 384], strides = [1, 1]} : vector<64x384xf32> to vector<8x384xf32>
    %c0_176 = arith.constant 0 : index
    %c0_177 = arith.constant 0 : index
    %c0_178 = arith.constant 0 : index
    %1133 = vector.load %arg8[%c0_176, %c0_177, %c0_178] : memref<8x8x384xf32, #tpu.memory_space<vmem>>, vector<1x8x384xf32>
    %1134 = vector.shape_cast %1133 : vector<1x8x384xf32> to vector<8x384xf32>
    %1135 = vector.shape_cast %1132 : vector<8x384xf32> to vector<1x8x384xf32>
    tpu.vector_store %arg8[%c0_176, %c0_177, %c0_178], %1135 {strides = array<i32>} : memref<8x8x384xf32, #tpu.memory_space<vmem>>, vector<1x8x384xf32>,
    %1136 = vector.extract_strided_slice %1131 {offsets = [8, 0], sizes = [8, 384], strides = [1, 1]} : vector<64x384xf32> to vector<8x384xf32>
    %c1_179 = arith.constant 1 : index
    %c0_180 = arith.constant 0 : index
    %c0_181 = arith.constant 0 : index
    %1137 = vector.load %arg8[%c1_179, %c0_180, %c0_181] : memref<8x8x384xf32, #tpu.memory_space<vmem>>, vector<1x8x384xf32>
    %1138 = vector.shape_cast %1137 : vector<1x8x384xf32> to vector<8x384xf32>
    %1139 = vector.shape_cast %1136 : vector<8x384xf32> to vector<1x8x384xf32>
    tpu.vector_store %arg8[%c1_179, %c0_180, %c0_181], %1139 {strides = array<i32>} : memref<8x8x384xf32, #tpu.memory_space<vmem>>, vector<1x8x384xf32>,
    %1140 = vector.extract_strided_slice %1131 {offsets = [16, 0], sizes = [8, 384], strides = [1, 1]} : vector<64x384xf32> to vector<8x384xf32>
    %c2_182 = arith.constant 2 : index
    %c0_183 = arith.constant 0 : index
    %c0_184 = arith.constant 0 : index
    %1141 = vector.load %arg8[%c2_182, %c0_183, %c0_184] : memref<8x8x384xf32, #tpu.memory_space<vmem>>, vector<1x8x384xf32>
    %1142 = vector.shape_cast %1141 : vector<1x8x384xf32> to vector<8x384xf32>
    %1143 = vector.shape_cast %1140 : vector<8x384xf32> to vector<1x8x384xf32>
    tpu.vector_store %arg8[%c2_182, %c0_183, %c0_184], %1143 {strides = array<i32>} : memref<8x8x384xf32, #tpu.memory_space<vmem>>, vector<1x8x384xf32>,
    %1144 = vector.extract_strided_slice %1131 {offsets = [24, 0], sizes = [8, 384], strides = [1, 1]} : vector<64x384xf32> to vector<8x384xf32>
    %c3_185 = arith.constant 3 : index
    %c0_186 = arith.constant 0 : index
    %c0_187 = arith.constant 0 : index
    %1145 = vector.load %arg8[%c3_185, %c0_186, %c0_187] : memref<8x8x384xf32, #tpu.memory_space<vmem>>, vector<1x8x384xf32>
    %1146 = vector.shape_cast %1145 : vector<1x8x384xf32> to vector<8x384xf32>
    %1147 = vector.shape_cast %1144 : vector<8x384xf32> to vector<1x8x384xf32>
    tpu.vector_store %arg8[%c3_185, %c0_186, %c0_187], %1147 {strides = array<i32>} : memref<8x8x384xf32, #tpu.memory_space<vmem>>, vector<1x8x384xf32>,
    %1148 = vector.extract_strided_slice %1131 {offsets = [32, 0], sizes = [8, 384], strides = [1, 1]} : vector<64x384xf32> to vector<8x384xf32>
    %c4_188 = arith.constant 4 : index
    %c0_189 = arith.constant 0 : index
    %c0_190 = arith.constant 0 : index
    %1149 = vector.load %arg8[%c4_188, %c0_189, %c0_190] : memref<8x8x384xf32, #tpu.memory_space<vmem>>, vector<1x8x384xf32>
    %1150 = vector.shape_cast %1149 : vector<1x8x384xf32> to vector<8x384xf32>
    %1151 = vector.shape_cast %1148 : vector<8x384xf32> to vector<1x8x384xf32>
    tpu.vector_store %arg8[%c4_188, %c0_189, %c0_190], %1151 {strides = array<i32>} : memref<8x8x384xf32, #tpu.memory_space<vmem>>, vector<1x8x384xf32>,
    %1152 = vector.extract_strided_slice %1131 {offsets = [40, 0], sizes = [8, 384], strides = [1, 1]} : vector<64x384xf32> to vector<8x384xf32>
    %c5_191 = arith.constant 5 : index
    %c0_192 = arith.constant 0 : index
    %c0_193 = arith.constant 0 : index
    %1153 = vector.load %arg8[%c5_191, %c0_192, %c0_193] : memref<8x8x384xf32, #tpu.memory_space<vmem>>, vector<1x8x384xf32>
    %1154 = vector.shape_cast %1153 : vector<1x8x384xf32> to vector<8x384xf32>
    %1155 = vector.shape_cast %1152 : vector<8x384xf32> to vector<1x8x384xf32>
    tpu.vector_store %arg8[%c5_191, %c0_192, %c0_193], %1155 {strides = array<i32>} : memref<8x8x384xf32, #tpu.memory_space<vmem>>, vector<1x8x384xf32>,
    %1156 = vector.extract_strided_slice %1131 {offsets = [48, 0], sizes = [8, 384], strides = [1, 1]} : vector<64x384xf32> to vector<8x384xf32>
    %c6_194 = arith.constant 6 : index
    %c0_195 = arith.constant 0 : index
    %c0_196 = arith.constant 0 : index
    %1157 = vector.load %arg8[%c6_194, %c0_195, %c0_196] : memref<8x8x384xf32, #tpu.memory_space<vmem>>, vector<1x8x384xf32>
    %1158 = vector.shape_cast %1157 : vector<1x8x384xf32> to vector<8x384xf32>
    %1159 = vector.shape_cast %1156 : vector<8x384xf32> to vector<1x8x384xf32>
    tpu.vector_store %arg8[%c6_194, %c0_195, %c0_196], %1159 {strides = array<i32>} : memref<8x8x384xf32, #tpu.memory_space<vmem>>, vector<1x8x384xf32>,
    %1160 = vector.extract_strided_slice %1131 {offsets = [56, 0], sizes = [8, 384], strides = [1, 1]} : vector<64x384xf32> to vector<8x384xf32>
    %c7_197 = arith.constant 7 : index
    %c0_198 = arith.constant 0 : index
    %c0_199 = arith.constant 0 : index
    %1161 = vector.load %arg8[%c7_197, %c0_198, %c0_199] : memref<8x8x384xf32, #tpu.memory_space<vmem>>, vector<1x8x384xf32>
    %1162 = vector.shape_cast %1161 : vector<1x8x384xf32> to vector<8x384xf32>
    %1163 = vector.shape_cast %1160 : vector<8x384xf32> to vector<1x8x384xf32>
    tpu.vector_store %arg8[%c7_197, %c0_198, %c0_199], %1163 {strides = array<i32>} : memref<8x8x384xf32, #tpu.memory_space<vmem>>, vector<1x8x384xf32>,
    return
  }
  func.func @transform_0(%arg0: i32) -> (i32, i32) {
    %c0_i32 = arith.constant 0 : i32
    %c0_i32_0 = arith.constant 0 : i32
    return %arg0, %c0_i32 : i32, i32
  }
  func.func @transform_1(%arg0: i32) -> i32 {
    %c0_i32 = arith.constant 0 : i32
    %c0_i32_0 = arith.constant 0 : i32
    return %c0_i32 : i32
  }
  func.func @transform_2(%arg0: i32) -> i32 {
    %c0_i32 = arith.constant 0 : i32
    %c0_i32_0 = arith.constant 0 : i32
    return %c0_i32 : i32
  }
  func.func @transform_3(%arg0: i32) -> i32 {
    %c0_i32 = arith.constant 0 : i32
    %c0_i32_0 = arith.constant 0 : i32
    return %c0_i32 : i32
  }
  func.func @transform_4(%arg0: i32) -> i32 {
    %c0_i32 = arith.constant 0 : i32
    %c0_i32_0 = arith.constant 0 : i32
    return %c0_i32 : i32
  }
  func.func @transform_5(%arg0: i32) -> i32 {
    %c0_i32 = arith.constant 0 : i32
    %c0_i32_0 = arith.constant 0 : i32
    return %c0_i32 : i32
  }
  func.func @transform_6(%arg0: i32) -> i32 {
    %c0_i32 = arith.constant 0 : i32
    %c0_i32_0 = arith.constant 0 : i32
    return %c0_i32 : i32
  }
  func.func @transform_7(%arg0: i32) -> (i32, i32, i32) {
    %c0_i32 = arith.constant 0 : i32
    %c0_i32_0 = arith.constant 0 : i32
    %c0_i32_1 = arith.constant 0 : i32
    return %c0_i32, %arg0, %c0_i32_0 : i32, i32, i32
  }
}

</mosaic_0001>

<bundles_post_ra>
// kernel: tpu_custom_call.1
= control target key start
LH: loop header
LB: loop body
LE: loop exit
PB: predicated region body
PF: predicated region fallthrough
CT: control target
= control target key end

     0   :  { %s7757_s0 = inlined_call_operand.hbm [shape: f32[16,512], index: 0, kind: input, shape index: {}]   ;;  %s7758_s1 = inlined_call_operand.vmem [shape: f32[20], index: 1, kind: input, shape index: {}]   ;;  %s7759_s2 = inlined_call_operand.vmem [shape: f32[2], index: 2, kind: input, shape index: {}]   ;;  %s7760_s3 = inlined_call_operand.vmem [shape: f32[40], index: 3, kind: input, shape index: {}]   ;;  %s7761_s4 = inlined_call_operand.vmem [shape: f32[4], index: 4, kind: input, shape index: {}]   ;;  %s7762_s5 = inlined_call_operand.vmem [shape: f32[160], index: 5, kind: input, shape index: {}]   ;;  %s7763_s6 = inlined_call_operand.vmem [shape: f32[8], index: 6, kind: input, shape index: {}]   ;;  %s7764_s7 = inlined_call_operand.hbm [shape: f32[8,16,384], index: 7, kind: output, shape index: {}]  }
   0x1   :  { %7881 = sst [smem:[#allocation193_spill]] %s7757_s0 }
   0x2   :  { %7882 = sst [smem:[#allocation194_spill]] %s7758_s1 }
   0x3   :  { %7883 = sst [smem:[#allocation195_spill]] %s7759_s2 }
   0x4   :  { %7884 = sst [smem:[#allocation196_spill]] %s7760_s3 }
   0x5   :  { %7885 = sst [smem:[#allocation197_spill]] %s7761_s4 }
   0x6   :  { %7886 = sst [smem:[#allocation198_spill]] %s7762_s5 }
   0x7   :  { %7887 = sst [smem:[#allocation199_spill]] %s7763_s6 }
   0x8   :  { %7888 = sst [smem:[#allocation200_spill]] %s7764_s7 }
   0x9   :  { %12 = vsyncpa [#allocation3], 0 }
   0xa   :  { %14 = vsyncpa [#allocation3 + $0x1], 0 }
   0xb   :  { %15 = vsyncpa [#allocation5], 0 }
   0xc   :  { %16 = vsyncpa [#allocation8], 0 }
   0xd   :  { %17 = vsyncpa [#allocation11], 0 }
   0xe   :  { %18 = vsyncpa [#allocation14], 0 }
   0xf   :  { %19 = vsyncpa [#allocation4], 0 }
  0x10   :  { %21 = vsyncpa [#allocation4 + $0x1], 0  ;;  %s3900_s24 = smov 0   ;;  %s3902_s25 = smov 0  }
  0x11   :  { %s3904_s26 = smov 0   ;;  %s3906_s27 = smov 0  }
  0x12 LB: > { %7889 = sst [smem:[#allocation22_spill]] %s3831_s24  ;;  %s7893_s2 = sld [smem:[#allocation195_spill]]  ;;  %s3843_s27 = sphi %s3906_s27, %s8391_s27   ;;  %s3839_s26 = sphi %s3904_s26, %s8394_s26   ;;  %s3835_s25 = sphi %s3902_s25, %s8393_s25   ;;  %s3831_s24 = sphi %s3900_s24, %s8392_s24  }
  0x13   : > { %7890 = sst [smem:[#allocation23_spill]] %s3835_s25  ;;  %s3924_s8 = sadd.s32 4294967295, %s3843_s27  }
  0x14   : > { %7891 = sst [smem:[#allocation24_spill]] %s3839_s26  ;;  %p3225_p0 = scmp.ge.s32.totalorder %s3843_s27, 1 }
  0x15   : > { %7892 = sst [smem:[#allocation25_spill]] %s3843_s27  ;;  %p7765_p1 = scmp.eq.s32.totalorder %s3924_s8, 0 }
  0x16   : > { %7894 = sst [smem:[#allocation26_spill]] %s3924_s8  ;;  %p210_p2 = scmp.lt.s32.totalorder %s3843_s27, 3 }
  0x17   : > { %s7896_s4 = sld [smem:[#allocation197_spill]]  ;;  %s7897_s1 = sld [smem:[#allocation194_spill]] }
  0x18   : > { %s234_s30 = sshll.u32 %s7893_s2, 4  ;;  %p3929_p3 = pnand %p3225_p0, %p210_p2  ;;  %s235_s30 = int_to_ptr.vmem [resolvable:$true] %s234_s30 }
  0x19   : > { %s7899_s3 = sld [smem:[#allocation196_spill]]  ;;  %s3641_s20 = scalar_lea.vmem %s235_s30, 16 }
  0x1a   : > { %s7895_s9 = scalar_select %p3929_p3, 1, 0 }
  0x1b   : > { %p3527_p5 = pneg %p3929_p3  ;;  %p3642_p7 = scmp.ne.s32.totalorder %s235_s30, %s3641_s20 }
  0x1c   : > { %p3649_p11 = scmp.lt.s32.totalorder %s235_s30, %s235_s30  ;;  %p3650_p12 = scmp.lt.s32.totalorder %s3641_s20, %s3641_s20 }
  0x1d   : > { %s256_s12 = sshll.u32 %s7896_s4, 4  ;;  %s223_s15 = sshll.u32 %s7897_s1, 4  ;;  %s257_s12 = int_to_ptr.vmem [resolvable:$true] %s256_s12  ;;  %s3948_s15 = int_to_ptr.vmem [resolvable:$true] %s223_s15 }
  0x1e   : > { %p3944_p6 = pnand %p3527_p5, %p7765_p1  ;;  %p3651_p13 = por %p3650_p12, %p3649_p11 }
  0x1f   : > { %s245_s19 = sshll.u32 %s7899_s3, 4  ;;  %s3953_s19 = int_to_ptr.vmem [resolvable:$true] %s245_s19 }
  0x20   : > { %p3957_p8 = pneg %p3944_p6 }
  0x22   : > { %p3644_p9 = pnand %p3957_p8, %p3642_p7 }
  0x24   : > { %p3645_p10 = pneg %p3644_p9 }
  0x26   : > { %p3652_p0 = pnand %p3651_p13, %p3645_p10 }
  0x28   : > { %3655 = shalt.err (!%p3652_p0)
}
  0x29   : > { %s3845_s22 = smov [#allocation7]   ;;  %s3656_s23 = scalar_lea.vmem %s257_s12, 16 }
  0x2a   : > { %3533 = dma.vmem_to_smem (!%p3944_p6), %s235_s30, 16, %s3845_s22, [#allocation8]  }
  0x2b   : > { %p3657_p2 = scmp.ne.s32.totalorder %s257_s12, %s3656_s23  ;;  %p3664_p1 = scmp.lt.s32.totalorder %s257_s12, %s257_s12 }
  0x2c   : > { %p3665_p3 = scmp.lt.s32.totalorder %s3656_s23, %s3656_s23 }
  0x2d   : > { %p3659_p5 = pnand %p3657_p2, %p3957_p8 }
  0x2e   : > { %p3666_p7 = por %p3665_p3, %p3664_p1 }
  0x2f   : > { %p3660_p4 = pneg %p3659_p5 }
  0x31   : > { %p3667_p9 = pnand %p3666_p7, %p3660_p4 }
  0x33   : > { %3670 = shalt.err (!%p3667_p9)
}
  0x34   : > { %s3846_s28 = smov [#allocation10]   ;;  %s3671_s29 = scalar_lea.vmem %s3948_s15, 16 }
  0x35   : > { %3539 = dma.vmem_to_smem (!%p3944_p6), %s257_s12, 16, %s3846_s28, [#allocation11]  }
  0x36   : > { %p3672_p10 = scmp.ne.s32.totalorder %s3948_s15, %s3671_s29  ;;  %p3679_p13 = scmp.lt.s32.totalorder %s3948_s15, %s3948_s15 }
  0x37   : > { %p3680_p0 = scmp.lt.s32.totalorder %s3671_s29, %s3671_s29 }
  0x38   : > { %p3674_p11 = pnand %p3672_p10, %p3957_p8 }
  0x39   : > { %p3681_p2 = por %p3680_p0, %p3679_p13 }
  0x3a   : > { %p3675_p12 = pneg %p3674_p11 }
  0x3c   : > { %p3682_p1 = pnand %p3681_p2, %p3675_p12 }
  0x3e   : > { %3685 = shalt.err (!%p3682_p1)
}
  0x3f   : > { %s3847_s30 = smov [#allocation6]   ;;  %s3686_s10 = scalar_lea.vmem %s3953_s19, 16 }
  0x40   : > { %3530 = dma.vmem_to_smem (!%p3944_p6), %s3948_s15, 16, %s3847_s30, [#allocation5]  }
  0x41   : > { %p3687_p3 = scmp.ne.s32.totalorder %s3953_s19, %s3686_s10  ;;  %p3694_p7 = scmp.lt.s32.totalorder %s3953_s19, %s3953_s19 }
  0x42   : > { %p3695_p9 = scmp.lt.s32.totalorder %s3686_s10, %s3686_s10 }
  0x43   : > { %p3689_p4 = pnand %p3687_p3, %p3957_p8 }
  0x44   : > { %p3696_p10 = por %p3695_p9, %p3694_p7 }
  0x45   : > { %p3690_p5 = pneg %p3689_p4 }
  0x47   : > { %p3697_p11 = pnand %p3696_p10, %p3690_p5 }
  0x49   : > { %3700 = shalt.err (!%p3697_p11)
}
  0x4a   : > { %s3848_s11 = smov [#allocation9]   ;;  %s7901_s5 = sld [smem:[#allocation198_spill]] }
  0x4b   : > { %3536 = dma.vmem_to_smem (!%p3944_p6), %s3953_s19, 16, %s3848_s11, [#allocation8]  }
  0x4c   : > { %s7902_s6 = sld [smem:[#allocation199_spill]] }
  0x50   : > { %s267_s14 = sshll.u32 %s7901_s5, 4  ;;  %s268_s14 = int_to_ptr.vmem [resolvable:$true] %s267_s14 }
  0x51   : > { %s3701_s20 = scalar_lea.vmem %s268_s14, 32  ;;  %p3709_p2 = scmp.lt.s32.totalorder %s268_s14, %s268_s14 }
  0x52   : > { %s278_s18 = sshll.u32 %s7902_s6, 4  ;;  %p3702_p12 = scmp.ne.s32.totalorder %s268_s14, %s3701_s20  ;;  %s279_s18 = int_to_ptr.vmem [resolvable:$true] %s278_s18 }
  0x53   : > { %p3710_p1 = scmp.lt.s32.totalorder %s3701_s20, %s3701_s20 }
  0x54   : > { %p3704_p13 = pnand %p3702_p12, %p3957_p8 }
  0x55   : > { %p3711_p3 = por %p3710_p1, %p3709_p2 }
  0x56   : > { %p3705_p0 = pneg %p3704_p13 }
  0x58   : > { %p3712_p4 = pnand %p3711_p3, %p3705_p0 }
  0x5a   : > { %3715 = shalt.err (!%p3712_p4)
}
  0x5b   : > { %s3849_s19 = smov [#allocation12]   ;;  %s3716_s22 = scalar_lea.vmem %s279_s18, 16 }
  0x5c   : > { %3542 = dma.vmem_to_smem (!%p3944_p6), %s268_s14, 32, %s3849_s19, [#allocation11]  }
  0x5d   : > { %p3717_p5 = scmp.ne.s32.totalorder %s279_s18, %s3716_s22  ;;  %p3724_p10 = scmp.lt.s32.totalorder %s279_s18, %s279_s18 }
  0x5e   : > { %p3725_p11 = scmp.lt.s32.totalorder %s3716_s22, %s3716_s22 }
  0x5f   : > { %p3719_p7 = pnand %p3717_p5, %p3957_p8 }
  0x60   : > { %p3726_p12 = por %p3725_p11, %p3724_p10 }
  0x61   : > { %p3720_p9 = pneg %p3719_p7 }
  0x63   : > { %p3727_p13 = pnand %p3726_p12, %p3720_p9 }
  0x65   : > { %3730 = shalt.err (!%p3727_p13)
}
  0x66   : > { %s3850_s23 = smov [#allocation13]   ;;  %s3224_s21 = sadd.s32 4294967294, %s3843_s27  }
  0x67   : > { %3545 = dma.vmem_to_smem (!%p3944_p6), %s279_s18, 16, %s3850_s23, [#allocation14]  }
  0x68   : > { %s4003_s28 = sadd.s32 1, %s3843_s27   ;;  %s34_s29 = sadd.s32 1, %s3839_s26 }
  0x69   : > { %7903 = sst [smem:[#allocation27_spill]] %s4003_s28  ;;  %s31_s16 = ssub.s32 %s3843_s27, %s4003_s28 }
  0x6a   : > { %p32_p8 = scmp.eq.s32.totalorder %s31_s16, 0  ;;  %p41_p0 = scmp.ne.s32.totalorder %s3839_s26, %s3835_s25 }
  0x6b   : > { %p42_p2 = scmp.eq.s32.totalorder %s3843_s27, 0  ;;  %p47_p1 = scmp.ne.s32.totalorder %s3835_s25, %s3831_s24 }
  0x6c   : > { %s4014_s30 = scalar_select %p32_p8, %s3839_s26, %s34_s29  }
  0x6d   : > { %p4016_p3 = por %p42_p2, %p41_p0  ;;  %p7906_p4 = scmp.eq.s32.totalorder %s3924_s8, 0 }
  0x6e   : > { %7904 = sst [smem:[#allocation28_spill]] %s4014_s30  ;;  %p197_p5 = scmp.eq.s32.totalorder %s3924_s8, 1 }
  0x6f   : > { %p4022_p6 = por %p7906_p4, %p47_p1  ;;  %p203_p7 = scmp.eq.s32.totalorder %s3224_s21, 1 }
  0x70   : > { %p3560_p9 = scmp.lt.s32.totalorder %s3843_s27, 2  ;;  %s289_s12 = sand.u32 1, %s3839_s26  }
  0x71   : > { %p4029_p10 = por %p197_p5, %p41_p0  ;;  %p4033_p11 = por %p203_p7, %p47_p1 }
  0x72   : > { %s3233_s15 = sshll.u32 %s289_s12, 5  ;;  %s3496_s17 = sshll.u32 %s3843_s27, 9 }
  0x73   : > { %s7908_s13 = scalar_select %p4029_p10, 1, 0 }
  0x74   : > { %s7910_s14 = scalar_select %p4033_p11, 1, 0 }
  0x75   : > { %7909 = sst [smem:[#allocation29_spill]] %s7908_s13  ;;  %s7912_s0 = sld [smem:[#allocation193_spill]] }
  0x76   : > { %7911 = sst [smem:[#allocation30_spill]] %s7910_s14  ;;  %s293_s22 = scalar_lea.vmem [#allocation2], %s3233_s15 }
  0x77   : > { %s301_s23 = sshll.u32 %s293_s22, 4  ;;  %p4047_p12 = pnand %p3560_p9, %p4016_p3  ;;  %s4043_s23 = int_to_ptr.vmem [resolvable:$true] %s301_s23 }
  0x78   : > { %s290_s16 = scalar_lea.sflag [#allocation3], %s289_s12 }
  0x79   : > { %p3733_p8 = pneg %p4047_p12 }
  0x7b   : > { %s4041_s19 = scalar_lea.hbm %s7912_s0, %s3496_s17  ;;  %s3736_s18 = scalar_lea.hbm %s7912_s0, 1024 }
  0x7c   : > { %s3731_s29 = scalar_lea.hbm %s4041_s19, 512  ;;  %p3737_p1 = scmp.lt.u32.totalorder %s4041_s19, %s7912_s0 }
  0x7d   : > { %p3732_p13 = scmp.ne.s32.totalorder %s4041_s19, %s3731_s29  ;;  %p3738_p3 = scmp.lt.u32.totalorder %s3736_s18, %s3731_s29 }
  0x7e   : > { %p3740_p5 = scmp.lt.u32.totalorder %s3731_s29, %s4041_s19 }
  0x7f   : > { %p3734_p0 = pnand %p3733_p8, %p3732_p13  ;;  %p3739_p4 = por %p3738_p3, %p3737_p1 }
  0x81   : > { %p3735_p2 = pneg %p3734_p0  ;;  %p3741_p7 = por %p3740_p5, %p3739_p4 }
  0x83   : > { %p3742_p9 = pnand %p3741_p7, %p3735_p2 }
  0x85   : > { %3745 = shalt.err (!%p3742_p9)
}
  0x86   : > { %s3746_s12 = scalar_lea.vmem %s4043_s23, 512  ;;  %s3851_s22 = smov [#allocation2]  }
  0x87   : > { %p3747_p13 = scmp.ne.s32.totalorder %s4043_s23, %s3746_s12  ;;  %s3751_s15 = sshll.u32 %s3851_s22, 4  ;;  %s3752_s15 = int_to_ptr.vmem [resolvable:$false] %s3751_s15 }
  0x88   : > { %s3753_s17 = scalar_lea.vmem %s3752_s15, 1024  ;;  %p3754_p10 = scmp.lt.s32.totalorder %s4043_s23, %s3752_s15 }
  0x89   : > { %p3749_p0 = pnand %p3747_p13, %p3733_p8  ;;  %p3755_p1 = scmp.lt.s32.totalorder %s3753_s17, %s3746_s12 }
  0x8b   : > { %p3750_p11 = pneg %p3749_p0  ;;  %p3756_p3 = por %p3755_p1, %p3754_p10 }
  0x8d   : > { %p3757_p4 = pnand %p3756_p3, %p3750_p11 }
  0x8f   : > { %3760 = shalt.err (!%p3757_p4)
}
  0x90   : > { %3549 = dma.hbm_to_vmem [thread:$0]  (!%p4047_p12), %s4041_s19, 512, %s4043_s23, %s290_s16  }
  0x91   : > { %p7914_p2 = scmp.ne.s32.totalorder %s7895_s9, 0 }
  0x93   : > { %310 = sbr.rel (%p7914_p2) target bundleno = 1893 (0x765), region = 48 }
  0x9a   : > { %s4079_s29 = sand.u32 1, %s3835_s25  }
  0x9b   : > { %7915 = sst [smem:[#allocation31_spill]] %s4079_s29  ;;  %s3237_s18 = sshll.u32 %s4079_s29, 5 }
  0x9c   : > { %s313_s10 = scalar_lea.sflag [#allocation3], %s4079_s29  ;;  %s4083_s20 = scalar_lea.vmem [#allocation2], %s3237_s18 }
  0x9d   : > { %3806 = dma.done.wait (%p4022_p6), %s313_s10, 512  }
  0x9e   : > { %3808 = vsyncadd (%p4022_p6), %s313_s10, 4294966784  ;;  %p7916_p10 = scmp.eq.s32.totalorder %s3924_s8, 0 }
  0xa0   : > { %3810 = dma.done.wait (%p7916_p10), [#allocation5], 16   ;;  %p7917_p11 = pmov %p7916_p10 }
  0xa1   : > { %p7918_p12 = pmov %p7916_p10 }
  0xa2   : > { %3812 = vsyncadd (%p7917_p11), [#allocation5], 4294967280 }
  0xa3   : > { %3814 = dma.done.wait (%p7918_p12), [#allocation8], 32   ;;  %p7919_p8 = pmov %p7916_p10 }
  0xa5   : > { %3816 = vsyncadd (%p7919_p8), [#allocation8], 4294967264  ;;  %p7920_p5 = pmov %p7919_p8 }
  0xa7   : > { %3818 = dma.done.wait (%p7920_p5), [#allocation11], 48   ;;  %p7921_p7 = pmov %p7920_p5 }
  0xa8   : > { %p7922_p6 = pmov %p7920_p5 }
  0xa9   : > { %3820 = vsyncadd (%p7921_p7), [#allocation11], 4294967248 }
  0xaa   : > { %3822 = dma.done.wait (%p7922_p6), [#allocation14], 16   ;;  %p7923_p9 = pmov %p7920_p5 }
  0xac   : > { %3824 = vsyncadd (%p7923_p9), [#allocation14], 4294967280 }
  0xad   : > { %345 = sfence }
  0xae   : > { %v4106_v0 = vld [vmem:[%s4083_s20 + $0x10] sm:$0xff]  ;;  %v4109_v1 = vld [vmem:[%s4083_s20] sm:$0xff]  ;;  %s7774_s9 = smov 2   ;;  %v4116_v2 = vld [vmem:[%s4083_s20 + $0x8] sm:$0xff]  ;;  %s7772_s11 = smov 1   ;;  %v372_v4 = vlaneseq }
  0xaf   : > { %432 = vrot.lane.b32.xlu1 %v4106_v0, %s7774_s9  ;;  %428 = vrot.lane.b32.xlu0 %v4109_v1, %s7774_s9  ;;  %s7770_s19 = smov 127   ;;  %s7768_s23 = smov 126   ;;  %v4139_v3 = vld [vmem:[%s4083_s20 + $0x18] sm:$0xff] }
  0xb0   : > { %v4149_v5 = vand.u32 127, %v372_v4  ;;  %s508_s21 = sld [smem:[#allocation6]]  ;;  %s3253_s16 = sld [smem:[#allocation6 + $0xa]] }
  0xb1   : > { %s3248_s12 = sld [smem:[#allocation6 + $0x5]]  ;;  %s3258_s22 = sld [smem:[#allocation6 + $0xf]] }
  0xb2   : > { %s3244_s15 = sld [smem:[#allocation6 + $0x1]]  ;;  %v374_v6 = vadd.s32 128, %v4149_v5  ;;  %s4152_s17 = sld [smem:[#allocation6 + $0xb]]  ;;  %v375_v7 = vadd.s32 256, %v4149_v5  ;;  %vm412_vm0 = vcmp.ge.s32.totalorder %v4149_v5, 2  ;;  %vm434_vm1 = vcmp.lt.s32.totalorder %v4149_v5, 2 }
  0xb3   : > { %441 = vrot.lane.b32.xlu1 %v4109_v1, %s7772_s11  ;;  %430 = vrot.lane.b32.xlu0 %v4116_v2, %s7774_s9  ;;  %s3245_s18 = sld [smem:[#allocation6 + $0x2]]  ;;  %s4155_s10 = sld [smem:[#allocation6 + $0x6]]  ;;  %vm447_vm2 = vcmp.lt.s32.totalorder %v4149_v5, 1  ;;  %vm415_vm5 = vcmp.ge.s32.totalorder %v4149_v5, 1  ;;  %vm418_vm8 = vcmp.lt.s32.totalorder %v4149_v5, 127  ;;  %vm7778_vm11 = vcmp.lt.s32.totalorder %v4149_v5, 126 }
  0xb4   : > { %s3255_s20 = sld [smem:[#allocation6 + $0xc]]  ;;  %v4165_v8 = vand.u32 127, %v374_v6  ;;  %s4167_s0 = sld [smem:[#allocation6 + $0x12]]  ;;  %v4171_v9 = vand.u32 127, %v375_v7 }
  0xb5   : > { %s4169_s1 = sld [smem:[#allocation6 + $0x4]]  ;;  %s4173_s2 = sld [smem:[#allocation6 + $0x7]] }
  0xb6   : > { %7924 = vst [vmem:[#allocation32_spill] sm:$0xff] %v4165_v8  ;;  %s4175_s3 = sld [smem:[#allocation6 + $0x11]]  ;;  %s4177_s4 = sld [smem:[#allocation6 + $0xe]]  ;;  %v4181_v10 = vstv %s508_s21  ;;  %v4183_v11 = vstv %s3253_s16  ;;  %vm413_vm3 = vcmp.ge.s32.totalorder %v4165_v8, 2  ;;  %vm414_vm4 = vcmp.ge.s32.totalorder %v4171_v9, 2 }
  0xb7   : > { %445 = vrot.lane.b32.xlu1 %v4106_v0, %s7772_s11  ;;  %443 = vrot.lane.b32.xlu0 %v4116_v2, %s7772_s11  ;;  %s4179_s5 = sld [smem:[#allocation6 + $0x9]]  ;;  %s4187_s6 = sld [smem:[#allocation6 + $0x13]]  ;;  %v4190_v12 = vstv %s3248_s12  ;;  %v4192_v13 = vstv %s3258_s22  ;;  %vm416_vm6 = vcmp.ge.s32.totalorder %v4165_v8, 1  ;;  %vm417_vm7 = vcmp.ge.s32.totalorder %v4171_v9, 1 }
  0xb8   : > { %v4196_v15 = vstv %s3244_s15  ;;  %s4200_s21 = sld [smem:[#allocation7 + $0x1]]  ;;  %v602_v19 = vstv %s4152_s17  ;;  %s4212_s16 = sld [smem:[#allocation7]]  ;;  %vm7779_vm9 = vcmp.lt.s32.totalorder %v4165_v8, 127  ;;  %vm420_vm10 = vcmp.lt.s32.totalorder %v4171_v9, 127 }
  0xb9   : > { %v525_v14 = vstv %s3245_s18  ;;  %v4206_v20 = vstv %s4155_s10  ;;  %vm7776_vm12 = vcmp.lt.s32.totalorder %v4171_v9, 126  ;;  %vm7777_vm13 = vcmp.lt.s32.totalorder %v4165_v8, 126  ;;  %s786_s12 = sld [smem:[#allocation9]]  ;;  %s3300_s22 = sld [smem:[#allocation9 + $0x25]] }
  0xba   : > { %v610_v16 = vstv %s3255_s20  ;;  %v4221_v24 = vmul.f32 %v525_v14, %v4109_v1  ;;  %v4224_v25 = vmul.f32 %v525_v14, %v4116_v2  ;;  %v4233_v28 = vmul.f32 %v525_v14, %v4106_v0  ;;  %s3268_s15 = sld [smem:[#allocation9 + $0xa]]  ;;  %s3273_s17 = sld [smem:[#allocation9 + $0x14]] }
  0xbb   : > { %456 = vrot.lane.b32.xlu1 %v4116_v2, %s7770_s19  ;;  %454 = vrot.lane.b32.xlu0 %v4109_v1, %s7770_s19  ;;  %v4230_v27 = vmul.f32 %v610_v16, %v4109_v1  ;;  %v4240_v30 = vmul.f32 %v610_v16, %v4116_v2  ;;  %v4243_v31 = vmul.f32 %v610_v16, %v4106_v0  ;;  %v565_v32 = vstv %s4173_s2  ;;  %s7927_s2 = smov 127   ;;  %s3278_s18 = sld [smem:[#allocation9 + $0x1e]] }
  0xbc   : > { %v650_v33 = vstv %s4175_s3  ;;  %v4250_v36 = vstv %s4167_s0  ;;  %v4253_v37 = vstv %s4169_s1  ;;  %v4256_v38 = vstv %s4177_s4  ;;  %s7925_s0 = smov 2   ;;  %s7926_s1 = smov 1  }
  0xbd   : > { %v4259_v39 = vstv %s4179_s5  ;;  %v4271_v43 = vstv %s4187_s6  ;;  %v4274_v44 = vmul.f32 %v565_v32, %v4116_v2  ;;  %v4277_v45 = vmul.f32 %v650_v33, %v4116_v2  ;;  %s7928_s3 = smov 126   ;;  %s3265_s4 = sld [smem:[#allocation9 + $0x2]] }
  0xbe   : > { %v4280_v46 = vmul.f32 %v565_v32, %v4106_v0  ;;  %v4283_v47 = vmul.f32 %v650_v33, %v4106_v0  ;;  %v4290_v49 = vmul.f32 %v565_v32, %v4139_v3  ;;  %v4293_v50 = vmul.f32 %v650_v33, %v4139_v3  ;;  %s3270_s5 = sld [smem:[#allocation9 + $0xc]]  ;;  %s3275_s6 = sld [smem:[#allocation9 + $0x16]] }
  0xbf   : > { %467 = vrot.lane.b32.xlu1 %v4109_v1, %s7768_s23  ;;  %458 = vrot.lane.b32.xlu0 %v4106_v0, %s7770_s19  ;;  %v4296_v51 = vstv %s4200_s21  ;;  %v4307_v57 = vstv %s4212_s16  ;;  %s3264_s10 = sld [smem:[#allocation9 + $0x1]]  ;;  %s3269_s20 = sld [smem:[#allocation9 + $0xb]] }
  0xc0   : > { %s3274_s21 = sld [smem:[#allocation9 + $0x15]]  ;;  %s3279_s16 = sld [smem:[#allocation9 + $0x1f]] }
  0xc1   : > { %s4545_s30 = sld [smem:[#allocation9 + $0x3]]  ;;  %s4547_s26 = sld [smem:[#allocation9 + $0xd]] }
  0xc2   : > { %s4549_s25 = sld [smem:[#allocation9 + $0x17]]  ;;  %s4551_s28 = sld [smem:[#allocation9 + $0x21]] }
  0xc3   : > { %471 = vrot.lane.b32.xlu1 %v4106_v0, %s7768_s23  ;;  %469 = vrot.lane.b32.xlu0 %v4116_v2, %s7768_s23  ;;  %s4553_s27 = sld [smem:[#allocation9 + $0x4]]  ;;  %s4555_s14 = sld [smem:[#allocation9 + $0xe]] }
  0xc4   : > { %s4557_s24 = sld [smem:[#allocation9 + $0x18]]  ;;  %s4559_s7 = sld [smem:[#allocation9 + $0x22]] }
  0xc5   : > { %s4561_s13 = sld [smem:[#allocation9 + $0x5]]  ;;  %s4563_s8 = sld [smem:[#allocation9 + $0xf]] }
  0xc6   : > { %s5188_s29 = sld [smem:[#allocation12 + $0x28]] }
  0xc7   : > { %487 = vrot.lane.b32.xlu1 %v4139_v3, %s7772_s11  ;;  %480 = vrot.lane.b32.xlu0 %v4139_v3, %s7774_s9  ;;  %s4161_s11 = sld [smem:[#allocation6 + $0xd]]  ;;  %s4163_s9 = sld [smem:[#allocation6 + $0x8]] }
  0xcb   : > { %501 = vrot.lane.b32.xlu1 %v4139_v3, %s7768_s23  ;;  %494 = vrot.lane.b32.xlu0 %v4139_v3, %s7770_s19  ;;  %s4157_s23 = sld [smem:[#allocation6 + $0x10]]  ;;  %s4159_s19 = sld [smem:[#allocation6 + $0x3]] }
  0xcd   : > { %v4218_v23 = vstv %s4161_s11  ;;  %v4236_v29 = vstv %s4163_s9  ;;  %s3280_s9 = sld [smem:[#allocation9 + $0x20]]  ;;  %s3285_s11 = sld [smem:[#allocation9 + $0x7]] }
  0xd1   : > { %v4209_v21 = vstv %s4157_s23  ;;  %v4215_v22 = vstv %s4159_s19  ;;  %s3290_s19 = sld [smem:[#allocation9 + $0x11]]  ;;  %s3295_s23 = sld [smem:[#allocation9 + $0x1b]] }
 0x121   : > { %v4202_v17 = vpop.permute.xlu1 %432  ;;  %v429_v18 = vpop.permute.xlu0 %428 }
 0x122   : > { %v437_v26 = vsel %vm434_vm1, %v4202_v17, %v429_v18 }
 0x123   : > { %v438_v40 = vsel %vm412_vm0, %v437_v26, 0.0 }
 0x124   : > { %v510_v52 = vmul.f32 %v4181_v10, %v438_v40  ;;  %v595_v53 = vmul.f32 %v4183_v11, %v438_v40 }
 0x125   : > { %v442_v34 = vpop.permute.xlu1 %441  ;;  %v4247_v35 = vpop.permute.xlu0 %430 }
 0x126   : > { %v435_v41 = vsel %vm434_vm1, %v4247_v35, %v4202_v17  ;;  %v436_v42 = vsel %vm434_vm1, %v429_v18, %v4247_v35 }
 0x127   : > { %v439_v48 = vsel %vm413_vm3, %v436_v42, 0.0  ;;  %v440_v54 = vsel %vm414_vm4, %v435_v41, 0.0  ;;  %v485_v58 = vsel %vm413_vm3, %v435_v41, 0.0 }
 0x128   : > { %v511_v62 = vmul.f32 %v4181_v10, %v439_v48  ;;  %v512_v7 = vmul.f32 %v4181_v10, %v440_v54  ;;  %v4340_v33 = vmul.f32 %v4190_v12, %v485_v58  ;;  %v597_v41 = vmul.f32 %v4183_v11, %v440_v54 }
 0x129   : > { %v4302_v55 = vpop.permute.xlu1 %445  ;;  %v4304_v56 = vpop.permute.xlu0 %443 }
 0x12a   : > { %v450_v59 = vsel %vm447_vm2, %v4302_v55, %v442_v34  ;;  %v448_v60 = vsel %vm447_vm2, %v4304_v56, %v4302_v55  ;;  %v449_v61 = vsel %vm447_vm2, %v442_v34, %v4304_v56  ;;  %v596_v34 = vmul.f32 %v4183_v11, %v439_v48 }
 0x12b   : > { %v451_v63 = vsel %vm415_vm5, %v450_v59, 0.0  ;;  %v452_v0 = vsel %vm416_vm6, %v449_v61, 0.0  ;;  %v453_v1 = vsel %vm417_vm7, %v448_v60, 0.0  ;;  %v492_v14 = vsel %vm416_vm6, %v448_v60, 0.0 }
 0x12c   : > { %v518_v2 = vmul.f32 %v4196_v15, %v451_v63  ;;  %v603_v3 = vmul.f32 %v602_v19, %v451_v63  ;;  %v519_v4 = vmul.f32 %v4196_v15, %v452_v0  ;;  %v520_v6 = vmul.f32 %v4196_v15, %v453_v1 }
 0x12d   : > { %v604_v16 = vmul.f32 %v602_v19, %v452_v0  ;;  %v605_v18 = vmul.f32 %v602_v19, %v453_v1  ;;  %v4336_v26 = vpop.permute.xlu1 %456  ;;  %v455_v32 = vpop.permute.xlu0 %454  ;;  %v4348_v59 = vmul.f32 %v4192_v13, %v485_v58  ;;  %v4351_v60 = vmul.f32 %v4206_v20, %v492_v14 }
 0x12e   : > { %v521_v15 = vadd.f32 %v518_v2, %v510_v52  ;;  %v606_v40 = vadd.f32 %v603_v3, %v595_v53  ;;  %v522_v10 = vadd.f32 %v519_v4, %v511_v62  ;;  %v523_v42 = vadd.f32 %v520_v6, %v512_v7 }
 0x12f   : > { %v462_v19 = vsel %vm418_vm8, %v455_v32, %v4336_v26  ;;  %v4354_v61 = vmul.f32 %v4209_v21, %v492_v14  ;;  %v607_v52 = vadd.f32 %v604_v16, %v596_v34  ;;  %v608_v11 = vadd.f32 %v605_v18, %v597_v41 }
 0x130   : > { %v464_v48 = vsel %vm418_vm8, %v462_v19, 0.0  ;;  %v529_v53 = vadd.f32 %v4221_v24, %v521_v15  ;;  %v614_v58 = vadd.f32 %v4230_v27, %v606_v40  ;;  %v530_v4 = vadd.f32 %v4224_v25, %v522_v10 }
 0x131   : > { %v534_v54 = vmul.f32 %v4215_v22, %v464_v48  ;;  %v468_v62 = vpop.permute.xlu1 %467  ;;  %v4360_v63 = vpop.permute.xlu0 %458  ;;  %v619_v0 = vmul.f32 %v4218_v23, %v464_v48  ;;  %v531_v27 = vadd.f32 %v4233_v28, %v523_v42  ;;  %v616_v34 = vadd.f32 %v4243_v31, %v608_v11 }
 0x132   : > { %v461_v1 = vsel %vm418_vm8, %v4336_v26, %v4360_v63  ;;  %v463_v2 = vsel %vm418_vm8, %v4360_v63, %v455_v32  ;;  %v615_v32 = vadd.f32 %v4240_v30, %v607_v52 }
 0x133   : > { %v465_v24 = vsel %vm7779_vm9, %v461_v1, 0.0  ;;  %v466_v3 = vsel %vm420_vm10, %v463_v2, 0.0  ;;  %v498_v6 = vsel %vm418_vm8, %v461_v1, 0.0  ;;  %v537_v18 = vadd.f32 %v534_v54, %v529_v53 }
 0x134   : > { %v535_v7 = vmul.f32 %v4215_v22, %v465_v24  ;;  %v536_v14 = vmul.f32 %v4215_v22, %v466_v3  ;;  %v620_v16 = vmul.f32 %v4218_v23, %v465_v24  ;;  %v621_v15 = vmul.f32 %v4218_v23, %v466_v3 }
 0x135   : > { %v472_v40 = vpop.permute.xlu1 %471  ;;  %v470_v25 = vpop.permute.xlu0 %469  ;;  %v622_v41 = vadd.f32 %v619_v0, %v614_v58  ;;  %v4386_v28 = vmul.f32 %v4236_v29, %v498_v6  ;;  %v4389_v10 = vmul.f32 %v4250_v36, %v498_v6 }
 0x136   : > { %v476_v22 = vsel %vm7778_vm11, %v472_v40, %v468_v62  ;;  %v538_v42 = vadd.f32 %v535_v7, %v530_v4  ;;  %v474_v31 = vsel %vm7778_vm11, %v470_v25, %v472_v40  ;;  %v475_v23 = vsel %vm7778_vm11, %v468_v62, %v470_v25 }
 0x137   : > { %v479_v30 = vsel %vm7776_vm12, %v476_v22, 0.0  ;;  %v539_v19 = vadd.f32 %v536_v14, %v531_v27  ;;  %v623_v48 = vadd.f32 %v620_v16, %v615_v32  ;;  %v477_v52 = vsel %vm7778_vm11, %v475_v23, 0.0 }
 0x138   : > { %v478_v11 = vsel %vm7777_vm13, %v474_v31, 0.0  ;;  %v624_v53 = vadd.f32 %v621_v15, %v616_v34  ;;  %v544_v54 = vmul.f32 %v4253_v37, %v479_v30  ;;  %v505_v58 = vsel %vm7778_vm11, %v474_v31, 0.0 }
 0x139   : > { %v543_v0 = vmul.f32 %v4253_v37, %v478_v11  ;;  %v488_v1 = vpop.permute.xlu1 %487  ;;  %v481_v2 = vpop.permute.xlu0 %480  ;;  %v542_v62 = vmul.f32 %v4253_v37, %v477_v52  ;;  %v627_v24 = vmul.f32 %v4256_v38, %v477_v52  ;;  %v628_v3 = vmul.f32 %v4256_v38, %v478_v11 }
 0x13a   : > { %v489_v4 = vsel %vm447_vm2, %v4302_v55, %v488_v1  ;;  %v490_v6 = vsel %vm447_vm2, %v488_v1, %v4304_v56  ;;  %v482_v37 = vsel %vm434_vm1, %v4202_v17, %v481_v2  ;;  %v629_v14 = vmul.f32 %v4256_v38, %v479_v30 }
 0x13b   : > { %v546_v27 = vadd.f32 %v543_v0, %v538_v42  ;;  %v493_v7 = vsel %vm417_vm7, %v489_v4, 0.0  ;;  %v582_v16 = vmul.f32 %v4259_v39, %v505_v58  ;;  %v667_v32 = vmul.f32 %v4271_v43, %v505_v58 }
 0x13c   : > { %v491_v55 = vsel %vm415_vm5, %v490_v6, 0.0  ;;  %v631_v15 = vadd.f32 %v628_v3, %v623_v48  ;;  %v560_v56 = vmul.f32 %v4206_v20, %v493_v7  ;;  %v483_v22 = vsel %vm434_vm1, %v481_v2, %v4247_v35 }
 0x13d   : > { %v554_v34 = vadd.f32 %v4340_v33, %v546_v27  ;;  %v502_v42 = vpop.permute.xlu1 %501  ;;  %v558_v17 = vmul.f32 %v4206_v20, %v491_v55  ;;  %v484_v38 = vsel %vm412_vm0, %v483_v22, 0.0  ;;  %v486_v30 = vsel %vm414_vm4, %v482_v37, 0.0 }
 0x13e   : > { %v545_v31 = vadd.f32 %v542_v62, %v537_v18  ;;  %v547_v23 = vadd.f32 %v544_v54, %v539_v19  ;;  %v550_v33 = vmul.f32 %v4190_v12, %v484_v38  ;;  %v552_v48 = vmul.f32 %v4190_v12, %v486_v30  ;;  %v495_v19 = vpop.permute.xlu0 %494 }
 0x13f   : > { %v630_v52 = vadd.f32 %v627_v24, %v622_v41  ;;  %v632_v11 = vadd.f32 %v629_v14, %v624_v53  ;;  %v635_v58 = vmul.f32 %v4192_v13, %v484_v38  ;;  %v637_v35 = vmul.f32 %v4192_v13, %v486_v30 }
 0x140   : > { %v503_v20 = vsel %vm7778_vm11, %v472_v40, %v502_v42  ;;  %v553_v0 = vadd.f32 %v550_v33, %v545_v31  ;;  %v555_v1 = vadd.f32 %v552_v48, %v547_v23  ;;  %v504_v2 = vsel %vm7778_vm11, %v502_v42, %v470_v25 }
 0x141   : > { %v506_v18 = vsel %vm7777_vm13, %v503_v20, 0.0  ;;  %v643_v12 = vmul.f32 %v4209_v21, %v491_v55  ;;  %v645_v41 = vmul.f32 %v4209_v21, %v493_v7  ;;  %v638_v53 = vadd.f32 %v635_v58, %v630_v52 }
 0x142   : > { %v640_v54 = vadd.f32 %v637_v35, %v632_v11  ;;  %v639_v13 = vadd.f32 %v4348_v59, %v631_v15  ;;  %v561_v62 = vadd.f32 %v558_v17, %v553_v0  ;;  %v563_v24 = vadd.f32 %v560_v56, %v555_v1 }
 0x143   : > { %v507_v40 = vsel %vm7776_vm12, %v504_v2, 0.0  ;;  %v646_v3 = vadd.f32 %v643_v12, %v638_v53  ;;  %v583_v25 = vmul.f32 %v4259_v39, %v506_v18  ;;  %v496_v27 = vsel %vm418_vm8, %v4360_v63, %v495_v19 }
 0x144   : > { %v648_v4 = vadd.f32 %v645_v41, %v640_v54  ;;  %v569_v6 = vadd.f32 %v4274_v44, %v561_v62  ;;  %v497_v21 = vsel %vm418_vm8, %v495_v19, %v4336_v26  ;;  %v499_v59 = vsel %vm7779_vm9, %v496_v27, 0.0 }
 0x145   : > { %v562_v7 = vadd.f32 %v4351_v60, %v554_v34  ;;  %v654_v37 = vadd.f32 %v4277_v45, %v646_v3  ;;  %v500_v14 = vsel %vm420_vm10, %v497_v21, 0.0  ;;  %v571_v55 = vadd.f32 %v4290_v49, %v563_v24 }
 0x146   : > { %v575_v63 = vmul.f32 %v4236_v29, %v499_v59  ;;  %v576_v15 = vmul.f32 %v4236_v29, %v500_v14  ;;  %v647_v26 = vadd.f32 %v4354_v61, %v639_v13  ;;  %v656_v56 = vadd.f32 %v4293_v50, %v648_v4 }
 0x147   : > { %v570_v44 = vadd.f32 %v4280_v46, %v562_v7  ;;  %v660_v22 = vmul.f32 %v4250_v36, %v499_v59  ;;  %v661_v60 = vmul.f32 %v4250_v36, %v500_v14  ;;  %v662_v45 = vadd.f32 %v4389_v10, %v654_v37 }
 0x148   : > { %v577_v34 = vadd.f32 %v4386_v28, %v569_v6  ;;  %v584_v49 = vmul.f32 %v4259_v39, %v507_v40  ;;  %v579_v17 = vadd.f32 %v576_v15, %v571_v55  ;;  %v655_v46 = vadd.f32 %v4283_v47, %v647_v26 }
 0x149   : > { %v578_v42 = vadd.f32 %v575_v63, %v570_v44  ;;  %v669_v29 = vmul.f32 %v4271_v43, %v507_v40  ;;  %v664_v38 = vadd.f32 %v661_v60, %v656_v56  ;;  %v670_v61 = vadd.f32 %v667_v32, %v662_v45 }
 0x14a   : > { %v585_v30 = vadd.f32 %v582_v16, %v577_v34  ;;  %v668_v50 = vmul.f32 %v4271_v43, %v506_v18  ;;  %v663_v23 = vadd.f32 %v660_v22, %v655_v46  ;;  %v587_v36 = vadd.f32 %v584_v49, %v579_v17 }
 0x14b   : > { %v586_v31 = vadd.f32 %v583_v25, %v578_v42  ;;  %v672_v33 = vadd.f32 %v669_v29, %v664_v38  ;;  %v675_v10 = vadd.f32 %v4296_v51, %v670_v61 }
 0x14c   : > { %v590_v28 = vadd.f32 %v4307_v57, %v585_v30  ;;  %v671_v39 = vadd.f32 %v668_v50, %v663_v23  ;;  %v592_v47 = vadd.f32 %v4307_v57, %v587_v36  ;;  %v843_v23 = vstv %s3270_s5  ;;  %s4573_s5 = sld [smem:[#allocation9 + $0x23]] }
 0x14d   : > { %v591_v48 = vadd.f32 %v4307_v57, %v586_v31  ;;  %v677_v52 = vadd.f32 %v4296_v51, %v672_v33  ;;  %vm681_vm14 = vcmp.ge.f32.partialorder %v675_v10, 0.0  ;;  %v687_v32 = vmul.f32 0.01, %v675_v10 }
 0x14e   : > { %vm678_vm15 = vcmp.ge.f32.partialorder %v590_v28, 0.0  ;;  %v676_v43 = vadd.f32 %v4296_v51, %v671_v39  ;;  %v684_v16 = vmul.f32 0.01, %v590_v28  ;;  %vm680_vm13 = vcmp.ge.f32.partialorder %v592_v47, 0.0 }
 0x14f   : > { %vm679_vm12 = vcmp.ge.f32.partialorder %v591_v48, 0.0  ;;  %v689_v11 = vmul.f32 0.01, %v677_v52  ;;  %v693_v58 = vsel %vm681_vm14, %v675_v10, %v687_v32  ;;  %v685_v35 = vmul.f32 0.01, %v591_v48 }
 0x150   : > { %vm682_vm11 = vcmp.ge.f32.partialorder %v676_v43, 0.0  ;;  %v688_v20 = vmul.f32 0.01, %v676_v43  ;;  %v686_v0 = vmul.f32 0.01, %v592_v47  ;;  %v690_v1 = vsel %vm678_vm15, %v590_v28, %v684_v16 }
 0x151   : > { %vm683_vm9 = vcmp.ge.f32.partialorder %v677_v52, 0.0  ;;  %v691_v2 = vsel %vm679_vm12, %v591_v48, %v685_v35  ;;  %v803_v31 = vstv %s3265_s4  ;;  %v883_v36 = vstv %s3275_s6  ;;  %s4571_s4 = sld [smem:[#allocation9 + $0x19]]  ;;  %s4583_s6 = sld [smem:[#allocation9 + $0x6]] }
 0x152   : > { %v694_v57 = vsel %vm682_vm11, %v676_v43, %v688_v20  ;;  %v696_v18 = vadd.f32 %v691_v2, %v690_v1  ;;  %v692_v12 = vsel %vm680_vm13, %v592_v47, %v686_v0  ;;  %v695_v41 = vsel %vm683_vm9, %v677_v52, %v689_v11 }
 0x153   : > { %v700_v19 = vadd.f32 %v694_v57, %v693_v58  ;;  %v923_v33 = vstv %s3280_s9  ;;  %v1011_v10 = vstv %s3285_s11  ;;  %v1051_v28 = vstv %s3290_s19  ;;  %s4585_s9 = sld [smem:[#allocation9 + $0x10]]  ;;  %s4598_s11 = sld [smem:[#allocation9 + $0x1a]] }
 0x154   : > { %v697_v53 = vadd.f32 %v696_v18, %v692_v12  ;;  %v1091_v39 = vstv %s3295_s23  ;;  %v4565_v48 = vstv %s786_s12  ;;  %v4567_v47 = vstv %s3268_s15  ;;  %s4600_s19 = sld [smem:[#allocation9 + $0x24]]  ;;  %s4614_s23 = sld [smem:[#allocation9 + $0x8]] }
 0x155   : > { %v701_v54 = vadd.f32 %v700_v19, %v695_v41  ;;  %v4569_v52 = vstv %s3273_s17  ;;  %v1131_v32 = vstv %s3300_s22  ;;  %v4575_v43 = vstv %s3278_s18  ;;  %s4616_s12 = sld [smem:[#allocation9 + $0x12]]  ;;  %s4630_s22 = sld [smem:[#allocation9 + $0x1c]] }
 0x156   : > { %698 = vadd.xlane.f32.xlu0 %v697_v53  ;;  %v4577_v16 = vstv %s3264_s10  ;;  %v4579_v11 = vstv %s3269_s20  ;;  %v4587_v35 = vstv %s3279_s16  ;;  %s4632_s15 = sld [smem:[#allocation9 + $0x26]]  ;;  %s4678_s17 = sld [smem:[#allocation10 + $0x1]]  ;;  %vm7959_vm9 = vcmp.lt.s32.totalorder %v4165_v8, 127 }
 0x157   : > { %702 = vadd.xlane.f32.xlu1 %v701_v54  ;;  %s4680_s18 = sld [smem:[#allocation10]]  ;;  %s4694_s10 = sld [smem:[#allocation10 + $0x2]]  ;;  %vm7960_vm11 = vcmp.lt.s32.totalorder %v4149_v5, 126  ;;  %vm7964_vm15 = vcmp.lt.s32.totalorder %v4165_v8, 126 }
 0x158   : > { %s4696_s20 = sld [smem:[#allocation10 + $0x3]]  ;;  %vm7961_vm12 = vmmov %vm7960_vm11  ;;  %s5138_s16 = sld [smem:[#allocation12 + $0x8e]] }
 0x159   : > { %vm7962_vm13 = vmmov %vm7960_vm11 }
 0x15a   : > { %vm7963_vm14 = vmmov %vm7960_vm11 }
 0x1e3   : > { %v699_v51 = vpop.xlane.xlu0 %698 }
 0x1e4   : > { %v703_v13 = vpop.xlane.xlu1 %702  ;;  %v704_v62 = vmul.f32 0.0026041667, %v699_v51  ;;  %v4635_v51 = vstv %s4549_s25  ;;  %s4662_s25 = sld [smem:[#allocation9 + $0x1d]] }
 0x1e5   : > { %v705_v24 = vmul.f32 0.0026041667, %v703_v13  ;;  %v4638_v13 = vstv %s4551_s28  ;;  %s4664_s28 = sld [smem:[#allocation9 + $0x27]] }
 0x1e6   : > { %v706_v40 = vsub.f32 %v690_v1, %v704_v62  ;;  %v707_v3 = vsub.f32 %v691_v2, %v704_v62  ;;  %v708_v4 = vsub.f32 %v692_v12, %v704_v62  ;;  %v4619_v12 = vstv %s4545_s30  ;;  %s4648_s30 = sld [smem:[#allocation9 + $0x13]] }
 0x1e7   : > { %v709_v25 = vsub.f32 %v693_v58, %v705_v24  ;;  %v710_v27 = vsub.f32 %v694_v57, %v705_v24  ;;  %v711_v37 = vsub.f32 %v695_v41, %v705_v24  ;;  %v4581_v58 = vstv %s3274_s21  ;;  %s5136_s21 = sld [smem:[#allocation12 + $0x7a]] }
 0x1e8   : > { %v712_v6 = vmul.f32 %v706_v40, %v706_v40  ;;  %v713_v21 = vmul.f32 %v707_v3, %v707_v3  ;;  %v714_v14 = vmul.f32 %v708_v4, %v708_v4  ;;  %v4622_v41 = vstv %s4547_s26  ;;  %s4646_s26 = sld [smem:[#allocation9 + $0x9]] }
 0x1e9   : > { %v715_v59 = vmul.f32 %v709_v25, %v709_v25  ;;  %v716_v7 = vmul.f32 %v710_v27, %v710_v27  ;;  %v717_v15 = vmul.f32 %v711_v37, %v711_v37 }
 0x1ea   : > { %v718_v55 = vadd.f32 %v713_v21, %v712_v6 }
 0x1eb   : > { %v722_v44 = vadd.f32 %v716_v7, %v715_v59 }
 0x1ec   : > { %v719_v63 = vadd.f32 %v718_v55, %v714_v14 }
 0x1ed   : > { %v723_v26 = vadd.f32 %v722_v44, %v717_v15  ;;  %v4699_v15 = vstv %s4553_s27  ;;  %s5128_s27 = sld [smem:[#allocation12 + $0x2a]] }
 0x1ee   : > { %720 = vadd.xlane.f32.xlu0 %v719_v63 }
 0x1f2   : > { %724 = vadd.xlane.f32.xlu0 %v723_v26  ;;  %v4702_v26 = vstv %s4555_s14  ;;  %s5134_s14 = sld [smem:[#allocation12 + $0x66]] }
 0x27b   : > { %v721_v56 = vpop.xlane.xlu0 %720 }
 0x27c   : > { %v726_v22 = vmul.f32 0.0026041667, %v721_v56  ;;  %v4705_v56 = vstv %s4557_s24  ;;  %s5126_s24 = sld [smem:[#allocation12 + $0x16]] }
 0x27e   : > { %v728_v60 = vadd.f32 1e-05, %v726_v22 }
 0x27f   : > { %v725_v45 = vpop.xlane.xlu0 %724 }
 0x280   : > { %3613 = vrsqrt.f32 %v728_v60  ;;  %v727_v49 = vmul.f32 0.0026041667, %v725_v45  ;;  %v4713_v45 = vstv %s4559_s7  ;;  %s5124_s7 = sld [smem:[#allocation12 + $0x2]] }
 0x282   : > { %v729_v46 = vadd.f32 1e-05, %v727_v49  ;;  %v4719_v49 = vstv %s4563_s8  ;;  %s5130_s8 = sld [smem:[#allocation12 + $0x3e]] }
 0x284   : > { %3615 = vrsqrt.f32 %v729_v46  ;;  %v4728_v46 = vstv %s4583_s6  ;;  %s5148_s6 = sld [smem:[#allocation12 + $0x2f]] }
 0x285   : > { %7943 = vst [vmem:[#allocation47_spill] sm:$0xff] %v4728_v46 }
 0x28a   : > { %v3614_v34 = vpop.eup %3613 }
 0x28b   : > { %v4485_v42 = vmul.f32 %v3614_v34, %v706_v40  ;;  %v4487_v17 = vmul.f32 %v3614_v34, %v707_v3  ;;  %v4493_v29 = vmul.f32 %v3614_v34, %v708_v4  ;;  %v4716_v34 = vstv %s4561_s13  ;;  %s5132_s13 = sld [smem:[#allocation12 + $0x52]] }
 0x28d   : > { %740 = vrot.lane.b32.xlu0 %v4487_v17, %s7925_s0  ;;  %738 = vrot.lane.b32.xlu1 %v4485_v42, %s7925_s0  ;;  %v4590_v20 = vmul.f32 %v803_v31, %v4493_v29  ;;  %v4593_v0 = vmul.f32 %v843_v23, %v4493_v29  ;;  %v4596_v1 = vmul.f32 %v883_v36, %v4493_v29 }
 0x28e   : > { %v3616_v38 = vpop.eup %3615  ;;  %v4603_v2 = vmul.f32 %v923_v33, %v4493_v29  ;;  %v4606_v57 = vmul.f32 %v803_v31, %v4487_v17  ;;  %v4609_v18 = vmul.f32 %v843_v23, %v4487_v17  ;;  %v4612_v19 = vmul.f32 %v883_v36, %v4487_v17 }
 0x28f   : > { %v4511_v61 = vmul.f32 %v3616_v38, %v709_v25  ;;  %v4517_v30 = vmul.f32 %v3616_v38, %v711_v37  ;;  %v4523_v50 = vmul.f32 %v3616_v38, %v710_v27  ;;  %v4625_v53 = vmul.f32 %v923_v33, %v4487_v17 }
 0x290   : > { %v4628_v54 = vmul.f32 %v803_v31, %v4485_v42  ;;  %v4641_v62 = vmul.f32 %v843_v23, %v4485_v42  ;;  %v4644_v24 = vmul.f32 %v883_v36, %v4485_v42  ;;  %v4651_v40 = vmul.f32 %v923_v33, %v4485_v42 }
 0x291   : > { %752 = vrot.lane.b32.xlu0 %v4487_v17, %s7926_s1  ;;  %742 = vrot.lane.b32.xlu1 %v4493_v29, %s7925_s0  ;;  %v4654_v3 = vmul.f32 %v1011_v10, %v4517_v30  ;;  %v4657_v4 = vmul.f32 %v1051_v28, %v4517_v30  ;;  %v4660_v25 = vmul.f32 %v1091_v39, %v4517_v30  ;;  %v4740_v31 = vstv %s4614_s23  ;;  %s5156_s23 = sld [smem:[#allocation12 + $0x7f]] }
 0x292   : > { %v4667_v27 = vmul.f32 %v1131_v32, %v4517_v30  ;;  %v4670_v6 = vmul.f32 %v1011_v10, %v4523_v50  ;;  %v4673_v21 = vmul.f32 %v1051_v28, %v4523_v50  ;;  %v4676_v59 = vmul.f32 %v1091_v39, %v4523_v50  ;;  %7947 = vst [vmem:[#allocation51_spill] sm:$0xff] %v4740_v31 }
 0x293   : > { %7929 = vst [vmem:[#allocation33_spill] sm:$0xff] %v4654_v3  ;;  %7930 = vst [vmem:[#allocation34_spill] sm:$0xff] %v4657_v4  ;;  %v4683_v14 = vmul.f32 %v1131_v32, %v4523_v50  ;;  %v4686_v55 = vmul.f32 %v1011_v10, %v4511_v61  ;;  %v4689_v63 = vmul.f32 %v1051_v28, %v4511_v61  ;;  %v4743_v23 = vstv %s4616_s12  ;;  %s5158_s12 = sld [smem:[#allocation12 + $0x93]] }
 0x294   : > { %7931 = vst [vmem:[#allocation35_spill] sm:$0xff] %v4660_v25  ;;  %7932 = vst [vmem:[#allocation36_spill] sm:$0xff] %v4667_v27  ;;  %v4692_v44 = vmul.f32 %v1091_v39, %v4511_v61  ;;  %v4708_v22 = vmul.f32 %v1131_v32, %v4511_v61  ;;  %v4752_v28 = vstv %s4630_s22  ;;  %v4755_v39 = vstv %s4632_s15  ;;  %s5164_s22 = sld [smem:[#allocation12 + $0xc]]  ;;  %s5166_s15 = sld [smem:[#allocation12 + $0x20]] }
 0x295   : > { %762 = vrot.lane.b32.xlu0 %v4485_v42, %s7927_s2  ;;  %750 = vrot.lane.b32.xlu1 %v4485_v42, %s7926_s1  ;;  %7933 = vst [vmem:[#allocation37_spill] sm:$0xff] %v4670_v6  ;;  %7934 = vst [vmem:[#allocation38_spill] sm:$0xff] %v4673_v21  ;;  %v4758_v32 = vstv %s4646_s26  ;;  %s5168_s26 = sld [smem:[#allocation12 + $0x34]] }
 0x296   : > { %7935 = vst [vmem:[#allocation39_spill] sm:$0xff] %v4676_v59  ;;  %7936 = vst [vmem:[#allocation40_spill] sm:$0xff] %v4683_v14  ;;  %v4761_v14 = vstv %s4648_s30  ;;  %v4771_v59 = vstv %s4664_s28  ;;  %s5170_s30 = sld [smem:[#allocation12 + $0x48]] }
 0x297   : > { %7937 = vst [vmem:[#allocation41_spill] sm:$0xff] %v4686_v55  ;;  %7938 = vst [vmem:[#allocation42_spill] sm:$0xff] %v4689_v63  ;;  %s5174_s28 = sld [smem:[#allocation12 + $0x70]] }
 0x298   : > { %7939 = vst [vmem:[#allocation43_spill] sm:$0xff] %v4692_v44  ;;  %7940 = vst [vmem:[#allocation44_spill] sm:$0xff] %v4708_v22  ;;  %v4764_v22 = vstv %s4662_s25  ;;  %v4774_v44 = vstv %s4678_s17  ;;  %s5172_s25 = sld [smem:[#allocation12 + $0x5c]] }
 0x299   : > { %766 = vrot.lane.b32.xlu0 %v4493_v29, %s7927_s2  ;;  %754 = vrot.lane.b32.xlu1 %v4493_v29, %s7926_s1  ;;  %7948 = vst [vmem:[#allocation52_spill] sm:$0xff] %v4743_v23  ;;  %7949 = vst [vmem:[#allocation53_spill] sm:$0xff] %v4752_v28  ;;  %s5176_s17 = sld [smem:[#allocation12 + $0x84]] }
 0x29a   : > { %7950 = vst [vmem:[#allocation54_spill] sm:$0xff] %v4755_v39  ;;  %7951 = vst [vmem:[#allocation55_spill] sm:$0xff] %v4758_v32  ;;  %v4780_v32 = vstv %s4680_s18  ;;  %s5178_s18 = sld [smem:[#allocation12 + $0x98]] }
 0x29b   : > { %7952 = vst [vmem:[#allocation56_spill] sm:$0xff] %v4761_v14  ;;  %7953 = vst [vmem:[#allocation57_spill] sm:$0xff] %v4764_v22  ;;  %v4783_v14 = vstv %s4694_s10  ;;  %v4786_v22 = vstv %s4696_s20  ;;  %s5184_s10 = sld [smem:[#allocation12]]  ;;  %s5186_s20 = sld [smem:[#allocation12 + $0x14]] }
 0x29c   : > { %7954 = vst [vmem:[#allocation58_spill] sm:$0xff] %v4771_v59  ;;  %7955 = vst [vmem:[#allocation59_spill] sm:$0xff] %v4774_v44 }
 0x29d   : > { %776 = vrot.lane.b32.xlu0 %v4487_v17, %s7928_s3  ;;  %764 = vrot.lane.b32.xlu1 %v4487_v17, %s7927_s2  ;;  %v4725_v17 = vstv %s4573_s5  ;;  %7956 = vst [vmem:[#allocation60_spill] sm:$0xff] %v4780_v32  ;;  %7957 = vst [vmem:[#allocation61_spill] sm:$0xff] %v4783_v14  ;;  %s5146_s5 = sld [smem:[#allocation12 + $0x1b]] }
 0x29e   : > { %7942 = vst [vmem:[#allocation46_spill] sm:$0xff] %v4725_v17  ;;  %7958 = vst [vmem:[#allocation62_spill] sm:$0xff] %v4786_v22 }
 0x2a0   : > { %8002 = sst [smem:[#allocation63_spill]] %s5178_s18  ;;  %s5200_s18 = sld [smem:[#allocation12 + $0x64]] }
 0x2a1   : > { %774 = vrot.lane.b32.xlu1 %v4485_v42, %s7928_s3  ;;  %946 = vrot.lane.b32.xlu0 %v4511_v61, %s7925_s0  ;;  %v4722_v42 = vstv %s4571_s4  ;;  %s5144_s4 = sld [smem:[#allocation12 + $0x7]] }
 0x2a2   : > { %7941 = vst [vmem:[#allocation45_spill] sm:$0xff] %v4722_v42 }
 0x2a5   : > { %778 = vrot.lane.b32.xlu1 %v4493_v29, %s7928_s3  ;;  %950 = vrot.lane.b32.xlu0 %v4517_v30, %s7925_s0  ;;  %v4731_v29 = vstv %s4585_s9  ;;  %s5150_s9 = sld [smem:[#allocation12 + $0x43]] }
 0x2a6   : > { %7944 = vst [vmem:[#allocation48_spill] sm:$0xff] %v4731_v29 }
 0x2a9   : > { %948 = vrot.lane.b32.xlu1 %v4523_v50, %s7925_s0  ;;  %960 = vrot.lane.b32.xlu0 %v4523_v50, %s7926_s1 }
 0x2ad   : > { %958 = vrot.lane.b32.xlu1 %v4511_v61, %s7926_s1  ;;  %970 = vrot.lane.b32.xlu0 %v4511_v61, %s7927_s2 }
 0x2b1   : > { %962 = vrot.lane.b32.xlu1 %v4517_v30, %s7926_s1  ;;  %974 = vrot.lane.b32.xlu0 %v4517_v30, %s7927_s2 }
 0x2b5   : > { %972 = vrot.lane.b32.xlu1 %v4523_v50, %s7927_s2  ;;  %984 = vrot.lane.b32.xlu0 %v4523_v50, %s7928_s3  ;;  %v4737_v50 = vstv %s4600_s19  ;;  %s5154_s19 = sld [smem:[#allocation12 + $0x6b]] }
 0x2b6   : > { %7946 = vst [vmem:[#allocation50_spill] sm:$0xff] %v4737_v50 }
 0x2b9   : > { %982 = vrot.lane.b32.xlu1 %v4511_v61, %s7928_s3 }
 0x2bd   : > { %986 = vrot.lane.b32.xlu1 %v4517_v30, %s7928_s3  ;;  %v4734_v30 = vstv %s4598_s11  ;;  %s5152_s11 = sld [smem:[#allocation12 + $0x57]] }
 0x2be   : > { %7945 = vst [vmem:[#allocation49_spill] sm:$0xff] %v4734_v30 }
 0x2ff   : > { %v739_v7 = vpop.permute.xlu1 %738  ;;  %v741_v37 = vpop.permute.xlu0 %740 }
 0x300   : > { %v745_v60 = vsel %vm434_vm1, %v739_v7, %v741_v37 }
 0x301   : > { %v748_v36 = vsel %vm413_vm3, %v745_v60, 0.0 }
 0x302   : > { %v869_v63 = vmul.f32 %v4569_v52, %v748_v36 }
 0x303   : > { %v743_v38 = vpop.permute.xlu1 %742  ;;  %v753_v61 = vpop.permute.xlu0 %752 }
 0x304   : > { %v744_v33 = vsel %vm434_vm1, %v741_v37, %v743_v38  ;;  %v746_v10 = vsel %vm434_vm1, %v743_v38, %v739_v7  ;;  %v789_v7 = vmul.f32 %v4565_v48, %v748_v36 }
 0x305   : > { %v747_v60 = vsel %vm412_vm0, %v746_v10, 0.0  ;;  %v749_v37 = vsel %vm414_vm4, %v744_v33, 0.0  ;;  %v829_v10 = vmul.f32 %v4567_v47, %v748_v36  ;;  %v909_v33 = vmul.f32 %v4575_v43, %v748_v36 }
 0x306   : > { %v788_v59 = vmul.f32 %v4565_v48, %v747_v60  ;;  %v790_v6 = vmul.f32 %v4565_v48, %v749_v37  ;;  %v828_v39 = vmul.f32 %v4567_v47, %v747_v60  ;;  %v830_v23 = vmul.f32 %v4567_v47, %v749_v37 }
 0x307   : > { %v751_v38 = vpop.permute.xlu1 %750  ;;  %v4777_v21 = vpop.permute.xlu0 %762  ;;  %v868_v31 = vmul.f32 %v4569_v52, %v747_v60  ;;  %v870_v27 = vmul.f32 %v4569_v52, %v749_v37  ;;  %v908_v48 = vmul.f32 %v4575_v43, %v747_v60 }
 0x308   : > { %v757_v44 = vsel %vm447_vm2, %v751_v38, %v753_v61 }
 0x309   : > { %v760_v14 = vsel %vm416_vm6, %v757_v44, 0.0  ;;  %v910_v44 = vmul.f32 %v4575_v43, %v749_v37 }
 0x30a   : > { %v797_v22 = vmul.f32 %v4577_v16, %v760_v14  ;;  %v837_v32 = vmul.f32 %v4579_v11, %v760_v14  ;;  %v877_v28 = vmul.f32 %v4581_v58, %v760_v14  ;;  %v917_v36 = vmul.f32 %v4587_v35, %v760_v14 }
 0x30b   : > { %v755_v55 = vpop.permute.xlu1 %754  ;;  %v767_v25 = vpop.permute.xlu0 %766 }
 0x30c   : > { %v800_v4 = vadd.f32 %v797_v22, %v789_v7  ;;  %v840_v3 = vadd.f32 %v837_v32, %v829_v10  ;;  %v880_v50 = vadd.f32 %v877_v28, %v869_v63  ;;  %v920_v30 = vadd.f32 %v917_v36, %v909_v33 }
 0x30d   : > { %v756_v29 = vsel %vm447_vm2, %v753_v61, %v755_v55  ;;  %v758_v47 = vsel %vm447_vm2, %v755_v55, %v751_v38  ;;  %v770_v52 = vsel %vm418_vm8, %v767_v25, %v4777_v21 }
 0x30e   : > { %v759_v14 = vsel %vm415_vm5, %v758_v47, 0.0  ;;  %v761_v43 = vsel %vm417_vm7, %v756_v29, 0.0  ;;  %v773_v63 = vsel %vm420_vm10, %v770_v52, 0.0  ;;  %v808_v22 = vadd.f32 %v4606_v57, %v800_v4 }
 0x30f   : > { %v796_v61 = vmul.f32 %v4577_v16, %v759_v14  ;;  %v798_v28 = vmul.f32 %v4577_v16, %v761_v43  ;;  %v836_v55 = vmul.f32 %v4579_v11, %v759_v14  ;;  %v838_v32 = vmul.f32 %v4579_v11, %v761_v43  ;;  %v765_v60 = vpop.permute.xlu1 %764  ;;  %v777_v42 = vpop.permute.xlu0 %776 }
 0x310   : > { %v876_v37 = vmul.f32 %v4581_v58, %v759_v14  ;;  %v878_v7 = vmul.f32 %v4581_v58, %v761_v43  ;;  %v916_v29 = vmul.f32 %v4587_v35, %v759_v14  ;;  %v918_v38 = vmul.f32 %v4587_v35, %v761_v43 }
 0x311   : > { %v799_v10 = vadd.f32 %v796_v61, %v788_v59  ;;  %v801_v33 = vadd.f32 %v798_v28, %v790_v6  ;;  %v839_v57 = vadd.f32 %v836_v55, %v828_v39  ;;  %v841_v4 = vadd.f32 %v838_v32, %v830_v23 }
 0x312   : > { %v879_v36 = vadd.f32 %v876_v37, %v868_v31  ;;  %v881_v47 = vadd.f32 %v878_v7, %v870_v27  ;;  %v919_v16 = vadd.f32 %v916_v29, %v908_v48  ;;  %v921_v52 = vadd.f32 %v918_v38, %v910_v44 }
 0x313   : > { %v809_v46 = vadd.f32 %v4590_v20, %v801_v33  ;;  %v849_v11 = vadd.f32 %v4593_v0, %v841_v4  ;;  %v814_v17 = vmul.f32 %v4619_v12, %v773_v63  ;;  %v854_v58 = vmul.f32 %v4622_v41, %v773_v63  ;;  %v775_v14 = vpop.permute.xlu1 %774  ;;  %v947_v37 = vpop.permute.xlu0 %946 }
 0x314   : > { %v889_v35 = vadd.f32 %v4596_v1, %v881_v47  ;;  %v929_v6 = vadd.f32 %v4603_v2, %v921_v52  ;;  %v894_v59 = vmul.f32 %v4635_v51, %v773_v63  ;;  %v934_v27 = vmul.f32 %v4638_v13, %v773_v63 }
 0x315   : > { %v817_v31 = vadd.f32 %v814_v17, %v809_v46  ;;  %v857_v23 = vadd.f32 %v854_v58, %v849_v11  ;;  %v768_v20 = vsel %vm418_vm8, %v765_v60, %v767_v25  ;;  %v769_v0 = vsel %vm418_vm8, %v4777_v21, %v765_v60 }
 0x316   : > { %v897_v39 = vadd.f32 %v894_v59, %v889_v35  ;;  %v4842_v48 = vadd.f32 %v934_v27, %v929_v6  ;;  %v771_v1 = vsel %vm418_vm8, %v769_v0, 0.0  ;;  %v772_v2 = vsel %vm7959_vm9, %v768_v20, 0.0 }
 0x317   : > { %v807_v44 = vadd.f32 %v4628_v54, %v799_v10  ;;  %v812_v17 = vmul.f32 %v4619_v12, %v771_v1  ;;  %v813_v46 = vmul.f32 %v4619_v12, %v772_v2  ;;  %v847_v25 = vadd.f32 %v4641_v62, %v839_v57  ;;  %v779_v43 = vpop.permute.xlu1 %778  ;;  %v951_v52 = vpop.permute.xlu0 %950 }
 0x318   : > { %v848_v21 = vadd.f32 %v4609_v18, %v840_v3  ;;  %v852_v63 = vmul.f32 %v4622_v41, %v771_v1  ;;  %v853_v61 = vmul.f32 %v4622_v41, %v772_v2  ;;  %v887_v28 = vadd.f32 %v4644_v24, %v879_v36 }
 0x319   : > { %v815_v55 = vadd.f32 %v812_v17, %v807_v44  ;;  %v816_v32 = vadd.f32 %v813_v46, %v808_v22  ;;  %v888_v60 = vadd.f32 %v4612_v19, %v880_v50  ;;  %v892_v54 = vmul.f32 %v4635_v51, %v771_v1 }
 0x31a   : > { %v855_v7 = vadd.f32 %v852_v63, %v847_v25  ;;  %v856_v12 = vadd.f32 %v853_v61, %v848_v21  ;;  %v893_v62 = vmul.f32 %v4635_v51, %v772_v2  ;;  %v927_v29 = vadd.f32 %v4651_v40, %v919_v16 }
 0x31b   : > { %v895_v18 = vadd.f32 %v892_v54, %v887_v28  ;;  %v928_v3 = vadd.f32 %v4625_v53, %v920_v30  ;;  %v932_v41 = vmul.f32 %v4638_v13, %v771_v1  ;;  %v933_v24 = vmul.f32 %v4638_v13, %v772_v2  ;;  %v949_v38 = vpop.permute.xlu1 %948 }
 0x31c   : > { %v896_v22 = vadd.f32 %v893_v62, %v888_v60  ;;  %v781_v19 = vsel %vm7960_vm11, %v775_v14, %v777_v42  ;;  %v780_v50 = vsel %vm7961_vm12, %v777_v42, %v779_v43  ;;  %v782_v51 = vsel %vm7962_vm13, %v779_v43, %v775_v14  ;;  %v961_v60 = vpop.permute.xlu0 %960  ;;  %vm7989_vm13 = vmmov %vm7961_vm12 }
 0x31d   : > { %v935_v10 = vadd.f32 %v932_v41, %v927_v29  ;;  %v936_v40 = vadd.f32 %v933_v24, %v928_v3  ;;  %v783_v53 = vsel %vm7963_vm14, %v781_v19, 0.0  ;;  %v784_v30 = vsel %vm7964_vm15, %v780_v50, 0.0  ;;  %vm7990_vm14 = vmmov %vm7961_vm12 }
 0x31e   : > { %v820_v13 = vmul.f32 %v4699_v15, %v783_v53  ;;  %v860_v33 = vmul.f32 %v4702_v26, %v783_v53  ;;  %v900_v57 = vmul.f32 %v4705_v56, %v783_v53  ;;  %v940_v4 = vmul.f32 %v4713_v45, %v783_v53  ;;  %vm7991_vm15 = vmmov %vm7961_vm12 }
 0x31f   : > { %vm7965_vm9 = vcmp.lt.s32.totalorder %v4171_v9, 126  ;;  %v821_v36 = vmul.f32 %v4699_v15, %v784_v30  ;;  %v861_v47 = vmul.f32 %v4702_v26, %v784_v30  ;;  %v901_v16 = vmul.f32 %v4705_v56, %v784_v30  ;;  %v959_v11 = vpop.permute.xlu1 %958 }
 0x320   : > { %v785_v42 = vsel %vm7965_vm9, %v782_v51, 0.0  ;;  %v823_v58 = vadd.f32 %v820_v13, %v815_v55  ;;  %v863_v14 = vadd.f32 %v860_v33, %v855_v7  ;;  %v903_v35 = vadd.f32 %v900_v57, %v895_v18  ;;  %v7967_v55 = vld [vmem:[#allocation46_spill] sm:$0xff] }
 0x321   : > { %v943_v6 = vadd.f32 %v940_v4, %v935_v10  ;;  %v822_v59 = vmul.f32 %v4699_v15, %v785_v42  ;;  %v824_v27 = vadd.f32 %v821_v36, %v816_v32  ;;  %v862_v20 = vmul.f32 %v4702_v26, %v785_v42  ;;  %v971_v4 = vpop.permute.xlu0 %970 }
 0x322   : > { %v864_v0 = vadd.f32 %v861_v47, %v856_v12  ;;  %v902_v1 = vmul.f32 %v4705_v56, %v785_v42  ;;  %v904_v2 = vadd.f32 %v901_v16, %v896_v22  ;;  %v941_v44 = vmul.f32 %v4713_v45, %v784_v30  ;;  %v7968_v47 = vld [vmem:[#allocation47_spill] sm:$0xff] }
 0x323   : > { %v942_v17 = vmul.f32 %v4713_v45, %v785_v42  ;;  %v825_v46 = vadd.f32 %v822_v59, %v817_v31  ;;  %v865_v25 = vadd.f32 %v862_v20, %v857_v23  ;;  %v954_v43 = vsel %vm434_vm1, %v951_v52, %v947_v37  ;;  %v963_v15 = vpop.permute.xlu1 %962  ;;  %v7966_v31 = vld [vmem:[#allocation45_spill] sm:$0xff] }
 0x324   : > { %v952_v21 = vsel %vm434_vm1, %v949_v38, %v951_v52  ;;  %v905_v63 = vadd.f32 %v902_v1, %v897_v39  ;;  %v944_v61 = vadd.f32 %v941_v44, %v936_v40  ;;  %v955_v56 = vsel %vm412_vm0, %v954_v43, 0.0  ;;  %v7969_v52 = vld [vmem:[#allocation48_spill] sm:$0xff] }
 0x325   : > { %v945_v26 = vadd.f32 %v942_v17, %v4842_v48  ;;  %v996_v28 = vmul.f32 %v4716_v34, %v955_v56  ;;  %v1036_v45 = vmul.f32 %v4719_v49, %v955_v56  ;;  %v1076_v23 = vmul.f32 %v7966_v31, %v955_v56 }
 0x326   : > { %v1116_v32 = vmul.f32 %v7967_v55, %v955_v56  ;;  %v953_v54 = vsel %vm434_vm1, %v947_v37, %v949_v38  ;;  %v957_v39 = vsel %vm414_vm4, %v952_v21, 0.0  ;;  %v965_v48 = vsel %vm447_vm2, %v959_v11, %v961_v60 }
 0x327   : > { %v964_v7 = vsel %vm447_vm2, %v961_v60, %v963_v15  ;;  %v999_v12 = vadd.f32 %v996_v28, %v823_v58  ;;  %v1039_v62 = vadd.f32 %v1036_v45, %v863_v14  ;;  %v1079_v29 = vadd.f32 %v1076_v23, %v903_v35  ;;  %v7970_v14 = vld [vmem:[#allocation49_spill] sm:$0xff]  ;;  %v973_v1 = vpop.permute.xlu1 %972  ;;  %v975_v28 = vpop.permute.xlu0 %974 }
 0x328   : > { %v1119_v18 = vadd.f32 %v1116_v32, %v943_v6  ;;  %v956_v3 = vsel %vm413_vm3, %v953_v54, 0.0  ;;  %v998_v41 = vmul.f32 %v4716_v34, %v957_v39  ;;  %v1038_v37 = vmul.f32 %v4719_v49, %v957_v39  ;;  %v7971_v6 = vld [vmem:[#allocation50_spill] sm:$0xff]  ;;  %v7972_v23 = vld [vmem:[#allocation33_spill] sm:$0xff] }
 0x329   : > { %v1078_v24 = vmul.f32 %v7966_v31, %v957_v39  ;;  %v997_v38 = vmul.f32 %v4716_v34, %v956_v3  ;;  %v1037_v22 = vmul.f32 %v4719_v49, %v956_v3  ;;  %v1077_v19 = vmul.f32 %v7966_v31, %v956_v3  ;;  %v7973_v32 = vld [vmem:[#allocation34_spill] sm:$0xff] }
 0x32a   : > { %v1117_v50 = vmul.f32 %v7967_v55, %v956_v3  ;;  %v1001_v51 = vadd.f32 %v998_v41, %v825_v46  ;;  %v1041_v10 = vadd.f32 %v1038_v37, %v865_v25  ;;  %v1118_v53 = vmul.f32 %v7967_v55, %v957_v39 }
 0x32b   : > { %v1081_v40 = vadd.f32 %v1078_v24, %v905_v63  ;;  %v1000_v30 = vadd.f32 %v997_v38, %v824_v27  ;;  %v1040_v13 = vadd.f32 %v1037_v22, %v864_v0  ;;  %v1080_v33 = vadd.f32 %v1077_v19, %v904_v2  ;;  %v983_v38 = vpop.permute.xlu1 %982  ;;  %v7976_v22 = vld [vmem:[#allocation36_spill] sm:$0xff] }
 0x32c   : > { %v1120_v57 = vadd.f32 %v1117_v50, %v944_v61  ;;  %v1121_v42 = vadd.f32 %v1118_v53, %v945_v26  ;;  %v968_v34 = vsel %vm416_vm6, %v965_v48, 0.0  ;;  %v966_v49 = vsel %vm447_vm2, %v963_v15, %v959_v11 }
 0x32d   : > { %v969_v36 = vsel %vm417_vm7, %v964_v7, 0.0  ;;  %v1005_v16 = vmul.f32 %v7968_v47, %v968_v34  ;;  %v1045_v58 = vmul.f32 %v7969_v52, %v968_v34  ;;  %v1085_v35 = vmul.f32 %v7970_v14, %v968_v34  ;;  %v7974_v7 = vld [vmem:[#allocation35_spill] sm:$0xff] }
 0x32e   : > { %v1125_v59 = vmul.f32 %v7971_v6, %v968_v34  ;;  %v967_v27 = vsel %vm415_vm5, %v966_v49, 0.0  ;;  %v1006_v20 = vmul.f32 %v7968_v47, %v969_v36  ;;  %v1046_v0 = vmul.f32 %v7969_v52, %v969_v36 }
 0x32f   : > { %v1086_v11 = vmul.f32 %v7970_v14, %v969_v36  ;;  %v1008_v2 = vadd.f32 %v1005_v16, %v1000_v30  ;;  %v1048_v44 = vadd.f32 %v1045_v58, %v1040_v13  ;;  %v1088_v17 = vadd.f32 %v1085_v35, %v1080_v33  ;;  %v7980_v30 = vld [vmem:[#allocation53_spill] sm:$0xff]  ;;  %v7981_v33 = vld [vmem:[#allocation54_spill] sm:$0xff] }
 0x330   : > { %v1128_v46 = vadd.f32 %v1125_v59, %v1120_v57  ;;  %v1004_v25 = vmul.f32 %v7968_v47, %v967_v27  ;;  %v1009_v43 = vadd.f32 %v1006_v20, %v1001_v51  ;;  %v1044_v21 = vmul.f32 %v7969_v52, %v967_v27  ;;  %v7978_v51 = vld [vmem:[#allocation51_spill] sm:$0xff]  ;;  %v7984_v59 = vld [vmem:[#allocation38_spill] sm:$0xff] }
 0x331   : > { %v1049_v15 = vadd.f32 %v1046_v0, %v1041_v10  ;;  %v1084_v63 = vmul.f32 %v7970_v14, %v967_v27  ;;  %v1089_v61 = vadd.f32 %v1086_v11, %v1081_v40  ;;  %v1124_v26 = vmul.f32 %v7971_v6, %v967_v27  ;;  %v7979_v40 = vld [vmem:[#allocation52_spill] sm:$0xff]  ;;  %v7985_v11 = vld [vmem:[#allocation43_spill] sm:$0xff] }
 0x332   : > { %v1126_v56 = vmul.f32 %v7971_v6, %v969_v36  ;;  %v1007_v45 = vadd.f32 %v1004_v25, %v999_v12  ;;  %v1047_v31 = vadd.f32 %v1044_v21, %v1039_v62  ;;  %v1017_v55 = vadd.f32 %v7972_v23, %v1009_v43  ;;  %v7975_v12 = vld [vmem:[#allocation41_spill] sm:$0xff]  ;;  %v7983_v36 = vld [vmem:[#allocation42_spill] sm:$0xff]  ;;  %v987_v21 = vpop.permute.xlu1 %986 }
 0x333   : > { %v1057_v60 = vadd.f32 %v7973_v32, %v1049_v15  ;;  %v1087_v54 = vadd.f32 %v1084_v63, %v1079_v29  ;;  %v1127_v39 = vadd.f32 %v1124_v26, %v1119_v18  ;;  %v1097_v3 = vadd.f32 %v7974_v7, %v1089_v61  ;;  %v7987_v61 = vld [vmem:[#allocation44_spill] sm:$0xff] }
 0x334   : > { %v1129_v48 = vadd.f32 %v1126_v56, %v1121_v42  ;;  %v978_v41 = vsel %vm418_vm8, %v975_v28, %v971_v4  ;;  %v976_v37 = vsel %vm418_vm8, %v973_v1, %v975_v28  ;;  %v977_v24 = vsel %vm418_vm8, %v971_v4, %v973_v1  ;;  %v7982_v4 = vld [vmem:[#allocation37_spill] sm:$0xff]  ;;  %v7988_v56 = vld [vmem:[#allocation40_spill] sm:$0xff] }
 0x335   : > { %v1015_v62 = vadd.f32 %v7975_v12, %v1007_v45  ;;  %v981_v29 = vsel %vm420_vm10, %v978_v41, 0.0  ;;  %v979_v18 = vsel %vm418_vm8, %v977_v24, 0.0  ;;  %vm7977_vm11 = vcmp.lt.s32.totalorder %v4165_v8, 127  ;;  %v7995_v12 = vld [vmem:[#allocation57_spill] sm:$0xff] }
 0x336   : > { %v1137_v19 = vadd.f32 %v7976_v22, %v1129_v48  ;;  %v980_v50 = vsel %vm7977_vm11, %v976_v37, 0.0  ;;  %v1022_v10 = vmul.f32 %v7978_v51, %v981_v29  ;;  %v1062_v53 = vmul.f32 %v7979_v40, %v981_v29  ;;  %v7994_v37 = vld [vmem:[#allocation56_spill] sm:$0xff]  ;;  %v7996_v22 = vld [vmem:[#allocation58_spill] sm:$0xff] }
 0x337   : > { %v1102_v13 = vmul.f32 %v7980_v30, %v981_v29  ;;  %v1142_v57 = vmul.f32 %v7981_v33, %v981_v29  ;;  %v1016_v42 = vadd.f32 %v7982_v4, %v1008_v2  ;;  %v1020_v34 = vmul.f32 %v7978_v51, %v979_v18  ;;  %v7986_v2 = vld [vmem:[#allocation39_spill] sm:$0xff] }
 0x338   : > { %v1021_v49 = vmul.f32 %v7978_v51, %v980_v50  ;;  %v1055_v47 = vadd.f32 %v7983_v36, %v1047_v31  ;;  %v1025_v16 = vadd.f32 %v1022_v10, %v1017_v55  ;;  %v1065_v52 = vadd.f32 %v1062_v53, %v1057_v60  ;;  %v985_v55 = vpop.permute.xlu0 %984 }
 0x339   : > { %v1105_v58 = vadd.f32 %v1102_v13, %v1097_v3  ;;  %v1145_v14 = vadd.f32 %v1142_v57, %v1137_v19  ;;  %v1023_v35 = vadd.f32 %v1020_v34, %v1015_v62  ;;  %v1056_v27 = vadd.f32 %v7984_v59, %v1048_v44  ;;  %v7993_v3 = vld [vmem:[#allocation55_spill] sm:$0xff] }
 0x33a   : > { %v1024_v6 = vadd.f32 %v1021_v49, %v1016_v42  ;;  %v1060_v20 = vmul.f32 %v7979_v40, %v979_v18  ;;  %v1061_v0 = vmul.f32 %v7979_v40, %v980_v50  ;;  %v1095_v1 = vadd.f32 %v7985_v11, %v1087_v54  ;;  %v7998_v59 = vld [vmem:[#allocation59_spill] sm:$0xff] }
 0x33b   : > { %v1096_v25 = vadd.f32 %v7986_v2, %v1088_v17  ;;  %v1100_v43 = vmul.f32 %v7980_v30, %v979_v18  ;;  %v1101_v63 = vmul.f32 %v7980_v30, %v980_v50  ;;  %v1135_v26 = vadd.f32 %v7987_v61, %v1127_v39 }
 0x33c   : > { %v1063_v15 = vadd.f32 %v1060_v20, %v1055_v47  ;;  %v1136_v28 = vadd.f32 %v7988_v56, %v1128_v46  ;;  %v1064_v45 = vadd.f32 %v1061_v0, %v1056_v27  ;;  %v1140_v31 = vmul.f32 %v7981_v33, %v979_v18 }
 0x33d   : > { %v1103_v44 = vadd.f32 %v1100_v43, %v1095_v1  ;;  %v1141_v23 = vmul.f32 %v7981_v33, %v980_v50  ;;  %v1104_v32 = vadd.f32 %v1101_v63, %v1096_v25  ;;  %v989_v17 = vsel %vm7961_vm12, %v983_v38, %v985_v55 }
 0x33e   : > { %v988_v60 = vsel %vm7989_vm13, %v985_v55, %v987_v21  ;;  %v990_v54 = vsel %vm7990_vm14, %v987_v21, %v983_v38  ;;  %v1143_v39 = vadd.f32 %v1140_v31, %v1135_v26  ;;  %v991_v46 = vsel %vm7991_vm15, %v989_v17, 0.0 }
 0x33f   : > { %v1144_v48 = vadd.f32 %v1141_v23, %v1136_v28  ;;  %vm7992_vm9 = vcmp.lt.s32.totalorder %v4165_v8, 126  ;;  %v1028_v41 = vmul.f32 %v7993_v3, %v991_v46  ;;  %v1068_v24 = vmul.f32 %v7994_v37, %v991_v46 }
 0x340   : > { %v992_v7 = vsel %vm7992_vm9, %v988_v60, 0.0  ;;  %v1108_v62 = vmul.f32 %v7995_v12, %v991_v46  ;;  %v1148_v19 = vmul.f32 %v7996_v22, %v991_v46  ;;  %vm7997_vm11 = vcmp.lt.s32.totalorder %v4171_v9, 126  ;;  %v8001_v60 = vld [vmem:[#allocation62_spill] sm:$0xff] }
 0x341   : > { %v993_v29 = vsel %vm7997_vm11, %v990_v54, 0.0  ;;  %v1029_v38 = vmul.f32 %v7993_v3, %v992_v7  ;;  %v1069_v18 = vmul.f32 %v7994_v37, %v992_v7  ;;  %v1109_v50 = vmul.f32 %v7995_v12, %v992_v7 }
 0x342   : > { %v1031_v51 = vadd.f32 %v1028_v41, %v1023_v35  ;;  %v1071_v10 = vadd.f32 %v1068_v24, %v1063_v15  ;;  %v1111_v40 = vadd.f32 %v1108_v62, %v1103_v44  ;;  %v1151_v53 = vadd.f32 %v1148_v19, %v1143_v39  ;;  %v8000_v44 = vld [vmem:[#allocation61_spill] sm:$0xff] }
 0x343   : > { %v1030_v30 = vmul.f32 %v7993_v3, %v993_v29  ;;  %v1032_v13 = vadd.f32 %v1029_v38, %v1024_v6  ;;  %v1070_v33 = vmul.f32 %v7994_v37, %v993_v29  ;;  %v1072_v57 = vadd.f32 %v1069_v18, %v1064_v45  ;;  %v7999_v6 = vld [vmem:[#allocation60_spill] sm:$0xff] }
 0x344   : > { %v1110_v4 = vmul.f32 %v7995_v12, %v993_v29  ;;  %v1112_v42 = vadd.f32 %v1109_v50, %v1104_v32  ;;  %v1149_v34 = vmul.f32 %v7996_v22, %v992_v7  ;;  %v1150_v49 = vmul.f32 %v7996_v22, %v993_v29 }
 0x345   : > { %v1033_v36 = vadd.f32 %v1030_v30, %v1025_v16  ;;  %v1073_v47 = vadd.f32 %v1070_v33, %v1065_v52  ;;  %v1161_v35 = vadd.f32 %v7998_v59, %v1071_v10  ;;  %v1162_v27 = vadd.f32 %v7998_v59, %v1072_v57 }
 0x346   : > { %v1113_v20 = vadd.f32 %v1110_v4, %v1105_v58  ;;  %v1152_v0 = vadd.f32 %v1149_v34, %v1144_v48  ;;  %v1153_v11 = vadd.f32 %v1150_v49, %v1145_v14  ;;  %v1156_v1 = vadd.f32 %v7999_v6, %v1031_v51 }
 0x347   : > { %v1163_v2 = vadd.f32 %v7998_v59, %v1073_v47  ;;  %vm1177_vm12 = vcmp.ge.f32.partialorder %v1161_v35, 0.0  ;;  %vm1178_vm13 = vcmp.ge.f32.partialorder %v1162_v27, 0.0  ;;  %v1189_v25 = vmul.f32 0.01, %v1161_v35 }
 0x348   : > { %v1190_v43 = vmul.f32 0.01, %v1162_v27  ;;  %v1157_v21 = vadd.f32 %v7999_v6, %v1032_v13  ;;  %v1158_v16 = vadd.f32 %v7999_v6, %v1033_v36  ;;  %vm1174_vm14 = vcmp.ge.f32.partialorder %v1156_v1, 0.0 }
 0x349   : > { %vm1179_vm15 = vcmp.ge.f32.partialorder %v1163_v2, 0.0  ;;  %v1191_v52 = vmul.f32 0.01, %v1163_v2  ;;  %v1201_v15 = vsel %vm1177_vm12, %v1161_v35, %v1189_v25  ;;  %v1186_v63 = vmul.f32 0.01, %v1156_v1 }
 0x34a   : > { %v1202_v58 = vsel %vm1178_vm13, %v1162_v27, %v1190_v43  ;;  %vm1175_vm9 = vcmp.ge.f32.partialorder %v1157_v21, 0.0  ;;  %vm1176_vm11 = vcmp.ge.f32.partialorder %v1158_v16, 0.0  ;;  %v1187_v14 = vmul.f32 0.01, %v1157_v21 }
 0x34b   : > { %v1203_v61 = vsel %vm1179_vm15, %v1163_v2, %v1191_v52  ;;  %v1214_v26 = vadd.f32 %v1202_v58, %v1201_v15  ;;  %v1188_v56 = vmul.f32 0.01, %v1158_v16  ;;  %v1198_v28 = vsel %vm1174_vm14, %v1156_v1, %v1186_v63 }
 0x34c   : > { %v1199_v45 = vsel %vm1175_vm9, %v1157_v21, %v1187_v14  ;;  %v1166_v31 = vadd.f32 %v8000_v44, %v1111_v40  ;;  %v1167_v23 = vadd.f32 %v8000_v44, %v1112_v42  ;;  %v1168_v55 = vadd.f32 %v8000_v44, %v1113_v20 }
 0x34d   : > { %v1215_v32 = vadd.f32 %v1214_v26, %v1203_v61  ;;  %v1210_v17 = vadd.f32 %v1199_v45, %v1198_v28  ;;  %v1171_v54 = vadd.f32 %v8001_v60, %v1151_v53  ;;  %v1200_v39 = vsel %vm1176_vm11, %v1158_v16, %v1188_v56 }
 0x34e   : > { %vm1180_vm12 = vcmp.ge.f32.partialorder %v1166_v31, 0.0  ;;  %vm1181_vm13 = vcmp.ge.f32.partialorder %v1167_v23, 0.0  ;;  %v1192_v48 = vmul.f32 0.01, %v1166_v31  ;;  %v1193_v7 = vmul.f32 0.01, %v1167_v23 }
 0x34f   : > { %1216 = vadd.xlane.f32.xlu1 %v1215_v32  ;;  %v1211_v46 = vadd.f32 %v1210_v17, %v1200_v39  ;;  %v1194_v3 = vmul.f32 0.01, %v1168_v55  ;;  %v1172_v41 = vadd.f32 %v8001_v60, %v1152_v0  ;;  %vm1182_vm14 = vcmp.ge.f32.partialorder %v1168_v55, 0.0 }
 0x350   : > { %v1173_v37 = vadd.f32 %v8001_v60, %v1153_v11  ;;  %vm1183_vm15 = vcmp.ge.f32.partialorder %v1171_v54, 0.0  ;;  %v1195_v24 = vmul.f32 0.01, %v1171_v54  ;;  %v1204_v12 = vsel %vm1180_vm12, %v1166_v31, %v1192_v48 }
 0x351   : > { %1212 = vadd.xlane.f32.xlu0 %v1211_v46  ;;  %v1205_v62 = vsel %vm1181_vm13, %v1167_v23, %v1193_v7  ;;  %vm1184_vm9 = vcmp.ge.f32.partialorder %v1172_v41, 0.0  ;;  %v1196_v22 = vmul.f32 0.01, %v1172_v41  ;;  %v1206_v29 = vsel %vm1182_vm14, %v1168_v55, %v1194_v3 }
 0x352   : > { %v1218_v19 = vadd.f32 %v1205_v62, %v1204_v12  ;;  %v1197_v38 = vmul.f32 0.01, %v1173_v37  ;;  %v1207_v18 = vsel %vm1183_vm15, %v1171_v54, %v1195_v24  ;;  %vm1185_vm11 = vcmp.ge.f32.partialorder %v1173_v37, 0.0 }
 0x353   : > { %v1208_v50 = vsel %vm1184_vm9, %v1172_v41, %v1196_v22  ;;  %vm8199_vm13 = vcmp.lt.s32.totalorder %v4149_v5, 126 }
 0x354   : > { %v1219_v51 = vadd.f32 %v1218_v19, %v1206_v29  ;;  %v1222_v10 = vadd.f32 %v1208_v50, %v1207_v18  ;;  %v1209_v40 = vsel %vm1185_vm11, %v1173_v37, %v1197_v38  ;;  %vm8200_vm14 = vmmov %vm8199_vm13 }
 0x355   : > { %vm8201_vm15 = vmmov %vm8199_vm13 }
 0x356   : > { %1220 = vadd.xlane.f32.xlu0 %v1219_v51  ;;  %v1223_v53 = vadd.f32 %v1222_v10, %v1209_v40  ;;  %vm8202_vm9 = vmmov %vm8199_vm13 }
 0x35a   : > { %1224 = vadd.xlane.f32.xlu0 %v1223_v53 }
 0x3dc   : > { %v1217_v30 = vpop.xlane.xlu1 %1216 }
 0x3dd   : > { %v1227_v13 = vmul.f32 0.0026041667, %v1217_v30 }
 0x3de   : > { %v1213_v33 = vpop.xlane.xlu0 %1212 }
 0x3df   : > { %v5008_v57 = vsub.f32 %v1201_v15, %v1227_v13  ;;  %v5010_v4 = vsub.f32 %v1202_v58, %v1227_v13  ;;  %v1226_v42 = vmul.f32 0.0026041667, %v1213_v33  ;;  %v5012_v34 = vsub.f32 %v1203_v61, %v1227_v13 }
 0x3e1   : > { %v1230_v49 = vsub.f32 %v1198_v28, %v1226_v42  ;;  %v1231_v36 = vsub.f32 %v1199_v45, %v1226_v42  ;;  %v1232_v47 = vsub.f32 %v1200_v39, %v1226_v42  ;;  %v1245_v59 = vmul.f32 %v5008_v57, %v5008_v57 }
 0x3e2   : > { %v1246_v35 = vmul.f32 %v5010_v4, %v5010_v4  ;;  %v1247_v6 = vmul.f32 %v5012_v34, %v5012_v34 }
 0x3e3   : > { %v1221_v27 = vpop.xlane.xlu0 %1220  ;;  %v1242_v20 = vmul.f32 %v1230_v49, %v1230_v49  ;;  %v1243_v0 = vmul.f32 %v1231_v36, %v1231_v36  ;;  %v1244_v2 = vmul.f32 %v1232_v47, %v1232_v47 }
 0x3e4   : > { %v1228_v11 = vmul.f32 0.0026041667, %v1221_v27  ;;  %v1258_v1 = vadd.f32 %v1246_v35, %v1245_v59  ;;  %v5217_v59 = vstv %s5134_s14  ;;  %v5220_v35 = vstv %s5136_s21  ;;  %s5267_s14 = sld [smem:[#allocation12 + $0x3d]]  ;;  %s8004_s21 = sld [smem:[#allocation63_spill]] }
 0x3e5   : > { %v1254_v25 = vadd.f32 %v1243_v0, %v1242_v20  ;;  %v5223_v27 = vstv %s5138_s16  ;;  %v5232_v20 = vstv %s5144_s4  ;;  %v5235_v0 = vstv %s5146_s5  ;;  %s5269_s16 = sld [smem:[#allocation12 + $0x51]]  ;;  %s5287_s4 = sld [smem:[#allocation12 + $0x65]] }
 0x3e6   : > { %v5020_v43 = vsub.f32 %v1204_v12, %v1228_v11  ;;  %v5022_v21 = vsub.f32 %v1205_v62, %v1228_v11  ;;  %v5024_v16 = vsub.f32 %v1206_v29, %v1228_v11  ;;  %v1259_v52 = vadd.f32 %v1258_v1, %v1247_v6  ;;  %s5289_s5 = sld [smem:[#allocation12 + $0x79]] }
 0x3e7   : > { %v1225_v15 = vpop.xlane.xlu0 %1224  ;;  %v1255_v63 = vadd.f32 %v1254_v25, %v1244_v2  ;;  %v5240_v11 = vstv %s5148_s6  ;;  %v5243_v6 = vstv %s5150_s9  ;;  %v5246_v1 = vstv %s5152_s11  ;;  %s5306_s6 = sld [smem:[#allocation12 + $0x8d]]  ;;  %s5367_s9 = sld [smem:[#allocation12 + $0x2b]] }
 0x3e8   : > { %v1229_v58 = vmul.f32 0.0026041667, %v1225_v15  ;;  %1260 = vadd.xlane.f32.xlu0 %v1259_v52  ;;  %v1248_v14 = vmul.f32 %v5020_v43, %v5020_v43  ;;  %v1249_v61 = vmul.f32 %v5022_v21, %v5022_v21  ;;  %v1250_v26 = vmul.f32 %v5024_v16, %v5024_v16  ;;  %s5387_s11 = sld [smem:[#allocation12 + $0x3f]] }
 0x3e9   : > { %1256 = vadd.xlane.f32.xlu1 %v1255_v63  ;;  %v5249_v2 = vstv %s5154_s19  ;;  %v5272_v52 = vstv %s5166_s15  ;;  %v5275_v15 = vstv %s5168_s26  ;;  %v5278_v63 = vstv %s5170_s30  ;;  %s5389_s19 = sld [smem:[#allocation12 + $0x53]]  ;;  %s5426_s15 = sld [smem:[#allocation12 + $0x8f]] }
 0x3ea   : > { %v5032_v56 = vsub.f32 %v1207_v18, %v1229_v58  ;;  %v5034_v28 = vsub.f32 %v1208_v50, %v1229_v58  ;;  %v5036_v45 = vsub.f32 %v1209_v40, %v1229_v58  ;;  %v1262_v44 = vadd.f32 %v1249_v61, %v1248_v14  ;;  %s5467_s26 = sld [smem:[#allocation12 + $0x11]] }
 0x3eb   : > { %v5281_v58 = vstv %s5172_s25  ;;  %v5292_v14 = vstv %s5174_s28  ;;  %v5295_v61 = vstv %s5176_s17  ;;  %s5484_s30 = sld [smem:[#allocation12 + $0x61]]  ;;  %s5507_s28 = sld [smem:[#allocation12 + $0x4]] }
 0x3ec   : > { %v1263_v31 = vadd.f32 %v1262_v44, %v1250_v26  ;;  %v1251_v23 = vmul.f32 %v5032_v56, %v5032_v56  ;;  %v1252_v55 = vmul.f32 %v5034_v28, %v5034_v28  ;;  %v1253_v32 = vmul.f32 %v5036_v45, %v5036_v45  ;;  %s5486_s25 = sld [smem:[#allocation12 + $0x39]]  ;;  %s5509_s17 = sld [smem:[#allocation12 + $0x18]] }
 0x3ed   : > { %v5298_v26 = vstv %s5184_s10  ;;  %v5309_v44 = vstv %s8004_s21  ;;  %s5519_s10 = sld [smem:[#allocation12 + $0x40]]  ;;  %s5590_s21 = sld [smem:[#allocation12 + $0x2d]] }
 0x3ee   : > { %1264 = vadd.xlane.f32.xlu1 %v1263_v31  ;;  %v1266_v17 = vadd.f32 %v1252_v55, %v1251_v23 }
 0x3f0   : > { %v1267_v60 = vadd.f32 %v1266_v17, %v1253_v32  ;;  %v5321_v32 = vstv %s5200_s18  ;;  %s5517_s18 = sld [smem:[#allocation12 + $0x2c]] }
 0x3f2   : > { %1268 = vadd.xlane.f32.xlu0 %v1267_v60 }
 0x475   : > { %v1261_v46 = vpop.xlane.xlu0 %1260 }
 0x476   : > { %v1257_v54 = vpop.xlane.xlu1 %1256  ;;  %v1271_v3 = vmul.f32 0.0026041667, %v1261_v46 }
 0x477   : > { %v1270_v39 = vmul.f32 0.0026041667, %v1257_v54 }
 0x478   : > { %v1275_v24 = vadd.f32 1e-05, %v1271_v3 }
 0x479   : > { %v1274_v48 = vadd.f32 1e-05, %v1270_v39 }
 0x47b   : > { %3617 = vrsqrt.f32 %v1274_v48  ;;  %v1265_v19 = vpop.xlane.xlu1 %1264 }
 0x47c   : > { %3619 = vrsqrt.f32 %v1275_v24  ;;  %v1272_v29 = vmul.f32 0.0026041667, %v1265_v19 }
 0x47e   : > { %v1276_v18 = vadd.f32 1e-05, %v1272_v29 }
 0x47f   : > { %v1269_v40 = vpop.xlane.xlu0 %1268 }
 0x480   : > { %3621 = vrsqrt.f32 %v1276_v18  ;;  %v1273_v53 = vmul.f32 0.0026041667, %v1269_v40 }
 0x482   : > { %v1277_v13 = vadd.f32 1e-05, %v1273_v53 }
 0x484   : > { %3623 = vrsqrt.f32 %v1277_v13  ;;  %v5403_v13 = vstv %s5267_s14  ;;  %s5588_s14 = sld [smem:[#allocation12 + $0x19]] }
 0x485   : > { %v3618_v7 = vpop.eup %3617 }
 0x486   : > { %v5044_v41 = vmul.f32 %v3618_v7, %v1230_v49  ;;  %v5046_v37 = vmul.f32 %v3618_v7, %v1231_v36  ;;  %v5052_v12 = vmul.f32 %v3618_v7, %v1232_v47  ;;  %v3620_v62 = vpop.eup %3619  ;;  %v5206_v49 = vstv %s5128_s27  ;;  %s5237_s27 = sld [smem:[#allocation12 + $0x1]] }
 0x487   : > { %v5071_v22 = vmul.f32 %v3620_v62, %v5008_v57  ;;  %v5078_v38 = vmul.f32 %v3620_v62, %v5012_v34  ;;  %v5085_v50 = vmul.f32 %v3620_v62, %v5010_v4  ;;  %v5193_v4 = vstv %s5124_s7  ;;  %s5211_s7 = sld [smem:[#allocation12 + $0x78]] }
 0x488   : > { %1294 = vrot.lane.b32.xlu1 %v5044_v41, %s7925_s0  ;;  %1296 = vrot.lane.b32.xlu0 %v5046_v37, %s7925_s0  ;;  %v5203_v34 = vstv %s5126_s24  ;;  %v5209_v36 = vstv %s5130_s8  ;;  %s5229_s24 = sld [smem:[#allocation12 + $0x8c]]  ;;  %s5254_s8 = sld [smem:[#allocation12 + $0x15]]  ;;  %v5349_v48 = vmul.f32 %v5193_v4, %v5052_v12  ;;  %v5365_v3 = vmul.f32 %v5206_v49, %v5052_v12 }
 0x489   : > { %v5214_v47 = vstv %s5132_s13  ;;  %s5256_s13 = sld [smem:[#allocation12 + $0x29]]  ;;  %v5328_v60 = vmul.f32 %v5232_v20, %v5078_v38  ;;  %v5332_v54 = vmul.f32 %v5235_v0, %v5078_v38  ;;  %v5355_v46 = vmul.f32 %v5203_v34, %v5052_v12 }
 0x48a   : > { %v3622_v51 = vpop.eup %3621  ;;  %v5359_v7 = vmul.f32 %v5243_v6, %v5078_v38  ;;  %v5371_v24 = vmul.f32 %v5209_v36, %v5052_v12  ;;  %v5375_v62 = vmul.f32 %v5214_v47, %v5052_v12  ;;  %v5379_v19 = vmul.f32 %v5217_v59, %v5052_v12 }
 0x48b   : > { %v5104_v10 = vmul.f32 %v3622_v51, %v5020_v43  ;;  %v5111_v30 = vmul.f32 %v3622_v51, %v5024_v16  ;;  %v5118_v33 = vmul.f32 %v3622_v51, %v5022_v21  ;;  %v5259_v43 = vstv %s5156_s23  ;;  %8006 = vst [vmem:[#allocation47_spill] sm:$0xff] %v5328_v60  ;;  %8007 = vst [vmem:[#allocation48_spill] sm:$0xff] %v5332_v54  ;;  %s5408_s23 = sld [smem:[#allocation12 + $0x67]] }
 0x48c   : > { %1298 = vrot.lane.b32.xlu1 %v5052_v12, %s7925_s0  ;;  %1308 = vrot.lane.b32.xlu0 %v5046_v37, %s7926_s1  ;;  %v5262_v21 = vstv %s5158_s12  ;;  %v5265_v16 = vstv %s5164_s22  ;;  %8010 = vst [vmem:[#allocation50_spill] sm:$0xff] %v5359_v7  ;;  %8011 = vst [vmem:[#allocation33_spill] sm:$0xff] %v5379_v19  ;;  %v5393_v51 = vmul.f32 %v5220_v35, %v5052_v12  ;;  %s5410_s12 = sld [smem:[#allocation12 + $0x7b]]  ;;  %s8015_s22 = smov 127  }
 0x48d   : > { %v5324_v17 = vstv %s5211_s7  ;;  %v5382_v29 = vstv %s5237_s27  ;;  %v5397_v40 = vmul.f32 %v5223_v27, %v5052_v12  ;;  %v5414_v7 = vmul.f32 %v5193_v4, %v5044_v41  ;;  %s5537_s7 = sld [smem:[#allocation12 + $0x68]] }
 0x48e   : > { %v3624_v57 = vpop.eup %3623  ;;  %v5345_v39 = vstv %s5229_s24  ;;  %v5385_v18 = vstv %s5254_s8  ;;  %8012 = vst [vmem:[#allocation34_spill] sm:$0xff] %v5393_v51  ;;  %v5430_v54 = vmul.f32 %v5193_v4, %v5046_v37  ;;  %v5434_v60 = vmul.f32 %v5203_v34, %v5044_v41  ;;  %s5553_s24 = sld [smem:[#allocation12 + $0x7c]]  ;;  %s5555_s27 = sld [smem:[#allocation12 + $0x90]] }
 0x48f   : > { %v5196_v42 = vmul.f32 %v3624_v57, %v5032_v56  ;;  %v5252_v25 = vmul.f32 %v3624_v57, %v5036_v45  ;;  %v5301_v56 = vstv %s5186_s20  ;;  %v5304_v45 = vstv %s5188_s29  ;;  %s5338_s29 = sld [smem:[#allocation12 + $0x25]]  ;;  %8013 = vst [vmem:[#allocation35_spill] sm:$0xff] %v5397_v40  ;;  %8014 = vst [vmem:[#allocation41_spill] sm:$0xff] %v5414_v7  ;;  %s5535_s20 = sld [smem:[#allocation12 + $0x54]] }
 0x490   : > { %1306 = vrot.lane.b32.xlu1 %v5044_v41, %s7926_s1  ;;  %1318 = vrot.lane.b32.xlu0 %v5044_v41, %s7927_s2  ;;  %v5312_v31 = vmul.f32 %v3624_v57, %v5034_v28  ;;  %v5336_v28 = vmul.f32 %v5240_v11, %v5078_v38  ;;  %v5400_v53 = vstv %s5256_s13  ;;  %v5406_v57 = vstv %s5269_s16  ;;  %8016 = vst [vmem:[#allocation36_spill] sm:$0xff] %v5430_v54  ;;  %s5572_s8 = sld [smem:[#allocation12 + $0x5]]  ;;  %s5586_s13 = sld [smem:[#allocation12 + $0x89]] }
 0x491   : > { %8003 = vst [vmem:[#allocation45_spill] sm:$0xff] %v5252_v25  ;;  %8017 = vst [vmem:[#allocation51_spill] sm:$0xff] %v5434_v60  ;;  %v5437_v7 = vstv %s5306_s6  ;;  %v5441_v40 = vmul.f32 %v5203_v34, %v5046_v37  ;;  %v5445_v51 = vmul.f32 %v5206_v49, %v5044_v41  ;;  %v5449_v19 = vmul.f32 %v5206_v49, %v5046_v37  ;;  %s5608_s16 = sld [smem:[#allocation12 + $0x41]]  ;;  %s5630_s6 = sld [smem:[#allocation12 + $0x7d]] }
 0x492   : > { %8005 = vst [vmem:[#allocation46_spill] sm:$0xff] %v5312_v31  ;;  %8008 = vst [vmem:[#allocation49_spill] sm:$0xff] %v5336_v28  ;;  %v5424_v28 = vstv %s5289_s5  ;;  %v5453_v4 = vmul.f32 %v5209_v36, %v5044_v41  ;;  %v5457_v54 = vmul.f32 %v5209_v36, %v5046_v37  ;;  %v5461_v34 = vmul.f32 %v5214_v47, %v5044_v41  ;;  %s5628_s5 = sld [smem:[#allocation12 + $0x69]] }
 0x493   : > { %8018 = vst [vmem:[#allocation52_spill] sm:$0xff] %v5441_v40  ;;  %8019 = vst [vmem:[#allocation53_spill] sm:$0xff] %v5445_v51  ;;  %v5465_v40 = vmul.f32 %v5214_v47, %v5046_v37  ;;  %v5471_v49 = vmul.f32 %v5217_v59, %v5044_v41  ;;  %v5475_v36 = vmul.f32 %v5217_v59, %v5046_v37 }
 0x494   : > { %1310 = vrot.lane.b32.xlu1 %v5052_v12, %s7926_s1  ;;  %1322 = vrot.lane.b32.xlu0 %v5052_v12, %s7927_s2  ;;  %8020 = vst [vmem:[#allocation54_spill] sm:$0xff] %v5449_v19  ;;  %8021 = vst [vmem:[#allocation37_spill] sm:$0xff] %v5453_v4  ;;  %v5497_v59 = vmul.f32 %v5220_v35, %v5046_v37  ;;  %v5614_v4 = vmul.f32 %v5235_v0, %v5071_v22 }
 0x495   : > { %8022 = vst [vmem:[#allocation42_spill] sm:$0xff] %v5457_v54  ;;  %8023 = vst [vmem:[#allocation38_spill] sm:$0xff] %v5461_v34  ;;  %v5479_v54 = vmul.f32 %v5220_v35, %v5044_v41  ;;  %v5482_v19 = vstv %s5338_s29  ;;  %v5530_v35 = vstv %s5387_s11  ;;  %v5563_v34 = vmul.f32 %v5235_v0, %v5085_v50  ;;  %s5647_s29 = sld [smem:[#allocation12 + $0x91]]  ;;  %s5689_s11 = sld [smem:[#allocation12 + $0x2e]] }
 0x496   : > { %8024 = vst [vmem:[#allocation43_spill] sm:$0xff] %v5465_v40  ;;  %8025 = vst [vmem:[#allocation39_spill] sm:$0xff] %v5471_v49  ;;  %v5505_v40 = vmul.f32 %v5223_v27, %v5046_v37  ;;  %v5515_v49 = vstv %s5367_s9  ;;  %v5634_v0 = vmul.f32 %v5249_v2, %v5071_v22  ;;  %s5687_s9 = sld [smem:[#allocation12 + $0x1a]] }
 0x497   : > { %8026 = vst [vmem:[#allocation44_spill] sm:$0xff] %v5475_v36  ;;  %8027 = vst [vmem:[#allocation40_spill] sm:$0xff] %v5479_v54  ;;  %v5501_v36 = vmul.f32 %v5223_v27, %v5044_v41  ;;  %v5533_v27 = vstv %s5389_s19  ;;  %s5707_s19 = sld [smem:[#allocation12 + $0x42]] }
 0x498   : > { %1320 = vrot.lane.b32.xlu1 %v5046_v37, %s7927_s2  ;;  %1332 = vrot.lane.b32.xlu0 %v5046_v37, %s7928_s3  ;;  %8028 = vst [vmem:[#allocation55_spill] sm:$0xff] %v5497_v59  ;;  %8030 = vst [vmem:[#allocation57_spill] sm:$0xff] %v5505_v40  ;;  %v5527_v37 = vmul.f32 %v5249_v2, %v5078_v38  ;;  %v5541_v40 = vmul.f32 %v5259_v43, %v5078_v38  ;;  %v5548_v59 = vstv %s5408_s23  ;;  %s5709_s23 = sld [smem:[#allocation12 + $0x56]] }
 0x499   : > { %8029 = vst [vmem:[#allocation56_spill] sm:$0xff] %v5501_v36  ;;  %8031 = vst [vmem:[#allocation58_spill] sm:$0xff] %v5515_v49  ;;  %v5551_v36 = vstv %s5410_s12  ;;  %s5729_s12 = sld [smem:[#allocation12 + $0x6a]] }
 0x49a   : > { %8033 = vst [vmem:[#allocation60_spill] sm:$0xff] %v5527_v37  ;;  %8034 = vst [vmem:[#allocation61_spill] sm:$0xff] %v5530_v35  ;;  %v5559_v37 = vmul.f32 %v5232_v20, %v5085_v50 }
 0x49b   : > { %8035 = vst [vmem:[#allocation62_spill] sm:$0xff] %v5533_v27  ;;  %8036 = vst [vmem:[#allocation64_spill] sm:$0xff] %v5541_v40  ;;  %v5594_v40 = vmul.f32 %v5249_v2, %v5085_v50  ;;  %v5655_v2 = vmul.f32 %v5272_v52, %v5111_v30 }
 0x49c   : > { %1330 = vrot.lane.b32.xlu1 %v5044_v41, %s7928_s3  ;;  %1662 = vrot.lane.b32.xlu0 %v5071_v22, %s7925_s0  ;;  %v5523_v41 = vmul.f32 %v5246_v1, %v5078_v38  ;;  %8038 = vst [vmem:[#allocation66_spill] sm:$0xff] %v5548_v59  ;;  %8039 = vst [vmem:[#allocation67_spill] sm:$0xff] %v5551_v36 }
 0x49d   : > { %8040 = vst [vmem:[#allocation68_spill] sm:$0xff] %v5559_v37  ;;  %8041 = vst [vmem:[#allocation69_spill] sm:$0xff] %v5563_v34  ;;  %v5580_v37 = vmul.f32 %v5243_v6, %v5085_v50  ;;  %v5584_v34 = vmul.f32 %v5246_v1, %v5085_v50 }
 0x49e   : > { %8032 = vst [vmem:[#allocation59_spill] sm:$0xff] %v5523_v41  ;;  %v5545_v41 = vmul.f32 %v5262_v21, %v5078_v38  ;;  %8046 = vst [vmem:[#allocation74_spill] sm:$0xff] %v5594_v40  ;;  %v5618_v40 = vmul.f32 %v5240_v11, %v5071_v22 }
 0x49f   : > { %8044 = vst [vmem:[#allocation72_spill] sm:$0xff] %v5580_v37  ;;  %8045 = vst [vmem:[#allocation73_spill] sm:$0xff] %v5584_v34  ;;  %v5602_v37 = vmul.f32 %v5262_v21, %v5085_v50  ;;  %v5606_v34 = vmul.f32 %v5232_v20, %v5071_v22  ;;  %v5626_v20 = vmul.f32 %v5246_v1, %v5071_v22 }
 0x4a0   : > { %1334 = vrot.lane.b32.xlu1 %v5052_v12, %s7928_s3  ;;  %1666 = vrot.lane.b32.xlu0 %v5078_v38, %s7925_s0  ;;  %v5421_v12 = vstv %s5287_s4  ;;  %8037 = vst [vmem:[#allocation65_spill] sm:$0xff] %v5545_v41  ;;  %v5576_v41 = vmul.f32 %v5240_v11, %v5085_v50  ;;  %s5610_s4 = sld [smem:[#allocation12 + $0x55]]  ;;  %8050 = vst [vmem:[#allocation78_spill] sm:$0xff] %v5614_v4  ;;  %v5638_v11 = vmul.f32 %v5259_v43, %v5071_v22 }
 0x4a1   : > { %8048 = vst [vmem:[#allocation76_spill] sm:$0xff] %v5602_v37  ;;  %8049 = vst [vmem:[#allocation77_spill] sm:$0xff] %v5606_v34  ;;  %v2463_v37 = vstv %s5467_s26  ;;  %v5651_v1 = vmul.f32 %v5265_v16, %v5111_v30  ;;  %s5763_s26 = sld [smem:[#allocation12 + $0x8]]  ;;  %v5948_v4 = vstv %s5709_s23  ;;  %s6021_s23 = sld [smem:[#allocation12 + $0x47]] }
 0x4a2   : > { %8043 = vst [vmem:[#allocation71_spill] sm:$0xff] %v5576_v41  ;;  %v5598_v41 = vmul.f32 %v5259_v43, %v5085_v50  ;;  %8051 = vst [vmem:[#allocation79_spill] sm:$0xff] %v5618_v40  ;;  %v5659_v43 = vmul.f32 %v5275_v15, %v5111_v30  ;;  %v5945_v40 = vstv %s5707_s19  ;;  %s6019_s19 = sld [smem:[#allocation12 + $0x33]] }
 0x4a3   : > { %8053 = vst [vmem:[#allocation81_spill] sm:$0xff] %v5626_v20  ;;  %8054 = vst [vmem:[#allocation82_spill] sm:$0xff] %v5634_v0 }
 0x4a4   : > { %1664 = vrot.lane.b32.xlu1 %v5085_v50, %s7925_s0  ;;  %1676 = vrot.lane.b32.xlu0 %v5085_v50, %s7926_s1  ;;  %8047 = vst [vmem:[#allocation75_spill] sm:$0xff] %v5598_v41  ;;  %8055 = vst [vmem:[#allocation83_spill] sm:$0xff] %v5638_v11  ;;  %v5900_v41 = vstv %s5647_s29 }
 0x4a5   : > { %8057 = vst [vmem:[#allocation85_spill] sm:$0xff] %v5651_v1  ;;  %8058 = vst [vmem:[#allocation86_spill] sm:$0xff] %v5655_v2  ;;  %v5675_v1 = vmul.f32 %v5292_v14, %v5111_v30  ;;  %v5679_v2 = vmul.f32 %v5295_v61, %v5111_v30 }
 0x4a6   : > { %8059 = vst [vmem:[#allocation87_spill] sm:$0xff] %v5659_v43  ;;  %v5683_v43 = vmul.f32 %v5309_v44, %v5111_v30  ;;  %8117 = vst [vmem:[#allocation144_spill] sm:$0xff] %v5900_v41 }
 0x4a7   : > { %8062 = vst [vmem:[#allocation90_spill] sm:$0xff] %v5675_v1  ;;  %8063 = vst [vmem:[#allocation91_spill] sm:$0xff] %v5679_v2  ;;  %v5697_v1 = vmul.f32 %v5265_v16, %v5118_v33  ;;  %v5701_v2 = vmul.f32 %v5272_v52, %v5104_v10 }
 0x4a8   : > { %1674 = vrot.lane.b32.xlu1 %v5071_v22, %s7926_s1  ;;  %1686 = vrot.lane.b32.xlu0 %v5071_v22, %s7927_s2  ;;  %8064 = vst [vmem:[#allocation92_spill] sm:$0xff] %v5683_v43  ;;  %8134 = vst [vmem:[#allocation155_spill] sm:$0xff] %v5945_v40 }
 0x4a9   : > { %8066 = vst [vmem:[#allocation94_spill] sm:$0xff] %v5697_v1  ;;  %8067 = vst [vmem:[#allocation95_spill] sm:$0xff] %v5701_v2  ;;  %v5721_v2 = vmul.f32 %v5278_v63, %v5104_v10  ;;  %v5880_v1 = vstv %s5608_s16  ;;  %s5925_s16 = sld [smem:[#allocation12 + $0x5a]] }
 0x4aa   : > { %8112 = vst [vmem:[#allocation139_spill] sm:$0xff] %v5880_v1  ;;  %8135 = vst [vmem:[#allocation156_spill] sm:$0xff] %v5948_v4 }
 0x4ab   : > { %8071 = vst [vmem:[#allocation99_spill] sm:$0xff] %v5721_v2  ;;  %v5743_v2 = vmul.f32 %v5292_v14, %v5104_v10 }
 0x4ac   : > { %1678 = vrot.lane.b32.xlu1 %v5078_v38, %s7926_s1  ;;  %1690 = vrot.lane.b32.xlu0 %v5078_v38, %s7927_s2 }
 0x4ad   : > { %8076 = vst [vmem:[#allocation103_spill] sm:$0xff] %v5743_v2 }
 0x4b0   : > { %1688 = vrot.lane.b32.xlu1 %v5085_v50, %s7927_s2  ;;  %1700 = vrot.lane.b32.xlu0 %v5085_v50, %s7928_s3  ;;  %v5622_v50 = vmul.f32 %v5243_v6, %v5071_v22  ;;  %v5642_v6 = vmul.f32 %v5262_v21, %v5071_v22  ;;  %v5671_v21 = vmul.f32 %v5281_v58, %v5111_v30 }
 0x4b2   : > { %8052 = vst [vmem:[#allocation80_spill] sm:$0xff] %v5622_v50  ;;  %8056 = vst [vmem:[#allocation84_spill] sm:$0xff] %v5642_v6  ;;  %v5891_v6 = vstv %s5610_s4  ;;  %s5927_s4 = sld [smem:[#allocation12 + $0x6e]]  ;;  %v5942_v50 = vstv %s5689_s11  ;;  %s6005_s11 = sld [smem:[#allocation12 + $0x1f]] }
 0x4b3   : > { %8061 = vst [vmem:[#allocation89_spill] sm:$0xff] %v5671_v21  ;;  %v5693_v21 = vmul.f32 %v5265_v16, %v5104_v10  ;;  %v5717_v16 = vmul.f32 %v5275_v15, %v5118_v33  ;;  %8114 = vst [vmem:[#allocation141_spill] sm:$0xff] %v5891_v6 }
 0x4b4   : > { %1698 = vrot.lane.b32.xlu1 %v5071_v22, %s7928_s3  ;;  %2030 = vrot.lane.b32.xlu0 %v5104_v10, %s7925_s0  ;;  %v5663_v22 = vmul.f32 %v5278_v63, %v5111_v30  ;;  %8132 = vst [vmem:[#allocation154_spill] sm:$0xff] %v5942_v50 }
 0x4b5   : > { %8065 = vst [vmem:[#allocation93_spill] sm:$0xff] %v5693_v21  ;;  %v5713_v21 = vmul.f32 %v5275_v15, %v5104_v10  ;;  %8070 = vst [vmem:[#allocation98_spill] sm:$0xff] %v5717_v16  ;;  %v5739_v15 = vmul.f32 %v5281_v58, %v5118_v33 }
 0x4b6   : > { %8060 = vst [vmem:[#allocation88_spill] sm:$0xff] %v5663_v22 }
 0x4b7   : > { %8069 = vst [vmem:[#allocation97_spill] sm:$0xff] %v5713_v21  ;;  %v5735_v21 = vmul.f32 %v5281_v58, %v5104_v10  ;;  %8075 = vst [vmem:[#allocation102_spill] sm:$0xff] %v5739_v15  ;;  %v2623_v58 = vstv %s5484_s30  ;;  %v2543_v15 = vstv %s5486_s25  ;;  %s5783_s30 = sld [smem:[#allocation12 + $0x30]]  ;;  %s5785_s25 = sld [smem:[#allocation12 + $0x44]] }
 0x4b8   : > { %1702 = vrot.lane.b32.xlu1 %v5078_v38, %s7928_s3  ;;  %2034 = vrot.lane.b32.xlu0 %v5111_v30, %s7925_s0  ;;  %v5570_v38 = vstv %s5426_s15  ;;  %s5761_s15 = sld [smem:[#allocation12 + $0x9d]]  ;;  %v6079_v1 = vstv %s6005_s11  ;;  %s7001_s11 = sld [smem:[#allocation12 + $0x10]] }
 0x4b9   : > { %8042 = vst [vmem:[#allocation70_spill] sm:$0xff] %v5570_v38  ;;  %8074 = vst [vmem:[#allocation101_spill] sm:$0xff] %v5735_v21  ;;  %v5757_v21 = vmul.f32 %v5295_v61, %v5118_v33 }
 0x4ba   : > { %8165 = vst [vmem:[#allocation186_spill] sm:$0xff] %v6079_v1 }
 0x4bb   : > { %8079 = vst [vmem:[#allocation106_spill] sm:$0xff] %v5757_v21  ;;  %v5781_v21 = vmul.f32 %v5482_v19, %v5312_v31 }
 0x4bc   : > { %2032 = vrot.lane.b32.xlu1 %v5118_v33, %s7925_s0  ;;  %2044 = vrot.lane.b32.xlu0 %v5118_v33, %s7926_s1 }
 0x4bd   : > { %8083 = vst [vmem:[#allocation110_spill] sm:$0xff] %v5781_v21  ;;  %8084 = sst [smem:[#allocation111_spill]] %s5783_s30  ;;  %v5798_v21 = vmul.f32 %v2463_v37, %v5252_v25  ;;  %s5800_s30 = sld [smem:[#allocation12 + $0x58]] }
 0x4be   : > { %8085 = sst [smem:[#allocation112_spill]] %s5785_s25  ;;  %v5920_v0 = vstv %s5761_s15  ;;  %s5952_s15 = sld [smem:[#allocation12 + $0x96]] }
 0x4bf   : > { %8089 = vst [vmem:[#allocation116_spill] sm:$0xff] %v5798_v21  ;;  %s5802_s25 = sld [smem:[#allocation12 + $0x6c]]  ;;  %v5817_v21 = vstv %s5507_s28  ;;  %s5842_s28 = sld [smem:[#allocation12 + $0x9]]  ;;  %8122 = vst [vmem:[#allocation148_spill] sm:$0xff] %v5920_v0 }
 0x4c0   : > { %2042 = vrot.lane.b32.xlu1 %v5104_v10, %s7926_s1  ;;  %2054 = vrot.lane.b32.xlu0 %v5104_v10, %s7927_s2  ;;  %8096 = vst [vmem:[#allocation123_spill] sm:$0xff] %v5817_v21 }
 0x4c3   : > { %8090 = sst [smem:[#allocation117_spill]] %s5800_s30  ;;  %s5819_s30 = sld [smem:[#allocation12 + $0x80]] }
 0x4c4   : > { %2046 = vrot.lane.b32.xlu1 %v5111_v30, %s7926_s1  ;;  %2058 = vrot.lane.b32.xlu0 %v5111_v30, %s7927_s2  ;;  %s5190_s1 = sld [smem:[#allocation12 + $0x3c]]  ;;  %s8128_s29 = sld [smem:[#allocation117_spill]] }
 0x4c5   : > { %8091 = sst [smem:[#allocation118_spill]] %s5802_s25  ;;  %s5821_s25 = sld [smem:[#allocation12 + $0x94]] }
 0x4c8   : > { %2056 = vrot.lane.b32.xlu1 %v5118_v33, %s7927_s2  ;;  %2068 = vrot.lane.b32.xlu0 %v5118_v33, %s7928_s3  ;;  %s5198_s2 = sld [smem:[#allocation12 + $0x50]] }
 0x4ca   : > { %v5315_v23 = vstv %s5190_s1  ;;  %s8009_s1 = smov 1  }
 0x4cb   : > { %8097 = sst [smem:[#allocation124_spill]] %s5821_s25  ;;  %s5844_s25 = sld [smem:[#allocation12 + $0x1d]] }
 0x4cc   : > { %2066 = vrot.lane.b32.xlu1 %v5104_v10, %s7928_s3  ;;  %2398 = vrot.lane.b32.xlu0 %v5196_v42, %s7925_s0 }
 0x4ce   : > { %v5318_v55 = vstv %s5198_s2  ;;  %s5351_s2 = sld [smem:[#allocation12 + $0x3]] }
 0x4d0   : > { %2070 = vrot.lane.b32.xlu1 %v5111_v30, %s7928_s3  ;;  %2402 = vrot.lane.b32.xlu0 %v5252_v25, %s7925_s0  ;;  %v5705_v30 = vmul.f32 %v5272_v52, %v5118_v33  ;;  %v5725_v52 = vmul.f32 %v5278_v63, %v5118_v33  ;;  %v5747_v63 = vmul.f32 %v5292_v14, %v5118_v33 }
 0x4d1   : > { %v5769_v14 = vmul.f32 %v5309_v44, %v5104_v10 }
 0x4d2   : > { %8068 = vst [vmem:[#allocation96_spill] sm:$0xff] %v5705_v30  ;;  %8072 = vst [vmem:[#allocation100_spill] sm:$0xff] %v5725_v52  ;;  %v5753_v52 = vmul.f32 %v5295_v61, %v5104_v10  ;;  %v5777_v61 = vmul.f32 %v5482_v19, %v5196_v42  ;;  %v5789_v10 = vmul.f32 %v5482_v19, %v5252_v25  ;;  %v5877_v30 = vstv %s5590_s21 }
 0x4d3   : > { %8077 = vst [vmem:[#allocation104_spill] sm:$0xff] %v5747_v63  ;;  %8080 = vst [vmem:[#allocation107_spill] sm:$0xff] %v5769_v14  ;;  %v5805_v19 = vmul.f32 %v2623_v58, %v5196_v42  ;;  %v5863_v14 = vstv %s5588_s14  ;;  %s5908_s14 = sld [smem:[#allocation12 + $0x46]] }
 0x4d4   : > { %2400 = vrot.lane.b32.xlu1 %v5312_v31, %s7925_s0  ;;  %2412 = vrot.lane.b32.xlu0 %v5312_v31, %s8009_s1  ;;  %s5361_s0 = sld [smem:[#allocation12 + $0x17]]  ;;  %v5493_v47 = vstv %s5351_s2  ;;  %s5667_s2 = sld [smem:[#allocation12 + $0x6]]  ;;  %8078 = vst [vmem:[#allocation105_spill] sm:$0xff] %v5753_v52  ;;  %v5773_v52 = vmul.f32 %v5309_v44, %v5118_v33  ;;  %8082 = vst [vmem:[#allocation109_spill] sm:$0xff] %v5777_v61  ;;  %v5792_v33 = vmul.f32 %v2463_v37, %v5196_v42 }
 0x4d5   : > { %8086 = vst [vmem:[#allocation113_spill] sm:$0xff] %v5789_v10  ;;  %v5795_v44 = vmul.f32 %v2463_v37, %v5312_v31  ;;  %8092 = vst [vmem:[#allocation119_spill] sm:$0xff] %v5805_v19  ;;  %v5808_v10 = vmul.f32 %v2623_v58, %v5312_v31  ;;  %v5814_v37 = vmul.f32 %v2543_v15, %v5196_v42  ;;  %v5840_v61 = vstv %s5535_s20  ;;  %s5867_s20 = sld [smem:[#allocation12 + $0x6d]] }
 0x4d6   : > { %8081 = vst [vmem:[#allocation108_spill] sm:$0xff] %v5773_v52  ;;  %8087 = vst [vmem:[#allocation114_spill] sm:$0xff] %v5792_v33  ;;  %v5811_v33 = vmul.f32 %v2623_v58, %v5252_v25  ;;  %v5824_v19 = vmul.f32 %v2543_v15, %v5312_v31  ;;  %v2703_v58 = vstv %s5586_s13  ;;  %v5856_v52 = vstv %s5572_s8  ;;  %s5904_s8 = sld [smem:[#allocation12 + $0x1e]]  ;;  %s5906_s13 = sld [smem:[#allocation12 + $0x32]] }
 0x4d7   : > { %8088 = vst [vmem:[#allocation115_spill] sm:$0xff] %v5795_v44  ;;  %8093 = vst [vmem:[#allocation120_spill] sm:$0xff] %v5808_v10  ;;  %v5827_v10 = vmul.f32 %v2543_v15, %v5252_v25  ;;  %v5834_v44 = vstv %s5517_s18  ;;  %v5850_v15 = vstv %s5553_s24  ;;  %s5860_s18 = sld [smem:[#allocation12 + $0x45]]  ;;  %v5870_v63 = vmul.f32 %v2703_v58, %v5196_v42 }
 0x4d8   : > { %2410 = vrot.lane.b32.xlu1 %v5196_v42, %s8009_s1  ;;  %2422 = vrot.lane.b32.xlu0 %v5196_v42, %s8015_s22  ;;  %8094 = vst [vmem:[#allocation121_spill] sm:$0xff] %v5811_v33  ;;  %8095 = vst [vmem:[#allocation122_spill] sm:$0xff] %v5814_v37  ;;  %v5831_v33 = vstv %s5509_s17  ;;  %v5837_v37 = vstv %s5519_s10  ;;  %s5858_s17 = sld [smem:[#allocation12 + $0x31]]  ;;  %v5873_v2 = vmul.f32 %v2703_v58, %v5312_v31  ;;  %s5884_s24 = sld [smem:[#allocation12 + $0x95]] }
 0x4d9   : > { %8098 = vst [vmem:[#allocation125_spill] sm:$0xff] %v5824_v19  ;;  %8099 = vst [vmem:[#allocation126_spill] sm:$0xff] %v5827_v10  ;;  %v5847_v19 = vstv %s5537_s7  ;;  %v5853_v10 = vstv %s5555_s27  ;;  %s5865_s10 = sld [smem:[#allocation12 + $0x59]]  ;;  %v5887_v43 = vmul.f32 %v2703_v58, %v5252_v25  ;;  %s5902_s27 = sld [smem:[#allocation12 + $0xa]] }
 0x4da   : > { %v5512_v54 = vstv %s5361_s0  ;;  %s5685_s0 = sld [smem:[#allocation12 + $0x75]]  ;;  %8100 = vst [vmem:[#allocation127_spill] sm:$0xff] %v5831_v33  ;;  %8101 = vst [vmem:[#allocation128_spill] sm:$0xff] %v5834_v44  ;;  %s5882_s7 = sld [smem:[#allocation12 + $0x81]]  ;;  %v5923_v20 = vstv %s5667_s2 }
 0x4db   : > { %8102 = vst [vmem:[#allocation129_spill] sm:$0xff] %v5837_v37  ;;  %8103 = vst [vmem:[#allocation130_spill] sm:$0xff] %v5840_v61  ;;  %s8133_s2 = sld [smem:[#allocation124_spill]] }
 0x4dc   : > { %2414 = vrot.lane.b32.xlu1 %v5252_v25, %s8009_s1  ;;  %2426 = vrot.lane.b32.xlu0 %v5252_v25, %s8015_s22  ;;  %s5665_s1 = sld [smem:[#allocation12 + $0x4d]]  ;;  %8104 = vst [vmem:[#allocation131_spill] sm:$0xff] %v5847_v19  ;;  %8105 = vst [vmem:[#allocation132_spill] sm:$0xff] %v5850_v15 }
 0x4dd   : > { %8106 = vst [vmem:[#allocation133_spill] sm:$0xff] %v5853_v10  ;;  %8107 = vst [vmem:[#allocation134_spill] sm:$0xff] %v5856_v52 }
 0x4de   : > { %8108 = vst [vmem:[#allocation135_spill] sm:$0xff] %v5863_v14  ;;  %8109 = vst [vmem:[#allocation136_spill] sm:$0xff] %v5870_v63  ;;  %v5894_v63 = vstv %s5628_s5  ;;  %s8124_s5 = sld [smem:[#allocation111_spill]]  ;;  %v6084_v14 = vstv %s6019_s19  ;;  %s7015_s19 = sld [smem:[#allocation12 + $0x24]] }
 0x4df   : > { %8110 = vst [vmem:[#allocation137_spill] sm:$0xff] %v5873_v2  ;;  %8111 = vst [vmem:[#allocation138_spill] sm:$0xff] %v5877_v30  ;;  %v5897_v2 = vstv %s5630_s6  ;;  %s8126_s6 = sld [smem:[#allocation112_spill]] }
 0x4e0   : > { %2424 = vrot.lane.b32.xlu1 %v5312_v31, %s8015_s22  ;;  %2436 = vrot.lane.b32.xlu0 %v5312_v31, %s7928_s3  ;;  %s5731_s22 = sld [smem:[#allocation12 + $0x7e]]  ;;  %8113 = vst [vmem:[#allocation140_spill] sm:$0xff] %v5887_v43  ;;  %v2663_v22 = vstv %s5685_s0  ;;  %8115 = vst [vmem:[#allocation142_spill] sm:$0xff] %v5894_v63  ;;  %s5950_s0 = sld [smem:[#allocation12 + $0x82]] }
 0x4e1   : > { %8116 = vst [vmem:[#allocation143_spill] sm:$0xff] %v5897_v2  ;;  %8123 = vst [vmem:[#allocation149_spill] sm:$0xff] %v5923_v20 }
 0x4e2   : > { %v2583_v16 = vstv %s5665_s1  ;;  %s8130_s1 = sld [smem:[#allocation118_spill]]  ;;  %8166 = vst [vmem:[#allocation187_spill] sm:$0xff] %v6084_v14 }
 0x4e3   : > { %v5911_v58 = vmul.f32 %v2583_v16, %v5196_v42  ;;  %v5914_v43 = vmul.f32 %v2583_v16, %v5312_v31  ;;  %v5917_v11 = vmul.f32 %v2583_v16, %v5252_v25  ;;  %v5936_v16 = vmul.f32 %v2663_v22, %v5252_v25 }
 0x4e4   : > { %2434 = vrot.lane.b32.xlu1 %v5196_v42, %s7928_s3  ;;  %v5974_v34 = vstv %s8124_s5  ;;  %s6901_s5 = sld [smem:[#allocation12 + $0xf]] }
 0x4e5   : > { %8118 = vst [vmem:[#allocation145_spill] sm:$0xff] %v5911_v58  ;;  %8119 = vst [vmem:[#allocation146_spill] sm:$0xff] %v5914_v43  ;;  %v5930_v58 = vmul.f32 %v2663_v22, %v5196_v42  ;;  %v5933_v43 = vmul.f32 %v2663_v22, %v5312_v31  ;;  %v5955_v22 = vstv %s5729_s12  ;;  %v5977_v4 = vstv %s8126_s6  ;;  %s6053_s12 = sld [smem:[#allocation12 + $0x5b]] }
 0x4e6   : > { %8073 = sst [smem:[#allocation63_spill]] %s5731_s22  ;;  %s5765_s22 = sld [smem:[#allocation12 + $0x1c]]  ;;  %8121 = vst [vmem:[#allocation147_spill] sm:$0xff] %v5917_v11  ;;  %8129 = vst [vmem:[#allocation152_spill] sm:$0xff] %v5936_v16  ;;  %v5939_v11 = vstv %s5687_s9  ;;  %v5965_v16 = vmul.f32 %v5920_v0, %v5196_v42  ;;  %v5989_v42 = vstv %s8133_s2  ;;  %v5995_v0 = vstv %s5844_s25 }
 0x4e7   : > { %s8120_s21 = sld [smem:[#allocation63_spill]]  ;;  %8125 = vst [vmem:[#allocation150_spill] sm:$0xff] %v5930_v58  ;;  %8127 = vst [vmem:[#allocation151_spill] sm:$0xff] %v5933_v43  ;;  %v5968_v43 = vstv %s5763_s26  ;;  %s6003_s9 = sld [smem:[#allocation12 + $0xb]] }
 0x4e8   : > { %2438 = vrot.lane.b32.xlu1 %v5252_v25, %s7928_s3  ;;  %s5749_s3 = sld [smem:[#allocation12 + $0x92]]  ;;  %8131 = vst [vmem:[#allocation153_spill] sm:$0xff] %v5939_v11  ;;  %8136 = vst [vmem:[#allocation157_spill] sm:$0xff] %v5955_v22  ;;  %v5980_v22 = vstv %s8128_s29  ;;  %v6048_v11 = vstv %s5950_s0  ;;  %s6063_s26 = sld [smem:[#allocation12 + $0x97]] }
 0x4e9   : > { %8139 = vst [vmem:[#allocation160_spill] sm:$0xff] %v5965_v16  ;;  %8140 = vst [vmem:[#allocation161_spill] sm:$0xff] %v5968_v43  ;;  %v5992_v16 = vstv %s5842_s28  ;;  %v6037_v43 = vstv %s5908_s14  ;;  %s6730_s25 = sld [smem:[#allocation12 + $0x21]]  ;;  %s6736_s28 = sld [smem:[#allocation12 + $0x35]] }
 0x4ea   : > { %8142 = vst [vmem:[#allocation163_spill] sm:$0xff] %v5974_v34  ;;  %8143 = vst [vmem:[#allocation164_spill] sm:$0xff] %v5977_v4  ;;  %v5998_v34 = vstv %s5858_s17  ;;  %v6029_v4 = vstv %s5904_s8  ;;  %s6738_s17 = sld [smem:[#allocation12 + $0x49]]  ;;  %s6871_s8 = sld [smem:[#allocation12 + $0x36]] }
 0x4eb   : > { %8144 = vst [vmem:[#allocation165_spill] sm:$0xff] %v5980_v22  ;;  %8147 = vst [vmem:[#allocation168_spill] sm:$0xff] %v5989_v42  ;;  %v6026_v22 = vstv %s5902_s27  ;;  %v6122_v61 = vstv %s6053_s12  ;;  %s6861_s27 = sld [smem:[#allocation12 + $0x22]]  ;;  %s6881_s14 = sld [smem:[#allocation12 + $0x5e]] }
 0x4ec   : > { %v5971_v58 = vstv %s5765_s22  ;;  %8148 = vst [vmem:[#allocation169_spill] sm:$0xff] %v5992_v16  ;;  %8149 = vst [vmem:[#allocation170_spill] sm:$0xff] %v5995_v0  ;;  %v6011_v16 = vstv %s5867_s20  ;;  %v6014_v0 = vstv %s5882_s7  ;;  %s6055_s22 = sld [smem:[#allocation12 + $0x6f]]  ;;  %s6755_s20 = sld [smem:[#allocation12 + $0x85]] }
 0x4ed   : > { %v5958_v31 = vstv %s8120_s21  ;;  %8141 = vst [vmem:[#allocation162_spill] sm:$0xff] %v5971_v58  ;;  %8150 = vst [vmem:[#allocation171_spill] sm:$0xff] %v5998_v34  ;;  %v6001_v58 = vstv %s5860_s18  ;;  %v6017_v34 = vstv %s5884_s24  ;;  %v6076_v6 = vstv %s6003_s9  ;;  %s6741_s18 = sld [smem:[#allocation12 + $0x5d]]  ;;  %s6757_s7 = sld [smem:[#allocation12 + $0x99]] }
 0x4ee   : > { %8137 = vst [vmem:[#allocation158_spill] sm:$0xff] %v5958_v31  ;;  %v5961_v25 = vstv %s5749_s3  ;;  %v5983_v31 = vstv %s8130_s1  ;;  %8151 = vst [vmem:[#allocation172_spill] sm:$0xff] %v6001_v58  ;;  %s6061_s3 = sld [smem:[#allocation12 + $0x83]]  ;;  %s6859_s24 = sld [smem:[#allocation12 + $0xe]] }
 0x4ef   : > { %8138 = vst [vmem:[#allocation159_spill] sm:$0xff] %v5961_v25  ;;  %8145 = vst [vmem:[#allocation166_spill] sm:$0xff] %v5983_v31  ;;  %v5986_v25 = vstv %s5819_s30  ;;  %v6008_v31 = vstv %s5865_s10  ;;  %s6677_s30 = sld [smem:[#allocation12 + $0xd]]  ;;  %s6743_s10 = sld [smem:[#allocation12 + $0x71]] }
 0x4f0   : > { %8146 = vst [vmem:[#allocation167_spill] sm:$0xff] %v5986_v25  ;;  %8152 = vst [vmem:[#allocation173_spill] sm:$0xff] %v6008_v31  ;;  %v6032_v31 = vstv %s5906_s13  ;;  %s6873_s13 = sld [smem:[#allocation12 + $0x4a]]  ;;  %s6968_s6 = sld [smem:[#allocation12 + $0x23]] }
 0x4f1   : > { %8153 = vst [vmem:[#allocation174_spill] sm:$0xff] %v6011_v16  ;;  %8154 = vst [vmem:[#allocation175_spill] sm:$0xff] %v6014_v0  ;;  %v6040_v0 = vstv %s5925_s16  ;;  %s6883_s21 = sld [smem:[#allocation12 + $0x72]]  ;;  %s6891_s16 = sld [smem:[#allocation12 + $0x86]] }
 0x4f2   : > { %8155 = vst [vmem:[#allocation176_spill] sm:$0xff] %v6017_v34  ;;  %8156 = vst [vmem:[#allocation177_spill] sm:$0xff] %v6026_v22  ;;  %v6043_v34 = vstv %s5927_s4  ;;  %v6051_v22 = vstv %s5952_s15  ;;  %v6127_v44 = vstv %s6055_s22  ;;  %s6893_s4 = sld [smem:[#allocation12 + $0x9a]]  ;;  %s6978_s29 = sld [smem:[#allocation12 + $0x37]] }
 0x4f3   : > { %8157 = vst [vmem:[#allocation178_spill] sm:$0xff] %v6029_v4  ;;  %8158 = vst [vmem:[#allocation179_spill] sm:$0xff] %v6032_v31  ;;  %s6980_s1 = sld [smem:[#allocation12 + $0x4b]]  ;;  %s6984_s2 = sld [smem:[#allocation12 + $0x5f]] }
 0x4f4   : > { %8159 = vst [vmem:[#allocation180_spill] sm:$0xff] %v6037_v43  ;;  %8160 = vst [vmem:[#allocation181_spill] sm:$0xff] %v6040_v0  ;;  %v6130_v33 = vstv %s6061_s3  ;;  %s6986_s0 = sld [smem:[#allocation12 + $0x73]]  ;;  %s6988_s15 = sld [smem:[#allocation12 + $0x87]] }
 0x4f5   : > { %8161 = vst [vmem:[#allocation182_spill] sm:$0xff] %v6043_v34  ;;  %8162 = vst [vmem:[#allocation183_spill] sm:$0xff] %v6048_v11  ;;  %s6990_s9 = sld [smem:[#allocation12 + $0x9b]]  ;;  %s7080_s12 = sld [smem:[#allocation12 + $0x4c]] }
 0x4f6   : > { %8163 = vst [vmem:[#allocation184_spill] sm:$0xff] %v6051_v22  ;;  %8164 = vst [vmem:[#allocation185_spill] sm:$0xff] %v6076_v6  ;;  %s7094_s22 = sld [smem:[#allocation12 + $0x60]]  ;;  %s7096_s3 = sld [smem:[#allocation12 + $0x74]] }
 0x4f7   : > { %8168 = vst [vmem:[#allocation189_spill] sm:$0xff] %v6122_v61  ;;  %8169 = vst [vmem:[#allocation190_spill] sm:$0xff] %v6127_v44 }
 0x4f8   : > { %8170 = vst [vmem:[#allocation191_spill] sm:$0xff] %v6130_v33 }
 0x4fa   : > { %v1295_v25 = vpop.permute.xlu1 %1294  ;;  %v1297_v42 = vpop.permute.xlu0 %1296 }
 0x4fb   : > { %v1301_v58 = vsel %vm434_vm1, %v1295_v25, %v1297_v42 }
 0x4fc   : > { %v1304_v16 = vsel %vm413_vm3, %v1301_v58, 0.0 }
 0x4fd   : > { %v1345_v40 = vmul.f32 %v5298_v26, %v1304_v16  ;;  %v1385_v50 = vmul.f32 %v5301_v56, %v1304_v16  ;;  %v1425_v58 = vmul.f32 %v5304_v45, %v1304_v16  ;;  %v1465_v0 = vmul.f32 %v5315_v23, %v1304_v16 }
 0x4fe   : > { %v1505_v34 = vmul.f32 %v5318_v55, %v1304_v16  ;;  %v1545_v43 = vmul.f32 %v5321_v32, %v1304_v16  ;;  %v1299_v31 = vpop.permute.xlu1 %1298  ;;  %v1309_v11 = vpop.permute.xlu0 %1308  ;;  %v1585_v22 = vmul.f32 %v5324_v17, %v1304_v16  ;;  %v1625_v4 = vmul.f32 %v5345_v39, %v1304_v16 }
 0x4ff   : > { %v1300_v20 = vsel %vm434_vm1, %v1297_v42, %v1299_v31  ;;  %v1302_v41 = vsel %vm434_vm1, %v1299_v31, %v1295_v25  ;;  %v6087_v42 = vstv %s6021_s23  ;;  %s7078_s23 = sld [smem:[#allocation12 + $0x38]] }
 0x500   : > { %v1303_v2 = vsel %vm412_vm0, %v1302_v41, 0.0  ;;  %v1305_v63 = vsel %vm414_vm4, %v1300_v20, 0.0  ;;  %8167 = vst [vmem:[#allocation188_spill] sm:$0xff] %v6087_v42 }
 0x501   : > { %v1344_v30 = vmul.f32 %v5298_v26, %v1303_v2  ;;  %v1346_v16 = vmul.f32 %v5298_v26, %v1305_v63  ;;  %v1384_v25 = vmul.f32 %v5301_v56, %v1303_v2  ;;  %v1386_v31 = vmul.f32 %v5301_v56, %v1305_v63 }
 0x502   : > { %v1424_v41 = vmul.f32 %v5304_v45, %v1303_v2  ;;  %v1426_v20 = vmul.f32 %v5304_v45, %v1305_v63  ;;  %v1307_v6 = vpop.permute.xlu1 %1306  ;;  %v1319_v1 = vpop.permute.xlu0 %1318  ;;  %v1464_v52 = vmul.f32 %v5315_v23, %v1303_v2  ;;  %v1466_v26 = vmul.f32 %v5315_v23, %v1305_v63 }
 0x503   : > { %v6096_v42 = vmul.f32 %v5318_v55, %v1303_v2  ;;  %v6099_v14 = vmul.f32 %v5318_v55, %v1305_v63  ;;  %v6102_v56 = vmul.f32 %v5321_v32, %v1303_v2  ;;  %v6105_v45 = vmul.f32 %v5321_v32, %v1305_v63 }
 0x504   : > { %v6108_v10 = vmul.f32 %v5324_v17, %v1303_v2  ;;  %v6111_v15 = vmul.f32 %v5324_v17, %v1305_v63  ;;  %v6114_v23 = vmul.f32 %v5345_v39, %v1303_v2  ;;  %v6117_v19 = vmul.f32 %v5345_v39, %v1305_v63 }
 0x505   : > { %v1313_v55 = vsel %vm447_vm2, %v1307_v6, %v1309_v11  ;;  %v6133_v17 = vstv %s6063_s26  ;;  %s7110_s26 = sld [smem:[#allocation12 + $0x88]] }
 0x506   : > { %v1316_v32 = vsel %vm416_vm6, %v1313_v55, 0.0  ;;  %v1311_v37 = vpop.permute.xlu1 %1310  ;;  %8171 = vst [vmem:[#allocation192_spill] sm:$0xff] %v6133_v17  ;;  %v1323_v51 = vpop.permute.xlu0 %1322 }
 0x507   : > { %v1353_v2 = vmul.f32 %v5382_v29, %v1316_v32  ;;  %v1393_v39 = vmul.f32 %v5385_v18, %v1316_v32  ;;  %v1433_v63 = vmul.f32 %v5400_v53, %v1316_v32  ;;  %v1473_v21 = vmul.f32 %v5403_v13, %v1316_v32 }
 0x508   : > { %v1513_v61 = vmul.f32 %v5406_v57, %v1316_v32  ;;  %v1553_v8 = vmul.f32 %v5421_v12, %v1316_v32  ;;  %v1593_v55 = vmul.f32 %v5424_v28, %v1316_v32  ;;  %v1633_v44 = vmul.f32 %v5437_v7, %v1316_v32 }
 0x509   : > { %v6143_v33 = vadd.f32 %v1353_v2, %v1345_v40  ;;  %v6145_v17 = vadd.f32 %v1393_v39, %v1385_v50  ;;  %v6147_v60 = vadd.f32 %v1433_v63, %v1425_v58  ;;  %v6149_v38 = vadd.f32 %v1473_v21, %v1465_v0 }
 0x50a   : > { %v6151_v36 = vadd.f32 %v1513_v61, %v1505_v34  ;;  %v6153_v59 = vadd.f32 %v1553_v8, %v1545_v43  ;;  %v6155_v27 = vadd.f32 %v1593_v55, %v1585_v22  ;;  %v6157_v35 = vadd.f32 %v1633_v44, %v1625_v4  ;;  %v1321_v49 = vpop.permute.xlu1 %1320 }
 0x50b   : > { %v1312_v32 = vsel %vm447_vm2, %v1309_v11, %v1311_v37  ;;  %v1314_v40 = vsel %vm447_vm2, %v1311_v37, %v1307_v6  ;;  %v1326_v50 = vsel %vm418_vm8, %v1323_v51, %v1319_v1  ;;  %v6167_v34 = vsel %vm418_vm8, %v1321_v49, %v1323_v51 }
 0x50c   : > { %v1315_v8 = vsel %vm415_vm5, %v1314_v40, 0.0  ;;  %v1317_v4 = vsel %vm417_vm7, %v1312_v32, 0.0  ;;  %v1329_v0 = vsel %vm420_vm10, %v1326_v50, 0.0  ;;  %v6177_v11 = vsel %vm418_vm8, %v1319_v1, %v1321_v49 }
 0x50d   : > { %v1352_v6 = vmul.f32 %v5382_v29, %v1315_v8  ;;  %v1354_v43 = vmul.f32 %v5382_v29, %v1317_v4  ;;  %v1392_v51 = vmul.f32 %v5385_v18, %v1315_v8  ;;  %v1394_v21 = vmul.f32 %v5385_v18, %v1317_v4 }
 0x50e   : > { %v1432_v61 = vmul.f32 %v5400_v53, %v1315_v8  ;;  %v1434_v44 = vmul.f32 %v5400_v53, %v1317_v4  ;;  %v1472_v37 = vmul.f32 %v5403_v13, %v1315_v8  ;;  %v1474_v22 = vmul.f32 %v5403_v13, %v1317_v4 }
 0x50f   : > { %v1355_v58 = vadd.f32 %v1352_v6, %v1344_v30  ;;  %v1357_v2 = vadd.f32 %v1354_v43, %v1346_v16  ;;  %v1395_v49 = vadd.f32 %v1392_v51, %v1384_v25  ;;  %v1397_v1 = vadd.f32 %v1394_v21, %v1386_v31  ;;  %v8174_v6 = vld [vmem:[#allocation35_spill] sm:$0xff]  ;;  %v8175_v43 = vld [vmem:[#allocation58_spill] sm:$0xff]  ;;  %v8176_v51 = vld [vmem:[#allocation61_spill] sm:$0xff] }
 0x510   : > { %v1435_v39 = vadd.f32 %v1432_v61, %v1424_v41  ;;  %v1437_v63 = vadd.f32 %v1434_v44, %v1426_v20  ;;  %v1475_v55 = vadd.f32 %v1472_v37, %v1464_v52  ;;  %v1477_v29 = vadd.f32 %v1474_v22, %v1466_v26  ;;  %v8177_v21 = vld [vmem:[#allocation62_spill] sm:$0xff]  ;;  %v8178_v61 = vld [vmem:[#allocation66_spill] sm:$0xff] }
 0x511   : > { %v1512_v32 = vmul.f32 %v5406_v57, %v1315_v8  ;;  %v1514_v18 = vmul.f32 %v5406_v57, %v1317_v4  ;;  %v1552_v40 = vmul.f32 %v5421_v12, %v1315_v8  ;;  %v1554_v53 = vmul.f32 %v5421_v12, %v1317_v4  ;;  %v8179_v44 = vld [vmem:[#allocation67_spill] sm:$0xff]  ;;  %v8180_v37 = vld [vmem:[#allocation70_spill] sm:$0xff] }
 0x512   : > { %v1592_v50 = vmul.f32 %v5424_v28, %v1315_v8  ;;  %v1594_v13 = vmul.f32 %v5424_v28, %v1317_v4  ;;  %v1632_v30 = vmul.f32 %v5437_v7, %v1315_v8  ;;  %v1634_v16 = vmul.f32 %v5437_v7, %v1317_v4  ;;  %v8172_v8 = vld [vmem:[#allocation33_spill] sm:$0xff]  ;;  %v8173_v4 = vld [vmem:[#allocation34_spill] sm:$0xff] }
 0x513   : > { %v1515_v25 = vadd.f32 %v1512_v32, %v6096_v42  ;;  %v1517_v52 = vadd.f32 %v1514_v18, %v6099_v14  ;;  %v1555_v31 = vadd.f32 %v1552_v40, %v6102_v56  ;;  %v1557_v57 = vadd.f32 %v1554_v53, %v6105_v45 }
 0x514   : > { %v1595_v41 = vadd.f32 %v1592_v50, %v6108_v10  ;;  %v1597_v12 = vadd.f32 %v1594_v13, %v6111_v15  ;;  %v1635_v20 = vadd.f32 %v1632_v30, %v6114_v23  ;;  %v1637_v28 = vadd.f32 %v1634_v16, %v6117_v19  ;;  %v8181_v50 = vld [vmem:[#allocation41_spill] sm:$0xff]  ;;  %v8182_v30 = vld [vmem:[#allocation51_spill] sm:$0xff] }
 0x515   : > { %v1365_v26 = vadd.f32 %v5349_v48, %v1357_v2  ;;  %v1405_v7 = vadd.f32 %v5355_v46, %v1397_v1  ;;  %v1445_v42 = vadd.f32 %v5365_v3, %v1437_v63  ;;  %v1485_v14 = vadd.f32 %v5371_v24, %v1477_v29  ;;  %v8183_v16 = vld [vmem:[#allocation53_spill] sm:$0xff] }
 0x516   : > { %v1525_v56 = vadd.f32 %v5375_v62, %v1517_v52  ;;  %v1565_v45 = vadd.f32 %v8172_v8, %v1557_v57  ;;  %v1605_v10 = vadd.f32 %v8173_v4, %v1597_v12  ;;  %v1645_v15 = vadd.f32 %v8174_v6, %v1637_v28  ;;  %v8184_v57 = vld [vmem:[#allocation37_spill] sm:$0xff]  ;;  %v8185_v28 = vld [vmem:[#allocation38_spill] sm:$0xff]  ;;  %v8188_v8 = vld [vmem:[#allocation56_spill] sm:$0xff] }
 0x517   : > { %v1370_v23 = vmul.f32 %v5493_v47, %v1329_v0  ;;  %v1410_v19 = vmul.f32 %v5512_v54, %v1329_v0  ;;  %v1450_v48 = vmul.f32 %v8175_v43, %v1329_v0  ;;  %v1490_v46 = vmul.f32 %v8176_v51, %v1329_v0 }
 0x518   : > { %v1530_v3 = vmul.f32 %v8177_v21, %v1329_v0  ;;  %v1570_v24 = vmul.f32 %v8178_v61, %v1329_v0  ;;  %v1610_v62 = vmul.f32 %v8179_v44, %v1329_v0  ;;  %v1650_v22 = vmul.f32 %v8180_v37, %v1329_v0 }
 0x519   : > { %v6219_v2 = vadd.f32 %v1370_v23, %v1365_v26  ;;  %v6221_v1 = vadd.f32 %v1410_v19, %v1405_v7  ;;  %v6223_v63 = vadd.f32 %v1450_v48, %v1445_v42  ;;  %v6225_v29 = vadd.f32 %v1490_v46, %v1485_v14  ;;  %v8186_v7 = vld [vmem:[#allocation39_spill] sm:$0xff]  ;;  %v8187_v14 = vld [vmem:[#allocation40_spill] sm:$0xff] }
 0x51a   : > { %v6227_v32 = vadd.f32 %v1530_v3, %v1525_v56  ;;  %v6229_v18 = vadd.f32 %v1570_v24, %v1565_v45  ;;  %v6231_v40 = vadd.f32 %v1610_v62, %v1605_v10  ;;  %v6233_v53 = vadd.f32 %v1650_v22, %v1645_v15  ;;  %v1331_v15 = vpop.permute.xlu1 %1330  ;;  %v8195_v22 = vld [vmem:[#allocation43_spill] sm:$0xff] }
 0x51b   : > { %v1363_v13 = vadd.f32 %v8181_v50, %v1355_v58  ;;  %v1403_v0 = vadd.f32 %v8182_v30, %v1395_v49  ;;  %v1443_v52 = vadd.f32 %v8183_v16, %v1435_v39  ;;  %v1483_v12 = vadd.f32 %v8184_v57, %v1475_v55  ;;  %v8189_v58 = vld [vmem:[#allocation32_spill] sm:$0xff] }
 0x51c   : > { %v1523_v26 = vadd.f32 %v8185_v28, %v1515_v25  ;;  %v1563_v42 = vadd.f32 %v8186_v7, %v1555_v31  ;;  %v1603_v56 = vadd.f32 %v8187_v14, %v1595_v41  ;;  %v1643_v45 = vadd.f32 %v8188_v8, %v1635_v20  ;;  %v8191_v39 = vld [vmem:[#allocation36_spill] sm:$0xff] }
 0x51d   : > { %v1327_v4 = vsel %vm418_vm8, %v6177_v11, 0.0  ;;  %vm8190_vm12 = vcmp.lt.s32.totalorder %v8189_v58, 127  ;;  %v1364_v10 = vadd.f32 %v8191_v39, %v6143_v33  ;;  %v8192_v55 = vld [vmem:[#allocation52_spill] sm:$0xff]  ;;  %v8193_v11 = vld [vmem:[#allocation54_spill] sm:$0xff]  ;;  %v1524_v50 = vadd.f32 %v8195_v22, %v6151_v36 }
 0x51e   : > { %v1328_v49 = vsel %vm8190_vm12, %v6167_v34, 0.0  ;;  %v1404_v25 = vadd.f32 %v8192_v55, %v6145_v17  ;;  %v1368_v31 = vmul.f32 %v5493_v47, %v1327_v4  ;;  %v1408_v20 = vmul.f32 %v5512_v54, %v1327_v4  ;;  %v8194_v33 = vld [vmem:[#allocation42_spill] sm:$0xff]  ;;  %v1335_v39 = vpop.permute.xlu1 %1334 }
 0x51f   : > { %v1369_v41 = vmul.f32 %v5493_v47, %v1328_v49  ;;  %v1409_v6 = vmul.f32 %v5512_v54, %v1328_v49  ;;  %v1444_v23 = vadd.f32 %v8193_v11, %v6147_v60  ;;  %v1448_v34 = vmul.f32 %v8175_v43, %v1327_v4 }
 0x520   : > { %v1449_v19 = vmul.f32 %v8175_v43, %v1328_v49  ;;  %v1484_v48 = vadd.f32 %v8194_v33, %v6149_v38  ;;  %v1371_v17 = vadd.f32 %v1368_v31, %v1363_v13  ;;  %v1411_v3 = vadd.f32 %v1408_v20, %v1403_v0  ;;  %v8196_v13 = vld [vmem:[#allocation44_spill] sm:$0xff]  ;;  %v1333_v0 = vpop.permute.xlu0 %1332 }
 0x521   : > { %v6263_v46 = vadd.f32 %v1369_v41, %v1364_v10  ;;  %v6265_v47 = vadd.f32 %v1409_v6, %v1404_v25  ;;  %v1451_v24 = vadd.f32 %v1448_v34, %v1443_v52  ;;  %v1488_v54 = vmul.f32 %v8176_v51, %v1327_v4  ;;  %v8206_v34 = vld [vmem:[#allocation129_spill] sm:$0xff]  ;;  %v8207_v33 = vld [vmem:[#allocation130_spill] sm:$0xff] }
 0x522   : > { %v6267_v62 = vadd.f32 %v1449_v19, %v1444_v23  ;;  %v1489_v60 = vmul.f32 %v8176_v51, %v1328_v49  ;;  %v1528_v43 = vmul.f32 %v8177_v21, %v1327_v4  ;;  %v1529_v38 = vmul.f32 %v8177_v21, %v1328_v49  ;;  %v8197_v51 = vld [vmem:[#allocation55_spill] sm:$0xff] }
 0x523   : > { %v1564_v30 = vadd.f32 %v8196_v13, %v6153_v59  ;;  %v1491_v16 = vadd.f32 %v1488_v54, %v1483_v12  ;;  %v1568_v52 = vmul.f32 %v8178_v61, %v1327_v4  ;;  %v1569_v28 = vmul.f32 %v8178_v61, %v1328_v49  ;;  %v8198_v12 = vld [vmem:[#allocation57_spill] sm:$0xff] }
 0x524   : > { %v1492_v57 = vadd.f32 %v1489_v60, %v1484_v48  ;;  %v1531_v7 = vadd.f32 %v1528_v43, %v1523_v26  ;;  %v6279_v14 = vadd.f32 %v1529_v38, %v1524_v50  ;;  %v1604_v36 = vadd.f32 %v8197_v51, %v6155_v27  ;;  %v8208_v54 = vld [vmem:[#allocation131_spill] sm:$0xff]  ;;  %v8210_v43 = vld [vmem:[#allocation133_spill] sm:$0xff] }
 0x525   : > { %v1608_v8 = vmul.f32 %v8179_v44, %v1327_v4  ;;  %v1571_v21 = vadd.f32 %v1568_v52, %v1563_v42  ;;  %v1572_v10 = vadd.f32 %v1569_v28, %v1564_v30  ;;  %v1609_v59 = vmul.f32 %v8179_v44, %v1328_v49 }
 0x526   : > { %v1644_v55 = vadd.f32 %v8198_v12, %v6157_v35  ;;  %v1648_v31 = vmul.f32 %v8180_v37, %v1327_v4  ;;  %v1649_v61 = vmul.f32 %v8180_v37, %v1328_v49  ;;  %v1337_v26 = vsel %vm8199_vm13, %v1331_v15, %v1333_v0  ;;  %v8204_v4 = vld [vmem:[#allocation127_spill] sm:$0xff]  ;;  %v1663_v37 = vpop.permute.xlu0 %1662  ;;  %v8205_v49 = vld [vmem:[#allocation128_spill] sm:$0xff] }
 0x527   : > { %v1611_v25 = vadd.f32 %v1608_v8, %v1603_v56  ;;  %v1612_v41 = vadd.f32 %v1609_v59, %v1604_v36  ;;  %v1339_v27 = vsel %vm8200_vm14, %v1337_v26, 0.0  ;;  %v1336_v42 = vsel %vm8201_vm15, %v1333_v0, %v1335_v39  ;;  %v8203_v56 = vld [vmem:[#allocation123_spill] sm:$0xff]  ;;  %vm8262_vm14 = vmmov %vm8202_vm9 }
 0x528   : > { %v1338_v44 = vsel %vm8202_vm9, %v1335_v39, %v1331_v15  ;;  %v1651_v20 = vadd.f32 %v1648_v31, %v1643_v45  ;;  %v1652_v35 = vadd.f32 %v1649_v61, %v1644_v55  ;;  %v1376_v6 = vmul.f32 %v8203_v56, %v1339_v27  ;;  %v8209_v15 = vld [vmem:[#allocation132_spill] sm:$0xff]  ;;  %vm8263_vm15 = vmmov %vm8202_vm9 }
 0x529   : > { %v1416_v11 = vmul.f32 %v8204_v4, %v1339_v27  ;;  %v1456_v23 = vmul.f32 %v8205_v49, %v1339_v27  ;;  %v1496_v19 = vmul.f32 %v8206_v34, %v1339_v27  ;;  %v1536_v48 = vmul.f32 %v8207_v33, %v1339_v27 }
 0x52a   : > { %v1576_v60 = vmul.f32 %v8208_v54, %v1339_v27  ;;  %v6303_v22 = vadd.f32 %v1376_v6, %v1371_v17  ;;  %v1616_v45 = vmul.f32 %v8209_v15, %v1339_v27  ;;  %v1656_v38 = vmul.f32 %v8210_v43, %v1339_v27  ;;  %v1665_v17 = vpop.permute.xlu1 %1664  ;;  %v1667_v55 = vpop.permute.xlu0 %1666 }
 0x52b   : > { %v6305_v50 = vadd.f32 %v1416_v11, %v1411_v3  ;;  %v1459_v13 = vadd.f32 %v1456_v23, %v1451_v24  ;;  %v1499_v30 = vadd.f32 %v1496_v19, %v1491_v16  ;;  %v1539_v0 = vadd.f32 %v1536_v48, %v1531_v7 }
 0x52c   : > { %v1579_v52 = vadd.f32 %v1576_v60, %v1571_v21  ;;  %v1619_v28 = vadd.f32 %v1616_v45, %v1611_v25  ;;  %v1659_v51 = vadd.f32 %v1656_v38, %v1651_v20  ;;  %vm8211_vm11 = vcmp.lt.s32.totalorder %v8189_v58, 126  ;;  %v8215_v45 = vld [vmem:[#allocation138_spill] sm:$0xff]  ;;  %v8216_v38 = vld [vmem:[#allocation139_spill] sm:$0xff] }
 0x52d   : > { %v1340_v36 = vsel %vm8211_vm11, %v1336_v42, 0.0  ;;  %vm8212_vm12 = vcmp.lt.s32.totalorder %v4171_v9, 126  ;;  %v1668_v60 = vsel %vm434_vm1, %v1665_v17, %v1667_v55  ;;  %vm8245_vm13 = vcmp.lt.s32.totalorder %v8189_v58, 127  ;;  %vm8264_vm11 = vmmov %vm8202_vm9 }
 0x52e   : > { %v1341_v8 = vsel %vm8212_vm12, %v1338_v44, 0.0  ;;  %v1377_v3 = vmul.f32 %v8203_v56, %v1340_v36  ;;  %v1417_v59 = vmul.f32 %v8204_v4, %v1340_v36  ;;  %v1457_v16 = vmul.f32 %v8205_v49, %v1340_v36  ;;  %v6343_v48 = vpop.permute.xlu0 %1676 }
 0x52f   : > { %v1378_v39 = vmul.f32 %v8203_v56, %v1341_v8  ;;  %v1418_v24 = vmul.f32 %v8204_v4, %v1341_v8  ;;  %v1458_v7 = vmul.f32 %v8205_v49, %v1341_v8  ;;  %v1497_v21 = vmul.f32 %v8206_v34, %v1340_v36 }
 0x530   : > { %v1498_v12 = vmul.f32 %v8206_v34, %v1341_v8  ;;  %v1380_v25 = vadd.f32 %v1377_v3, %v6263_v46  ;;  %v1420_v61 = vadd.f32 %v1417_v59, %v6265_v47  ;;  %v1460_v27 = vadd.f32 %v1457_v16, %v6267_v62  ;;  %v8218_v3 = vld [vmem:[#allocation142_spill] sm:$0xff]  ;;  %v8219_v59 = vld [vmem:[#allocation143_spill] sm:$0xff]  ;;  %v8220_v16 = vld [vmem:[#allocation144_spill] sm:$0xff] }
 0x531   : > { %v1381_v31 = vadd.f32 %v1378_v39, %v6219_v2  ;;  %v1421_v26 = vadd.f32 %v1418_v24, %v6221_v1  ;;  %v1461_v42 = vadd.f32 %v1458_v7, %v6223_v63  ;;  %v1500_v44 = vadd.f32 %v1497_v21, %v1492_v57  ;;  %v6336_v63 = vpop.permute.xlu1 %1674 }
 0x532   : > { %v1501_v20 = vadd.f32 %v1498_v12, %v6225_v29  ;;  %v1537_v56 = vmul.f32 %v8207_v33, %v1340_v36  ;;  %v1538_v6 = vmul.f32 %v8207_v33, %v1341_v8  ;;  %v1577_v4 = vmul.f32 %v8208_v54, %v1340_v36 }
 0x533   : > { %v1578_v46 = vmul.f32 %v8208_v54, %v1341_v8  ;;  %v1617_v2 = vmul.f32 %v8209_v15, %v1340_v36  ;;  %v1618_v47 = vmul.f32 %v8209_v15, %v1341_v8  ;;  %v1657_v1 = vmul.f32 %v8210_v43, %v1340_v36 }
 0x534   : > { %v1658_v62 = vmul.f32 %v8210_v43, %v1341_v8  ;;  %v1540_v29 = vadd.f32 %v1537_v56, %v6279_v14  ;;  %v1541_v57 = vadd.f32 %v1538_v6, %v6227_v32  ;;  %v1580_v11 = vadd.f32 %v1577_v4, %v1572_v10  ;;  %v8217_v8 = vld [vmem:[#allocation141_spill] sm:$0xff] }
 0x535   : > { %v1581_v49 = vadd.f32 %v1578_v46, %v6229_v18  ;;  %v1620_v23 = vadd.f32 %v1617_v2, %v1612_v41  ;;  %v1621_v34 = vadd.f32 %v1618_v47, %v6231_v40  ;;  %v1660_v19 = vadd.f32 %v1657_v1, %v1652_v35  ;;  %v8213_v41 = vld [vmem:[#allocation134_spill] sm:$0xff] }
 0x536   : > { %v1661_v33 = vadd.f32 %v1658_v62, %v6233_v53  ;;  %v1670_v54 = vsel %vm434_vm1, %v1667_v55, %v1663_v37  ;;  %v1669_v32 = vsel %vm434_vm1, %v1663_v37, %v1665_v17  ;;  %v1681_v18 = vsel %vm447_vm2, %v6336_v63, %v6343_v48  ;;  %v8214_v37 = vld [vmem:[#allocation135_spill] sm:$0xff] }
 0x537   : > { %v1671_v40 = vsel %vm412_vm0, %v1670_v54, 0.0  ;;  %v1672_v53 = vsel %vm413_vm3, %v1669_v32, 0.0  ;;  %v1673_v14 = vsel %vm414_vm4, %v1668_v60, 0.0  ;;  %v1684_v10 = vsel %vm416_vm6, %v1681_v18, 0.0 }
 0x538   : > { %v1712_v35 = vmul.f32 %v8213_v41, %v1671_v40  ;;  %v1752_v15 = vmul.f32 %v8214_v37, %v1671_v40  ;;  %v1792_v43 = vmul.f32 %v8215_v45, %v1671_v40  ;;  %v1832_v36 = vmul.f32 %v8216_v38, %v1671_v40 }
 0x539   : > { %v1872_v17 = vmul.f32 %v8217_v8, %v1671_v40  ;;  %v1912_v39 = vmul.f32 %v8218_v3, %v1671_v40  ;;  %v1952_v24 = vmul.f32 %v8219_v59, %v1671_v40  ;;  %v1992_v7 = vmul.f32 %v8220_v16, %v1671_v40 }
 0x53a   : > { %v6372_v21 = vadd.f32 %v1712_v35, %v6303_v22  ;;  %v6375_v12 = vadd.f32 %v1752_v15, %v6305_v50  ;;  %v6377_v55 = vadd.f32 %v1792_v43, %v1459_v13  ;;  %v6379_v56 = vadd.f32 %v1832_v36, %v1499_v30  ;;  %v1679_v35 = vpop.permute.xlu1 %1678 }
 0x53b   : > { %v6381_v6 = vadd.f32 %v1872_v17, %v1539_v0  ;;  %v6383_v4 = vadd.f32 %v1912_v39, %v1579_v52  ;;  %v6385_v46 = vadd.f32 %v1952_v24, %v1619_v28  ;;  %v6387_v2 = vadd.f32 %v1992_v7, %v1659_v51  ;;  %v8221_v39 = vld [vmem:[#allocation149_spill] sm:$0xff] }
 0x53c   : > { %v1713_v47 = vmul.f32 %v8213_v41, %v1672_v53  ;;  %v1714_v22 = vmul.f32 %v8213_v41, %v1673_v14  ;;  %v1753_v1 = vmul.f32 %v8214_v37, %v1672_v53  ;;  %v1754_v50 = vmul.f32 %v8214_v37, %v1673_v14  ;;  %v1687_v41 = vpop.permute.xlu0 %1686  ;;  %v8222_v7 = vld [vmem:[#allocation153_spill] sm:$0xff] }
 0x53d   : > { %v1793_v13 = vmul.f32 %v8215_v45, %v1672_v53  ;;  %v1794_v30 = vmul.f32 %v8215_v45, %v1673_v14  ;;  %v1833_v0 = vmul.f32 %v8216_v38, %v1672_v53  ;;  %v1834_v52 = vmul.f32 %v8216_v38, %v1673_v14 }
 0x53e   : > { %v1716_v28 = vadd.f32 %v1713_v47, %v1380_v25  ;;  %v1717_v62 = vadd.f32 %v1714_v22, %v1381_v31  ;;  %v1756_v51 = vadd.f32 %v1753_v1, %v1420_v61  ;;  %v1757_v54 = vadd.f32 %v1754_v50, %v1421_v26  ;;  %v8223_v47 = vld [vmem:[#allocation154_spill] sm:$0xff]  ;;  %v8224_v1 = vld [vmem:[#allocation155_spill] sm:$0xff]  ;;  %v8225_v50 = vld [vmem:[#allocation156_spill] sm:$0xff] }
 0x53f   : > { %v1796_v60 = vadd.f32 %v1793_v13, %v1460_v27  ;;  %v1797_v32 = vadd.f32 %v1794_v30, %v1461_v42  ;;  %v1836_v18 = vadd.f32 %v1833_v0, %v1500_v44  ;;  %v1837_v40 = vadd.f32 %v1834_v52, %v1501_v20  ;;  %v8226_v13 = vld [vmem:[#allocation157_spill] sm:$0xff] }
 0x540   : > { %v1873_v37 = vmul.f32 %v8217_v8, %v1672_v53  ;;  %v1874_v15 = vmul.f32 %v8217_v8, %v1673_v14  ;;  %v1913_v45 = vmul.f32 %v8218_v3, %v1672_v53  ;;  %v1914_v43 = vmul.f32 %v8218_v3, %v1673_v14 }
 0x541   : > { %v1953_v38 = vmul.f32 %v8219_v59, %v1672_v53  ;;  %v1954_v25 = vmul.f32 %v8219_v59, %v1673_v14  ;;  %v1993_v31 = vmul.f32 %v8220_v16, %v1672_v53  ;;  %v1994_v61 = vmul.f32 %v8220_v16, %v1673_v14 }
 0x542   : > { %v1876_v26 = vadd.f32 %v1873_v37, %v1540_v29  ;;  %v1877_v27 = vadd.f32 %v1874_v15, %v1541_v57  ;;  %v1916_v42 = vadd.f32 %v1913_v45, %v1580_v11  ;;  %v1917_v44 = vadd.f32 %v1914_v43, %v1581_v49  ;;  %v8227_v29 = vld [vmem:[#allocation158_spill] sm:$0xff]  ;;  %v8228_v11 = vld [vmem:[#allocation159_spill] sm:$0xff] }
 0x543   : > { %v1956_v20 = vadd.f32 %v1953_v38, %v1620_v23  ;;  %v1957_v36 = vadd.f32 %v1954_v25, %v1621_v34  ;;  %v1996_v17 = vadd.f32 %v1993_v31, %v1660_v19  ;;  %v1997_v8 = vadd.f32 %v1994_v61, %v1661_v33  ;;  %v1691_v23 = vpop.permute.xlu0 %1690  ;;  %v1689_v34 = vpop.permute.xlu1 %1688 }
 0x544   : > { %v1721_v24 = vmul.f32 %v8221_v39, %v1684_v10  ;;  %v1761_v3 = vmul.f32 %v8222_v7, %v1684_v10  ;;  %v1801_v22 = vmul.f32 %v8223_v47, %v1684_v10  ;;  %v1841_v59 = vmul.f32 %v8224_v1, %v1684_v10 }
 0x545   : > { %v1881_v53 = vmul.f32 %v8225_v50, %v1684_v10  ;;  %v1921_v14 = vmul.f32 %v8226_v13, %v1684_v10  ;;  %v1961_v57 = vmul.f32 %v8227_v29, %v1684_v10  ;;  %v2001_v49 = vmul.f32 %v8228_v11, %v1684_v10 }
 0x546   : > { %v6413_v19 = vadd.f32 %v1721_v24, %v1716_v28  ;;  %v6415_v33 = vadd.f32 %v1761_v3, %v1756_v51  ;;  %v6417_v16 = vadd.f32 %v1801_v22, %v1796_v60  ;;  %v6419_v30 = vadd.f32 %v1841_v59, %v1836_v18 }
 0x547   : > { %v6421_v0 = vadd.f32 %v1881_v53, %v1876_v26  ;;  %v6423_v52 = vadd.f32 %v1921_v14, %v1916_v42  ;;  %v6425_v37 = vadd.f32 %v1961_v57, %v1956_v20  ;;  %v6427_v15 = vadd.f32 %v2001_v49, %v1996_v17 }
 0x548   : > { %v1680_v10 = vsel %vm447_vm2, %v6343_v48, %v1679_v35  ;;  %v1682_v28 = vsel %vm447_vm2, %v1679_v35, %v6336_v63  ;;  %v1694_v51 = vsel %vm418_vm8, %v1691_v23, %v1687_v41  ;;  %v6439_v60 = vsel %vm418_vm8, %v1689_v34, %v1691_v23  ;;  %v8230_v23 = vld [vmem:[#allocation48_spill] sm:$0xff] }
 0x549   : > { %v1683_v18 = vsel %vm415_vm5, %v1682_v28, 0.0  ;;  %v1685_v45 = vsel %vm417_vm7, %v1680_v10, 0.0  ;;  %v1697_v48 = vsel %vm420_vm10, %v1694_v51, 0.0  ;;  %v1693_v43 = vsel %vm418_vm8, %v1687_v41, %v1689_v34  ;;  %v8233_v28 = vld [vmem:[#allocation59_spill] sm:$0xff]  ;;  %v8234_v51 = vld [vmem:[#allocation60_spill] sm:$0xff] }
 0x54a   : > { %v1720_v63 = vmul.f32 %v8221_v39, %v1683_v18  ;;  %v1722_v35 = vmul.f32 %v8221_v39, %v1685_v45  ;;  %v1760_v38 = vmul.f32 %v8222_v7, %v1683_v18  ;;  %v1762_v25 = vmul.f32 %v8222_v7, %v1685_v45 }
 0x54b   : > { %v1800_v31 = vmul.f32 %v8223_v47, %v1683_v18  ;;  %v1802_v61 = vmul.f32 %v8223_v47, %v1685_v45  ;;  %v1840_v26 = vmul.f32 %v8224_v1, %v1683_v18  ;;  %v1842_v42 = vmul.f32 %v8224_v1, %v1685_v45 }
 0x54c   : > { %v1723_v20 = vadd.f32 %v1720_v63, %v6372_v21  ;;  %v1725_v17 = vadd.f32 %v1722_v35, %v1717_v62  ;;  %v1763_v41 = vadd.f32 %v1760_v38, %v6375_v12  ;;  %v1765_v24 = vadd.f32 %v1762_v25, %v1757_v54  ;;  %v8237_v63 = vld [vmem:[#allocation161_spill] sm:$0xff]  ;;  %v8238_v35 = vld [vmem:[#allocation162_spill] sm:$0xff]  ;;  %v8239_v38 = vld [vmem:[#allocation163_spill] sm:$0xff] }
 0x54d   : > { %v1803_v39 = vadd.f32 %v1800_v31, %v6377_v55  ;;  %v1805_v3 = vadd.f32 %v1802_v61, %v1797_v32  ;;  %v6461_v22 = vadd.f32 %v1840_v26, %v6379_v56  ;;  %v1845_v7 = vadd.f32 %v1842_v42, %v1837_v40  ;;  %v8240_v31 = vld [vmem:[#allocation164_spill] sm:$0xff]  ;;  %v8241_v26 = vld [vmem:[#allocation165_spill] sm:$0xff] }
 0x54e   : > { %v1880_v59 = vmul.f32 %v8225_v50, %v1683_v18  ;;  %v1882_v47 = vmul.f32 %v8225_v50, %v1685_v45  ;;  %v1920_v53 = vmul.f32 %v8226_v13, %v1683_v18  ;;  %v1922_v1 = vmul.f32 %v8226_v13, %v1685_v45 }
 0x54f   : > { %v1960_v21 = vmul.f32 %v8227_v29, %v1683_v18  ;;  %v1962_v12 = vmul.f32 %v8227_v29, %v1685_v45  ;;  %v2000_v62 = vmul.f32 %v8228_v11, %v1683_v18  ;;  %v2002_v55 = vmul.f32 %v8228_v11, %v1685_v45  ;;  %v8229_v29 = vld [vmem:[#allocation47_spill] sm:$0xff]  ;;  %v8231_v11 = vld [vmem:[#allocation49_spill] sm:$0xff]  ;;  %v8236_v45 = vld [vmem:[#allocation65_spill] sm:$0xff] }
 0x550   : > { %v1883_v56 = vadd.f32 %v1880_v59, %v6381_v6  ;;  %v1885_v54 = vadd.f32 %v1882_v47, %v1877_v27  ;;  %v6473_v32 = vadd.f32 %v1920_v53, %v6383_v4  ;;  %v1925_v40 = vadd.f32 %v1922_v1, %v1917_v44  ;;  %v8232_v6 = vld [vmem:[#allocation50_spill] sm:$0xff]  ;;  %v8235_v18 = vld [vmem:[#allocation64_spill] sm:$0xff]  ;;  %v6497_v53 = vpop.permute.xlu0 %1700 }
 0x551   : > { %v6476_v50 = vadd.f32 %v1960_v21, %v6385_v46  ;;  %v1965_v14 = vadd.f32 %v1962_v12, %v1957_v36  ;;  %v6479_v13 = vadd.f32 %v2000_v62, %v6387_v2  ;;  %v2005_v57 = vadd.f32 %v2002_v55, %v1997_v8  ;;  %v8244_v59 = vld [vmem:[#allocation168_spill] sm:$0xff] }
 0x552   : > { %v1733_v49 = vadd.f32 %v8229_v29, %v1725_v17  ;;  %v1773_v34 = vadd.f32 %v8230_v23, %v1765_v24  ;;  %v1813_v10 = vadd.f32 %v8231_v11, %v1805_v3  ;;  %v1853_v27 = vadd.f32 %v8232_v6, %v1845_v7  ;;  %v8242_v17 = vld [vmem:[#allocation166_spill] sm:$0xff]  ;;  %v8243_v3 = vld [vmem:[#allocation167_spill] sm:$0xff]  ;;  %v8247_v23 = vld [vmem:[#allocation68_spill] sm:$0xff] }
 0x553   : > { %v1893_v4 = vadd.f32 %v8233_v28, %v1885_v54  ;;  %v1933_v44 = vadd.f32 %v8234_v51, %v1925_v40  ;;  %v1973_v46 = vadd.f32 %v8235_v18, %v1965_v14  ;;  %v2013_v36 = vadd.f32 %v8236_v45, %v2005_v57  ;;  %v8246_v29 = vld [vmem:[#allocation77_spill] sm:$0xff]  ;;  %v8248_v6 = vld [vmem:[#allocation78_spill] sm:$0xff] }
 0x554   : > { %v1738_v2 = vmul.f32 %v8237_v63, %v1697_v48  ;;  %v1778_v8 = vmul.f32 %v8238_v35, %v1697_v48  ;;  %v1818_v25 = vmul.f32 %v8239_v38, %v1697_v48  ;;  %v1858_v61 = vmul.f32 %v8240_v31, %v1697_v48  ;;  %v8249_v28 = vld [vmem:[#allocation69_spill] sm:$0xff] }
 0x555   : > { %v1898_v42 = vmul.f32 %v8241_v26, %v1697_v48  ;;  %v1938_v24 = vmul.f32 %v8242_v17, %v1697_v48  ;;  %v1978_v7 = vmul.f32 %v8243_v3, %v1697_v48  ;;  %v2018_v47 = vmul.f32 %v8244_v59, %v1697_v48 }
 0x556   : > { %v6499_v1 = vadd.f32 %v1738_v2, %v1733_v49  ;;  %v6501_v21 = vadd.f32 %v1778_v8, %v1773_v34  ;;  %v6503_v12 = vadd.f32 %v1818_v25, %v1813_v10  ;;  %v6505_v62 = vadd.f32 %v1858_v61, %v1853_v27 }
 0x557   : > { %v6507_v55 = vadd.f32 %v1898_v42, %v1893_v4  ;;  %v6509_v54 = vadd.f32 %v1938_v24, %v1933_v44  ;;  %v6511_v40 = vadd.f32 %v1978_v7, %v1973_v46  ;;  %v6513_v14 = vadd.f32 %v2018_v47, %v2013_v36  ;;  %v8250_v44 = vld [vmem:[#allocation79_spill] sm:$0xff]  ;;  %v8255_v47 = vld [vmem:[#allocation73_spill] sm:$0xff] }
 0x558   : > { %v1695_v48 = vsel %vm418_vm8, %v1693_v43, 0.0  ;;  %v1696_v57 = vsel %vm8245_vm13, %v6439_v60, 0.0  ;;  %v1731_v49 = vadd.f32 %v8246_v29, %v1723_v20  ;;  %v1732_v34 = vadd.f32 %v8247_v23, %v6413_v19  ;;  %v8251_v20 = vld [vmem:[#allocation71_spill] sm:$0xff] }
 0x559   : > { %v1736_v11 = vmul.f32 %v8237_v63, %v1695_v48  ;;  %v1737_v10 = vmul.f32 %v8237_v63, %v1696_v57  ;;  %v1771_v27 = vadd.f32 %v8248_v6, %v1763_v41  ;;  %v1772_v4 = vadd.f32 %v8249_v28, %v6415_v33  ;;  %v1699_v41 = vpop.permute.xlu1 %1698  ;;  %v6537_v63 = vpop.permute.xlu0 %2030 }
 0x55a   : > { %v1776_v43 = vmul.f32 %v8238_v35, %v1695_v48  ;;  %v1777_v51 = vmul.f32 %v8238_v35, %v1696_v57  ;;  %v1811_v60 = vadd.f32 %v8250_v44, %v1803_v39  ;;  %v1812_v18 = vadd.f32 %v8251_v20, %v6417_v16  ;;  %v8252_v35 = vld [vmem:[#allocation80_spill] sm:$0xff] }
 0x55b   : > { %v1739_v46 = vadd.f32 %v1736_v11, %v1731_v49  ;;  %v6533_v19 = vadd.f32 %v1737_v10, %v1732_v34  ;;  %v1816_v45 = vmul.f32 %v8239_v38, %v1695_v48  ;;  %v1817_v36 = vmul.f32 %v8239_v38, %v1696_v57  ;;  %v8253_v39 = vld [vmem:[#allocation72_spill] sm:$0xff]  ;;  %v8254_v38 = vld [vmem:[#allocation81_spill] sm:$0xff]  ;;  %v8257_v10 = vld [vmem:[#allocation74_spill] sm:$0xff] }
 0x55c   : > { %v1779_v33 = vadd.f32 %v1776_v43, %v1771_v27  ;;  %v6539_v2 = vadd.f32 %v1777_v51, %v1772_v4  ;;  %v1851_v8 = vadd.f32 %v8252_v35, %v6461_v22  ;;  %v1852_v25 = vadd.f32 %v8253_v39, %v6419_v30  ;;  %v8256_v30 = vld [vmem:[#allocation82_spill] sm:$0xff] }
 0x55d   : > { %v1819_v16 = vadd.f32 %v1816_v45, %v1811_v60  ;;  %v6545_v61 = vadd.f32 %v1817_v36, %v1812_v18  ;;  %v1856_v42 = vmul.f32 %v8240_v31, %v1695_v48  ;;  %v1857_v24 = vmul.f32 %v8240_v31, %v1696_v57  ;;  %v1703_v44 = vpop.permute.xlu1 %1702  ;;  %v6568_v60 = vpop.permute.xlu0 %2034  ;;  %v8260_v18 = vld [vmem:[#allocation84_spill] sm:$0xff] }
 0x55e   : > { %v1891_v7 = vadd.f32 %v8254_v38, %v1883_v56  ;;  %v1892_v29 = vadd.f32 %v8255_v47, %v6421_v0  ;;  %v1896_v49 = vmul.f32 %v8241_v26, %v1695_v48  ;;  %v1897_v23 = vmul.f32 %v8241_v26, %v1696_v57  ;;  %v8258_v0 = vld [vmem:[#allocation83_spill] sm:$0xff]  ;;  %v8267_v38 = vld [vmem:[#allocation170_spill] sm:$0xff] }
 0x55f   : > { %v1859_v22 = vadd.f32 %v1856_v42, %v1851_v8  ;;  %v1860_v34 = vadd.f32 %v1857_v24, %v1852_v25  ;;  %v1931_v11 = vadd.f32 %v8256_v30, %v6473_v32  ;;  %v1932_v6 = vadd.f32 %v8257_v10, %v6423_v52  ;;  %v8259_v26 = vld [vmem:[#allocation75_spill] sm:$0xff]  ;;  %v8266_v42 = vld [vmem:[#allocation169_spill] sm:$0xff]  ;;  %v8271_v30 = vld [vmem:[#allocation174_spill] sm:$0xff] }
 0x560   : > { %v1899_v27 = vadd.f32 %v1896_v49, %v1891_v7  ;;  %v6558_v28 = vadd.f32 %v1897_v23, %v1892_v29  ;;  %v1936_v56 = vmul.f32 %v8242_v17, %v1695_v48  ;;  %v1937_v31 = vmul.f32 %v8242_v17, %v1696_v57  ;;  %v8261_v17 = vld [vmem:[#allocation76_spill] sm:$0xff]  ;;  %v8268_v7 = vld [vmem:[#allocation171_spill] sm:$0xff] }
 0x561   : > { %v1971_v4 = vadd.f32 %v8258_v0, %v6476_v50  ;;  %v1972_v43 = vadd.f32 %v8259_v26, %v6425_v37  ;;  %v1976_v51 = vmul.f32 %v8243_v3, %v1695_v48  ;;  %v1977_v32 = vmul.f32 %v8243_v3, %v1696_v57  ;;  %v8270_v49 = vld [vmem:[#allocation173_spill] sm:$0xff]  ;;  %v8272_v10 = vld [vmem:[#allocation175_spill] sm:$0xff] }
 0x562   : > { %v1939_v52 = vadd.f32 %v1936_v56, %v1931_v11  ;;  %v1940_v20 = vadd.f32 %v1937_v31, %v1932_v6  ;;  %v2011_v45 = vadd.f32 %v8260_v18, %v6479_v13  ;;  %v2012_v36 = vadd.f32 %v8261_v17, %v6427_v15  ;;  %v8273_v56 = vld [vmem:[#allocation176_spill] sm:$0xff] }
 0x563   : > { %v1979_v35 = vadd.f32 %v1976_v51, %v1971_v4  ;;  %v1980_v50 = vadd.f32 %v1977_v32, %v1972_v43  ;;  %v2016_v8 = vmul.f32 %v8244_v59, %v1695_v48  ;;  %v2017_v37 = vmul.f32 %v8244_v59, %v1696_v57  ;;  %v2033_v51 = vpop.permute.xlu1 %2032 }
 0x564   : > { %v1705_v3 = vsel %vm8262_vm14, %v1699_v41, %v6497_v53  ;;  %v1704_v39 = vsel %vm8263_vm15, %v6497_v53, %v1703_v44  ;;  %v1706_v13 = vsel %vm8202_vm9, %v1703_v44, %v1699_v41  ;;  %v2038_v15 = vsel %vm434_vm1, %v6568_v60, %v6537_v63  ;;  %v8269_v41 = vld [vmem:[#allocation172_spill] sm:$0xff]  ;;  %vm8316_vm15 = vmmov %vm8202_vm9 }
 0x565   : > { %v2019_v25 = vadd.f32 %v2016_v8, %v2011_v45  ;;  %v2020_v48 = vadd.f32 %v2017_v37, %v2012_v36  ;;  %v1707_v59 = vsel %vm8264_vm11, %v1705_v3, 0.0  ;;  %vm8265_vm12 = vcmp.lt.s32.totalorder %v8189_v58, 126  ;;  %vm8317_vm11 = vmmov %vm8202_vm9 }
 0x566   : > { %v1708_v57 = vsel %vm8265_vm12, %v1704_v39, 0.0  ;;  %v1744_v24 = vmul.f32 %v8266_v42, %v1707_v59  ;;  %v1784_v53 = vmul.f32 %v8267_v38, %v1707_v59  ;;  %v1824_v47 = vmul.f32 %v8268_v7, %v1707_v59  ;;  %vm8318_vm12 = vmmov %vm8202_vm9 }
 0x567   : > { %v1864_v29 = vmul.f32 %v8269_v41, %v1707_v59  ;;  %v1904_v23 = vmul.f32 %v8270_v49, %v1707_v59  ;;  %v1944_v11 = vmul.f32 %v8271_v30, %v1707_v59  ;;  %v1984_v6 = vmul.f32 %v8272_v10, %v1707_v59 }
 0x568   : > { %v2024_v31 = vmul.f32 %v8273_v56, %v1707_v59  ;;  %v1747_v0 = vadd.f32 %v1744_v24, %v1739_v46  ;;  %v1787_v4 = vadd.f32 %v1784_v53, %v1779_v33  ;;  %v1827_v26 = vadd.f32 %v1824_v47, %v1819_v16 }
 0x569   : > { %v1867_v43 = vadd.f32 %v1864_v29, %v1859_v22  ;;  %v1907_v32 = vadd.f32 %v1904_v23, %v1899_v27  ;;  %v1947_v44 = vadd.f32 %v1944_v11, %v1939_v52  ;;  %v1987_v18 = vadd.f32 %v1984_v6, %v1979_v35  ;;  %v8277_v11 = vld [vmem:[#allocation179_spill] sm:$0xff] }
 0x56a   : > { %v2027_v45 = vadd.f32 %v2024_v31, %v2019_v25  ;;  %vm8274_vm13 = vcmp.lt.s32.totalorder %v4171_v9, 126  ;;  %v1745_v36 = vmul.f32 %v8266_v42, %v1708_v57  ;;  %v1785_v8 = vmul.f32 %v8267_v38, %v1708_v57  ;;  %v8281_v31 = vld [vmem:[#allocation183_spill] sm:$0xff] }
 0x56b   : > { %v1709_v17 = vsel %vm8274_vm13, %v1706_v13, 0.0  ;;  %v1825_v37 = vmul.f32 %v8268_v7, %v1708_v57  ;;  %v1865_v16 = vmul.f32 %v8269_v41, %v1708_v57  ;;  %v1905_v24 = vmul.f32 %v8270_v49, %v1708_v57 }
 0x56c   : > { %v1746_v3 = vmul.f32 %v8266_v42, %v1709_v17  ;;  %v1786_v46 = vmul.f32 %v8267_v38, %v1709_v17  ;;  %v1826_v33 = vmul.f32 %v8268_v7, %v1709_v17  ;;  %v1748_v22 = vadd.f32 %v1745_v36, %v6533_v19  ;;  %v8282_v36 = vld [vmem:[#allocation184_spill] sm:$0xff] }
 0x56d   : > { %v1788_v27 = vadd.f32 %v1785_v8, %v6539_v2  ;;  %v1828_v52 = vadd.f32 %v1825_v37, %v6545_v61  ;;  %v1866_v35 = vmul.f32 %v8269_v41, %v1709_v17  ;;  %v1868_v59 = vadd.f32 %v1865_v16, %v1860_v34  ;;  %v6620_v2 = vpop.permute.xlu1 %2042 }
 0x56e   : > { %v1749_v39 = vadd.f32 %v1746_v3, %v6499_v1  ;;  %v1789_v13 = vadd.f32 %v1786_v46, %v6501_v21  ;;  %v1829_v25 = vadd.f32 %v1826_v33, %v6503_v12  ;;  %v1906_v38 = vmul.f32 %v8270_v49, %v1709_v17 }
 0x56f   : > { %v1869_v42 = vadd.f32 %v1866_v35, %v6505_v62  ;;  %v1945_v19 = vmul.f32 %v8271_v30, %v1708_v57  ;;  %v1946_v61 = vmul.f32 %v8271_v30, %v1709_v17  ;;  %v1985_v53 = vmul.f32 %v8272_v10, %v1708_v57 }
 0x570   : > { %v1986_v1 = vmul.f32 %v8272_v10, %v1709_v17  ;;  %v2025_v21 = vmul.f32 %v8273_v56, %v1708_v57  ;;  %v1908_v12 = vadd.f32 %v1905_v24, %v6558_v28  ;;  %v1909_v62 = vadd.f32 %v1906_v38, %v6507_v55  ;;  %v2045_v24 = vpop.permute.xlu0 %2044 }
 0x571   : > { %v1948_v34 = vadd.f32 %v1945_v19, %v1940_v20  ;;  %v2026_v7 = vmul.f32 %v8273_v56, %v1709_v17  ;;  %v1949_v47 = vadd.f32 %v1946_v61, %v6509_v54  ;;  %v1988_v41 = vadd.f32 %v1985_v53, %v1980_v50  ;;  %v8275_v20 = vld [vmem:[#allocation177_spill] sm:$0xff]  ;;  %v8276_v54 = vld [vmem:[#allocation178_spill] sm:$0xff]  ;;  %v2047_v8 = vpop.permute.xlu1 %2046 }
 0x572   : > { %v1989_v29 = vadd.f32 %v1986_v1, %v6511_v40  ;;  %v2028_v49 = vadd.f32 %v2025_v21, %v2020_v48  ;;  %v2039_v30 = vsel %vm412_vm0, %v2038_v15, 0.0  ;;  %v2036_v28 = vsel %vm434_vm1, %v2033_v51, %v6568_v60  ;;  %v8278_v48 = vld [vmem:[#allocation180_spill] sm:$0xff]  ;;  %v8280_v56 = vld [vmem:[#allocation182_spill] sm:$0xff] }
 0x573   : > { %v2029_v23 = vadd.f32 %v2026_v7, %v6513_v14  ;;  %v2037_v55 = vsel %vm434_vm1, %v6537_v63, %v2033_v51  ;;  %v2080_v57 = vmul.f32 %v8275_v20, %v2039_v30  ;;  %v2120_v50 = vmul.f32 %v8276_v54, %v2039_v30  ;;  %v8279_v14 = vld [vmem:[#allocation181_spill] sm:$0xff] }
 0x574   : > { %v2160_v40 = vmul.f32 %v8277_v11, %v2039_v30  ;;  %v2200_v10 = vmul.f32 %v8278_v48, %v2039_v30  ;;  %v2240_v6 = vmul.f32 %v8279_v14, %v2039_v30  ;;  %v2280_v15 = vmul.f32 %v8280_v56, %v2039_v30 }
 0x575   : > { %v2320_v17 = vmul.f32 %v8281_v31, %v2039_v30  ;;  %v2360_v60 = vmul.f32 %v8282_v36, %v2039_v30  ;;  %v6648_v37 = vadd.f32 %v2080_v57, %v1747_v0  ;;  %v6650_v63 = vadd.f32 %v2120_v50, %v1787_v4 }
 0x576   : > { %v6652_v51 = vadd.f32 %v2160_v40, %v1827_v26  ;;  %v6654_v3 = vadd.f32 %v2200_v10, %v1867_v43  ;;  %v6656_v46 = vadd.f32 %v2240_v6, %v1907_v32  ;;  %v6658_v33 = vadd.f32 %v2280_v15, %v1947_v44 }
 0x577   : > { %v6660_v16 = vadd.f32 %v2320_v17, %v1987_v18  ;;  %v6662_v35 = vadd.f32 %v2360_v60, %v2027_v45  ;;  %v2040_v38 = vsel %vm413_vm3, %v2037_v55, 0.0  ;;  %v2041_v0 = vsel %vm414_vm4, %v2036_v28, 0.0 }
 0x578   : > { %v2049_v4 = vsel %vm447_vm2, %v6620_v2, %v2045_v24  ;;  %v2048_v26 = vsel %vm447_vm2, %v2045_v24, %v2047_v8  ;;  %v2081_v43 = vmul.f32 %v8275_v20, %v2040_v38  ;;  %v2082_v32 = vmul.f32 %v8275_v20, %v2041_v0  ;;  %v8288_v24 = vld [vmem:[#allocation190_spill] sm:$0xff] }
 0x579   : > { %v2121_v44 = vmul.f32 %v8276_v54, %v2040_v38  ;;  %v2122_v18 = vmul.f32 %v8276_v54, %v2041_v0  ;;  %v2161_v45 = vmul.f32 %v8277_v11, %v2040_v38  ;;  %v2162_v19 = vmul.f32 %v8277_v11, %v2041_v0 }
 0x57a   : > { %v2201_v61 = vmul.f32 %v8278_v48, %v2040_v38  ;;  %v2202_v53 = vmul.f32 %v8278_v48, %v2041_v0  ;;  %v2084_v1 = vadd.f32 %v2081_v43, %v1748_v22  ;;  %v2085_v21 = vadd.f32 %v2082_v32, %v1749_v39 }
 0x57b   : > { %v2124_v7 = vadd.f32 %v2121_v44, %v1788_v27  ;;  %v2125_v30 = vadd.f32 %v2122_v18, %v1789_v13  ;;  %v2164_v28 = vadd.f32 %v2161_v45, %v1828_v52  ;;  %v2165_v55 = vadd.f32 %v2162_v19, %v1829_v25 }
 0x57c   : > { %v2204_v20 = vadd.f32 %v2201_v61, %v1868_v59  ;;  %v2205_v57 = vadd.f32 %v2202_v53, %v1869_v42  ;;  %v2241_v54 = vmul.f32 %v8279_v14, %v2040_v38  ;;  %v2242_v50 = vmul.f32 %v8279_v14, %v2041_v0 }
 0x57d   : > { %v2281_v40 = vmul.f32 %v8280_v56, %v2040_v38  ;;  %v2282_v11 = vmul.f32 %v8280_v56, %v2041_v0  ;;  %v2321_v10 = vmul.f32 %v8281_v31, %v2040_v38  ;;  %v2322_v22 = vmul.f32 %v8281_v31, %v2041_v0 }
 0x57e   : > { %v2361_v27 = vmul.f32 %v8282_v36, %v2040_v38  ;;  %v2362_v52 = vmul.f32 %v8282_v36, %v2041_v0  ;;  %v2244_v39 = vadd.f32 %v2241_v54, %v1908_v12  ;;  %v2245_v13 = vadd.f32 %v2242_v50, %v1909_v62  ;;  %v8283_v12 = vld [vmem:[#allocation185_spill] sm:$0xff]  ;;  %v8289_v0 = vld [vmem:[#allocation191_spill] sm:$0xff] }
 0x57f   : > { %v2284_v25 = vadd.f32 %v2281_v40, %v1948_v34  ;;  %v2285_v59 = vadd.f32 %v2282_v11, %v1949_v47  ;;  %v2324_v42 = vadd.f32 %v2321_v10, %v1988_v41  ;;  %v2325_v48 = vadd.f32 %v2322_v22, %v1989_v29  ;;  %v8284_v34 = vld [vmem:[#allocation186_spill] sm:$0xff]  ;;  %v8285_v41 = vld [vmem:[#allocation187_spill] sm:$0xff]  ;;  %v8287_v36 = vld [vmem:[#allocation189_spill] sm:$0xff] }
 0x580   : > { %v2364_v14 = vadd.f32 %v2361_v27, %v2028_v49  ;;  %v2365_v6 = vadd.f32 %v2362_v52, %v2029_v23  ;;  %v2052_v56 = vsel %vm416_vm6, %v2049_v4, 0.0  ;;  %v2050_v15 = vsel %vm447_vm2, %v2047_v8, %v6620_v2  ;;  %v8286_v49 = vld [vmem:[#allocation188_spill] sm:$0xff]  ;;  %v2055_v52 = vpop.permute.xlu0 %2054 }
 0x581   : > { %v2053_v31 = vsel %vm417_vm7, %v2048_v26, 0.0  ;;  %v6699_v17 = vstv %s6677_s30  ;;  %v2089_v62 = vmul.f32 %v8283_v12, %v2052_v56  ;;  %v2129_v47 = vmul.f32 %v8284_v34, %v2052_v56  ;;  %v8290_v2 = vld [vmem:[#allocation192_spill] sm:$0xff]  ;;  %s7112_s30 = sld [smem:[#allocation12 + $0x9c]] }
 0x582   : > { %v2169_v29 = vmul.f32 %v8285_v41, %v2052_v56  ;;  %v2209_v23 = vmul.f32 %v8286_v49, %v2052_v56  ;;  %v2249_v60 = vmul.f32 %v8287_v36, %v2052_v56  ;;  %v2289_v38 = vmul.f32 %v8288_v24, %v2052_v56 }
 0x583   : > { %v2329_v4 = vmul.f32 %v8289_v0, %v2052_v56  ;;  %v2369_v8 = vmul.f32 %v8290_v2, %v2052_v56  ;;  %v6709_v43 = vadd.f32 %v2089_v62, %v2084_v1  ;;  %v6711_v26 = vadd.f32 %v2129_v47, %v2124_v7 }
 0x584   : > { %v6713_v32 = vadd.f32 %v2169_v29, %v2164_v28  ;;  %v6715_v44 = vadd.f32 %v2209_v23, %v2204_v20  ;;  %v6717_v18 = vadd.f32 %v2249_v60, %v2244_v39  ;;  %v6719_v45 = vadd.f32 %v2289_v38, %v2284_v25  ;;  %v8293_v60 = vld [vmem:[#allocation87_spill] sm:$0xff] }
 0x585   : > { %v6721_v19 = vadd.f32 %v2329_v4, %v2324_v42  ;;  %v6723_v61 = vadd.f32 %v2369_v8, %v2364_v14  ;;  %v2051_v53 = vsel %vm415_vm5, %v2050_v15, 0.0  ;;  %v2090_v1 = vmul.f32 %v8283_v12, %v2053_v31  ;;  %v2057_v4 = vpop.permute.xlu1 %2056  ;;  %v8296_v8 = vld [vmem:[#allocation90_spill] sm:$0xff] }
 0x586   : > { %v2130_v7 = vmul.f32 %v8284_v34, %v2053_v31  ;;  %v2170_v28 = vmul.f32 %v8285_v41, %v2053_v31  ;;  %v2088_v20 = vmul.f32 %v8283_v12, %v2051_v53  ;;  %v2128_v54 = vmul.f32 %v8284_v34, %v2051_v53 }
 0x587   : > { %v2168_v50 = vmul.f32 %v8285_v41, %v2051_v53  ;;  %v2208_v40 = vmul.f32 %v8286_v49, %v2051_v53  ;;  %v2093_v11 = vadd.f32 %v2090_v1, %v2085_v21  ;;  %v2210_v27 = vmul.f32 %v8286_v49, %v2053_v31  ;;  %v8297_v1 = vld [vmem:[#allocation91_spill] sm:$0xff] }
 0x588   : > { %v2133_v10 = vadd.f32 %v2130_v7, %v2125_v30  ;;  %v2173_v22 = vadd.f32 %v2170_v28, %v2165_v55  ;;  %v2091_v39 = vadd.f32 %v2088_v20, %v6648_v37  ;;  %v6747_v25 = vadd.f32 %v2128_v54, %v6650_v63  ;;  %v8298_v20 = vld [vmem:[#allocation92_spill] sm:$0xff] }
 0x589   : > { %v6750_v42 = vadd.f32 %v2168_v50, %v6652_v51  ;;  %v6753_v14 = vadd.f32 %v2208_v40, %v6654_v3  ;;  %v2213_v21 = vadd.f32 %v2210_v27, %v2205_v57  ;;  %v2248_v30 = vmul.f32 %v8287_v36, %v2051_v53 }
 0x58a   : > { %v2250_v55 = vmul.f32 %v8287_v36, %v2053_v31  ;;  %v2288_v37 = vmul.f32 %v8288_v24, %v2051_v53  ;;  %v2290_v63 = vmul.f32 %v8288_v24, %v2053_v31  ;;  %v2328_v51 = vmul.f32 %v8289_v0, %v2051_v53 }
 0x58b   : > { %v2330_v3 = vmul.f32 %v8289_v0, %v2053_v31  ;;  %v2368_v56 = vmul.f32 %v8290_v2, %v2051_v53  ;;  %v6767_v15 = vadd.f32 %v2248_v30, %v6656_v46  ;;  %v2370_v62 = vmul.f32 %v8290_v2, %v2053_v31  ;;  %v8291_v46 = vld [vmem:[#allocation85_spill] sm:$0xff]  ;;  %v2059_v0 = vpop.permute.xlu0 %2058 }
 0x58c   : > { %v2253_v57 = vadd.f32 %v2250_v55, %v2245_v13  ;;  %v6770_v12 = vadd.f32 %v2288_v37, %v6658_v33  ;;  %v2293_v34 = vadd.f32 %v2290_v63, %v2285_v59  ;;  %v6774_v47 = vadd.f32 %v2328_v51, %v6660_v16  ;;  %v8292_v13 = vld [vmem:[#allocation86_spill] sm:$0xff]  ;;  %v8294_v59 = vld [vmem:[#allocation88_spill] sm:$0xff] }
 0x58d   : > { %v2333_v41 = vadd.f32 %v2330_v3, %v2325_v48  ;;  %v6777_v29 = vadd.f32 %v2368_v56, %v6662_v35  ;;  %v2373_v49 = vadd.f32 %v2370_v62, %v2365_v6  ;;  %v2101_v23 = vadd.f32 %v8291_v46, %v2093_v11  ;;  %v8295_v48 = vld [vmem:[#allocation89_spill] sm:$0xff]  ;;  %v8301_v37 = vld [vmem:[#allocation94_spill] sm:$0xff] }
 0x58e   : > { %v2141_v33 = vadd.f32 %v8292_v13, %v2133_v10  ;;  %v2143_v36 = vstv %s6730_s25  ;;  %v2181_v31 = vadd.f32 %v8293_v60, %v2173_v22  ;;  %v2183_v24 = vstv %s6736_s28  ;;  %v8299_v22 = vld [vmem:[#allocation93_spill] sm:$0xff]  ;;  %s7199_s25 = sld [smem:[#allocation12 + $0x26]]  ;;  %s7213_s28 = sld [smem:[#allocation12 + $0x27]] }
 0x58f   : > { %v2221_v38 = vadd.f32 %v8294_v59, %v2213_v21  ;;  %v2223_v16 = vstv %s6738_s17  ;;  %v2261_v2 = vadd.f32 %v8295_v48, %v2253_v57  ;;  %v2263_v35 = vstv %s6741_s18  ;;  %s7215_s17 = sld [smem:[#allocation13 + $0x1]]  ;;  %s7246_s18 = sld [smem:[#allocation12 + $0x12]] }
 0x590   : > { %v2301_v53 = vadd.f32 %v8296_v8, %v2293_v34  ;;  %v6790_v6 = vstv %s6743_s10  ;;  %v2341_v7 = vadd.f32 %v8297_v1, %v2333_v41  ;;  %v6794_v28 = vstv %s6755_s20  ;;  %s7248_s10 = sld [smem:[#allocation12 + $0x13]]  ;;  %s7299_s20 = sld [smem:[#allocation13]] }
 0x591   : > { %v2381_v54 = vadd.f32 %v8298_v20, %v2373_v49  ;;  %v6798_v50 = vstv %s6757_s7  ;;  %v2062_v40 = vsel %vm418_vm8, %v2059_v0, %v2055_v52  ;;  %v2060_v11 = vsel %vm418_vm8, %v2057_v4, %v2059_v0  ;;  %s7305_s7 = sld [smem:[#allocation12 + $0x62]] }
 0x592   : > { %v2061_v10 = vsel %vm418_vm8, %v2055_v52, %v2057_v4  ;;  %v2099_v27 = vadd.f32 %v8299_v22, %v2091_v39  ;;  %v2065_v21 = vsel %vm420_vm10, %v2062_v40, 0.0  ;;  %vm8300_vm14 = vcmp.lt.s32.totalorder %v8189_v58, 127 }
 0x593   : > { %v6811_v30 = vsel %vm418_vm8, %v2061_v10, 0.0  ;;  %v6815_v55 = vsel %vm8300_vm14, %v2060_v11, 0.0  ;;  %v2100_v63 = vadd.f32 %v8301_v37, %v6709_v43  ;;  %v2106_v51 = vmul.f32 %v6699_v17, %v2065_v21  ;;  %v8308_v37 = vld [vmem:[#allocation101_spill] sm:$0xff] }
 0x594   : > { %v2146_v3 = vmul.f32 %v2143_v36, %v2065_v21  ;;  %v2186_v52 = vmul.f32 %v2183_v24, %v2065_v21  ;;  %v2226_v56 = vmul.f32 %v2223_v16, %v2065_v21  ;;  %v2266_v39 = vmul.f32 %v2263_v35, %v2065_v21 }
 0x595   : > { %v2306_v57 = vmul.f32 %v6790_v6, %v2065_v21  ;;  %v2346_v62 = vmul.f32 %v6794_v28, %v2065_v21  ;;  %v2386_v34 = vmul.f32 %v6798_v50, %v2065_v21  ;;  %v6823_v41 = vadd.f32 %v2106_v51, %v2101_v23 }
 0x596   : > { %v6825_v49 = vadd.f32 %v2146_v3, %v2141_v33  ;;  %v6827_v46 = vadd.f32 %v2186_v52, %v2181_v31  ;;  %v6829_v13 = vadd.f32 %v2226_v56, %v2221_v38  ;;  %v6831_v43 = vadd.f32 %v2266_v39, %v2261_v2  ;;  %v8302_v33 = vld [vmem:[#allocation95_spill] sm:$0xff]  ;;  %v8303_v38 = vld [vmem:[#allocation96_spill] sm:$0xff] }
 0x597   : > { %v6833_v60 = vadd.f32 %v2306_v57, %v2301_v53  ;;  %v6835_v59 = vadd.f32 %v2346_v62, %v2341_v7  ;;  %v6837_v0 = vadd.f32 %v2386_v34, %v2381_v54  ;;  %v2104_v4 = vmul.f32 %v6699_v17, %v6811_v30  ;;  %v8304_v53 = vld [vmem:[#allocation97_spill] sm:$0xff]  ;;  %v8305_v7 = vld [vmem:[#allocation98_spill] sm:$0xff]  ;;  %v8310_v39 = vld [vmem:[#allocation103_spill] sm:$0xff] }
 0x598   : > { %v2105_v23 = vmul.f32 %v6699_v17, %v6815_v55  ;;  %v2139_v31 = vadd.f32 %v8302_v33, %v6747_v25  ;;  %v2140_v48 = vadd.f32 %v8303_v38, %v6711_v26  ;;  %v2144_v2 = vmul.f32 %v2143_v36, %v6811_v30  ;;  %v8311_v62 = vld [vmem:[#allocation104_spill] sm:$0xff] }
 0x599   : > { %v2145_v8 = vmul.f32 %v2143_v36, %v6815_v55  ;;  %v2179_v1 = vadd.f32 %v8304_v53, %v6750_v42  ;;  %v2180_v20 = vadd.f32 %v8305_v7, %v6713_v32  ;;  %v6853_v54 = vadd.f32 %v2104_v4, %v2099_v27  ;;  %v8306_v42 = vld [vmem:[#allocation99_spill] sm:$0xff]  ;;  %v8307_v32 = vld [vmem:[#allocation100_spill] sm:$0xff] }
 0x59a   : > { %v6855_v40 = vadd.f32 %v2105_v23, %v2100_v63  ;;  %v2184_v17 = vmul.f32 %v2183_v24, %v6811_v30  ;;  %v2185_v25 = vmul.f32 %v2183_v24, %v6815_v55  ;;  %v6863_v26 = vadd.f32 %v2144_v2, %v2139_v31  ;;  %v8309_v63 = vld [vmem:[#allocation102_spill] sm:$0xff]  ;;  %v8312_v23 = vld [vmem:[#allocation105_spill] sm:$0xff] }
 0x59b   : > { %v6865_v36 = vadd.f32 %v2145_v8, %v2140_v48  ;;  %v2219_v11 = vadd.f32 %v8306_v42, %v6753_v14  ;;  %v2220_v10 = vadd.f32 %v8307_v32, %v6715_v44  ;;  %v2224_v27 = vmul.f32 %v2223_v16, %v6811_v30  ;;  %v2067_v14 = vpop.permute.xlu1 %2066 }
 0x59c   : > { %v6875_v22 = vadd.f32 %v2184_v17, %v2179_v1  ;;  %v6877_v24 = vadd.f32 %v2185_v25, %v2180_v20  ;;  %v2225_v21 = vmul.f32 %v2223_v16, %v6815_v55  ;;  %v2259_v44 = vadd.f32 %v8308_v37, %v6767_v15  ;;  %v2069_v20 = vpop.permute.xlu0 %2068 }
 0x59d   : > { %v2260_v51 = vadd.f32 %v8309_v63, %v6717_v18  ;;  %v2264_v3 = vmul.f32 %v2263_v35, %v6811_v30  ;;  %v2265_v52 = vmul.f32 %v2263_v35, %v6815_v55  ;;  %v2227_v16 = vadd.f32 %v2224_v27, %v2219_v11 }
 0x59e   : > { %v6895_v56 = vadd.f32 %v2225_v21, %v2220_v10  ;;  %v2299_v57 = vadd.f32 %v8310_v39, %v6770_v12  ;;  %v2300_v15 = vadd.f32 %v8311_v62, %v6719_v45  ;;  %v2304_v35 = vmul.f32 %v6790_v6, %v6811_v30  ;;  %v8313_v12 = vld [vmem:[#allocation106_spill] sm:$0xff] }
 0x59f   : > { %v2267_v18 = vadd.f32 %v2264_v3, %v2259_v44  ;;  %v6903_v34 = vadd.f32 %v2265_v52, %v2260_v51  ;;  %v2305_v4 = vmul.f32 %v6790_v6, %v6815_v55  ;;  %v2339_v33 = vadd.f32 %v8312_v23, %v6774_v47  ;;  %v8314_v6 = vld [vmem:[#allocation107_spill] sm:$0xff]  ;;  %v8315_v47 = vld [vmem:[#allocation108_spill] sm:$0xff]  ;;  %v2071_v17 = vpop.permute.xlu1 %2070 }
 0x5a0   : > { %v2340_v45 = vadd.f32 %v8313_v12, %v6721_v19  ;;  %v2344_v31 = vmul.f32 %v6794_v28, %v6811_v30  ;;  %v2345_v38 = vmul.f32 %v6794_v28, %v6815_v55  ;;  %v2307_v48 = vadd.f32 %v2304_v35, %v2299_v57  ;;  %v6955_v23 = vpop.permute.xlu0 %2398 }
 0x5a1   : > { %v6917_v2 = vadd.f32 %v2305_v4, %v2300_v15  ;;  %v2379_v8 = vadd.f32 %v8314_v6, %v6777_v29  ;;  %v2380_v53 = vadd.f32 %v8315_v47, %v6723_v61  ;;  %v2384_v7 = vmul.f32 %v6798_v50, %v6811_v30 }
 0x5a2   : > { %v2347_v19 = vadd.f32 %v2344_v31, %v2339_v33  ;;  %v6923_v1 = vadd.f32 %v2345_v38, %v2340_v45  ;;  %v2385_v28 = vmul.f32 %v6798_v50, %v6815_v55  ;;  %v2111_v25 = vstv %s6859_s24  ;;  %s7316_s24 = sld [smem:[#allocation12 + $0x63]] }
 0x5a3   : > { %v2151_v42 = vstv %s6861_s27  ;;  %v2191_v29 = vstv %s6871_s8  ;;  %v2231_v11 = vstv %s6873_s13  ;;  %v2387_v32 = vadd.f32 %v2384_v7, %v2379_v8  ;;  %s7318_s27 = sld [smem:[#allocation13 + $0x4]]  ;;  %s7333_s8 = sld [smem:[#allocation12 + $0x3a]] }
 0x5a4   : > { %v6933_v10 = vadd.f32 %v2385_v28, %v2380_v53  ;;  %v2271_v61 = vstv %s6881_s14  ;;  %v2311_v27 = vstv %s6883_s21  ;;  %v2351_v21 = vstv %s6891_s16  ;;  %s7353_s13 = sld [smem:[#allocation12 + $0x3b]]  ;;  %s7355_s14 = sld [smem:[#allocation13 + $0x2]] }
 0x5a5   : > { %v6939_v37 = vstv %s6893_s4  ;;  %v2073_v30 = vsel %vm8316_vm15, %v2067_v14, %v2069_v20  ;;  %v2072_v50 = vsel %vm8202_vm9, %v2069_v20, %v2071_v17  ;;  %v2074_v44 = vsel %vm8318_vm12, %v2071_v17, %v2067_v14  ;;  %s7369_s21 = sld [smem:[#allocation12 + $0x8a]]  ;;  %s7386_s16 = sld [smem:[#allocation12 + $0x8b]] }
 0x5a6   : > { %v2075_v55 = vsel %vm8317_vm11, %v2073_v30, 0.0  ;;  %vm8319_vm13 = vcmp.lt.s32.totalorder %v8189_v58, 126  ;;  %v6952_v51 = vstv %s6901_s5  ;;  %vm8320_vm14 = vcmp.lt.s32.totalorder %v4171_v9, 126  ;;  %s7398_s4 = sld [smem:[#allocation13 + $0x6]] }
 0x5a7   : > { %v2076_v63 = vsel %vm8319_vm13, %v2072_v50, 0.0  ;;  %v2112_v3 = vmul.f32 %v2111_v25, %v2075_v55  ;;  %v2152_v52 = vmul.f32 %v2151_v42, %v2075_v55  ;;  %v2192_v39 = vmul.f32 %v2191_v29, %v2075_v55  ;;  %s7405_s5 = sld [smem:[#allocation12 + $0x4e]] }
 0x5a8   : > { %v2232_v57 = vmul.f32 %v2231_v11, %v2075_v55  ;;  %v2272_v62 = vmul.f32 %v2271_v61, %v2075_v55  ;;  %v2312_v15 = vmul.f32 %v2311_v27, %v2075_v55  ;;  %v2352_v35 = vmul.f32 %v2351_v21, %v2075_v55 }
 0x5a9   : > { %v2392_v4 = vmul.f32 %v6939_v37, %v2075_v55  ;;  %v6958_v33 = vadd.f32 %v2112_v3, %v6853_v54  ;;  %v6961_v14 = vadd.f32 %v2152_v52, %v6863_v26  ;;  %v6964_v12 = vadd.f32 %v2192_v39, %v6875_v22  ;;  %v2401_v54 = vpop.permute.xlu1 %2400 }
 0x5aa   : > { %v6966_v45 = vadd.f32 %v2232_v57, %v2227_v16  ;;  %v6970_v31 = vadd.f32 %v2272_v62, %v2267_v18  ;;  %v6972_v38 = vadd.f32 %v2312_v15, %v2307_v48  ;;  %v6974_v6 = vadd.f32 %v2352_v35, %v2347_v19 }
 0x5ab   : > { %v6976_v8 = vadd.f32 %v2392_v4, %v2387_v32  ;;  %v2077_v26 = vsel %vm8320_vm14, %v2074_v44, 0.0  ;;  %v2113_v22 = vmul.f32 %v2111_v25, %v2076_v63  ;;  %v2153_v16 = vmul.f32 %v2151_v42, %v2076_v63 }
 0x5ac   : > { %v2193_v47 = vmul.f32 %v2191_v29, %v2076_v63  ;;  %v2114_v18 = vmul.f32 %v2111_v25, %v2077_v26  ;;  %v2154_v48 = vmul.f32 %v2151_v42, %v2077_v26  ;;  %v2194_v53 = vmul.f32 %v2191_v29, %v2077_v26 }
 0x5ad   : > { %v2233_v19 = vmul.f32 %v2231_v11, %v2076_v63  ;;  %v6993_v7 = vadd.f32 %v2113_v22, %v6855_v40  ;;  %v6996_v28 = vadd.f32 %v2153_v16, %v6865_v36  ;;  %v2234_v17 = vmul.f32 %v2231_v11, %v2077_v26  ;;  %v2403_v36 = vpop.permute.xlu0 %2402  ;;  %v7021_v50 = vpop.permute.xlu1 %2410 }
 0x5ae   : > { %v6999_v20 = vadd.f32 %v2193_v47, %v6877_v24  ;;  %v7004_v25 = vadd.f32 %v2114_v18, %v6823_v41  ;;  %v7007_v42 = vadd.f32 %v2154_v48, %v6825_v49  ;;  %v7010_v29 = vadd.f32 %v2194_v53, %v6827_v46 }
 0x5af   : > { %v7013_v40 = vadd.f32 %v2233_v19, %v6895_v56  ;;  %v7018_v24 = vadd.f32 %v2234_v17, %v6829_v13  ;;  %v2273_v11 = vmul.f32 %v2271_v61, %v2076_v63  ;;  %v2274_v32 = vmul.f32 %v2271_v61, %v2077_v26 }
 0x5b0   : > { %v2313_v41 = vmul.f32 %v2311_v27, %v2076_v63  ;;  %v2314_v30 = vmul.f32 %v2311_v27, %v2077_v26  ;;  %v2353_v49 = vmul.f32 %v2351_v21, %v2076_v63  ;;  %v2354_v46 = vmul.f32 %v2351_v21, %v2077_v26 }
 0x5b1   : > { %v2393_v56 = vmul.f32 %v6939_v37, %v2076_v63  ;;  %v7024_v13 = vadd.f32 %v2273_v11, %v6903_v34  ;;  %v7027_v61 = vadd.f32 %v2274_v32, %v6831_v43  ;;  %v2394_v27 = vmul.f32 %v6939_v37, %v2077_v26  ;;  %v7055_v62 = vpop.permute.xlu0 %2412  ;;  %v2415_v22 = vpop.permute.xlu1 %2414 }
 0x5b2   : > { %v7030_v55 = vadd.f32 %v2313_v41, %v6917_v2  ;;  %v7034_v21 = vadd.f32 %v2314_v30, %v6833_v60  ;;  %v7037_v44 = vadd.f32 %v2353_v49, %v6923_v1  ;;  %v7040_v63 = vadd.f32 %v2354_v46, %v6835_v59 }
 0x5b3   : > { %v7043_v34 = vadd.f32 %v2393_v56, %v6933_v10  ;;  %v7046_v43 = vadd.f32 %v2394_v27, %v6837_v0  ;;  %v2487_v2 = vstv %s6968_s6  ;;  %v2527_v3 = vstv %s6978_s29  ;;  %s7421_s6 = sld [smem:[#allocation12 + $0x4f]]  ;;  %s7432_s29 = sld [smem:[#allocation13 + $0x3]] }
 0x5b4   : > { %8321 = vst [vmem:[#allocation33_spill] sm:$0xff] %v7034_v21  ;;  %v2567_v37 = vstv %s6980_s1  ;;  %v2607_v52 = vstv %s6984_s2  ;;  %v2647_v60 = vstv %s6986_s0  ;;  %v2687_v39 = vstv %s6988_s15  ;;  %v8345_v21 = vld [vmem:[#allocation114_spill] sm:$0xff]  ;;  %s7439_s1 = sld [smem:[#allocation12 + $0x76]]  ;;  %s7455_s2 = sld [smem:[#allocation12 + $0x77]] }
 0x5b5   : > { %8322 = vst [vmem:[#allocation34_spill] sm:$0xff] %v7046_v43  ;;  %v2727_v57 = vstv %s6990_s9  ;;  %v2406_v59 = vsel %vm434_vm1, %v2403_v36, %v6955_v23  ;;  %v2404_v1 = vsel %vm434_vm1, %v2401_v54, %v2403_v36  ;;  %v2405_v0 = vsel %vm434_vm1, %v6955_v23, %v2401_v54  ;;  %v7126_v27 = vpop.permute.xlu1 %2424  ;;  %vm8336_vm1 = vmmov %vm8202_vm9  ;;  %s7466_s0 = sld [smem:[#allocation13 + $0x5]]  ;;  %s7473_s15 = sld [smem:[#allocation12 + $0x9e]] }
 0x5b6   : > { %v7066_v10 = vstv %s7001_s11  ;;  %v2407_v15 = vsel %vm412_vm0, %v2406_v59, 0.0  ;;  %v2408_v35 = vsel %vm413_vm3, %v2405_v0, 0.0  ;;  %v2409_v4 = vsel %vm414_vm4, %v2404_v1, 0.0  ;;  %vm8338_vm3 = vmmov %vm8336_vm1  ;;  %s7489_s9 = sld [smem:[#allocation12 + $0x9f]] }
 0x5b7   : > { %v7075_v26 = vstv %s7015_s19  ;;  %v2448_v16 = vmul.f32 %v6952_v51, %v2407_v15  ;;  %v2488_v47 = vmul.f32 %v2487_v2, %v2407_v15  ;;  %v2528_v18 = vmul.f32 %v2527_v3, %v2407_v15  ;;  %vm8339_vm4 = vmmov %vm8336_vm1  ;;  %s7500_s11 = sld [smem:[#allocation13 + $0x7]]  ;;  %s8381_s19 = sld [smem:[#allocation31_spill]] }
 0x5b8   : > { %v2568_v48 = vmul.f32 %v2567_v37, %v2407_v15  ;;  %v2608_v23 = vmul.f32 %v2607_v52, %v2407_v15  ;;  %v2648_v54 = vmul.f32 %v2647_v60, %v2407_v15  ;;  %v2688_v53 = vmul.f32 %v2687_v39, %v2407_v15 }
 0x5b9   : > { %v2728_v19 = vmul.f32 %v2727_v57, %v2407_v15  ;;  %v7083_v17 = vadd.f32 %v2448_v16, %v6958_v33  ;;  %v7086_v36 = vadd.f32 %v2488_v47, %v6961_v14  ;;  %v7089_v11 = vadd.f32 %v2528_v18, %v6964_v12  ;;  %v7114_v12 = vpop.permute.xlu0 %2422 }
 0x5ba   : > { %v7092_v32 = vadd.f32 %v2568_v48, %v6966_v45  ;;  %v7099_v41 = vadd.f32 %v2608_v23, %v6970_v31  ;;  %v7102_v30 = vadd.f32 %v2648_v54, %v6972_v38  ;;  %v7105_v33 = vadd.f32 %v2688_v53, %v6974_v6 }
 0x5bb   : > { %v7108_v14 = vadd.f32 %v2728_v19, %v6976_v8  ;;  %v2449_v45 = vmul.f32 %v6952_v51, %v2408_v35  ;;  %v7118_v31 = vmul.f32 %v6952_v51, %v2409_v4  ;;  %v2489_v49 = vmul.f32 %v2487_v2, %v2408_v35 }
 0x5bc   : > { %8323 = vst [vmem:[#allocation35_spill] sm:$0xff] %v7102_v30  ;;  %v7120_v38 = vmul.f32 %v2487_v2, %v2409_v4  ;;  %v2529_v46 = vmul.f32 %v2527_v3, %v2408_v35  ;;  %v7122_v6 = vmul.f32 %v2527_v3, %v2409_v4  ;;  %v2569_v56 = vmul.f32 %v2567_v37, %v2408_v35 }
 0x5bd   : > { %8324 = vst [vmem:[#allocation58_spill] sm:$0xff] %v7108_v14  ;;  %v7124_v8 = vmul.f32 %v2567_v37, %v2409_v4  ;;  %v7129_v59 = vadd.f32 %v2449_v45, %v6993_v7  ;;  %v7132_v1 = vadd.f32 %v2489_v49, %v6996_v28  ;;  %v2609_v51 = vmul.f32 %v2607_v52, %v2408_v35  ;;  %v2427_v48 = vpop.permute.xlu0 %2426 }
 0x5be   : > { %v7134_v0 = vmul.f32 %v2607_v52, %v2409_v4  ;;  %v7137_v2 = vadd.f32 %v2529_v46, %v6999_v20  ;;  %v7140_v3 = vadd.f32 %v2569_v56, %v7013_v40  ;;  %v2649_v37 = vmul.f32 %v2647_v60, %v2408_v35 }
 0x5bf   : > { %v7142_v15 = vmul.f32 %v2647_v60, %v2409_v4  ;;  %v7145_v7 = vadd.f32 %v2609_v51, %v7024_v13  ;;  %v2689_v28 = vmul.f32 %v2687_v39, %v2408_v35  ;;  %v7147_v16 = vmul.f32 %v2687_v39, %v2409_v4 }
 0x5c0   : > { %v2729_v52 = vmul.f32 %v2727_v57, %v2408_v35  ;;  %v7150_v47 = vadd.f32 %v2649_v37, %v7030_v55  ;;  %v7152_v20 = vmul.f32 %v2727_v57, %v2409_v4  ;;  %v2535_v18 = vstv %s7078_s23  ;;  %v2435_v35 = vpop.permute.xlu1 %2434  ;;  %s3497_s23 = smul.u32 192, %s8381_s19 }
 0x5c1   : > { %8325 = vst [vmem:[#allocation61_spill] sm:$0xff] %v7142_v15  ;;  %v2575_v40 = vstv %s7080_s12  ;;  %v7157_v23 = vadd.f32 %v2689_v28, %v7037_v44  ;;  %v2615_v13 = vstv %s7094_s22  ;;  %v2655_v54 = vstv %s7096_s3  ;;  %s8382_s22 = sld [smem:[#allocation26_spill]]  ;;  %s8383_s3 = sld [smem:[#allocation29_spill]] }
 0x5c2   : > { %8326 = vst [vmem:[#allocation62_spill] sm:$0xff] %v7150_v47  ;;  %8327 = vst [vmem:[#allocation66_spill] sm:$0xff] %v7152_v20  ;;  %v7160_v60 = vadd.f32 %v2729_v52, %v7043_v34  ;;  %v2695_v53 = vstv %s7110_s26  ;;  %v2735_v39 = vstv %s7112_s30  ;;  %v2417_v55 = vsel %vm447_vm2, %v7021_v50, %v7055_v62  ;;  %s7659_s12 = scalar_lea.vmem [#allocation15], %s3497_s23 }
 0x5c3   : > { %v2416_v57 = vsel %vm447_vm2, %v7055_v62, %v2415_v22  ;;  %v2420_v44 = vsel %vm416_vm6, %v2417_v55, 0.0  ;;  %v2418_v34 = vsel %vm447_vm2, %v2415_v22, %v7021_v50  ;;  %v2430_v19 = vsel %vm418_vm8, %v2427_v48, %v7114_v12  ;;  %vm8337_vm2 = vmmov %vm8336_vm1  ;;  %s3091_s30 = sshll.u32 %s7659_s12, 4  ;;  %s7707_s30 = int_to_ptr.vmem [resolvable:$true] %s3091_s30 }
 0x5c4   : > { %8328 = vst [vmem:[#allocation67_spill] sm:$0xff] %v7160_v60  ;;  %v2421_v4 = vsel %vm417_vm7, %v2416_v57, 0.0  ;;  %v7184_v45 = vmul.f32 %v7066_v10, %v2420_v44  ;;  %v2497_v62 = vmul.f32 %v7075_v26, %v2420_v44  ;;  %v7187_v49 = vmul.f32 %v2535_v18, %v2420_v44  ;;  %vm8341_vm6 = vmmov %vm8320_vm14 }
 0x5c5   : > { %v7189_v46 = vmul.f32 %v2575_v40, %v2420_v44  ;;  %v7191_v56 = vmul.f32 %v2615_v13, %v2420_v44  ;;  %v7193_v51 = vmul.f32 %v2655_v54, %v2420_v44  ;;  %v7195_v50 = vmul.f32 %v2695_v53, %v2420_v44 }
 0x5c6   : > { %v7197_v22 = vmul.f32 %v2735_v39, %v2420_v44  ;;  %v2419_v37 = vsel %vm415_vm5, %v2418_v34, 0.0  ;;  %v2458_v28 = vmul.f32 %v7066_v10, %v2421_v4  ;;  %v2498_v52 = vmul.f32 %v7075_v26, %v2421_v4  ;;  %vm8340_vm5 = vmmov %vm8319_vm13 }
 0x5c7   : > { %8329 = vst [vmem:[#allocation70_spill] sm:$0xff] %v7193_v51  ;;  %v7205_v55 = vmul.f32 %v2535_v18, %v2421_v4  ;;  %v2456_v57 = vmul.f32 %v7066_v10, %v2419_v37  ;;  %v2496_v60 = vmul.f32 %v7075_v26, %v2419_v37  ;;  %v7209_v14 = vmul.f32 %v2535_v18, %v2419_v37  ;;  %v2439_v51 = vpop.permute.xlu1 %2438  ;;  %s3498_s26 = smul.u32 384, %s8382_s22  ;;  %p8385_p0 = scmp.ne.s32.totalorder %s8383_s3, 0 }
 0x5c8   : > { %8330 = vst [vmem:[#allocation41_spill] sm:$0xff] %v7197_v22  ;;  %v7211_v20 = vmul.f32 %v2575_v40, %v2419_v37  ;;  %v7217_v44 = vmul.f32 %v2575_v40, %v2421_v4  ;;  %v7219_v34 = vmul.f32 %v2615_v13, %v2419_v37  ;;  %v7221_v22 = vmul.f32 %v2615_v13, %v2421_v4 }
 0x5c9   : > { %v7223_v43 = vmul.f32 %v2655_v54, %v2419_v37  ;;  %v7225_v10 = vmul.f32 %v2655_v54, %v2421_v4  ;;  %v7227_v26 = vmul.f32 %v2695_v53, %v2419_v37  ;;  %v7229_v18 = vmul.f32 %v2695_v53, %v2421_v4  ;;  %v2437_v53 = vpop.permute.xlu0 %2436 }
 0x5ca   : > { %v7231_v47 = vmul.f32 %v2735_v39, %v2419_v37  ;;  %v7233_v30 = vmul.f32 %v2735_v39, %v2421_v4  ;;  %v7237_v40 = vsel %vm420_vm10, %v2430_v19, 0.0  ;;  %v2428_v13 = vsel %vm418_vm8, %v7126_v27, %v2427_v48 }
 0x5cb   : > { %8331 = vst [vmem:[#allocation51_spill] sm:$0xff] %v7223_v43  ;;  %8332 = vst [vmem:[#allocation53_spill] sm:$0xff] %v7225_v10  ;;  %v2429_v54 = vsel %vm418_vm8, %v7114_v12, %v7126_v27  ;;  %vm8335_vm0 = vcmp.lt.s32.totalorder %v8189_v58, 127  ;;  %v2441_v48 = vsel %vm8336_vm1, %v2435_v35, %v2437_v53  ;;  %v2440_v12 = vsel %vm8337_vm2, %v2437_v53, %v2439_v51  ;;  %v8344_v10 = vld [vmem:[#allocation113_spill] sm:$0xff] }
 0x5cc   : > { %8333 = vst [vmem:[#allocation37_spill] sm:$0xff] %v7231_v47  ;;  %8334 = vst [vmem:[#allocation38_spill] sm:$0xff] %v7233_v30  ;;  %v7252_v39 = vsel %vm418_vm8, %v2429_v54, 0.0  ;;  %v7256_v4 = vsel %vm8335_vm0, %v2428_v13, 0.0  ;;  %v7264_v27 = vsel %vm8338_vm3, %v2441_v48, 0.0  ;;  %v2442_v19 = vsel %vm8339_vm4, %v2439_v51, %v2435_v35  ;;  %v8342_v51 = vld [vmem:[#allocation109_spill] sm:$0xff] }
 0x5cd   : > { %v7270_v37 = vsel %vm8340_vm5, %v2440_v12, 0.0  ;;  %v2493_v13 = vadd.f32 %v7120_v38, %v7007_v42  ;;  %v7276_v54 = vsel %vm8341_vm6, %v2442_v19, 0.0  ;;  %v2499_v53 = vadd.f32 %v2496_v60, %v7086_v36  ;;  %v8343_v38 = vld [vmem:[#allocation110_spill] sm:$0xff] }
 0x5ce   : > { %v2500_v30 = vadd.f32 %v2497_v62, %v7132_v1  ;;  %v2511_v48 = vstv %s7199_s25  ;;  %v2519_v12 = vstv %s7213_s28  ;;  %v2772_v19 = vstv %s7215_s17  ;;  %s8384_s17 = sld [smem:[#allocation200_spill]] }
 0x5cf   : > { %v2501_v47 = vadd.f32 %v2498_v52, %v2493_v13  ;;  %v2512_v5 = vmul.f32 %v2511_v48, %v7252_v39  ;;  %v2513_v35 = vmul.f32 %v2511_v48, %v7256_v4  ;;  %v2514_v58 = vmul.f32 %v2511_v48, %v7237_v40 }
 0x5d0   : > { %v2507_v42 = vadd.f32 %v8342_v51, %v2499_v53  ;;  %v2508_v9 = vadd.f32 %v8343_v38, %v2500_v30  ;;  %v2520_v1 = vmul.f32 %v2519_v12, %v7264_v27  ;;  %v2521_v60 = vmul.f32 %v2519_v12, %v7270_v37 }
 0x5d1   : > { %v2509_v36 = vadd.f32 %v8344_v10, %v2501_v47  ;;  %v2522_v62 = vmul.f32 %v2519_v12, %v7276_v54  ;;  %v2453_v48 = vadd.f32 %v7118_v31, %v7004_v25  ;;  %v2459_v43 = vadd.f32 %v2456_v57, %v7083_v17 }
 0x5d2   : > { %v2515_v52 = vadd.f32 %v2512_v5, %v2507_v42  ;;  %v2516_v13 = vadd.f32 %v2513_v35, %v2508_v9  ;;  %v2460_v30 = vadd.f32 %v7184_v45, %v7129_v59  ;;  %v2471_v51 = vstv %s7246_s18  ;;  %v8346_v35 = vld [vmem:[#allocation115_spill] sm:$0xff]  ;;  %v8347_v45 = vld [vmem:[#allocation116_spill] sm:$0xff] }
 0x5d3   : > { %v2517_v53 = vadd.f32 %v2514_v58, %v2509_v36  ;;  %v2479_v38 = vstv %s7248_s10  ;;  %v2461_v15 = vadd.f32 %v2458_v28, %v2453_v48  ;;  %v2467_v12 = vadd.f32 %v8345_v21, %v2459_v43  ;;  %s3078_s10 = scalar_lea.sflag [#allocation4], %s8381_s19 }
 0x5d4   : > { %v2523_v47 = vadd.f32 %v2520_v1, %v2515_v52  ;;  %v2524_v10 = vadd.f32 %v2521_v60, %v2516_v13  ;;  %v2468_v42 = vadd.f32 %v8346_v35, %v2460_v30  ;;  %v2472_v25 = vmul.f32 %v2471_v51, %v7252_v39  ;;  %s7705_s18 = scalar_lea.hbm %s8384_s17, %s3498_s26 }
 0x5d5   : > { %v2525_v5 = vadd.f32 %v2522_v62, %v2517_v53  ;;  %v2473_v17 = vmul.f32 %v2471_v51, %v7256_v4  ;;  %v2469_v57 = vadd.f32 %v8347_v45, %v2461_v15  ;;  %v2474_v58 = vmul.f32 %v2471_v51, %v7237_v40 }
 0x5d6   : > { %v2773_v31 = vadd.f32 %v2772_v19, %v2523_v47  ;;  %v2774_v59 = vadd.f32 %v2772_v19, %v2524_v10  ;;  %v2475_v36 = vadd.f32 %v2472_v25, %v2467_v12  ;;  %v2480_v21 = vmul.f32 %v2479_v38, %v7264_v27 }
 0x5d7   : > { %v2775_v9 = vadd.f32 %v2772_v19, %v2525_v5  ;;  %v2476_v28 = vadd.f32 %v2473_v17, %v2468_v42  ;;  %v2477_v62 = vadd.f32 %v2474_v58, %v2469_v57  ;;  %v2481_v52 = vmul.f32 %v2479_v38, %v7270_v37 }
 0x5d8   : > { %vm2809_vm7 = vcmp.ge.f32.partialorder %v2773_v31, 0.0  ;;  %vm2810_vm8 = vcmp.ge.f32.partialorder %v2774_v59, 0.0  ;;  %v2833_v43 = vmul.f32 0.01, %v2773_v31  ;;  %v2834_v1 = vmul.f32 0.01, %v2774_v59 }
 0x5d9   : > { %vm2811_vm10 = vcmp.ge.f32.partialorder %v2775_v9, 0.0  ;;  %v2835_v60 = vmul.f32 0.01, %v2775_v9  ;;  %v2482_v19 = vmul.f32 %v2479_v38, %v7276_v54  ;;  %v2483_v48 = vadd.f32 %v2480_v21, %v2475_v36 }
 0x5da   : > { %v7311_v13 = vsel %vm2809_vm7, %v2773_v31, %v2833_v43  ;;  %v7313_v15 = vsel %vm2810_vm8, %v2774_v59, %v2834_v1  ;;  %v2484_v51 = vadd.f32 %v2481_v52, %v2476_v28  ;;  %v2767_v47 = vstv %s7299_s20  ;;  %s3761_s20 = scalar_lea.vmem %s7707_s30, 3072 }
 0x5db   : > { %v7320_v53 = vsel %vm2811_vm10, %v2775_v9, %v2835_v60  ;;  %v2882_v30 = vadd.f32 %v7313_v15, %v7311_v13  ;;  %v2485_v10 = vadd.f32 %v2482_v19, %v2477_v62  ;;  %v2768_v12 = vadd.f32 %v2767_v47, %v2483_v48  ;;  %p3762_p13 = scmp.ne.s32.totalorder %s7707_s30, %s3761_s20 }
 0x5dc   : > { %v2613_v5 = vadd.f32 %v7134_v0, %v7027_v61  ;;  %v2619_v38 = vadd.f32 %v7219_v34, %v7099_v41  ;;  %v2769_v42 = vadd.f32 %v2767_v47, %v2484_v51  ;;  %v2620_v25 = vadd.f32 %v7191_v56, %v7145_v7  ;;  %v8348_v41 = vld [vmem:[#allocation119_spill] sm:$0xff]  ;;  %v8349_v34 = vld [vmem:[#allocation120_spill] sm:$0xff]  ;;  %v8350_v56 = vld [vmem:[#allocation121_spill] sm:$0xff] }
 0x5dd   : > { %v2883_v35 = vadd.f32 %v2882_v30, %v7320_v53  ;;  %v2631_v17 = vstv %s7305_s7  ;;  %v2770_v31 = vadd.f32 %v2767_v47, %v2485_v10  ;;  %vm2806_vm15 = vcmp.ge.f32.partialorder %v2768_v12, 0.0  ;;  %p3763_p1 = pnand %p3762_p13, %p8385_p0  ;;  %s3856_s7 = smov [#allocation15]  }
 0x5de   : > { %v2830_v59 = vmul.f32 0.01, %v2768_v12  ;;  %v2621_v45 = vadd.f32 %v7221_v22, %v2613_v5  ;;  %vm2807_vm9 = vcmp.ge.f32.partialorder %v2769_v42, 0.0  ;;  %v2831_v61 = vmul.f32 0.01, %v2769_v42 }
 0x5df   : > { %2884 = vadd.xlane.f32.xlu1 %v2883_v35  ;;  %v2627_v0 = vadd.f32 %v8348_v41, %v2619_v38  ;;  %v2628_v57 = vadd.f32 %v8349_v34, %v2620_v25  ;;  %vm2808_vm11 = vcmp.ge.f32.partialorder %v2770_v31, 0.0  ;;  %v2832_v58 = vmul.f32 0.01, %v2770_v31  ;;  %p3764_p3 = pneg %p3763_p1 }
 0x5e0   : > { %v7338_v7 = vsel %vm2806_vm15, %v2768_v12, %v2830_v59  ;;  %v2629_v9 = vadd.f32 %v8350_v56, %v2621_v45  ;;  %v7341_v36 = vsel %vm2807_vm9, %v2769_v42, %v2831_v61  ;;  %v2632_v28 = vmul.f32 %v2631_v17, %v7252_v39  ;;  %v8351_v61 = vld [vmem:[#allocation122_spill] sm:$0xff] }
 0x5e1   : > { %v2633_v22 = vmul.f32 %v2631_v17, %v7256_v4  ;;  %v2634_v21 = vmul.f32 %v2631_v17, %v7237_v40  ;;  %v7346_v43 = vsel %vm2808_vm11, %v2770_v31, %v2832_v58  ;;  %v2878_v1 = vadd.f32 %v7341_v36, %v7338_v7 }
 0x5e2   : > { %v2639_v60 = vstv %s7316_s24  ;;  %v2787_v62 = vstv %s7318_s27  ;;  %v2635_v52 = vadd.f32 %v2632_v28, %v2627_v0  ;;  %v2533_v12 = vadd.f32 %v7122_v6, %v7010_v29  ;;  %v8352_v6 = vld [vmem:[#allocation125_spill] sm:$0xff]  ;;  %s3765_s24 = sshll.u32 %s3856_s7, 4  ;;  %s3766_s24 = int_to_ptr.vmem [resolvable:$false] %s3765_s24 }
 0x5e3   : > { %v2636_v19 = vadd.f32 %v2633_v22, %v2628_v57  ;;  %v2637_v48 = vadd.f32 %v2634_v21, %v2629_v9  ;;  %v2640_v30 = vmul.f32 %v2639_v60, %v7264_v27  ;;  %v2879_v51 = vadd.f32 %v2878_v1, %v7346_v43  ;;  %s3767_s27 = scalar_lea.vmem %s3766_s24, 6144  ;;  %p3768_p4 = scmp.lt.s32.totalorder %s7707_s30, %s3766_s24 }
 0x5e4   : > { %v2641_v47 = vmul.f32 %v2639_v60, %v7270_v37  ;;  %v2642_v10 = vmul.f32 %v2639_v60, %v7276_v54  ;;  %v2539_v38 = vadd.f32 %v7209_v14, %v7089_v11  ;;  %v2540_v35 = vadd.f32 %v7187_v49, %v7137_v2  ;;  %v8353_v49 = vld [vmem:[#allocation126_spill] sm:$0xff]  ;;  %p3769_p2 = scmp.lt.s32.totalorder %s3767_s27, %s3761_s20 }
 0x5e5   : > { %v2643_v5 = vadd.f32 %v2640_v30, %v2635_v52  ;;  %v2551_v42 = vstv %s7333_s8  ;;  %2880 = vadd.xlane.f32.xlu0 %v2879_v51  ;;  %v2541_v31 = vadd.f32 %v7205_v55, %v2533_v12  ;;  %v2559_v21 = vstv %s7353_s13 }
 0x5e6   : > { %v2644_v25 = vadd.f32 %v2641_v47, %v2636_v19  ;;  %v2645_v17 = vadd.f32 %v2642_v10, %v2637_v48  ;;  %v2552_v59 = vmul.f32 %v2551_v42, %v7252_v39  ;;  %v2547_v29 = vadd.f32 %v8351_v61, %v2539_v38  ;;  %p3770_p10 = por %p3769_p2, %p3768_p4 }
 0x5e7   : > { %v2788_v45 = vadd.f32 %v2787_v62, %v2643_v5  ;;  %v2548_v41 = vadd.f32 %v8352_v6, %v2540_v35  ;;  %v2553_v11 = vmul.f32 %v2551_v42, %v7256_v4  ;;  %v2549_v0 = vadd.f32 %v8353_v49, %v2541_v31 }
 0x5e8   : > { %v2789_v14 = vadd.f32 %v2787_v62, %v2644_v25  ;;  %v2790_v2 = vadd.f32 %v2787_v62, %v2645_v17  ;;  %v2554_v34 = vmul.f32 %v2551_v42, %v7237_v40  ;;  %v2555_v57 = vadd.f32 %v2552_v59, %v2547_v29  ;;  %v8354_v17 = vld [vmem:[#allocation136_spill] sm:$0xff]  ;;  %p3771_p11 = pnand %p3770_p10, %p3764_p3 }
 0x5e9   : > { %vm2818_vm12 = vcmp.ge.f32.partialorder %v2788_v45, 0.0  ;;  %v2842_v55 = vmul.f32 0.01, %v2788_v45  ;;  %v2556_v58 = vadd.f32 %v2553_v11, %v2548_v41  ;;  %v2777_v1 = vstv %s7355_s14 }
 0x5ea   : > { %vm2819_vm13 = vcmp.ge.f32.partialorder %v2789_v14, 0.0  ;;  %vm2820_vm14 = vcmp.ge.f32.partialorder %v2790_v2, 0.0  ;;  %v2843_v56 = vmul.f32 0.01, %v2789_v14  ;;  %v2844_v9 = vmul.f32 0.01, %v2790_v2 }
 0x5eb   : > { %v7376_v28 = vsel %vm2818_vm12, %v2788_v45, %v2842_v55  ;;  %v2557_v22 = vadd.f32 %v2554_v34, %v2549_v0  ;;  %v2560_v52 = vmul.f32 %v2559_v21, %v7264_v27  ;;  %v2561_v19 = vmul.f32 %v2559_v21, %v7270_v37 }
 0x5ec   : > { %v7380_v60 = vsel %vm2819_vm13, %v2789_v14, %v2843_v56  ;;  %v7382_v62 = vsel %vm2820_vm14, %v2790_v2, %v2844_v9  ;;  %v2562_v30 = vmul.f32 %v2559_v21, %v7276_v54  ;;  %v2693_v51 = vadd.f32 %v7147_v16, %v7040_v63  ;;  %v8355_v16 = vld [vmem:[#allocation137_spill] sm:$0xff] }
 0x5ed   : > { %v2894_v48 = vadd.f32 %v7380_v60, %v7376_v28  ;;  %v2699_v47 = vadd.f32 %v7227_v26, %v7105_v33  ;;  %v2563_v10 = vadd.f32 %v2560_v52, %v2555_v57  ;;  %v2564_v12 = vadd.f32 %v2561_v19, %v2556_v58 }
 0x5ee   : > { %v2700_v5 = vadd.f32 %v7195_v50, %v7157_v23  ;;  %v2711_v38 = vstv %s7369_s21  ;;  %v2565_v42 = vadd.f32 %v2562_v30, %v2557_v22  ;;  %v2701_v25 = vadd.f32 %v7229_v18, %v2693_v51  ;;  %v8356_v50 = vld [vmem:[#allocation140_spill] sm:$0xff] }
 0x5ef   : > { %v2895_v35 = vadd.f32 %v2894_v48, %v7382_v62  ;;  %v2707_v31 = vadd.f32 %v8354_v17, %v2699_v47  ;;  %v2778_v59 = vadd.f32 %v2777_v1, %v2563_v10  ;;  %v2779_v63 = vadd.f32 %v2777_v1, %v2564_v12  ;;  %v8357_v10 = vld [vmem:[#allocation145_spill] sm:$0xff] }
 0x5f0   : > { %v2708_v45 = vadd.f32 %v8355_v16, %v2700_v5  ;;  %v2712_v33 = vmul.f32 %v2711_v38, %v7252_v39  ;;  %v2780_v23 = vadd.f32 %v2777_v1, %v2565_v42  ;;  %v2709_v26 = vadd.f32 %v8356_v50, %v2701_v25 }
 0x5f1   : > { %2896 = vadd.xlane.f32.xlu1 %v2895_v35  ;;  %v2713_v61 = vmul.f32 %v2711_v38, %v7256_v4  ;;  %v2714_v29 = vmul.f32 %v2711_v38, %v7237_v40  ;;  %vm2812_vm0 = vcmp.ge.f32.partialorder %v2778_v59, 0.0  ;;  %vm2813_vm1 = vcmp.ge.f32.partialorder %v2779_v63, 0.0  ;;  %v8358_v38 = vld [vmem:[#allocation146_spill] sm:$0xff] }
 0x5f2   : > { %v2836_v18 = vmul.f32 0.01, %v2778_v59  ;;  %v2837_v6 = vmul.f32 0.01, %v2779_v63  ;;  %vm2814_vm2 = vcmp.ge.f32.partialorder %v2780_v23, 0.0  ;;  %v2715_v11 = vadd.f32 %v2712_v33, %v2707_v31 }
 0x5f3   : > { %v2838_v41 = vmul.f32 0.01, %v2780_v23  ;;  %v2716_v14 = vadd.f32 %v2713_v61, %v2708_v45  ;;  %v2717_v0 = vadd.f32 %v2714_v29, %v2709_v26  ;;  %v2719_v34 = vstv %s7386_s16 }
 0x5f4   : > { %v7410_v2 = vsel %vm2812_vm0, %v2778_v59, %v2836_v18  ;;  %v7412_v49 = vsel %vm2813_vm1, %v2779_v63, %v2837_v6  ;;  %v2720_v58 = vmul.f32 %v2719_v34, %v7264_v27  ;;  %v2721_v56 = vmul.f32 %v2719_v34, %v7270_v37 }
 0x5f5   : > { %v7415_v55 = vsel %vm2814_vm2, %v2780_v23, %v2838_v41  ;;  %v2886_v57 = vadd.f32 %v7412_v49, %v7410_v2  ;;  %v2722_v9 = vmul.f32 %v2719_v34, %v7276_v54  ;;  %v2797_v22 = vstv %s7398_s4  ;;  %v8360_v41 = vld [vmem:[#allocation33_spill] sm:$0xff]  ;;  %v8363_v34 = vld [vmem:[#allocation51_spill] sm:$0xff] }
 0x5f6   : > { %v2573_v21 = vadd.f32 %v7124_v8, %v7018_v24  ;;  %v2579_v1 = vadd.f32 %v7211_v20, %v7092_v32  ;;  %v2723_v19 = vadd.f32 %v2720_v58, %v2715_v11  ;;  %v2724_v48 = vadd.f32 %v2721_v56, %v2716_v14  ;;  %v8361_v11 = vld [vmem:[#allocation61_spill] sm:$0xff] }
 0x5f7   : > { %v2887_v52 = vadd.f32 %v2886_v57, %v7415_v55  ;;  %v2580_v30 = vadd.f32 %v7189_v46, %v7140_v3  ;;  %v2725_v51 = vadd.f32 %v2722_v9, %v2717_v0  ;;  %v2591_v5 = vstv %s7405_s5  ;;  %v8359_v3 = vld [vmem:[#allocation147_spill] sm:$0xff]  ;;  %v8362_v0 = vld [vmem:[#allocation35_spill] sm:$0xff] }
 0x5f8   : > { %v2581_v47 = vadd.f32 %v7217_v44, %v2573_v21  ;;  %v2587_v12 = vadd.f32 %v8357_v10, %v2579_v1  ;;  %v2798_v24 = vadd.f32 %v2797_v22, %v2723_v19  ;;  %v2799_v8 = vadd.f32 %v2797_v22, %v2724_v48  ;;  %v8365_v21 = vld [vmem:[#allocation70_spill] sm:$0xff] }
 0x5f9   : > { %2888 = vadd.xlane.f32.xlu0 %v2887_v52  ;;  %v2588_v32 = vadd.f32 %v8358_v38, %v2580_v30  ;;  %v2592_v20 = vmul.f32 %v2591_v5, %v7252_v39  ;;  %v2800_v35 = vadd.f32 %v2797_v22, %v2725_v51  ;;  %v2593_v42 = vmul.f32 %v2591_v5, %v7256_v4  ;;  %v8364_v22 = vld [vmem:[#allocation62_spill] sm:$0xff]  ;;  %v8366_v19 = vld [vmem:[#allocation53_spill] sm:$0xff]  ;;  %v8367_v30 = vld [vmem:[#allocation150_spill] sm:$0xff] }
 0x5fa   : > { %v2589_v46 = vadd.f32 %v8359_v3, %v2581_v47  ;;  %v2594_v44 = vmul.f32 %v2591_v5, %v7237_v40  ;;  %vm2824_vm3 = vcmp.ge.f32.partialorder %v2798_v24, 0.0  ;;  %vm2825_vm4 = vcmp.ge.f32.partialorder %v2799_v8, 0.0  ;;  %v8368_v5 = vld [vmem:[#allocation151_spill] sm:$0xff] }
 0x5fb   : > { %v2848_v25 = vmul.f32 0.01, %v2798_v24  ;;  %v2849_v17 = vmul.f32 0.01, %v2799_v8  ;;  %vm2826_vm5 = vcmp.ge.f32.partialorder %v2800_v35, 0.0  ;;  %v2595_v59 = vadd.f32 %v2592_v20, %v2587_v12 }
 0x5fc   : > { %v2850_v31 = vmul.f32 0.01, %v2800_v35  ;;  %v2596_v63 = vadd.f32 %v2593_v42, %v2588_v32  ;;  %v2597_v33 = vadd.f32 %v2594_v44, %v2589_v46  ;;  %v2599_v23 = vstv %s7421_s6  ;;  %v8369_v32 = vld [vmem:[#allocation152_spill] sm:$0xff] }
 0x5fd   : > { %v7444_v16 = vsel %vm2824_vm3, %v2798_v24, %v2848_v25  ;;  %v7446_v45 = vsel %vm2825_vm4, %v2799_v8, %v2849_v17  ;;  %v2600_v61 = vmul.f32 %v2599_v23, %v7264_v27  ;;  %v2601_v29 = vmul.f32 %v2599_v23, %v7270_v37 }
 0x5fe   : > { %v7449_v50 = vsel %vm2826_vm5, %v2800_v35, %v2850_v31  ;;  %v2902_v26 = vadd.f32 %v7446_v45, %v7444_v16  ;;  %v2602_v18 = vmul.f32 %v2599_v23, %v7276_v54  ;;  %v2782_v6 = vstv %s7432_s29 }
 0x5ff   : > { %v2653_v14 = vadd.f32 %v8361_v11, %v8360_v41  ;;  %v2659_v57 = vadd.f32 %v8363_v34, %v8362_v0  ;;  %v2603_v56 = vadd.f32 %v2600_v61, %v2595_v59  ;;  %v2604_v9 = vadd.f32 %v2601_v29, %v2596_v63  ;;  %v8370_v41 = vld [vmem:[#allocation34_spill] sm:$0xff]  ;;  %v8371_v11 = vld [vmem:[#allocation66_spill] sm:$0xff] }
 0x600   : > { %v2903_v58 = vadd.f32 %v2902_v26, %v7449_v50  ;;  %v2660_v1 = vadd.f32 %v8365_v21, %v8364_v22  ;;  %v2605_v52 = vadd.f32 %v2602_v18, %v2597_v33  ;;  %v2671_v47 = vstv %s7439_s1  ;;  %v8372_v0 = vld [vmem:[#allocation58_spill] sm:$0xff]  ;;  %v8373_v34 = vld [vmem:[#allocation37_spill] sm:$0xff] }
 0x601   : > { %v2661_v48 = vadd.f32 %v8366_v19, %v2653_v14  ;;  %v2667_v51 = vadd.f32 %v8367_v30, %v2659_v57  ;;  %v2783_v10 = vadd.f32 %v2782_v6, %v2603_v56  ;;  %v2784_v12 = vadd.f32 %v2782_v6, %v2604_v9  ;;  %v8374_v22 = vld [vmem:[#allocation45_spill] sm:$0xff]  ;;  %v8375_v21 = vld [vmem:[#allocation148_spill] sm:$0xff] }
 0x602   : > { %2904 = vadd.xlane.f32.xlu1 %v2903_v58  ;;  %v2668_v24 = vadd.f32 %v8368_v5, %v2660_v1  ;;  %v2672_v8 = vmul.f32 %v2671_v47, %v7252_v39  ;;  %v2785_v38 = vadd.f32 %v2782_v6, %v2605_v52  ;;  %v2673_v35 = vmul.f32 %v2671_v47, %v7256_v4  ;;  %v8376_v19 = vld [vmem:[#allocation67_spill] sm:$0xff] }
 0x603   : > { %v2669_v20 = vadd.f32 %v8369_v32, %v2661_v48  ;;  %v2674_v3 = vmul.f32 %v2671_v47, %v7237_v40  ;;  %vm2815_vm6 = vcmp.ge.f32.partialorder %v2783_v10, 0.0  ;;  %vm2816_vm7 = vcmp.ge.f32.partialorder %v2784_v12, 0.0  ;;  %v8377_v48 = vld [vmem:[#allocation41_spill] sm:$0xff] }
 0x604   : > { %v2839_v46 = vmul.f32 0.01, %v2783_v10  ;;  %v2840_v42 = vmul.f32 0.01, %v2784_v12  ;;  %vm2817_vm8 = vcmp.ge.f32.partialorder %v2785_v38, 0.0  ;;  %v2675_v25 = vadd.f32 %v2672_v8, %v2667_v51  ;;  %v8378_v51 = vld [vmem:[#allocation38_spill] sm:$0xff] }
 0x605   : > { %v2841_v44 = vmul.f32 0.01, %v2785_v38  ;;  %v2676_v17 = vadd.f32 %v2673_v35, %v2668_v24  ;;  %v2677_v63 = vadd.f32 %v2674_v3, %v2669_v20  ;;  %v2679_v33 = vstv %s7455_s2  ;;  %v8379_v24 = vld [vmem:[#allocation160_spill] sm:$0xff] }
 0x606   : > { %v7478_v31 = vsel %vm2815_vm6, %v2783_v10, %v2839_v46  ;;  %v7480_v59 = vsel %vm2816_vm7, %v2784_v12, %v2840_v42  ;;  %v2680_v61 = vmul.f32 %v2679_v33, %v7264_v27  ;;  %v2681_v29 = vmul.f32 %v2679_v33, %v7270_v37  ;;  %v8380_v20 = vld [vmem:[#allocation46_spill] sm:$0xff] }
 0x607   : > { %v7483_v23 = vsel %vm2817_vm8, %v2785_v38, %v2841_v44  ;;  %v2890_v26 = vadd.f32 %v7480_v59, %v7478_v31  ;;  %v2682_v18 = vmul.f32 %v2679_v33, %v7276_v54  ;;  %v2792_v6 = vstv %s7466_s0 }
 0x608   : > { %v2733_v14 = vadd.f32 %v8371_v11, %v8370_v41  ;;  %v2739_v57 = vadd.f32 %v8373_v34, %v8372_v0  ;;  %v2683_v56 = vadd.f32 %v2680_v61, %v2675_v25  ;;  %v2684_v9 = vadd.f32 %v2681_v29, %v2676_v17 }
 0x609   : > { %v2891_v58 = vadd.f32 %v2890_v26, %v7483_v23  ;;  %v2746_v1 = vmul.f32 %v8375_v21, %v8374_v22  ;;  %v2685_v52 = vadd.f32 %v2682_v18, %v2677_v63  ;;  %v2740_v30 = vadd.f32 %v8377_v48, %v8376_v19 }
 0x60a   : > { %v2741_v47 = vadd.f32 %v8378_v51, %v2733_v14  ;;  %v2751_v10 = vstv %s7473_s15  ;;  %v2793_v12 = vadd.f32 %v2792_v6, %v2683_v56  ;;  %v2794_v5 = vadd.f32 %v2792_v6, %v2684_v9 }
 0x60b   : > { %2892 = vadd.xlane.f32.xlu0 %v2891_v58  ;;  %v2747_v8 = vadd.f32 %v8379_v24, %v2739_v57  ;;  %v2752_v38 = vmul.f32 %v2751_v10, %v7252_v39  ;;  %v2795_v32 = vadd.f32 %v2792_v6, %v2685_v52  ;;  %v2745_v35 = vmul.f32 %v8375_v21, %v8380_v20 }
 0x60c   : > { %v2749_v3 = vadd.f32 %v2746_v1, %v2741_v47  ;;  %v2753_v46 = vmul.f32 %v2751_v10, %v7256_v4  ;;  %vm2821_vm10 = vcmp.ge.f32.partialorder %v2793_v12, 0.0  ;;  %vm2822_vm15 = vcmp.ge.f32.partialorder %v2794_v5, 0.0 }
 0x60d   : > { %v2845_v42 = vmul.f32 0.01, %v2793_v12  ;;  %v2846_v44 = vmul.f32 0.01, %v2794_v5  ;;  %vm2823_vm9 = vcmp.ge.f32.partialorder %v2795_v32, 0.0  ;;  %v2748_v17 = vadd.f32 %v2745_v35, %v2740_v30 }
 0x60e   : > { %v2847_v25 = vmul.f32 0.01, %v2795_v32  ;;  %v2754_v63 = vmul.f32 %v2751_v10, %v7237_v40  ;;  %v2755_v26 = vadd.f32 %v2752_v38, %v2747_v8  ;;  %v2759_v61 = vstv %s7489_s9 }
 0x60f   : > { %v7512_v33 = vsel %vm2821_vm10, %v2793_v12, %v2845_v42  ;;  %v7514_v39 = vsel %vm2822_vm15, %v2794_v5, %v2846_v44  ;;  %v2756_v4 = vadd.f32 %v2753_v46, %v2748_v17  ;;  %v2760_v18 = vmul.f32 %v2759_v61, %v7264_v27 }
 0x610   : > { %v2898_v29 = vadd.f32 %v7514_v39, %v7512_v33  ;;  %v2761_v6 = vmul.f32 %v2759_v61, %v7270_v37  ;;  %v7521_v41 = vsel %vm2823_vm9, %v2795_v32, %v2847_v25  ;;  %v2757_v11 = vadd.f32 %v2754_v63, %v2749_v3 }
 0x611   : > { %v2762_v14 = vmul.f32 %v2759_v61, %v7276_v54  ;;  %v2802_v40 = vstv %s7500_s11  ;;  %v2763_v34 = vadd.f32 %v2760_v18, %v2755_v26 }
 0x612   : > { %v2899_v0 = vadd.f32 %v2898_v29, %v7521_v41  ;;  %v2764_v57 = vadd.f32 %v2761_v6, %v2756_v4 }
 0x613   : > { %v2765_v58 = vadd.f32 %v2762_v14, %v2757_v11  ;;  %v2803_v56 = vadd.f32 %v2802_v40, %v2763_v34 }
 0x614   : > { %2900 = vadd.xlane.f32.xlu0 %v2899_v0  ;;  %v2804_v9 = vadd.f32 %v2802_v40, %v2764_v57 }
 0x615   : > { %v2805_v22 = vadd.f32 %v2802_v40, %v2765_v58  ;;  %vm2827_vm11 = vcmp.ge.f32.partialorder %v2803_v56, 0.0  ;;  %v2851_v27 = vmul.f32 0.01, %v2803_v56 }
 0x616   : > { %vm2828_vm12 = vcmp.ge.f32.partialorder %v2804_v9, 0.0  ;;  %v2852_v21 = vmul.f32 0.01, %v2804_v9 }
 0x617   : > { %vm2829_vm13 = vcmp.ge.f32.partialorder %v2805_v22, 0.0  ;;  %v2853_v37 = vmul.f32 0.01, %v2805_v22  ;;  %v7526_v1 = vsel %vm2827_vm11, %v2803_v56, %v2851_v27 }
 0x618   : > { %v7528_v52 = vsel %vm2828_vm12, %v2804_v9, %v2852_v21 }
 0x619   : > { %v2906_v54 = vadd.f32 %v7528_v52, %v7526_v1  ;;  %v7532_v19 = vsel %vm2829_vm13, %v2805_v22, %v2853_v37 }
 0x61b   : > { %v2907_v48 = vadd.f32 %v2906_v54, %v7532_v19 }
 0x61d   : > { %2908 = vadd.xlane.f32.xlu0 %v2907_v48 }
 0x66c   : > { %v2885_v30 = vpop.xlane.xlu1 %2884 }
 0x66d   : > { %v2911_v51 = vmul.f32 0.0026041667, %v2885_v30 }
 0x66f   : > { %v7536_v47 = vsub.f32 %v7311_v13, %v2911_v51  ;;  %v7539_v10 = vsub.f32 %v7313_v15, %v2911_v51  ;;  %v7542_v12 = vsub.f32 %v7320_v53, %v2911_v51 }
 0x671   : > { %v2945_v5 = vmul.f32 %v7536_v47, %v7536_v47  ;;  %v2946_v24 = vmul.f32 %v7539_v10, %v7539_v10  ;;  %v2947_v38 = vmul.f32 %v7542_v12, %v7542_v12 }
 0x672   : > { %v2881_v8 = vpop.xlane.xlu0 %2880 }
 0x673   : > { %v2970_v32 = vadd.f32 %v2946_v24, %v2945_v5  ;;  %v2910_v20 = vmul.f32 0.0026041667, %v2881_v8 }
 0x675   : > { %v2971_v13 = vadd.f32 %v2970_v32, %v2947_v38  ;;  %v7551_v35 = vsub.f32 %v7338_v7, %v2910_v20  ;;  %v7554_v15 = vsub.f32 %v7341_v36, %v2910_v20  ;;  %v7557_v53 = vsub.f32 %v7346_v43, %v2910_v20 }
 0x677   : > { %2972 = vadd.xlane.f32.xlu0 %v2971_v13  ;;  %v2942_v3 = vmul.f32 %v7551_v35, %v7551_v35  ;;  %v2943_v46 = vmul.f32 %v7554_v15, %v7554_v15  ;;  %v2944_v42 = vmul.f32 %v7557_v53, %v7557_v53 }
 0x679   : > { %v2966_v44 = vadd.f32 %v2943_v46, %v2942_v3 }
 0x67b   : > { %v2967_v25 = vadd.f32 %v2966_v44, %v2944_v42 }
 0x67d   : > { %2968 = vadd.xlane.f32.xlu1 %v2967_v25 }
 0x67e   : > { %v2897_v7 = vpop.xlane.xlu1 %2896 }
 0x67f   : > { %v2914_v17 = vmul.f32 0.0026041667, %v2897_v7 }
 0x681   : > { %v7566_v63 = vsub.f32 %v7376_v28, %v2914_v17  ;;  %v7569_v43 = vsub.f32 %v7380_v60, %v2914_v17 }
 0x683   : > { %v2954_v18 = vmul.f32 %v7566_v63, %v7566_v63  ;;  %v2955_v28 = vmul.f32 %v7569_v43, %v7569_v43 }
 0x685   : > { %v2982_v40 = vadd.f32 %v2955_v28, %v2954_v18 }
 0x686   : > { %v2889_v36 = vpop.xlane.xlu0 %2888 }
 0x687   : > { %v2912_v26 = vmul.f32 0.0026041667, %v2889_v36 }
 0x689   : > { %v7572_v61 = vsub.f32 %v7410_v2, %v2912_v26  ;;  %v7575_v29 = vsub.f32 %v7412_v49, %v2912_v26  ;;  %v7578_v4 = vsub.f32 %v7415_v55, %v2912_v26  ;;  %v7589_v2 = vsub.f32 %v7382_v62, %v2914_v17 }
 0x68b   : > { %v2948_v60 = vmul.f32 %v7572_v61, %v7572_v61  ;;  %v2949_v6 = vmul.f32 %v7575_v29, %v7575_v29  ;;  %v2950_v49 = vmul.f32 %v7578_v4, %v7578_v4  ;;  %v2956_v34 = vmul.f32 %v7589_v2, %v7589_v2 }
 0x68d   : > { %v2974_v55 = vadd.f32 %v2949_v6, %v2948_v60  ;;  %v2983_v56 = vadd.f32 %v2982_v40, %v2956_v34 }
 0x68f   : > { %v2905_v11 = vpop.xlane.xlu1 %2904  ;;  %v2975_v14 = vadd.f32 %v2974_v55, %v2950_v49 }
 0x690   : > { %v2916_v0 = vmul.f32 0.0026041667, %v2905_v11 }
 0x691   : > { %2976 = vadd.xlane.f32.xlu1 %v2975_v14 }
 0x692   : > { %v7596_v57 = vsub.f32 %v7444_v16, %v2916_v0  ;;  %v7599_v58 = vsub.f32 %v7446_v45, %v2916_v0  ;;  %v7602_v62 = vsub.f32 %v7449_v50, %v2916_v0 }
 0x694   : > { %v2960_v9 = vmul.f32 %v7596_v57, %v7596_v57  ;;  %v2961_v22 = vmul.f32 %v7599_v58, %v7599_v58  ;;  %v2962_v27 = vmul.f32 %v7602_v62, %v7602_v62 }
 0x695   : > { %2984 = vadd.xlane.f32.xlu1 %v2983_v56 }
 0x696   : > { %v2990_v21 = vadd.f32 %v2961_v22, %v2960_v9 }
 0x698   : > { %v2893_v16 = vpop.xlane.xlu0 %2892  ;;  %v2991_v37 = vadd.f32 %v2990_v21, %v2962_v27 }
 0x699   : > { %v2913_v54 = vmul.f32 0.0026041667, %v2893_v16 }
 0x69a   : > { %2992 = vadd.xlane.f32.xlu1 %v2991_v37 }
 0x69b   : > { %v7611_v45 = vsub.f32 %v7478_v31, %v2913_v54  ;;  %v7614_v50 = vsub.f32 %v7480_v59, %v2913_v54  ;;  %v7617_v48 = vsub.f32 %v7483_v23, %v2913_v54 }
 0x69d   : > { %v2951_v30 = vmul.f32 %v7611_v45, %v7611_v45  ;;  %v2952_v51 = vmul.f32 %v7614_v50, %v7614_v50  ;;  %v2953_v5 = vmul.f32 %v7617_v48, %v7617_v48 }
 0x69f   : > { %v2978_v24 = vadd.f32 %v2952_v51, %v2951_v30 }
 0x6a1   : > { %v2901_v8 = vpop.xlane.xlu0 %2900  ;;  %v2979_v38 = vadd.f32 %v2978_v24, %v2953_v5 }
 0x6a2   : > { %v2915_v31 = vmul.f32 0.0026041667, %v2901_v8 }
 0x6a3   : > { %2980 = vadd.xlane.f32.xlu0 %v2979_v38 }
 0x6a4   : > { %v7626_v59 = vsub.f32 %v7512_v33, %v2915_v31  ;;  %v7629_v23 = vsub.f32 %v7514_v39, %v2915_v31  ;;  %v7632_v32 = vsub.f32 %v7521_v41, %v2915_v31 }
 0x6a6   : > { %v2957_v20 = vmul.f32 %v7626_v59, %v7626_v59  ;;  %v2958_v13 = vmul.f32 %v7629_v23, %v7629_v23  ;;  %v2959_v3 = vmul.f32 %v7632_v32, %v7632_v32 }
 0x6a8   : > { %v2986_v46 = vadd.f32 %v2958_v13, %v2957_v20 }
 0x6aa   : > { %v2909_v42 = vpop.xlane.xlu0 %2908  ;;  %v2987_v44 = vadd.f32 %v2986_v46, %v2959_v3 }
 0x6ab   : > { %v2917_v33 = vmul.f32 0.0026041667, %v2909_v42 }
 0x6ac   : > { %2988 = vadd.xlane.f32.xlu0 %v2987_v44 }
 0x6ad   : > { %v7641_v39 = vsub.f32 %v7526_v1, %v2917_v33  ;;  %v7644_v41 = vsub.f32 %v7528_v52, %v2917_v33  ;;  %v7647_v25 = vsub.f32 %v7532_v19, %v2917_v33 }
 0x6af   : > { %v2963_v7 = vmul.f32 %v7641_v39, %v7641_v39  ;;  %v2964_v17 = vmul.f32 %v7644_v41, %v7644_v41  ;;  %v2965_v36 = vmul.f32 %v7647_v25, %v7647_v25 }
 0x6b1   : > { %v2994_v26 = vadd.f32 %v2964_v17, %v2963_v7 }
 0x6b3   : > { %v2995_v18 = vadd.f32 %v2994_v26, %v2965_v36 }
 0x6b5   : > { %2996 = vadd.xlane.f32.xlu0 %v2995_v18 }
 0x704   : > { %v2973_v1 = vpop.xlane.xlu0 %2972 }
 0x705   : > { %v2999_v28 = vmul.f32 0.0026041667, %v2973_v1 }
 0x707   : > { %v3007_v60 = vadd.f32 1e-05, %v2999_v28 }
 0x709   : > { %3625 = vrsqrt.f32 %v3007_v60 }
 0x70a   : > { %v2969_v52 = vpop.xlane.xlu1 %2968 }
 0x70b   : > { %v2998_v6 = vmul.f32 0.0026041667, %v2969_v52 }
 0x70d   : > { %v3006_v19 = vadd.f32 1e-05, %v2998_v6 }
 0x70f   : > { %3627 = vrsqrt.f32 %v3006_v19 }
 0x713   : > { %v3626_v49 = vpop.eup %3625 }
 0x714   : > { %v3025_v55 = vmul.f32 %v3626_v49, %v7536_v47  ;;  %v3026_v11 = vmul.f32 %v3626_v49, %v7539_v10  ;;  %v3027_v14 = vmul.f32 %v3626_v49, %v7542_v12 }
 0x716   : > { %3472 = vst [vmem:[%s7659_s12 + $0x18] sm:$0xff] %v3025_v55  ;;  %3473 = vst [vmem:[%s7659_s12 + $0x20] sm:$0xff] %v3026_v11 }
 0x717   : > { %3474 = vst [vmem:[%s7659_s12 + $0x28] sm:$0xff] %v3027_v14 }
 0x719   : > { %v3628_v40 = vpop.eup %3627 }
 0x71a   : > { %v3022_v0 = vmul.f32 %v3628_v40, %v7551_v35  ;;  %v3023_v47 = vmul.f32 %v3628_v40, %v7554_v15  ;;  %v3024_v10 = vmul.f32 %v3628_v40, %v7557_v53 }
 0x71c   : > { %3046 = vst [vmem:[%s7659_s12] sm:$0xff] %v3022_v0  ;;  %3047 = vst [vmem:[%s7659_s12 + $0x8] sm:$0xff] %v3023_v47 }
 0x71d   : > { %3048 = vst [vmem:[%s7659_s12 + $0x10] sm:$0xff] %v3024_v10 }
 0x71e   : > { %v2977_v12 = vpop.xlane.xlu1 %2976 }
 0x71f   : > { %v3000_v34 = vmul.f32 0.0026041667, %v2977_v12 }
 0x721   : > { %v3008_v56 = vadd.f32 1e-05, %v3000_v34 }
 0x722   : > { %v2985_v9 = vpop.xlane.xlu1 %2984 }
 0x723   : > { %3629 = vrsqrt.f32 %v3008_v56  ;;  %v3002_v22 = vmul.f32 0.0026041667, %v2985_v9 }
 0x725   : > { %v3010_v27 = vadd.f32 1e-05, %v3002_v22 }
 0x727   : > { %3631 = vrsqrt.f32 %v3010_v27  ;;  %v2993_v21 = vpop.xlane.xlu1 %2992 }
 0x728   : > { %v3004_v35 = vmul.f32 0.0026041667, %v2993_v21 }
 0x72a   : > { %v3012_v16 = vadd.f32 1e-05, %v3004_v35 }
 0x72c   : > { %3633 = vrsqrt.f32 %v3012_v16 }
 0x72d   : > { %v3630_v15 = vpop.eup %3629 }
 0x72e   : > { %v3028_v53 = vmul.f32 %v3630_v15, %v7572_v61  ;;  %v3029_v37 = vmul.f32 %v3630_v15, %v7575_v29  ;;  %v3030_v54 = vmul.f32 %v3630_v15, %v7578_v4 }
 0x730   : > { %3475 = vst [vmem:[%s7659_s12 + $0x30] sm:$0xff] %v3028_v53  ;;  %3476 = vst [vmem:[%s7659_s12 + $0x38] sm:$0xff] %v3029_v37  ;;  %v2981_v30 = vpop.xlane.xlu0 %2980 }
 0x731   : > { %3477 = vst [vmem:[%s7659_s12 + $0x40] sm:$0xff] %v3030_v54  ;;  %v3632_v51 = vpop.eup %3631  ;;  %v3001_v5 = vmul.f32 0.0026041667, %v2981_v30 }
 0x732   : > { %v3034_v24 = vmul.f32 %v3632_v51, %v7566_v63  ;;  %v3035_v8 = vmul.f32 %v3632_v51, %v7569_v43  ;;  %v3036_v38 = vmul.f32 %v3632_v51, %v7589_v2 }
 0x733   : > { %v3009_v61 = vadd.f32 1e-05, %v3001_v5 }
 0x734   : > { %3481 = vst [vmem:[%s7659_s12 + $0x60] sm:$0xff] %v3034_v24  ;;  %3482 = vst [vmem:[%s7659_s12 + $0x68] sm:$0xff] %v3035_v8 }
 0x735   : > { %3483 = vst [vmem:[%s7659_s12 + $0x70] sm:$0xff] %v3036_v38  ;;  %3635 = vrsqrt.f32 %v3009_v61 }
 0x736   : > { %v3634_v29 = vpop.eup %3633 }
 0x737   : > { %v3040_v4 = vmul.f32 %v3634_v29, %v7596_v57  ;;  %v3041_v31 = vmul.f32 %v3634_v29, %v7599_v58  ;;  %v3042_v20 = vmul.f32 %v3634_v29, %v7602_v62 }
 0x739   : > { %3487 = vst [vmem:[%s7659_s12 + $0x90] sm:$0xff] %v3040_v4  ;;  %3488 = vst [vmem:[%s7659_s12 + $0x98] sm:$0xff] %v3041_v31  ;;  %v2989_v63 = vpop.xlane.xlu0 %2988 }
 0x73a   : > { %3489 = vst [vmem:[%s7659_s12 + $0xa0] sm:$0xff] %v3042_v20  ;;  %v3003_v43 = vmul.f32 0.0026041667, %v2989_v63 }
 0x73c   : > { %v3011_v2 = vadd.f32 1e-05, %v3003_v43 }
 0x73e   : > { %3637 = vrsqrt.f32 %v3011_v2 }
 0x73f   : > { %v3636_v13 = vpop.eup %3635 }
 0x740   : > { %v3031_v3 = vmul.f32 %v3636_v13, %v7611_v45  ;;  %v3032_v57 = vmul.f32 %v3636_v13, %v7614_v50  ;;  %v3033_v58 = vmul.f32 %v3636_v13, %v7617_v48 }
 0x742   : > { %3478 = vst [vmem:[%s7659_s12 + $0x48] sm:$0xff] %v3031_v3  ;;  %3479 = vst [vmem:[%s7659_s12 + $0x50] sm:$0xff] %v3032_v57  ;;  %v2997_v62 = vpop.xlane.xlu0 %2996 }
 0x743   : > { %3480 = vst [vmem:[%s7659_s12 + $0x58] sm:$0xff] %v3033_v58  ;;  %v3005_v46 = vmul.f32 0.0026041667, %v2997_v62 }
 0x745   : > { %v3013_v42 = vadd.f32 1e-05, %v3005_v46 }
 0x747   : > { %3639 = vrsqrt.f32 %v3013_v42 }
 0x748   : > { %v3638_v44 = vpop.eup %3637 }
 0x749   : > { %v3037_v33 = vmul.f32 %v3638_v44, %v7626_v59  ;;  %v3038_v45 = vmul.f32 %v3638_v44, %v7629_v23  ;;  %v3039_v50 = vmul.f32 %v3638_v44, %v7632_v32 }
 0x74b   : > { %3484 = vst [vmem:[%s7659_s12 + $0x78] sm:$0xff] %v3037_v33  ;;  %3485 = vst [vmem:[%s7659_s12 + $0x80] sm:$0xff] %v3038_v45 }
 0x74c   : > { %3486 = vst [vmem:[%s7659_s12 + $0x88] sm:$0xff] %v3039_v50 }
 0x751   : > { %v3640_v48 = vpop.eup %3639 }
 0x752   : > { %v3043_v59 = vmul.f32 %v3640_v48, %v7641_v39  ;;  %v3044_v23 = vmul.f32 %v3640_v48, %v7644_v41  ;;  %v3045_v32 = vmul.f32 %v3640_v48, %v7647_v25 }
 0x754   : > { %3490 = vst [vmem:[%s7659_s12 + $0xa8] sm:$0xff] %v3043_v59  ;;  %3491 = vst [vmem:[%s7659_s12 + $0xb0] sm:$0xff] %v3044_v23 }
 0x755   : > { %3492 = vst [vmem:[%s7659_s12 + $0xb8] sm:$0xff] %v3045_v32 }
 0x756   : > { %3774 = shalt.err (!%p3771_p11)
}
 0x757   : > { %s3775_s8 = scalar_lea.hbm %s7705_s18, 3072  ;;  %s3779_s21 = scalar_lea.hbm %s8384_s17, 6144 }
 0x758   : > { %p3776_p12 = scmp.ne.s32.totalorder %s7705_s18, %s3775_s8  ;;  %p3780_p7 = scmp.lt.u32.totalorder %s7705_s18, %s8384_s17 }
 0x759   : > { %p3781_p6 = scmp.lt.u32.totalorder %s3779_s21, %s3775_s8  ;;  %p3783_p13 = scmp.lt.u32.totalorder %s3775_s8, %s7705_s18 }
 0x75a   : > { %p3777_p8 = pnand %p3776_p12, %p8385_p0 }
 0x75b   : > { %p3782_p9 = por %p3781_p6, %p3780_p7 }
 0x75c   : > { %p3778_p5 = pneg %p3777_p8 }
 0x75d   : > { %p3784_p1 = por %p3783_p13, %p3782_p9 }
 0x75f   : > { %p3785_p3 = pnand %p3784_p1, %p3778_p5 }
 0x761   : > { %3788 = shalt.err (!%p3785_p3)
}
 0x762   : > { %s3857_s5 = smov 384   ;;  %s3858_s6 = smov 768  }
 0x763   : > { %s3859_s29 = smov 24  }
 0x764   : > { %3525 = dma.vmem_to_hbm [thread:$0]  (%p8385_p0), %s7707_s30, 3072, %s7705_s18, %s3078_s10, %s3857_s5, %s3858_s6, %s3859_s29  }
 0x765 PF: > { %s8386_s1 = sld [smem:[#allocation22_spill]]  ;;  %s8387_s2 = sld [smem:[#allocation30_spill]] }
 0x766   : > { %s8388_s0 = sld [smem:[#allocation25_spill]] }
 0x76b   : > { %s3106_s15 = sand.u32 1, %s8386_s1   ;;  %p8389_p4 = scmp.ne.s32.totalorder %s8387_s2, 0 }
 0x76c   : > { %p8390_p2 = scmp.ge.s32.totalorder %s8388_s0, 2  ;;  %s3107_s9 = scalar_lea.sflag [#allocation4], %s3106_s15 }
 0x76e   : > { %p3551_p10 = pnand %p8390_p2, %p8389_p4 }
 0x770   : > { %3826 = dma.done.wait (!%p3551_p10), %s3107_s9, 3072  }
 0x771   : > { %3828 = vsyncadd (!%p3551_p10), %s3107_s9, 4294964224  ;;  %s8391_s27 = sld [smem:[#allocation27_spill]]  ;;  %s8392_s24 = sld [smem:[#allocation23_spill]] }
 0x772   : > { %s8393_s25 = sld [smem:[#allocation24_spill]]  ;;  %s8394_s26 = sld [smem:[#allocation28_spill]] }
 0x777   : > { %p24_p11 = scmp.ge.s32.totalorder %s8391_s27, 4  }
 0x779   :  { %26 = sbr.rel (!%p24_p11) target bundleno = 18 (0x12), region = 125 }
 0x780   :  { %3112 = vsyncpa [#allocation3], 1 }
 0x781   :  { %3114 = vsyncpa [#allocation3 + $0x1], 1 }
 0x782   :  { %3115 = vsyncpa [#allocation4], 1 }
 0x783   :  { %3117 = vsyncpa [#allocation4 + $0x1], 1 }
 0x784   :  { %3118 = vsyncpa [#allocation5], 1 }
 0x785   :  { %3120 = vsyncpa [#allocation5 + $0x1], 1 }
 0x786   :  { %3121 = vsyncpa [#allocation8], 1 }
 0x787   :  { %3122 = vsyncpa [#allocation11], 1 }
 0x788   :  { %3123 = vsyncpa [#allocation14], 1 }

</bundles_post_ra>
